<compile_context>
chip_gen: v5e
topology: v5e:2x2
jax: 0.10.0
libtpu: 0.0.40
codegen_flags: <defaults>
</compile_context>

<pallas_src>
import functools
import math

import jax
import jax.numpy as jnp
from jax.experimental import pallas as pl
from jax.experimental.pallas import tpu as pltpu

F32 = jnp.float32
BF16 = jnp.bfloat16
_LN_EPS = 1e-5
_TM = 512          # rows per M-tile; fits scoped VMEM defaults on v5e/v6e/v7x for K<=1024


def _ln(x, g, b):
    mu = jnp.mean(x, axis=-1, keepdims=True)
    var = jnp.mean((x - mu) ** 2, axis=-1, keepdims=True)
    return (x - mu) * jax.lax.rsqrt(var + _LN_EPS) * g + b


# ----------------------------------------------------------------------------------
# Kernel 1: M-tiled matmul + bias (+ ReLU).  bf16 MXU operands, f32 accumulate.
# ----------------------------------------------------------------------------------
def _matmul_bias_act_kernel(x_ref, w_ref, b_ref, o_ref, *, act):
    acc = jnp.dot(x_ref[...].astype(BF16), w_ref[...],
                  preferred_element_type=F32) + b_ref[...]
    if act == "relu":
        acc = jnp.maximum(acc, 0.0)
    o_ref[...] = acc.astype(o_ref.dtype)


def matmul_bias_act(x, w, b, act="none", tm=_TM):
    M, K = x.shape
    K2, N = w.shape
    assert K == K2
    tm = M if M <= tm else tm
    return pl.pallas_call(
        functools.partial(_matmul_bias_act_kernel, act=act),
        grid=(pl.cdiv(M, tm),),
        in_specs=[
            pl.BlockSpec((tm, K), lambda i: (i, 0)),
            pl.BlockSpec((K, N), lambda i: (0, 0)),      # weight resident
            pl.BlockSpec((1, N), lambda i: (0, 0)),
        ],
        out_specs=pl.BlockSpec((tm, N), lambda i: (i, 0)),
        out_shape=jax.ShapeDtypeStruct((M, N), F32),
        compiler_params=pltpu.CompilerParams(dimension_semantics=("parallel",)),
    )(x, w.astype(BF16), b.reshape(1, N).astype(F32))


# ----------------------------------------------------------------------------------
# Kernel 2: fused ReLU-MLP chain (MLPBase), all weights resident, M-tiled grid.
# ----------------------------------------------------------------------------------
def _mlp_relu_kernel(*refs, n_layers):
    x_ref, o_ref = refs[0], refs[-1]
    h = x_ref[...]
    for li in range(n_layers):
        w = refs[1 + 2 * li][...]
        bb = refs[2 + 2 * li][...]
        h = jnp.dot(h.astype(BF16), w, preferred_element_type=F32) + bb
        h = jnp.maximum(h, 0.0)
    o_ref[...] = h.astype(o_ref.dtype)


def mlp_relu_chain(x, layers, tm=_TM):
    M, K0 = x.shape
    tm = M if M <= tm else tm
    in_specs = [pl.BlockSpec((tm, K0), lambda i: (i, 0))]
    args = [x]
    for w, bb in layers:
        kin, kout = w.shape
        in_specs.append(pl.BlockSpec((kin, kout), lambda i: (0, 0)))
        in_specs.append(pl.BlockSpec((1, kout), lambda i: (0, 0)))
        args.append(w.astype(BF16))
        args.append(bb.reshape(1, kout).astype(F32))
    n_out = layers[-1][0].shape[1]
    return pl.pallas_call(
        functools.partial(_mlp_relu_kernel, n_layers=len(layers)),
        grid=(pl.cdiv(M, tm),),
        in_specs=in_specs,
        out_specs=pl.BlockSpec((tm, n_out), lambda i: (i, 0)),
        out_shape=jax.ShapeDtypeStruct((M, n_out), F32),
        compiler_params=pltpu.CompilerParams(dimension_semantics=("parallel",)),
    )(*args)


# ----------------------------------------------------------------------------------
# Kernel 3: fused attention block.
#   out = MLP(LN( MHA_1head(xq, xkv, xkv) + xq ))   (MLP = Linear-ReLU-Linear)
# grid over batch, attention over the T (time) axis, all weights resident.
# ----------------------------------------------------------------------------------
def _attn_block_kernel(xq_ref, xkv_ref,
                       wq_ref, bq_ref, wk_ref, bk_ref, wv_ref, bv_ref,
                       wo_ref, bo_ref,
                       g_ref, beta_ref, w1_ref, b1_ref, w2_ref, b2_ref,
                       o_ref, *, scale):
    def mm(a, w_ref, b_ref):
        return jnp.dot(a.astype(BF16), w_ref[...],
                       preferred_element_type=F32) + b_ref[...]

    xq = xq_ref[0]                                  # (T, H)
    xkv = xkv_ref[0]                                # (T, H)
    q = mm(xq, wq_ref, bq_ref)
    k = mm(xkv, wk_ref, bk_ref)
    v = mm(xkv, wv_ref, bv_ref)
    s = jax.lax.dot_general(q.astype(BF16), k.astype(BF16),
                            (((1,), (1,)), ((), ())),
                            preferred_element_type=F32) * scale     # (T, T)
    s = s - jnp.max(s, axis=-1, keepdims=True)
    p = jnp.exp(s)
    p = p / jnp.sum(p, axis=-1, keepdims=True)
    a = jnp.dot(p.astype(BF16), v.astype(BF16), preferred_element_type=F32)
    attn = mm(a, wo_ref, bo_ref) + xq                               # residual
    xn = _ln(attn, g_ref[...], beta_ref[...])                       # post-MLP
    hmid = jnp.maximum(mm(xn, w1_ref, b1_ref), 0.0)
    o_ref[0] = mm(hmid, w2_ref, b2_ref).astype(o_ref.dtype)


def attn_block(xq, xkv, ap, mp):
    B, T, H = xq.shape
    bt = pl.BlockSpec((1, T, H), lambda b: (b, 0, 0))
    wsp = pl.BlockSpec((H, H), lambda b: (0, 0))
    vsp = pl.BlockSpec((1, H), lambda b: (0, 0))
    return pl.pallas_call(
        functools.partial(_attn_block_kernel, scale=1.0 / math.sqrt(H)),
        grid=(B,),
        in_specs=[bt, bt, wsp, vsp, wsp, vsp, wsp, vsp, wsp, vsp,
                  vsp, vsp, wsp, vsp, wsp, vsp],
        out_specs=bt,
        out_shape=jax.ShapeDtypeStruct((B, T, H), F32),
        compiler_params=pltpu.CompilerParams(dimension_semantics=("parallel",)),
    )(xq, xkv,
      ap["wq"].astype(BF16), ap["bq"].reshape(1, H),
      ap["wk"].astype(BF16), ap["bk"].reshape(1, H),
      ap["wv"].astype(BF16), ap["bv"].reshape(1, H),
      ap["wo"].astype(BF16), ap["bo"].reshape(1, H),
      mp["g"].reshape(1, H), mp["beta"].reshape(1, H),
      mp["w1"].astype(BF16), mp["b1"].reshape(1, H),
      mp["w2"].astype(BF16), mp["b2"].reshape(1, H))


# ----------------------------------------------------------------------------------
# Kernel 4: rnn_input = head * neck * state  ->  x@Wx  ->  LN(., gx, bx)
# (the ln(xw) is hoisted here, off the recurrent critical path).
# ----------------------------------------------------------------------------------
def _rnn_in_xw_ln_kernel(a_ref, b_ref, c_ref, wx_ref, gx_ref, bx_ref, o_ref):
    x = a_ref[...] * b_ref[...] * c_ref[...]
    xw = jnp.dot(x.astype(BF16), wx_ref[...], preferred_element_type=F32)
    o_ref[...] = _ln(xw, gx_ref[...], bx_ref[...]).astype(o_ref.dtype)


def rnn_input_xw_ln(head, neck, state, wx, gx, bx, tm=_TM):
    M, H = head.shape
    G = wx.shape[1]
    tm = M if M <= tm else tm
    row = pl.BlockSpec((tm, H), lambda i: (i, 0))
    return pl.pallas_call(
        _rnn_in_xw_ln_kernel,
        grid=(pl.cdiv(M, tm),),
        in_specs=[row, row, row,
                  pl.BlockSpec((H, G), lambda i: (0, 0)),
                  pl.BlockSpec((1, G), lambda i: (0, 0)),
                  pl.BlockSpec((1, G), lambda i: (0, 0))],
        out_specs=pl.BlockSpec((tm, G), lambda i: (i, 0)),
        out_shape=jax.ShapeDtypeStruct((M, G), F32),
        compiler_params=pltpu.CompilerParams(dimension_semantics=("parallel",)),
    )(head, neck, state, wx.astype(BF16),
      gx.reshape(1, G).astype(F32), bx.reshape(1, G).astype(F32))


# ----------------------------------------------------------------------------------
# Kernel 5: fused LN-LSTM scan.  One pallas_call, grid=(T,), weights resident,
# h/c carried in VMEM scratch across grid steps.
# ----------------------------------------------------------------------------------
def _lnlstm_scan_kernel(lnxw_ref, m_ref, h0_ref, c0_ref, wh_ref, b_ref,
                        gh_ref, bh_ref, gc_ref, bc_ref,
                        h_all_ref, h_last_ref, c_last_ref, h_sc, c_sc, *, nh):
    t = pl.program_id(0)

    @pl.when(t == 0)
    def _():
        h_sc[...] = h0_ref[...]
        c_sc[...] = c0_ref[...]

    m = m_ref[0]                                   # (B, 1); 1.0 == keep state
    h = h_sc[...] * m
    c = c_sc[...] * m
    hw = jnp.dot(h.astype(BF16), wh_ref[...], preferred_element_type=F32)  # (B, 4*nh)
    gates = lnxw_ref[0] + _ln(hw, gh_ref[...], bh_ref[...]) + b_ref[...]
    i = jax.nn.sigmoid(gates[:, 0 * nh:1 * nh])
    f = jax.nn.sigmoid(gates[:, 1 * nh:2 * nh])
    g = jnp.tanh(gates[:, 2 * nh:3 * nh])
    o = jax.nn.sigmoid(gates[:, 3 * nh:4 * nh])
    c_new = f * c + i * g
    h_new = o * jnp.tanh(_ln(c_new, gc_ref[...], bc_ref[...]))
    h_sc[...] = h_new
    c_sc[...] = c_new
    h_all_ref[0] = h_new.astype(h_all_ref.dtype)
    h_last_ref[...] = h_new.astype(h_last_ref.dtype)
    c_last_ref[...] = c_new.astype(c_last_ref.dtype)


def lnlstm_scan(lnxw, mask, h0, c0, p):
    T, B, G = lnxw.shape
    nh = h0.shape[1]
    step3 = lambda shape: pl.BlockSpec(shape, lambda t: (t, 0, 0))
    const = lambda shape: pl.BlockSpec(shape, lambda t: (0, 0))
    return pl.pallas_call(
        functools.partial(_lnlstm_scan_kernel, nh=nh),
        grid=(T,),
        in_specs=[
            step3((1, B, G)), step3((1, B, 1)),
            const((B, nh)), const((B, nh)),
            const((nh, G)), const((1, G)),
            const((1, G)), const((1, G)),
            const((1, nh)), const((1, nh)),
        ],
        out_specs=(step3((1, B, nh)), const((B, nh)), const((B, nh))),
        out_shape=(jax.ShapeDtypeStruct((T, B, nh), F32),
                   jax.ShapeDtypeStruct((B, nh), F32),
                   jax.ShapeDtypeStruct((B, nh), F32)),
        scratch_shapes=[pltpu.VMEM((B, nh), F32), pltpu.VMEM((B, nh), F32)],
        compiler_params=pltpu.CompilerParams(dimension_semantics=("arbitrary",)),
    )(lnxw, mask, h0, c0,
      p["wh"].astype(BF16), p["b_lstm"].reshape(1, G),
      p["gh"].reshape(1, G), p["bh"].reshape(1, G),
      p["gc"].reshape(1, nh), p["bc"].reshape(1, nh))


# ----------------------------------------------------------------------------------
# JAX glue: im2col conv, NatureEncoder, and the full forward pass.
# ----------------------------------------------------------------------------------
def conv2d_relu(x, w, b, stride):
    """x: (N, C, H, W) NCHW, w: (O, C, kh, kw).  VALID padding, + bias, ReLU."""
    N, C, Hh, Ww = x.shape
    O, _, kh, kw = w.shape
    oh = (Hh - kh) // stride + 1
    ow = (Ww - kw) // stride + 1
    ih = (jnp.arange(oh) * stride)[:, None] + jnp.arange(kh)[None, :]
    iw = (jnp.arange(ow) * stride)[:, None] + jnp.arange(kw)[None, :]
    patches = x[:, :, ih[:, :, None, None], iw[None, None, :, :]]     # (N,C,oh,kh,ow,kw)
    patches = patches.transpose(0, 2, 4, 1, 3, 5).reshape(N * oh * ow, C * kh * kw)
    wm = w.reshape(O, C * kh * kw).T
    out = matmul_bias_act(patches, wm, b, act="relu")                 # (N*oh*ow, O)
    return out.reshape(N, oh, ow, O).transpose(0, 3, 1, 2)            # back to NCHW


def nature_encoder(x, p):
    """Conv(8,4)-ReLU -> Conv(4,2)-ReLU -> Conv(3,1)-ReLU -> Flatten (NCHW order)."""
    x = conv2d_relu(x, p["w1"], p["b1"], 4)
    x = conv2d_relu(x, p["w2"], p["b2"], 2)
    x = conv2d_relu(x, p["w3"], p["b3"], 1)
    return x.reshape(x.shape[0], -1)            # (N, 64*4*4) = (N, 1024) for 64x64 input


def nature_fuse_lstm_multiply_attention_encoder_v2(params, cfg, x, states, mask):
    state_dim = cfg["state_dim"]
    in_channels = cfg["in_channels"]
    px = int(math.sqrt(cfg["visual_dim"] // in_channels))
    T, B = x.shape[0], x.shape[1]
    H = cfg["hidden_dims"][-1]
    nh = cfg["recurrent"]["hidden_size"]

    state_x = x[..., :state_dim]                                      # (T, B, state_dim)
    visual_x = x[..., state_dim:].reshape(-1, in_channels, px, px)
    head_x = visual_x[:, : in_channels // 2]
    neck_x = visual_x[:, in_channels // 2:]

    head_feat = nature_encoder(head_x, params["head"])                # (T*B, 1024)
    neck_feat = nature_encoder(neck_x, params["neck"])

    head_proj = matmul_bias_act(head_feat, params["head_proj_w"],
                                params["head_proj_b"], act="relu")    # (T*B, H)
    neck_proj = matmul_bias_act(neck_feat, params["neck_proj_w"],
                                params["neck_proj_b"], act="relu")

    head_bt = head_proj.reshape(T, B, H).transpose(1, 0, 2)           # (B, T, H)
    neck_bt = neck_proj.reshape(T, B, H).transpose(1, 0, 2)

    # head = head_mlp(head_attention(head, neck, neck) + head)
    head_bt = attn_block(head_bt, neck_bt, params["head_attn"], params["head_mlp"])
    # neck = neck_mlp(neck_attention(neck, head, head) + neck)
    neck_bt = attn_block(neck_bt, head_bt, params["neck_attn"], params["neck_mlp"])

    head_flat = head_bt.transpose(1, 0, 2).reshape(T * B, H)
    neck_flat = neck_bt.transpose(1, 0, 2).reshape(T * B, H)

    state_out = mlp_relu_chain(state_x.reshape(T * B, state_dim), params["mlp"])  # (T*B, H)

    # rnn_input = (head * neck) * state  ->  x@Wx  ->  LN  (fused, all timesteps at once)
    lnxw = rnn_input_xw_ln(head_flat, neck_flat, state_out,
                           params["wx"], params["gx"], params["bx"])  # (T*B, 4*nh)
    lnxw = lnxw.reshape(T, B, 4 * nh)

    h0, c0 = states[:, :nh], states[:, nh:]
    m = mask.reshape(T, B, 1).astype(F32)
    h_all, h_last, c_last = lnlstm_scan(lnxw, m, h0, c0, params)
    new_states = jnp.concatenate([h_last, c_last], axis=-1)           # (B, 2*nh)
    return h_all, new_states


# ----------------------------------------------------------------------------------
# Parameters
# ----------------------------------------------------------------------------------
def init_params(key, cfg):
    H = cfg["hidden_dims"][-1]
    nh = cfg["recurrent"]["hidden_size"]
    ic2 = cfg["in_channels"] // 2
    G = 4 * nh
    keys = iter(jax.random.split(key, 64))

    def normal(shape, scale=0.05):
        return (scale * jax.random.normal(next(keys), shape)).astype(F32)

    zeros = lambda s: jnp.zeros(s, F32)
    ones = lambda s: jnp.ones(s, F32)

    def nature():
        return dict(w1=normal((32, ic2, 8, 8)), b1=zeros((32,)),
                    w2=normal((64, 32, 4, 4)), b2=zeros((64,)),
                    w3=normal((64, 64, 3, 3)), b3=zeros((64,)))

    def attn():
        return dict(wq=normal((H, H)), bq=zeros((H,)),
                    wk=normal((H, H)), bk=zeros((H,)),
                    wv=normal((H, H)), bv=zeros((H,)),
                    wo=normal((H, H)), bo=zeros((H,)))

    def mlp_block():
        return dict(g=ones((H,)), beta=zeros((H,)),
                    w1=normal((H, H)), b1=zeros((H,)),
                    w2=normal((H, H)), b2=zeros((H,)))

    params = dict(
        head=nature(), neck=nature(),
        head_proj_w=normal((1024, H)), head_proj_b=zeros((H,)),
        neck_proj_w=normal((1024, H)), neck_proj_b=zeros((H,)),
        head_attn=attn(), head_mlp=mlp_block(),
        neck_attn=attn(), neck_mlp=mlp_block(),
        mlp=[],
        wx=normal((H, G)), wh=normal((nh, G)),
        b_lstm=zeros((G,)),
        gx=ones((G,)), bx=zeros((G,)),
        gh=ones((G,)), bh=zeros((G,)),
        gc=ones((nh,)), bc=zeros((nh,)),
    )
    dims = [cfg["state_dim"]] + list(cfg["hidden_dims"])
    for din, dout in zip(dims[:-1], dims[1:]):
        params["mlp"].append((normal((din, dout)), zeros((dout,))))
    return params


if __name__ == "__main__":
    # NatureEncoder's hard-coded output_dim=1024 implies 64x64 camera images.
    # 128-wide hidden / recurrent sizes keep gate slices and outputs on 128-lane boundaries.
    cfg = dict(in_channels=4, visual_dim=4 * 64 * 64, state_dim=24,
               hidden_dims=[128, 128], recurrent=dict(hidden_size=128))
    T, B = 4, 2
    nh = cfg["recurrent"]["hidden_size"]
    key = jax.random.PRNGKey(0)
    kx, ks, kp = jax.random.split(key, 3)

    D = cfg["state_dim"] + cfg["visual_dim"]
    x = jax.random.normal(kx, (T, B, D), dtype=F32)
    states = 0.1 * jax.random.normal(ks, (B, 2 * nh), dtype=F32)
    mask = jnp.ones((T, B, 1), dtype=F32)
    params = init_params(kp, cfg)

    fwd = jax.jit(lambda p, xx, ss, mm: nature_fuse_lstm_multiply_attention_encoder_v2(
        p, cfg, xx, ss, mm))
    rnn_out, new_states = fwd(params, x, states, mask)
    jax.block_until_ready((rnn_out, new_states))

    assert rnn_out.shape == (T, B, nh)
    assert new_states.shape == (B, 2 * nh)
    assert bool(jnp.all(jnp.isfinite(rnn_out))) and bool(jnp.all(jnp.isfinite(new_states)))
    print("KERNEL_OK")
</pallas_src>

<mosaic_0001>
module attributes {stable_mosaic.version = 11 : i64} {
  func.func @_matmul_bias_act_kernel(%arg0: i32, %arg1: memref<512x128xf32, #tpu.memory_space<vmem>>, %arg2: memref<128x32xbf16, #tpu.memory_space<vmem>>, %arg3: memref<1x32xf32, #tpu.memory_space<vmem>>, %arg4: memref<512x32xf32, #tpu.memory_space<vmem>>) attributes {dimension_semantics = [#tpu.dimension_semantics<parallel>], iteration_bounds = array<i64: 4>, scalar_prefetch = 0 : i64, scratch_operands = 0 : i64, tpu.core_type = #tpu.core_type<tc>, window_params = [{transform_indices = @transform_0, window_bounds = array<i64: 512, 128>}, {pipeline_mode = #tpu.pipeline_mode<synchronous>, transform_indices = @transform_1, window_bounds = array<i64: 128, 32>}, {pipeline_mode = #tpu.pipeline_mode<synchronous>, transform_indices = @transform_2, window_bounds = array<i64: 1, 32>}, {transform_indices = @transform_3, window_bounds = array<i64: 512, 32>}]} {
    %c0 = arith.constant 0 : index
    %c0_0 = arith.constant 0 : index
    %0 = vector.load %arg1[%c0, %c0_0] : memref<512x128xf32, #tpu.memory_space<vmem>>, vector<512x128xf32>
    %1 = arith.truncf %0 : vector<512x128xf32> to vector<512x128xbf16>
    %c0_1 = arith.constant 0 : index
    %c0_2 = arith.constant 0 : index
    %2 = vector.load %arg2[%c0_1, %c0_2] : memref<128x32xbf16, #tpu.memory_space<vmem>>, vector<128x32xbf16>
    %cst = arith.constant dense<0.000000e+00> : vector<512x32xf32>
    %3 = tpu.matmul %1, %2, %cst {dimension_numbers = #tpu.dot_dimension_numbers<[1], [0], [0], [1], [0, 0, 1, 1], [], []>} : vector<512x128xbf16>, vector<128x32xbf16>, vector<512x32xf32> -> vector<512x32xf32>
    %c0_3 = arith.constant 0 : index
    %c0_4 = arith.constant 0 : index
    %4 = vector.load %arg3[%c0_3, %c0_4] : memref<1x32xf32, #tpu.memory_space<vmem>>, vector<1x32xf32>
    %5 = vector.broadcast %4 : vector<1x32xf32> to vector<512x32xf32>
    %6 = arith.addf %3, %5 : vector<512x32xf32>
    %cst_5 = arith.constant 0.000000e+00 : f32
    %7 = vector.broadcast %cst_5 : f32 to vector<512x32xf32>
    %8 = arith.maximumf %6, %7 : vector<512x32xf32>
    %c0_6 = arith.constant 0 : index
    %c0_7 = arith.constant 0 : index
    %9 = vector.load %arg4[%c0_6, %c0_7] : memref<512x32xf32, #tpu.memory_space<vmem>>, vector<512x32xf32>
    tpu.vector_store %arg4[%c0_6, %c0_7], %8 {strides = array<i32>} : memref<512x32xf32, #tpu.memory_space<vmem>>, vector<512x32xf32>,
    return
  }
  func.func @transform_0(%arg0: i32) -> (i32, i32) {
    %c0_i32 = arith.constant 0 : i32
    %c0_i32_0 = arith.constant 0 : i32
    return %arg0, %c0_i32 : i32, i32
  }
  func.func @transform_1(%arg0: i32) -> (i32, i32) {
    %c0_i32 = arith.constant 0 : i32
    %c0_i32_0 = arith.constant 0 : i32
    %c0_i32_1 = arith.constant 0 : i32
    return %c0_i32, %c0_i32_0 : i32, i32
  }
  func.func @transform_2(%arg0: i32) -> (i32, i32) {
    %c0_i32 = arith.constant 0 : i32
    %c0_i32_0 = arith.constant 0 : i32
    %c0_i32_1 = arith.constant 0 : i32
    return %c0_i32, %c0_i32_0 : i32, i32
  }
  func.func @transform_3(%arg0: i32) -> (i32, i32) {
    %c0_i32 = arith.constant 0 : i32
    %c0_i32_0 = arith.constant 0 : i32
    return %arg0, %c0_i32 : i32, i32
  }
}

module attributes {stable_mosaic.version = 11 : i64} {
  func.func @_matmul_bias_act_kernel(%arg0: i32, %arg1: memref<288x512xf32, #tpu.memory_space<vmem>>, %arg2: memref<512x64xbf16, #tpu.memory_space<vmem>>, %arg3: memref<1x64xf32, #tpu.memory_space<vmem>>, %arg4: memref<288x64xf32, #tpu.memory_space<vmem>>) attributes {dimension_semantics = [#tpu.dimension_semantics<parallel>], iteration_bounds = array<i64: 1>, scalar_prefetch = 0 : i64, scratch_operands = 0 : i64, tpu.core_type = #tpu.core_type<tc>, window_params = [{transform_indices = @transform_0, window_bounds = array<i64: 288, 512>}, {pipeline_mode = #tpu.pipeline_mode<synchronous>, transform_indices = @transform_1, window_bounds = array<i64: 512, 64>}, {pipeline_mode = #tpu.pipeline_mode<synchronous>, transform_indices = @transform_2, window_bounds = array<i64: 1, 64>}, {transform_indices = @transform_3, window_bounds = array<i64: 288, 64>}]} {
    %c0 = arith.constant 0 : index
    %c0_0 = arith.constant 0 : index
    %0 = vector.load %arg1[%c0, %c0_0] : memref<288x512xf32, #tpu.memory_space<vmem>>, vector<288x512xf32>
    %1 = arith.truncf %0 : vector<288x512xf32> to vector<288x512xbf16>
    %c0_1 = arith.constant 0 : index
    %c0_2 = arith.constant 0 : index
    %2 = vector.load %arg2[%c0_1, %c0_2] : memref<512x64xbf16, #tpu.memory_space<vmem>>, vector<512x64xbf16>
    %cst = arith.constant dense<0.000000e+00> : vector<288x64xf32>
    %3 = tpu.matmul %1, %2, %cst {dimension_numbers = #tpu.dot_dimension_numbers<[1], [0], [0], [1], [0, 0, 1, 1], [], []>} : vector<288x512xbf16>, vector<512x64xbf16>, vector<288x64xf32> -> vector<288x64xf32>
    %c0_3 = arith.constant 0 : index
    %c0_4 = arith.constant 0 : index
    %4 = vector.load %arg3[%c0_3, %c0_4] : memref<1x64xf32, #tpu.memory_space<vmem>>, vector<1x64xf32>
    %5 = vector.broadcast %4 : vector<1x64xf32> to vector<288x64xf32>
    %6 = arith.addf %3, %5 : vector<288x64xf32>
    %cst_5 = arith.constant 0.000000e+00 : f32
    %7 = vector.broadcast %cst_5 : f32 to vector<288x64xf32>
    %8 = arith.maximumf %6, %7 : vector<288x64xf32>
    %c0_6 = arith.constant 0 : index
    %c0_7 = arith.constant 0 : index
    %9 = vector.load %arg4[%c0_6, %c0_7] : memref<288x64xf32, #tpu.memory_space<vmem>>, vector<288x64xf32>
    tpu.vector_store %arg4[%c0_6, %c0_7], %8 {strides = array<i32>} : memref<288x64xf32, #tpu.memory_space<vmem>>, vector<288x64xf32>,
    return
  }
  func.func @transform_0(%arg0: i32) -> (i32, i32) {
    %c0_i32 = arith.constant 0 : i32
    %c0_i32_0 = arith.constant 0 : i32
    return %arg0, %c0_i32 : i32, i32
  }
  func.func @transform_1(%arg0: i32) -> (i32, i32) {
    %c0_i32 = arith.constant 0 : i32
    %c0_i32_0 = arith.constant 0 : i32
    %c0_i32_1 = arith.constant 0 : i32
    return %c0_i32, %c0_i32_0 : i32, i32
  }
  func.func @transform_2(%arg0: i32) -> (i32, i32) {
    %c0_i32 = arith.constant 0 : i32
    %c0_i32_0 = arith.constant 0 : i32
    %c0_i32_1 = arith.constant 0 : i32
    return %c0_i32, %c0_i32_0 : i32, i32
  }
  func.func @transform_3(%arg0: i32) -> (i32, i32) {
    %c0_i32 = arith.constant 0 : i32
    %c0_i32_0 = arith.constant 0 : i32
    return %arg0, %c0_i32 : i32, i32
  }
}

module attributes {stable_mosaic.version = 11 : i64} {
  func.func @_matmul_bias_act_kernel(%arg0: i32, %arg1: memref<128x576xf32, #tpu.memory_space<vmem>>, %arg2: memref<576x64xbf16, #tpu.memory_space<vmem>>, %arg3: memref<1x64xf32, #tpu.memory_space<vmem>>, %arg4: memref<128x64xf32, #tpu.memory_space<vmem>>) attributes {dimension_semantics = [#tpu.dimension_semantics<parallel>], iteration_bounds = array<i64: 1>, scalar_prefetch = 0 : i64, scratch_operands = 0 : i64, tpu.core_type = #tpu.core_type<tc>, window_params = [{transform_indices = @transform_0, window_bounds = array<i64: 128, 576>}, {pipeline_mode = #tpu.pipeline_mode<synchronous>, transform_indices = @transform_1, window_bounds = array<i64: 576, 64>}, {pipeline_mode = #tpu.pipeline_mode<synchronous>, transform_indices = @transform_2, window_bounds = array<i64: 1, 64>}, {transform_indices = @transform_3, window_bounds = array<i64: 128, 64>}]} {
    %c0 = arith.constant 0 : index
    %c0_0 = arith.constant 0 : index
    %0 = vector.load %arg1[%c0, %c0_0] : memref<128x576xf32, #tpu.memory_space<vmem>>, vector<128x576xf32>
    %1 = arith.truncf %0 : vector<128x576xf32> to vector<128x576xbf16>
    %c0_1 = arith.constant 0 : index
    %c0_2 = arith.constant 0 : index
    %2 = vector.load %arg2[%c0_1, %c0_2] : memref<576x64xbf16, #tpu.memory_space<vmem>>, vector<576x64xbf16>
    %cst = arith.constant dense<0.000000e+00> : vector<128x64xf32>
    %3 = tpu.matmul %1, %2, %cst {dimension_numbers = #tpu.dot_dimension_numbers<[1], [0], [0], [1], [0, 0, 1, 1], [], []>} : vector<128x576xbf16>, vector<576x64xbf16>, vector<128x64xf32> -> vector<128x64xf32>
    %c0_3 = arith.constant 0 : index
    %c0_4 = arith.constant 0 : index
    %4 = vector.load %arg3[%c0_3, %c0_4] : memref<1x64xf32, #tpu.memory_space<vmem>>, vector<1x64xf32>
    %5 = vector.broadcast %4 : vector<1x64xf32> to vector<128x64xf32>
    %6 = arith.addf %3, %5 : vector<128x64xf32>
    %cst_5 = arith.constant 0.000000e+00 : f32
    %7 = vector.broadcast %cst_5 : f32 to vector<128x64xf32>
    %8 = arith.maximumf %6, %7 : vector<128x64xf32>
    %c0_6 = arith.constant 0 : index
    %c0_7 = arith.constant 0 : index
    %9 = vector.load %arg4[%c0_6, %c0_7] : memref<128x64xf32, #tpu.memory_space<vmem>>, vector<128x64xf32>
    tpu.vector_store %arg4[%c0_6, %c0_7], %8 {strides = array<i32>} : memref<128x64xf32, #tpu.memory_space<vmem>>, vector<128x64xf32>,
    return
  }
  func.func @transform_0(%arg0: i32) -> (i32, i32) {
    %c0_i32 = arith.constant 0 : i32
    %c0_i32_0 = arith.constant 0 : i32
    return %arg0, %c0_i32 : i32, i32
  }
  func.func @transform_1(%arg0: i32) -> (i32, i32) {
    %c0_i32 = arith.constant 0 : i32
    %c0_i32_0 = arith.constant 0 : i32
    %c0_i32_1 = arith.constant 0 : i32
    return %c0_i32, %c0_i32_0 : i32, i32
  }
  func.func @transform_2(%arg0: i32) -> (i32, i32) {
    %c0_i32 = arith.constant 0 : i32
    %c0_i32_0 = arith.constant 0 : i32
    %c0_i32_1 = arith.constant 0 : i32
    return %c0_i32, %c0_i32_0 : i32, i32
  }
  func.func @transform_3(%arg0: i32) -> (i32, i32) {
    %c0_i32 = arith.constant 0 : i32
    %c0_i32_0 = arith.constant 0 : i32
    return %arg0, %c0_i32 : i32, i32
  }
}

module attributes {stable_mosaic.version = 11 : i64} {
  func.func @_matmul_bias_act_kernel(%arg0: i32, %arg1: memref<8x1024xf32, #tpu.memory_space<vmem>>, %arg2: memref<1024x128xbf16, #tpu.memory_space<vmem>>, %arg3: memref<1x128xf32, #tpu.memory_space<vmem>>, %arg4: memref<8x128xf32, #tpu.memory_space<vmem>>) attributes {dimension_semantics = [#tpu.dimension_semantics<parallel>], iteration_bounds = array<i64: 1>, scalar_prefetch = 0 : i64, scratch_operands = 0 : i64, tpu.core_type = #tpu.core_type<tc>, window_params = [{transform_indices = @transform_0, window_bounds = array<i64: 8, 1024>}, {pipeline_mode = #tpu.pipeline_mode<synchronous>, transform_indices = @transform_1, window_bounds = array<i64: 1024, 128>}, {pipeline_mode = #tpu.pipeline_mode<synchronous>, transform_indices = @transform_2, window_bounds = array<i64: 1, 128>}, {transform_indices = @transform_3, window_bounds = array<i64: 8, 128>}]} {
    %c0 = arith.constant 0 : index
    %c0_0 = arith.constant 0 : index
    %0 = vector.load %arg1[%c0, %c0_0] : memref<8x1024xf32, #tpu.memory_space<vmem>>, vector<8x1024xf32>
    %1 = arith.truncf %0 : vector<8x1024xf32> to vector<8x1024xbf16>
    %c0_1 = arith.constant 0 : index
    %c0_2 = arith.constant 0 : index
    %2 = vector.load %arg2[%c0_1, %c0_2] : memref<1024x128xbf16, #tpu.memory_space<vmem>>, vector<1024x128xbf16>
    %cst = arith.constant dense<0.000000e+00> : vector<8x128xf32>
    %3 = tpu.matmul %1, %2, %cst {dimension_numbers = #tpu.dot_dimension_numbers<[1], [0], [0], [1], [0, 0, 1, 1], [], []>} : vector<8x1024xbf16>, vector<1024x128xbf16>, vector<8x128xf32> -> vector<8x128xf32>
    %c0_3 = arith.constant 0 : index
    %c0_4 = arith.constant 0 : index
    %4 = vector.load %arg3[%c0_3, %c0_4] : memref<1x128xf32, #tpu.memory_space<vmem>>, vector<1x128xf32>
    %5 = vector.broadcast %4 : vector<1x128xf32> to vector<8x128xf32>
    %6 = arith.addf %3, %5 : vector<8x128xf32>
    %cst_5 = arith.constant 0.000000e+00 : f32
    %7 = vector.broadcast %cst_5 : f32 to vector<8x128xf32>
    %8 = arith.maximumf %6, %7 : vector<8x128xf32>
    %c0_6 = arith.constant 0 : index
    %c0_7 = arith.constant 0 : index
    %9 = vector.load %arg4[%c0_6, %c0_7] : memref<8x128xf32, #tpu.memory_space<vmem>>, vector<8x128xf32>
    tpu.vector_store %arg4[%c0_6, %c0_7], %8 {strides = array<i32>} : memref<8x128xf32, #tpu.memory_space<vmem>>, vector<8x128xf32>,
    return
  }
  func.func @transform_0(%arg0: i32) -> (i32, i32) {
    %c0_i32 = arith.constant 0 : i32
    %c0_i32_0 = arith.constant 0 : i32
    return %arg0, %c0_i32 : i32, i32
  }
  func.func @transform_1(%arg0: i32) -> (i32, i32) {
    %c0_i32 = arith.constant 0 : i32
    %c0_i32_0 = arith.constant 0 : i32
    %c0_i32_1 = arith.constant 0 : i32
    return %c0_i32, %c0_i32_0 : i32, i32
  }
  func.func @transform_2(%arg0: i32) -> (i32, i32) {
    %c0_i32 = arith.constant 0 : i32
    %c0_i32_0 = arith.constant 0 : i32
    %c0_i32_1 = arith.constant 0 : i32
    return %c0_i32, %c0_i32_0 : i32, i32
  }
  func.func @transform_3(%arg0: i32) -> (i32, i32) {
    %c0_i32 = arith.constant 0 : i32
    %c0_i32_0 = arith.constant 0 : i32
    return %arg0, %c0_i32 : i32, i32
  }
}

module attributes {stable_mosaic.version = 11 : i64} {
  func.func @_attn_block_kernel(%arg0: i32, %arg1: memref<1x4x128xf32, #tpu.memory_space<vmem>>, %arg2: memref<1x4x128xf32, #tpu.memory_space<vmem>>, %arg3: memref<128x128xbf16, #tpu.memory_space<vmem>>, %arg4: memref<1x128xf32, #tpu.memory_space<vmem>>, %arg5: memref<128x128xbf16, #tpu.memory_space<vmem>>, %arg6: memref<1x128xf32, #tpu.memory_space<vmem>>, %arg7: memref<128x128xbf16, #tpu.memory_space<vmem>>, %arg8: memref<1x128xf32, #tpu.memory_space<vmem>>, %arg9: memref<128x128xbf16, #tpu.memory_space<vmem>>, %arg10: memref<1x128xf32, #tpu.memory_space<vmem>>, %arg11: memref<1x128xf32, #tpu.memory_space<vmem>>, %arg12: memref<1x128xf32, #tpu.memory_space<vmem>>, %arg13: memref<128x128xbf16, #tpu.memory_space<vmem>>, %arg14: memref<1x128xf32, #tpu.memory_space<vmem>>, %arg15: memref<128x128xbf16, #tpu.memory_space<vmem>>, %arg16: memref<1x128xf32, #tpu.memory_space<vmem>>, %arg17: memref<1x4x128xf32, #tpu.memory_space<vmem>>) attributes {dimension_semantics = [#tpu.dimension_semantics<parallel>], iteration_bounds = array<i64: 2>, scalar_prefetch = 0 : i64, scratch_operands = 0 : i64, tpu.core_type = #tpu.core_type<tc>, window_params = [{transform_indices = @transform_0, window_bounds = array<i64: 1, 4, 128>}, {transform_indices = @transform_1, window_bounds = array<i64: 1, 4, 128>}, {pipeline_mode = #tpu.pipeline_mode<synchronous>, transform_indices = @transform_2, window_bounds = array<i64: 128, 128>}, {pipeline_mode = #tpu.pipeline_mode<synchronous>, transform_indices = @transform_3, window_bounds = array<i64: 1, 128>}, {pipeline_mode = #tpu.pipeline_mode<synchronous>, transform_indices = @transform_4, window_bounds = array<i64: 128, 128>}, {pipeline_mode = #tpu.pipeline_mode<synchronous>, transform_indices = @transform_5, window_bounds = array<i64: 1, 128>}, {pipeline_mode = #tpu.pipeline_mode<synchronous>, transform_indices = @transform_6, window_bounds = array<i64: 128, 128>}, {pipeline_mode = #tpu.pipeline_mode<synchronous>, transform_indices = @transform_7, window_bounds = array<i64: 1, 128>}, {pipeline_mode = #tpu.pipeline_mode<synchronous>, transform_indices = @transform_8, window_bounds = array<i64: 128, 128>}, {pipeline_mode = #tpu.pipeline_mode<synchronous>, transform_indices = @transform_9, window_bounds = array<i64: 1, 128>}, {pipeline_mode = #tpu.pipeline_mode<synchronous>, transform_indices = @transform_10, window_bounds = array<i64: 1, 128>}, {pipeline_mode = #tpu.pipeline_mode<synchronous>, transform_indices = @transform_11, window_bounds = array<i64: 1, 128>}, {pipeline_mode = #tpu.pipeline_mode<synchronous>, transform_indices = @transform_12, window_bounds = array<i64: 128, 128>}, {pipeline_mode = #tpu.pipeline_mode<synchronous>, transform_indices = @transform_13, window_bounds = array<i64: 1, 128>}, {pipeline_mode = #tpu.pipeline_mode<synchronous>, transform_indices = @transform_14, window_bounds = array<i64: 128, 128>}, {pipeline_mode = #tpu.pipeline_mode<synchronous>, transform_indices = @transform_15, window_bounds = array<i64: 1, 128>}, {transform_indices = @transform_16, window_bounds = array<i64: 1, 4, 128>}]} {
    %c0 = arith.constant 0 : index
    %c0_0 = arith.constant 0 : index
    %c0_1 = arith.constant 0 : index
    %0 = vector.load %arg1[%c0, %c0_0, %c0_1] : memref<1x4x128xf32, #tpu.memory_space<vmem>>, vector<1x4x128xf32>
    %1 = vector.shape_cast %0 : vector<1x4x128xf32> to vector<4x128xf32>
    %c0_2 = arith.constant 0 : index
    %c0_3 = arith.constant 0 : index
    %c0_4 = arith.constant 0 : index
    %2 = vector.load %arg2[%c0_2, %c0_3, %c0_4] : memref<1x4x128xf32, #tpu.memory_space<vmem>>, vector<1x4x128xf32>
    %3 = vector.shape_cast %2 : vector<1x4x128xf32> to vector<4x128xf32>
    %4 = arith.truncf %1 : vector<4x128xf32> to vector<4x128xbf16>
    %c0_5 = arith.constant 0 : index
    %c0_6 = arith.constant 0 : index
    %5 = vector.load %arg3[%c0_5, %c0_6] : memref<128x128xbf16, #tpu.memory_space<vmem>>, vector<128x128xbf16>
    %cst = arith.constant dense<0.000000e+00> : vector<4x128xf32>
    %6 = tpu.matmul %4, %5, %cst {dimension_numbers = #tpu.dot_dimension_numbers<[1], [0], [0], [1], [0, 0, 1, 1], [], []>} : vector<4x128xbf16>, vector<128x128xbf16>, vector<4x128xf32> -> vector<4x128xf32>
    %c0_7 = arith.constant 0 : index
    %c0_8 = arith.constant 0 : index
    %7 = vector.load %arg4[%c0_7, %c0_8] : memref<1x128xf32, #tpu.memory_space<vmem>>, vector<1x128xf32>
    %8 = vector.broadcast %7 : vector<1x128xf32> to vector<4x128xf32>
    %9 = arith.addf %6, %8 : vector<4x128xf32>
    %10 = arith.truncf %3 : vector<4x128xf32> to vector<4x128xbf16>
    %c0_9 = arith.constant 0 : index
    %c0_10 = arith.constant 0 : index
    %11 = vector.load %arg5[%c0_9, %c0_10] : memref<128x128xbf16, #tpu.memory_space<vmem>>, vector<128x128xbf16>
    %cst_11 = arith.constant dense<0.000000e+00> : vector<4x128xf32>
    %12 = tpu.matmul %10, %11, %cst_11 {dimension_numbers = #tpu.dot_dimension_numbers<[1], [0], [0], [1], [0, 0, 1, 1], [], []>} : vector<4x128xbf16>, vector<128x128xbf16>, vector<4x128xf32> -> vector<4x128xf32>
    %c0_12 = arith.constant 0 : index
    %c0_13 = arith.constant 0 : index
    %13 = vector.load %arg6[%c0_12, %c0_13] : memref<1x128xf32, #tpu.memory_space<vmem>>, vector<1x128xf32>
    %14 = vector.broadcast %13 : vector<1x128xf32> to vector<4x128xf32>
    %15 = arith.addf %12, %14 : vector<4x128xf32>
    %16 = arith.truncf %3 : vector<4x128xf32> to vector<4x128xbf16>
    %c0_14 = arith.constant 0 : index
    %c0_15 = arith.constant 0 : index
    %17 = vector.load %arg7[%c0_14, %c0_15] : memref<128x128xbf16, #tpu.memory_space<vmem>>, vector<128x128xbf16>
    %cst_16 = arith.constant dense<0.000000e+00> : vector<4x128xf32>
    %18 = tpu.matmul %16, %17, %cst_16 {dimension_numbers = #tpu.dot_dimension_numbers<[1], [0], [0], [1], [0, 0, 1, 1], [], []>} : vector<4x128xbf16>, vector<128x128xbf16>, vector<4x128xf32> -> vector<4x128xf32>
    %c0_17 = arith.constant 0 : index
    %c0_18 = arith.constant 0 : index
    %19 = vector.load %arg8[%c0_17, %c0_18] : memref<1x128xf32, #tpu.memory_space<vmem>>, vector<1x128xf32>
    %20 = vector.broadcast %19 : vector<1x128xf32> to vector<4x128xf32>
    %21 = arith.addf %18, %20 : vector<4x128xf32>
    %22 = arith.truncf %9 : vector<4x128xf32> to vector<4x128xbf16>
    %23 = arith.truncf %15 : vector<4x128xf32> to vector<4x128xbf16>
    %cst_19 = arith.constant dense<0.000000e+00> : vector<4x4xf32>
    %24 = tpu.matmul %22, %23, %cst_19 {dimension_numbers = #tpu.dot_dimension_numbers<[1], [1], [0], [0], [0, 0, 1, 0], [], []>} : vector<4x128xbf16>, vector<4x128xbf16>, vector<4x4xf32> -> vector<4x4xf32>
    %cst_20 = arith.constant 0.0883883461 : f32
    %25 = vector.broadcast %cst_20 : f32 to vector<4x4xf32>
    %26 = arith.mulf %24, %25 : vector<4x4xf32>
    %cst_21 = arith.constant dense<0xFF800000> : vector<4xf32>
    %27 = vector.multi_reduction <maximumf>, %26, %cst_21 [1] : vector<4x4xf32> to vector<4xf32>
    %28 = vector.shape_cast %27 : vector<4xf32> to vector<4x1xf32>
    %29 = vector.broadcast %28 : vector<4x1xf32> to vector<4x4xf32>
    %30 = arith.subf %26, %29 : vector<4x4xf32>
    %31 = math.exp %30 : vector<4x4xf32>
    %cst_22 = arith.constant dense<0.000000e+00> : vector<4xf32>
    %32 = vector.multi_reduction <add>, %31, %cst_22 [1] : vector<4x4xf32> to vector<4xf32>
    %33 = vector.shape_cast %32 : vector<4xf32> to vector<4x1xf32>
    %34 = vector.broadcast %33 : vector<4x1xf32> to vector<4x4xf32>
    %35 = arith.divf %31, %34 : vector<4x4xf32>
    %36 = arith.truncf %35 : vector<4x4xf32> to vector<4x4xbf16>
    %37 = arith.truncf %21 : vector<4x128xf32> to vector<4x128xbf16>
    %cst_23 = arith.constant dense<0.000000e+00> : vector<4x128xf32>
    %38 = tpu.matmul %36, %37, %cst_23 {dimension_numbers = #tpu.dot_dimension_numbers<[1], [0], [0], [1], [0, 0, 1, 1], [], []>} : vector<4x4xbf16>, vector<4x128xbf16>, vector<4x128xf32> -> vector<4x128xf32>
    %39 = arith.truncf %38 : vector<4x128xf32> to vector<4x128xbf16>
    %c0_24 = arith.constant 0 : index
    %c0_25 = arith.constant 0 : index
    %40 = vector.load %arg9[%c0_24, %c0_25] : memref<128x128xbf16, #tpu.memory_space<vmem>>, vector<128x128xbf16>
    %cst_26 = arith.constant dense<0.000000e+00> : vector<4x128xf32>
    %41 = tpu.matmul %39, %40, %cst_26 {dimension_numbers = #tpu.dot_dimension_numbers<[1], [0], [0], [1], [0, 0, 1, 1], [], []>} : vector<4x128xbf16>, vector<128x128xbf16>, vector<4x128xf32> -> vector<4x128xf32>
    %c0_27 = arith.constant 0 : index
    %c0_28 = arith.constant 0 : index
    %42 = vector.load %arg10[%c0_27, %c0_28] : memref<1x128xf32, #tpu.memory_space<vmem>>, vector<1x128xf32>
    %43 = vector.broadcast %42 : vector<1x128xf32> to vector<4x128xf32>
    %44 = arith.addf %41, %43 : vector<4x128xf32>
    %45 = arith.addf %44, %1 : vector<4x128xf32>
    %c0_29 = arith.constant 0 : index
    %c0_30 = arith.constant 0 : index
    %46 = vector.load %arg11[%c0_29, %c0_30] : memref<1x128xf32, #tpu.memory_space<vmem>>, vector<1x128xf32>
    %c0_31 = arith.constant 0 : index
    %c0_32 = arith.constant 0 : index
    %47 = vector.load %arg12[%c0_31, %c0_32] : memref<1x128xf32, #tpu.memory_space<vmem>>, vector<1x128xf32>
    %cst_33 = arith.constant dense<0.000000e+00> : vector<4xf32>
    %48 = vector.multi_reduction <add>, %45, %cst_33 [1] : vector<4x128xf32> to vector<4xf32>
    %49 = vector.shape_cast %48 : vector<4xf32> to vector<4x1xf32>
    %cst_34 = arith.constant 1.280000e+02 : f32
    %50 = vector.broadcast %cst_34 : f32 to vector<4x1xf32>
    %51 = arith.divf %49, %50 : vector<4x1xf32>
    %52 = vector.broadcast %51 : vector<4x1xf32> to vector<4x128xf32>
    %53 = arith.subf %45, %52 : vector<4x128xf32>
    %54 = arith.mulf %53, %53 : vector<4x128xf32>
    %cst_35 = arith.constant dense<0.000000e+00> : vector<4xf32>
    %55 = vector.multi_reduction <add>, %54, %cst_35 [1] : vector<4x128xf32> to vector<4xf32>
    %56 = vector.shape_cast %55 : vector<4xf32> to vector<4x1xf32>
    %cst_36 = arith.constant 1.280000e+02 : f32
    %57 = vector.broadcast %cst_36 : f32 to vector<4x1xf32>
    %58 = arith.divf %56, %57 : vector<4x1xf32>
    %59 = vector.broadcast %51 : vector<4x1xf32> to vector<4x128xf32>
    %60 = arith.subf %45, %59 : vector<4x128xf32>
    %cst_37 = arith.constant 9.99999974E-6 : f32
    %61 = vector.broadcast %cst_37 : f32 to vector<4x1xf32>
    %62 = arith.addf %58, %61 : vector<4x1xf32>
    %63 = math.rsqrt %62 : vector<4x1xf32>
    %64 = vector.broadcast %63 : vector<4x1xf32> to vector<4x128xf32>
    %65 = arith.mulf %60, %64 : vector<4x128xf32>
    %66 = vector.broadcast %46 : vector<1x128xf32> to vector<4x128xf32>
    %67 = arith.mulf %65, %66 : vector<4x128xf32>
    %68 = vector.broadcast %47 : vector<1x128xf32> to vector<4x128xf32>
    %69 = arith.addf %67, %68 : vector<4x128xf32>
    %70 = arith.truncf %69 : vector<4x128xf32> to vector<4x128xbf16>
    %c0_38 = arith.constant 0 : index
    %c0_39 = arith.constant 0 : index
    %71 = vector.load %arg13[%c0_38, %c0_39] : memref<128x128xbf16, #tpu.memory_space<vmem>>, vector<128x128xbf16>
    %cst_40 = arith.constant dense<0.000000e+00> : vector<4x128xf32>
    %72 = tpu.matmul %70, %71, %cst_40 {dimension_numbers = #tpu.dot_dimension_numbers<[1], [0], [0], [1], [0, 0, 1, 1], [], []>} : vector<4x128xbf16>, vector<128x128xbf16>, vector<4x128xf32> -> vector<4x128xf32>
    %c0_41 = arith.constant 0 : index
    %c0_42 = arith.constant 0 : index
    %73 = vector.load %arg14[%c0_41, %c0_42] : memref<1x128xf32, #tpu.memory_space<vmem>>, vector<1x128xf32>
    %74 = vector.broadcast %73 : vector<1x128xf32> to vector<4x128xf32>
    %75 = arith.addf %72, %74 : vector<4x128xf32>
    %cst_43 = arith.constant 0.000000e+00 : f32
    %76 = vector.broadcast %cst_43 : f32 to vector<4x128xf32>
    %77 = arith.maximumf %75, %76 : vector<4x128xf32>
    %78 = arith.truncf %77 : vector<4x128xf32> to vector<4x128xbf16>
    %c0_44 = arith.constant 0 : index
    %c0_45 = arith.constant 0 : index
    %79 = vector.load %arg15[%c0_44, %c0_45] : memref<128x128xbf16, #tpu.memory_space<vmem>>, vector<128x128xbf16>
    %cst_46 = arith.constant dense<0.000000e+00> : vector<4x128xf32>
    %80 = tpu.matmul %78, %79, %cst_46 {dimension_numbers = #tpu.dot_dimension_numbers<[1], [0], [0], [1], [0, 0, 1, 1], [], []>} : vector<4x128xbf16>, vector<128x128xbf16>, vector<4x128xf32> -> vector<4x128xf32>
    %c0_47 = arith.constant 0 : index
    %c0_48 = arith.constant 0 : index
    %81 = vector.load %arg16[%c0_47, %c0_48] : memref<1x128xf32, #tpu.memory_space<vmem>>, vector<1x128xf32>
    %82 = vector.broadcast %81 : vector<1x128xf32> to vector<4x128xf32>
    %83 = arith.addf %80, %82 : vector<4x128xf32>
    %c0_49 = arith.constant 0 : index
    %c0_50 = arith.constant 0 : index
    %c0_51 = arith.constant 0 : index
    %84 = vector.load %arg17[%c0_49, %c0_50, %c0_51] : memref<1x4x128xf32, #tpu.memory_space<vmem>>, vector<1x4x128xf32>
    %85 = vector.shape_cast %84 : vector<1x4x128xf32> to vector<4x128xf32>
    %86 = vector.shape_cast %83 : vector<4x128xf32> to vector<1x4x128xf32>
    tpu.vector_store %arg17[%c0_49, %c0_50, %c0_51], %86 {strides = array<i32>} : memref<1x4x128xf32, #tpu.memory_space<vmem>>, vector<1x4x128xf32>,
    return
  }
  func.func @transform_0(%arg0: i32) -> (i32, i32, i32) {
    %c0_i32 = arith.constant 0 : i32
    %c0_i32_0 = arith.constant 0 : i32
    %c0_i32_1 = arith.constant 0 : i32
    return %arg0, %c0_i32, %c0_i32_0 : i32, i32, i32
  }
  func.func @transform_1(%arg0: i32) -> (i32, i32, i32) {
    %c0_i32 = arith.constant 0 : i32
    %c0_i32_0 = arith.constant 0 : i32
    %c0_i32_1 = arith.constant 0 : i32
    return %arg0, %c0_i32, %c0_i32_0 : i32, i32, i32
  }
  func.func @transform_2(%arg0: i32) -> (i32, i32) {
    %c0_i32 = arith.constant 0 : i32
    %c0_i32_0 = arith.constant 0 : i32
    %c0_i32_1 = arith.constant 0 : i32
    return %c0_i32, %c0_i32_0 : i32, i32
  }
  func.func @transform_3(%arg0: i32) -> (i32, i32) {
    %c0_i32 = arith.constant 0 : i32
    %c0_i32_0 = arith.constant 0 : i32
    %c0_i32_1 = arith.constant 0 : i32
    return %c0_i32, %c0_i32_0 : i32, i32
  }
  func.func @transform_4(%arg0: i32) -> (i32, i32) {
    %c0_i32 = arith.constant 0 : i32
    %c0_i32_0 = arith.constant 0 : i32
    %c0_i32_1 = arith.constant 0 : i32
    return %c0_i32, %c0_i32_0 : i32, i32
  }
  func.func @transform_5(%arg0: i32) -> (i32, i32) {
    %c0_i32 = arith.constant 0 : i32
    %c0_i32_0 = arith.constant 0 : i32
    %c0_i32_1 = arith.constant 0 : i32
    return %c0_i32, %c0_i32_0 : i32, i32
  }
  func.func @transform_6(%arg0: i32) -> (i32, i32) {
    %c0_i32 = arith.constant 0 : i32
    %c0_i32_0 = arith.constant 0 : i32
    %c0_i32_1 = arith.constant 0 : i32
    return %c0_i32, %c0_i32_0 : i32, i32
  }
  func.func @transform_7(%arg0: i32) -> (i32, i32) {
    %c0_i32 = arith.constant 0 : i32
    %c0_i32_0 = arith.constant 0 : i32
    %c0_i32_1 = arith.constant 0 : i32
    return %c0_i32, %c0_i32_0 : i32, i32
  }
  func.func @transform_8(%arg0: i32) -> (i32, i32) {
    %c0_i32 = arith.constant 0 : i32
    %c0_i32_0 = arith.constant 0 : i32
    %c0_i32_1 = arith.constant 0 : i32
    return %c0_i32, %c0_i32_0 : i32, i32
  }
  func.func @transform_9(%arg0: i32) -> (i32, i32) {
    %c0_i32 = arith.constant 0 : i32
    %c0_i32_0 = arith.constant 0 : i32
    %c0_i32_1 = arith.constant 0 : i32
    return %c0_i32, %c0_i32_0 : i32, i32
  }
  func.func @transform_10(%arg0: i32) -> (i32, i32) {
    %c0_i32 = arith.constant 0 : i32
    %c0_i32_0 = arith.constant 0 : i32
    %c0_i32_1 = arith.constant 0 : i32
    return %c0_i32, %c0_i32_0 : i32, i32
  }
  func.func @transform_11(%arg0: i32) -> (i32, i32) {
    %c0_i32 = arith.constant 0 : i32
    %c0_i32_0 = arith.constant 0 : i32
    %c0_i32_1 = arith.constant 0 : i32
    return %c0_i32, %c0_i32_0 : i32, i32
  }
  func.func @transform_12(%arg0: i32) -> (i32, i32) {
    %c0_i32 = arith.constant 0 : i32
    %c0_i32_0 = arith.constant 0 : i32
    %c0_i32_1 = arith.constant 0 : i32
    return %c0_i32, %c0_i32_0 : i32, i32
  }
  func.func @transform_13(%arg0: i32) -> (i32, i32) {
    %c0_i32 = arith.constant 0 : i32
    %c0_i32_0 = arith.constant 0 : i32
    %c0_i32_1 = arith.constant 0 : i32
    return %c0_i32, %c0_i32_0 : i32, i32
  }
  func.func @transform_14(%arg0: i32) -> (i32, i32) {
    %c0_i32 = arith.constant 0 : i32
    %c0_i32_0 = arith.constant 0 : i32
    %c0_i32_1 = arith.constant 0 : i32
    return %c0_i32, %c0_i32_0 : i32, i32
  }
  func.func @transform_15(%arg0: i32) -> (i32, i32) {
    %c0_i32 = arith.constant 0 : i32
    %c0_i32_0 = arith.constant 0 : i32
    %c0_i32_1 = arith.constant 0 : i32
    return %c0_i32, %c0_i32_0 : i32, i32
  }
  func.func @transform_16(%arg0: i32) -> (i32, i32, i32) {
    %c0_i32 = arith.constant 0 : i32
    %c0_i32_0 = arith.constant 0 : i32
    %c0_i32_1 = arith.constant 0 : i32
    return %arg0, %c0_i32, %c0_i32_0 : i32, i32, i32
  }
}

module attributes {stable_mosaic.version = 11 : i64} {
  func.func @_attn_block_kernel(%arg0: i32, %arg1: memref<1x4x128xf32, #tpu.memory_space<vmem>>, %arg2: memref<1x4x128xf32, #tpu.memory_space<vmem>>, %arg3: memref<128x128xbf16, #tpu.memory_space<vmem>>, %arg4: memref<1x128xf32, #tpu.memory_space<vmem>>, %arg5: memref<128x128xbf16, #tpu.memory_space<vmem>>, %arg6: memref<1x128xf32, #tpu.memory_space<vmem>>, %arg7: memref<128x128xbf16, #tpu.memory_space<vmem>>, %arg8: memref<1x128xf32, #tpu.memory_space<vmem>>, %arg9: memref<128x128xbf16, #tpu.memory_space<vmem>>, %arg10: memref<1x128xf32, #tpu.memory_space<vmem>>, %arg11: memref<1x128xf32, #tpu.memory_space<vmem>>, %arg12: memref<1x128xf32, #tpu.memory_space<vmem>>, %arg13: memref<128x128xbf16, #tpu.memory_space<vmem>>, %arg14: memref<1x128xf32, #tpu.memory_space<vmem>>, %arg15: memref<128x128xbf16, #tpu.memory_space<vmem>>, %arg16: memref<1x128xf32, #tpu.memory_space<vmem>>, %arg17: memref<1x4x128xf32, #tpu.memory_space<vmem>>) attributes {dimension_semantics = [#tpu.dimension_semantics<parallel>], iteration_bounds = array<i64: 2>, scalar_prefetch = 0 : i64, scratch_operands = 0 : i64, tpu.core_type = #tpu.core_type<tc>, window_params = [{transform_indices = @transform_0, window_bounds = array<i64: 1, 4, 128>}, {transform_indices = @transform_1, window_bounds = array<i64: 1, 4, 128>}, {pipeline_mode = #tpu.pipeline_mode<synchronous>, transform_indices = @transform_2, window_bounds = array<i64: 128, 128>}, {pipeline_mode = #tpu.pipeline_mode<synchronous>, transform_indices = @transform_3, window_bounds = array<i64: 1, 128>}, {pipeline_mode = #tpu.pipeline_mode<synchronous>, transform_indices = @transform_4, window_bounds = array<i64: 128, 128>}, {pipeline_mode = #tpu.pipeline_mode<synchronous>, transform_indices = @transform_5, window_bounds = array<i64: 1, 128>}, {pipeline_mode = #tpu.pipeline_mode<synchronous>, transform_indices = @transform_6, window_bounds = array<i64: 128, 128>}, {pipeline_mode = #tpu.pipeline_mode<synchronous>, transform_indices = @transform_7, window_bounds = array<i64: 1, 128>}, {pipeline_mode = #tpu.pipeline_mode<synchronous>, transform_indices = @transform_8, window_bounds = array<i64: 128, 128>}, {pipeline_mode = #tpu.pipeline_mode<synchronous>, transform_indices = @transform_9, window_bounds = array<i64: 1, 128>}, {pipeline_mode = #tpu.pipeline_mode<synchronous>, transform_indices = @transform_10, window_bounds = array<i64: 1, 128>}, {pipeline_mode = #tpu.pipeline_mode<synchronous>, transform_indices = @transform_11, window_bounds = array<i64: 1, 128>}, {pipeline_mode = #tpu.pipeline_mode<synchronous>, transform_indices = @transform_12, window_bounds = array<i64: 128, 128>}, {pipeline_mode = #tpu.pipeline_mode<synchronous>, transform_indices = @transform_13, window_bounds = array<i64: 1, 128>}, {pipeline_mode = #tpu.pipeline_mode<synchronous>, transform_indices = @transform_14, window_bounds = array<i64: 128, 128>}, {pipeline_mode = #tpu.pipeline_mode<synchronous>, transform_indices = @transform_15, window_bounds = array<i64: 1, 128>}, {transform_indices = @transform_16, window_bounds = array<i64: 1, 4, 128>}]} {
    %c0 = arith.constant 0 : index
    %c0_0 = arith.constant 0 : index
    %c0_1 = arith.constant 0 : index
    %0 = vector.load %arg1[%c0, %c0_0, %c0_1] : memref<1x4x128xf32, #tpu.memory_space<vmem>>, vector<1x4x128xf32>
    %1 = vector.shape_cast %0 : vector<1x4x128xf32> to vector<4x128xf32>
    %c0_2 = arith.constant 0 : index
    %c0_3 = arith.constant 0 : index
    %c0_4 = arith.constant 0 : index
    %2 = vector.load %arg2[%c0_2, %c0_3, %c0_4] : memref<1x4x128xf32, #tpu.memory_space<vmem>>, vector<1x4x128xf32>
    %3 = vector.shape_cast %2 : vector<1x4x128xf32> to vector<4x128xf32>
    %4 = arith.truncf %1 : vector<4x128xf32> to vector<4x128xbf16>
    %c0_5 = arith.constant 0 : index
    %c0_6 = arith.constant 0 : index
    %5 = vector.load %arg3[%c0_5, %c0_6] : memref<128x128xbf16, #tpu.memory_space<vmem>>, vector<128x128xbf16>
    %cst = arith.constant dense<0.000000e+00> : vector<4x128xf32>
    %6 = tpu.matmul %4, %5, %cst {dimension_numbers = #tpu.dot_dimension_numbers<[1], [0], [0], [1], [0, 0, 1, 1], [], []>} : vector<4x128xbf16>, vector<128x128xbf16>, vector<4x128xf32> -> vector<4x128xf32>
    %c0_7 = arith.constant 0 : index
    %c0_8 = arith.constant 0 : index
    %7 = vector.load %arg4[%c0_7, %c0_8] : memref<1x128xf32, #tpu.memory_space<vmem>>, vector<1x128xf32>
    %8 = vector.broadcast %7 : vector<1x128xf32> to vector<4x128xf32>
    %9 = arith.addf %6, %8 : vector<4x128xf32>
    %10 = arith.truncf %3 : vector<4x128xf32> to vector<4x128xbf16>
    %c0_9 = arith.constant 0 : index
    %c0_10 = arith.constant 0 : index
    %11 = vector.load %arg5[%c0_9, %c0_10] : memref<128x128xbf16, #tpu.memory_space<vmem>>, vector<128x128xbf16>
    %cst_11 = arith.constant dense<0.000000e+00> : vector<4x128xf32>
    %12 = tpu.matmul %10, %11, %cst_11 {dimension_numbers = #tpu.dot_dimension_numbers<[1], [0], [0], [1], [0, 0, 1, 1], [], []>} : vector<4x128xbf16>, vector<128x128xbf16>, vector<4x128xf32> -> vector<4x128xf32>
    %c0_12 = arith.constant 0 : index
    %c0_13 = arith.constant 0 : index
    %13 = vector.load %arg6[%c0_12, %c0_13] : memref<1x128xf32, #tpu.memory_space<vmem>>, vector<1x128xf32>
    %14 = vector.broadcast %13 : vector<1x128xf32> to vector<4x128xf32>
    %15 = arith.addf %12, %14 : vector<4x128xf32>
    %16 = arith.truncf %3 : vector<4x128xf32> to vector<4x128xbf16>
    %c0_14 = arith.constant 0 : index
    %c0_15 = arith.constant 0 : index
    %17 = vector.load %arg7[%c0_14, %c0_15] : memref<128x128xbf16, #tpu.memory_space<vmem>>, vector<128x128xbf16>
    %cst_16 = arith.constant dense<0.000000e+00> : vector<4x128xf32>
    %18 = tpu.matmul %16, %17, %cst_16 {dimension_numbers = #tpu.dot_dimension_numbers<[1], [0], [0], [1], [0, 0, 1, 1], [], []>} : vector<4x128xbf16>, vector<128x128xbf16>, vector<4x128xf32> -> vector<4x128xf32>
    %c0_17 = arith.constant 0 : index
    %c0_18 = arith.constant 0 : index
    %19 = vector.load %arg8[%c0_17, %c0_18] : memref<1x128xf32, #tpu.memory_space<vmem>>, vector<1x128xf32>
    %20 = vector.broadcast %19 : vector<1x128xf32> to vector<4x128xf32>
    %21 = arith.addf %18, %20 : vector<4x128xf32>
    %22 = arith.truncf %9 : vector<4x128xf32> to vector<4x128xbf16>
    %23 = arith.truncf %15 : vector<4x128xf32> to vector<4x128xbf16>
    %cst_19 = arith.constant dense<0.000000e+00> : vector<4x4xf32>
    %24 = tpu.matmul %22, %23, %cst_19 {dimension_numbers = #tpu.dot_dimension_numbers<[1], [1], [0], [0], [0, 0, 1, 0], [], []>} : vector<4x128xbf16>, vector<4x128xbf16>, vector<4x4xf32> -> vector<4x4xf32>
    %cst_20 = arith.constant 0.0883883461 : f32
    %25 = vector.broadcast %cst_20 : f32 to vector<4x4xf32>
    %26 = arith.mulf %24, %25 : vector<4x4xf32>
    %cst_21 = arith.constant dense<0xFF800000> : vector<4xf32>
    %27 = vector.multi_reduction <maximumf>, %26, %cst_21 [1] : vector<4x4xf32> to vector<4xf32>
    %28 = vector.shape_cast %27 : vector<4xf32> to vector<4x1xf32>
    %29 = vector.broadcast %28 : vector<4x1xf32> to vector<4x4xf32>
    %30 = arith.subf %26, %29 : vector<4x4xf32>
    %31 = math.exp %30 : vector<4x4xf32>
    %cst_22 = arith.constant dense<0.000000e+00> : vector<4xf32>
    %32 = vector.multi_reduction <add>, %31, %cst_22 [1] : vector<4x4xf32> to vector<4xf32>
    %33 = vector.shape_cast %32 : vector<4xf32> to vector<4x1xf32>
    %34 = vector.broadcast %33 : vector<4x1xf32> to vector<4x4xf32>
    %35 = arith.divf %31, %34 : vector<4x4xf32>
    %36 = arith.truncf %35 : vector<4x4xf32> to vector<4x4xbf16>
    %37 = arith.truncf %21 : vector<4x128xf32> to vector<4x128xbf16>
    %cst_23 = arith.constant dense<0.000000e+00> : vector<4x128xf32>
    %38 = tpu.matmul %36, %37, %cst_23 {dimension_numbers = #tpu.dot_dimension_numbers<[1], [0], [0], [1], [0, 0, 1, 1], [], []>} : vector<4x4xbf16>, vector<4x128xbf16>, vector<4x128xf32> -> vector<4x128xf32>
    %39 = arith.truncf %38 : vector<4x128xf32> to vector<4x128xbf16>
    %c0_24 = arith.constant 0 : index
    %c0_25 = arith.constant 0 : index
    %40 = vector.load %arg9[%c0_24, %c0_25] : memref<128x128xbf16, #tpu.memory_space<vmem>>, vector<128x128xbf16>
    %cst_26 = arith.constant dense<0.000000e+00> : vector<4x128xf32>
    %41 = tpu.matmul %39, %40, %cst_26 {dimension_numbers = #tpu.dot_dimension_numbers<[1], [0], [0], [1], [0, 0, 1, 1], [], []>} : vector<4x128xbf16>, vector<128x128xbf16>, vector<4x128xf32> -> vector<4x128xf32>
    %c0_27 = arith.constant 0 : index
    %c0_28 = arith.constant 0 : index
    %42 = vector.load %arg10[%c0_27, %c0_28] : memref<1x128xf32, #tpu.memory_space<vmem>>, vector<1x128xf32>
    %43 = vector.broadcast %42 : vector<1x128xf32> to vector<4x128xf32>
    %44 = arith.addf %41, %43 : vector<4x128xf32>
    %45 = arith.addf %44, %1 : vector<4x128xf32>
    %c0_29 = arith.constant 0 : index
    %c0_30 = arith.constant 0 : index
    %46 = vector.load %arg11[%c0_29, %c0_30] : memref<1x128xf32, #tpu.memory_space<vmem>>, vector<1x128xf32>
    %c0_31 = arith.constant 0 : index
    %c0_32 = arith.constant 0 : index
    %47 = vector.load %arg12[%c0_31, %c0_32] : memref<1x128xf32, #tpu.memory_space<vmem>>, vector<1x128xf32>
    %cst_33 = arith.constant dense<0.000000e+00> : vector<4xf32>
    %48 = vector.multi_reduction <add>, %45, %cst_33 [1] : vector<4x128xf32> to vector<4xf32>
    %49 = vector.shape_cast %48 : vector<4xf32> to vector<4x1xf32>
    %cst_34 = arith.constant 1.280000e+02 : f32
    %50 = vector.broadcast %cst_34 : f32 to vector<4x1xf32>
    %51 = arith.divf %49, %50 : vector<4x1xf32>
    %52 = vector.broadcast %51 : vector<4x1xf32> to vector<4x128xf32>
    %53 = arith.subf %45, %52 : vector<4x128xf32>
    %54 = arith.mulf %53, %53 : vector<4x128xf32>
    %cst_35 = arith.constant dense<0.000000e+00> : vector<4xf32>
    %55 = vector.multi_reduction <add>, %54, %cst_35 [1] : vector<4x128xf32> to vector<4xf32>
    %56 = vector.shape_cast %55 : vector<4xf32> to vector<4x1xf32>
    %cst_36 = arith.constant 1.280000e+02 : f32
    %57 = vector.broadcast %cst_36 : f32 to vector<4x1xf32>
    %58 = arith.divf %56, %57 : vector<4x1xf32>
    %59 = vector.broadcast %51 : vector<4x1xf32> to vector<4x128xf32>
    %60 = arith.subf %45, %59 : vector<4x128xf32>
    %cst_37 = arith.constant 9.99999974E-6 : f32
    %61 = vector.broadcast %cst_37 : f32 to vector<4x1xf32>
    %62 = arith.addf %58, %61 : vector<4x1xf32>
    %63 = math.rsqrt %62 : vector<4x1xf32>
    %64 = vector.broadcast %63 : vector<4x1xf32> to vector<4x128xf32>
    %65 = arith.mulf %60, %64 : vector<4x128xf32>
    %66 = vector.broadcast %46 : vector<1x128xf32> to vector<4x128xf32>
    %67 = arith.mulf %65, %66 : vector<4x128xf32>
    %68 = vector.broadcast %47 : vector<1x128xf32> to vector<4x128xf32>
    %69 = arith.addf %67, %68 : vector<4x128xf32>
    %70 = arith.truncf %69 : vector<4x128xf32> to vector<4x128xbf16>
    %c0_38 = arith.constant 0 : index
    %c0_39 = arith.constant 0 : index
    %71 = vector.load %arg13[%c0_38, %c0_39] : memref<128x128xbf16, #tpu.memory_space<vmem>>, vector<128x128xbf16>
    %cst_40 = arith.constant dense<0.000000e+00> : vector<4x128xf32>
    %72 = tpu.matmul %70, %71, %cst_40 {dimension_numbers = #tpu.dot_dimension_numbers<[1], [0], [0], [1], [0, 0, 1, 1], [], []>} : vector<4x128xbf16>, vector<128x128xbf16>, vector<4x128xf32> -> vector<4x128xf32>
    %c0_41 = arith.constant 0 : index
    %c0_42 = arith.constant 0 : index
    %73 = vector.load %arg14[%c0_41, %c0_42] : memref<1x128xf32, #tpu.memory_space<vmem>>, vector<1x128xf32>
    %74 = vector.broadcast %73 : vector<1x128xf32> to vector<4x128xf32>
    %75 = arith.addf %72, %74 : vector<4x128xf32>
    %cst_43 = arith.constant 0.000000e+00 : f32
    %76 = vector.broadcast %cst_43 : f32 to vector<4x128xf32>
    %77 = arith.maximumf %75, %76 : vector<4x128xf32>
    %78 = arith.truncf %77 : vector<4x128xf32> to vector<4x128xbf16>
    %c0_44 = arith.constant 0 : index
    %c0_45 = arith.constant 0 : index
    %79 = vector.load %arg15[%c0_44, %c0_45] : memref<128x128xbf16, #tpu.memory_space<vmem>>, vector<128x128xbf16>
    %cst_46 = arith.constant dense<0.000000e+00> : vector<4x128xf32>
    %80 = tpu.matmul %78, %79, %cst_46 {dimension_numbers = #tpu.dot_dimension_numbers<[1], [0], [0], [1], [0, 0, 1, 1], [], []>} : vector<4x128xbf16>, vector<128x128xbf16>, vector<4x128xf32> -> vector<4x128xf32>
    %c0_47 = arith.constant 0 : index
    %c0_48 = arith.constant 0 : index
    %81 = vector.load %arg16[%c0_47, %c0_48] : memref<1x128xf32, #tpu.memory_space<vmem>>, vector<1x128xf32>
    %82 = vector.broadcast %81 : vector<1x128xf32> to vector<4x128xf32>
    %83 = arith.addf %80, %82 : vector<4x128xf32>
    %c0_49 = arith.constant 0 : index
    %c0_50 = arith.constant 0 : index
    %c0_51 = arith.constant 0 : index
    %84 = vector.load %arg17[%c0_49, %c0_50, %c0_51] : memref<1x4x128xf32, #tpu.memory_space<vmem>>, vector<1x4x128xf32>
    %85 = vector.shape_cast %84 : vector<1x4x128xf32> to vector<4x128xf32>
    %86 = vector.shape_cast %83 : vector<4x128xf32> to vector<1x4x128xf32>
    tpu.vector_store %arg17[%c0_49, %c0_50, %c0_51], %86 {strides = array<i32>} : memref<1x4x128xf32, #tpu.memory_space<vmem>>, vector<1x4x128xf32>,
    return
  }
  func.func @transform_0(%arg0: i32) -> (i32, i32, i32) {
    %c0_i32 = arith.constant 0 : i32
    %c0_i32_0 = arith.constant 0 : i32
    %c0_i32_1 = arith.constant 0 : i32
    return %arg0, %c0_i32, %c0_i32_0 : i32, i32, i32
  }
  func.func @transform_1(%arg0: i32) -> (i32, i32, i32) {
    %c0_i32 = arith.constant 0 : i32
    %c0_i32_0 = arith.constant 0 : i32
    %c0_i32_1 = arith.constant 0 : i32
    return %arg0, %c0_i32, %c0_i32_0 : i32, i32, i32
  }
  func.func @transform_2(%arg0: i32) -> (i32, i32) {
    %c0_i32 = arith.constant 0 : i32
    %c0_i32_0 = arith.constant 0 : i32
    %c0_i32_1 = arith.constant 0 : i32
    return %c0_i32, %c0_i32_0 : i32, i32
  }
  func.func @transform_3(%arg0: i32) -> (i32, i32) {
    %c0_i32 = arith.constant 0 : i32
    %c0_i32_0 = arith.constant 0 : i32
    %c0_i32_1 = arith.constant 0 : i32
    return %c0_i32, %c0_i32_0 : i32, i32
  }
  func.func @transform_4(%arg0: i32) -> (i32, i32) {
    %c0_i32 = arith.constant 0 : i32
    %c0_i32_0 = arith.constant 0 : i32
    %c0_i32_1 = arith.constant 0 : i32
    return %c0_i32, %c0_i32_0 : i32, i32
  }
  func.func @transform_5(%arg0: i32) -> (i32, i32) {
    %c0_i32 = arith.constant 0 : i32
    %c0_i32_0 = arith.constant 0 : i32
    %c0_i32_1 = arith.constant 0 : i32
    return %c0_i32, %c0_i32_0 : i32, i32
  }
  func.func @transform_6(%arg0: i32) -> (i32, i32) {
    %c0_i32 = arith.constant 0 : i32
    %c0_i32_0 = arith.constant 0 : i32
    %c0_i32_1 = arith.constant 0 : i32
    return %c0_i32, %c0_i32_0 : i32, i32
  }
  func.func @transform_7(%arg0: i32) -> (i32, i32) {
    %c0_i32 = arith.constant 0 : i32
    %c0_i32_0 = arith.constant 0 : i32
    %c0_i32_1 = arith.constant 0 : i32
    return %c0_i32, %c0_i32_0 : i32, i32
  }
  func.func @transform_8(%arg0: i32) -> (i32, i32) {
    %c0_i32 = arith.constant 0 : i32
    %c0_i32_0 = arith.constant 0 : i32
    %c0_i32_1 = arith.constant 0 : i32
    return %c0_i32, %c0_i32_0 : i32, i32
  }
  func.func @transform_9(%arg0: i32) -> (i32, i32) {
    %c0_i32 = arith.constant 0 : i32
    %c0_i32_0 = arith.constant 0 : i32
    %c0_i32_1 = arith.constant 0 : i32
    return %c0_i32, %c0_i32_0 : i32, i32
  }
  func.func @transform_10(%arg0: i32) -> (i32, i32) {
    %c0_i32 = arith.constant 0 : i32
    %c0_i32_0 = arith.constant 0 : i32
    %c0_i32_1 = arith.constant 0 : i32
    return %c0_i32, %c0_i32_0 : i32, i32
  }
  func.func @transform_11(%arg0: i32) -> (i32, i32) {
    %c0_i32 = arith.constant 0 : i32
    %c0_i32_0 = arith.constant 0 : i32
    %c0_i32_1 = arith.constant 0 : i32
    return %c0_i32, %c0_i32_0 : i32, i32
  }
  func.func @transform_12(%arg0: i32) -> (i32, i32) {
    %c0_i32 = arith.constant 0 : i32
    %c0_i32_0 = arith.constant 0 : i32
    %c0_i32_1 = arith.constant 0 : i32
    return %c0_i32, %c0_i32_0 : i32, i32
  }
  func.func @transform_13(%arg0: i32) -> (i32, i32) {
    %c0_i32 = arith.constant 0 : i32
    %c0_i32_0 = arith.constant 0 : i32
    %c0_i32_1 = arith.constant 0 : i32
    return %c0_i32, %c0_i32_0 : i32, i32
  }
  func.func @transform_14(%arg0: i32) -> (i32, i32) {
    %c0_i32 = arith.constant 0 : i32
    %c0_i32_0 = arith.constant 0 : i32
    %c0_i32_1 = arith.constant 0 : i32
    return %c0_i32, %c0_i32_0 : i32, i32
  }
  func.func @transform_15(%arg0: i32) -> (i32, i32) {
    %c0_i32 = arith.constant 0 : i32
    %c0_i32_0 = arith.constant 0 : i32
    %c0_i32_1 = arith.constant 0 : i32
    return %c0_i32, %c0_i32_0 : i32, i32
  }
  func.func @transform_16(%arg0: i32) -> (i32, i32, i32) {
    %c0_i32 = arith.constant 0 : i32
    %c0_i32_0 = arith.constant 0 : i32
    %c0_i32_1 = arith.constant 0 : i32
    return %arg0, %c0_i32, %c0_i32_0 : i32, i32, i32
  }
}

module attributes {stable_mosaic.version = 11 : i64} {
  func.func @_mlp_relu_kernel(%arg0: i32, %arg1: memref<8x24xf32, #tpu.memory_space<vmem>>, %arg2: memref<24x128xbf16, #tpu.memory_space<vmem>>, %arg3: memref<1x128xf32, #tpu.memory_space<vmem>>, %arg4: memref<128x128xbf16, #tpu.memory_space<vmem>>, %arg5: memref<1x128xf32, #tpu.memory_space<vmem>>, %arg6: memref<8x128xf32, #tpu.memory_space<vmem>>) attributes {dimension_semantics = [#tpu.dimension_semantics<parallel>], iteration_bounds = array<i64: 1>, scalar_prefetch = 0 : i64, scratch_operands = 0 : i64, tpu.core_type = #tpu.core_type<tc>, window_params = [{transform_indices = @transform_0, window_bounds = array<i64: 8, 24>}, {pipeline_mode = #tpu.pipeline_mode<synchronous>, transform_indices = @transform_1, window_bounds = array<i64: 24, 128>}, {pipeline_mode = #tpu.pipeline_mode<synchronous>, transform_indices = @transform_2, window_bounds = array<i64: 1, 128>}, {pipeline_mode = #tpu.pipeline_mode<synchronous>, transform_indices = @transform_3, window_bounds = array<i64: 128, 128>}, {pipeline_mode = #tpu.pipeline_mode<synchronous>, transform_indices = @transform_4, window_bounds = array<i64: 1, 128>}, {transform_indices = @transform_5, window_bounds = array<i64: 8, 128>}]} {
    %c0 = arith.constant 0 : index
    %c0_0 = arith.constant 0 : index
    %0 = vector.load %arg1[%c0, %c0_0] : memref<8x24xf32, #tpu.memory_space<vmem>>, vector<8x24xf32>
    %c0_1 = arith.constant 0 : index
    %c0_2 = arith.constant 0 : index
    %1 = vector.load %arg2[%c0_1, %c0_2] : memref<24x128xbf16, #tpu.memory_space<vmem>>, vector<24x128xbf16>
    %c0_3 = arith.constant 0 : index
    %c0_4 = arith.constant 0 : index
    %2 = vector.load %arg3[%c0_3, %c0_4] : memref<1x128xf32, #tpu.memory_space<vmem>>, vector<1x128xf32>
    %3 = arith.truncf %0 : vector<8x24xf32> to vector<8x24xbf16>
    %cst = arith.constant dense<0.000000e+00> : vector<8x128xf32>
    %4 = tpu.matmul %3, %1, %cst {dimension_numbers = #tpu.dot_dimension_numbers<[1], [0], [0], [1], [0, 0, 1, 1], [], []>} : vector<8x24xbf16>, vector<24x128xbf16>, vector<8x128xf32> -> vector<8x128xf32>
    %5 = vector.broadcast %2 : vector<1x128xf32> to vector<8x128xf32>
    %6 = arith.addf %4, %5 : vector<8x128xf32>
    %cst_5 = arith.constant 0.000000e+00 : f32
    %7 = vector.broadcast %cst_5 : f32 to vector<8x128xf32>
    %8 = arith.maximumf %6, %7 : vector<8x128xf32>
    %c0_6 = arith.constant 0 : index
    %c0_7 = arith.constant 0 : index
    %9 = vector.load %arg4[%c0_6, %c0_7] : memref<128x128xbf16, #tpu.memory_space<vmem>>, vector<128x128xbf16>
    %c0_8 = arith.constant 0 : index
    %c0_9 = arith.constant 0 : index
    %10 = vector.load %arg5[%c0_8, %c0_9] : memref<1x128xf32, #tpu.memory_space<vmem>>, vector<1x128xf32>
    %11 = arith.truncf %8 : vector<8x128xf32> to vector<8x128xbf16>
    %cst_10 = arith.constant dense<0.000000e+00> : vector<8x128xf32>
    %12 = tpu.matmul %11, %9, %cst_10 {dimension_numbers = #tpu.dot_dimension_numbers<[1], [0], [0], [1], [0, 0, 1, 1], [], []>} : vector<8x128xbf16>, vector<128x128xbf16>, vector<8x128xf32> -> vector<8x128xf32>
    %13 = vector.broadcast %10 : vector<1x128xf32> to vector<8x128xf32>
    %14 = arith.addf %12, %13 : vector<8x128xf32>
    %cst_11 = arith.constant 0.000000e+00 : f32
    %15 = vector.broadcast %cst_11 : f32 to vector<8x128xf32>
    %16 = arith.maximumf %14, %15 : vector<8x128xf32>
    %c0_12 = arith.constant 0 : index
    %c0_13 = arith.constant 0 : index
    %17 = vector.load %arg6[%c0_12, %c0_13] : memref<8x128xf32, #tpu.memory_space<vmem>>, vector<8x128xf32>
    tpu.vector_store %arg6[%c0_12, %c0_13], %16 {strides = array<i32>} : memref<8x128xf32, #tpu.memory_space<vmem>>, vector<8x128xf32>,
    return
  }
  func.func @transform_0(%arg0: i32) -> (i32, i32) {
    %c0_i32 = arith.constant 0 : i32
    %c0_i32_0 = arith.constant 0 : i32
    return %arg0, %c0_i32 : i32, i32
  }
  func.func @transform_1(%arg0: i32) -> (i32, i32) {
    %c0_i32 = arith.constant 0 : i32
    %c0_i32_0 = arith.constant 0 : i32
    %c0_i32_1 = arith.constant 0 : i32
    return %c0_i32, %c0_i32_0 : i32, i32
  }
  func.func @transform_2(%arg0: i32) -> (i32, i32) {
    %c0_i32 = arith.constant 0 : i32
    %c0_i32_0 = arith.constant 0 : i32
    %c0_i32_1 = arith.constant 0 : i32
    return %c0_i32, %c0_i32_0 : i32, i32
  }
  func.func @transform_3(%arg0: i32) -> (i32, i32) {
    %c0_i32 = arith.constant 0 : i32
    %c0_i32_0 = arith.constant 0 : i32
    %c0_i32_1 = arith.constant 0 : i32
    return %c0_i32, %c0_i32_0 : i32, i32
  }
  func.func @transform_4(%arg0: i32) -> (i32, i32) {
    %c0_i32 = arith.constant 0 : i32
    %c0_i32_0 = arith.constant 0 : i32
    %c0_i32_1 = arith.constant 0 : i32
    return %c0_i32, %c0_i32_0 : i32, i32
  }
  func.func @transform_5(%arg0: i32) -> (i32, i32) {
    %c0_i32 = arith.constant 0 : i32
    %c0_i32_0 = arith.constant 0 : i32
    return %arg0, %c0_i32 : i32, i32
  }
}

module attributes {stable_mosaic.version = 11 : i64} {
  func.func @_rnn_in_xw_ln_kernel(%arg0: i32, %arg1: memref<8x128xf32, #tpu.memory_space<vmem>>, %arg2: memref<8x128xf32, #tpu.memory_space<vmem>>, %arg3: memref<8x128xf32, #tpu.memory_space<vmem>>, %arg4: memref<128x512xbf16, #tpu.memory_space<vmem>>, %arg5: memref<1x512xf32, #tpu.memory_space<vmem>>, %arg6: memref<1x512xf32, #tpu.memory_space<vmem>>, %arg7: memref<8x512xf32, #tpu.memory_space<vmem>>) attributes {dimension_semantics = [#tpu.dimension_semantics<parallel>], iteration_bounds = array<i64: 1>, scalar_prefetch = 0 : i64, scratch_operands = 0 : i64, tpu.core_type = #tpu.core_type<tc>, window_params = [{transform_indices = @transform_0, window_bounds = array<i64: 8, 128>}, {transform_indices = @transform_1, window_bounds = array<i64: 8, 128>}, {transform_indices = @transform_2, window_bounds = array<i64: 8, 128>}, {pipeline_mode = #tpu.pipeline_mode<synchronous>, transform_indices = @transform_3, window_bounds = array<i64: 128, 512>}, {pipeline_mode = #tpu.pipeline_mode<synchronous>, transform_indices = @transform_4, window_bounds = array<i64: 1, 512>}, {pipeline_mode = #tpu.pipeline_mode<synchronous>, transform_indices = @transform_5, window_bounds = array<i64: 1, 512>}, {transform_indices = @transform_6, window_bounds = array<i64: 8, 512>}]} {
    %c0 = arith.constant 0 : index
    %c0_0 = arith.constant 0 : index
    %0 = vector.load %arg1[%c0, %c0_0] : memref<8x128xf32, #tpu.memory_space<vmem>>, vector<8x128xf32>
    %c0_1 = arith.constant 0 : index
    %c0_2 = arith.constant 0 : index
    %1 = vector.load %arg2[%c0_1, %c0_2] : memref<8x128xf32, #tpu.memory_space<vmem>>, vector<8x128xf32>
    %2 = arith.mulf %0, %1 : vector<8x128xf32>
    %c0_3 = arith.constant 0 : index
    %c0_4 = arith.constant 0 : index
    %3 = vector.load %arg3[%c0_3, %c0_4] : memref<8x128xf32, #tpu.memory_space<vmem>>, vector<8x128xf32>
    %4 = arith.mulf %2, %3 : vector<8x128xf32>
    %5 = arith.truncf %4 : vector<8x128xf32> to vector<8x128xbf16>
    %c0_5 = arith.constant 0 : index
    %c0_6 = arith.constant 0 : index
    %6 = vector.load %arg4[%c0_5, %c0_6] : memref<128x512xbf16, #tpu.memory_space<vmem>>, vector<128x512xbf16>
    %cst = arith.constant dense<0.000000e+00> : vector<8x512xf32>
    %7 = tpu.matmul %5, %6, %cst {dimension_numbers = #tpu.dot_dimension_numbers<[1], [0], [0], [1], [0, 0, 1, 1], [], []>} : vector<8x128xbf16>, vector<128x512xbf16>, vector<8x512xf32> -> vector<8x512xf32>
    %c0_7 = arith.constant 0 : index
    %c0_8 = arith.constant 0 : index
    %8 = vector.load %arg5[%c0_7, %c0_8] : memref<1x512xf32, #tpu.memory_space<vmem>>, vector<1x512xf32>
    %c0_9 = arith.constant 0 : index
    %c0_10 = arith.constant 0 : index
    %9 = vector.load %arg6[%c0_9, %c0_10] : memref<1x512xf32, #tpu.memory_space<vmem>>, vector<1x512xf32>
    %cst_11 = arith.constant dense<0.000000e+00> : vector<8xf32>
    %10 = vector.multi_reduction <add>, %7, %cst_11 [1] : vector<8x512xf32> to vector<8xf32>
    %11 = vector.shape_cast %10 : vector<8xf32> to vector<8x1xf32>
    %cst_12 = arith.constant 5.120000e+02 : f32
    %12 = vector.broadcast %cst_12 : f32 to vector<8x1xf32>
    %13 = arith.divf %11, %12 : vector<8x1xf32>
    %14 = vector.broadcast %13 : vector<8x1xf32> to vector<8x512xf32>
    %15 = arith.subf %7, %14 : vector<8x512xf32>
    %16 = arith.mulf %15, %15 : vector<8x512xf32>
    %cst_13 = arith.constant dense<0.000000e+00> : vector<8xf32>
    %17 = vector.multi_reduction <add>, %16, %cst_13 [1] : vector<8x512xf32> to vector<8xf32>
    %18 = vector.shape_cast %17 : vector<8xf32> to vector<8x1xf32>
    %cst_14 = arith.constant 5.120000e+02 : f32
    %19 = vector.broadcast %cst_14 : f32 to vector<8x1xf32>
    %20 = arith.divf %18, %19 : vector<8x1xf32>
    %21 = vector.broadcast %13 : vector<8x1xf32> to vector<8x512xf32>
    %22 = arith.subf %7, %21 : vector<8x512xf32>
    %cst_15 = arith.constant 9.99999974E-6 : f32
    %23 = vector.broadcast %cst_15 : f32 to vector<8x1xf32>
    %24 = arith.addf %20, %23 : vector<8x1xf32>
    %25 = math.rsqrt %24 : vector<8x1xf32>
    %26 = vector.broadcast %25 : vector<8x1xf32> to vector<8x512xf32>
    %27 = arith.mulf %22, %26 : vector<8x512xf32>
    %28 = vector.broadcast %8 : vector<1x512xf32> to vector<8x512xf32>
    %29 = arith.mulf %27, %28 : vector<8x512xf32>
    %30 = vector.broadcast %9 : vector<1x512xf32> to vector<8x512xf32>
    %31 = arith.addf %29, %30 : vector<8x512xf32>
    %c0_16 = arith.constant 0 : index
    %c0_17 = arith.constant 0 : index
    %32 = vector.load %arg7[%c0_16, %c0_17] : memref<8x512xf32, #tpu.memory_space<vmem>>, vector<8x512xf32>
    tpu.vector_store %arg7[%c0_16, %c0_17], %31 {strides = array<i32>} : memref<8x512xf32, #tpu.memory_space<vmem>>, vector<8x512xf32>,
    return
  }
  func.func @transform_0(%arg0: i32) -> (i32, i32) {
    %c0_i32 = arith.constant 0 : i32
    %c0_i32_0 = arith.constant 0 : i32
    return %arg0, %c0_i32 : i32, i32
  }
  func.func @transform_1(%arg0: i32) -> (i32, i32) {
    %c0_i32 = arith.constant 0 : i32
    %c0_i32_0 = arith.constant 0 : i32
    return %arg0, %c0_i32 : i32, i32
  }
  func.func @transform_2(%arg0: i32) -> (i32, i32) {
    %c0_i32 = arith.constant 0 : i32
    %c0_i32_0 = arith.constant 0 : i32
    return %arg0, %c0_i32 : i32, i32
  }
  func.func @transform_3(%arg0: i32) -> (i32, i32) {
    %c0_i32 = arith.constant 0 : i32
    %c0_i32_0 = arith.constant 0 : i32
    %c0_i32_1 = arith.constant 0 : i32
    return %c0_i32, %c0_i32_0 : i32, i32
  }
  func.func @transform_4(%arg0: i32) -> (i32, i32) {
    %c0_i32 = arith.constant 0 : i32
    %c0_i32_0 = arith.constant 0 : i32
    %c0_i32_1 = arith.constant 0 : i32
    return %c0_i32, %c0_i32_0 : i32, i32
  }
  func.func @transform_5(%arg0: i32) -> (i32, i32) {
    %c0_i32 = arith.constant 0 : i32
    %c0_i32_0 = arith.constant 0 : i32
    %c0_i32_1 = arith.constant 0 : i32
    return %c0_i32, %c0_i32_0 : i32, i32
  }
  func.func @transform_6(%arg0: i32) -> (i32, i32) {
    %c0_i32 = arith.constant 0 : i32
    %c0_i32_0 = arith.constant 0 : i32
    return %arg0, %c0_i32 : i32, i32
  }
}

module attributes {stable_mosaic.version = 11 : i64} {
  func.func @_lnlstm_scan_kernel(%arg0: i32, %arg1: memref<1x2x512xf32, #tpu.memory_space<vmem>>, %arg2: memref<1x2x1xf32, #tpu.memory_space<vmem>>, %arg3: memref<2x128xf32, #tpu.memory_space<vmem>>, %arg4: memref<2x128xf32, #tpu.memory_space<vmem>>, %arg5: memref<128x512xbf16, #tpu.memory_space<vmem>>, %arg6: memref<1x512xf32, #tpu.memory_space<vmem>>, %arg7: memref<1x512xf32, #tpu.memory_space<vmem>>, %arg8: memref<1x512xf32, #tpu.memory_space<vmem>>, %arg9: memref<1x128xf32, #tpu.memory_space<vmem>>, %arg10: memref<1x128xf32, #tpu.memory_space<vmem>>, %arg11: memref<1x2x128xf32, #tpu.memory_space<vmem>>, %arg12: memref<2x128xf32, #tpu.memory_space<vmem>>, %arg13: memref<2x128xf32, #tpu.memory_space<vmem>>, %arg14: memref<2x128xf32, #tpu.memory_space<vmem>>, %arg15: memref<2x128xf32, #tpu.memory_space<vmem>>) attributes {dimension_semantics = [#tpu.dimension_semantics<arbitrary>], iteration_bounds = array<i64: 4>, scalar_prefetch = 0 : i64, scratch_operands = 2 : i64, tpu.core_type = #tpu.core_type<tc>, window_params = [{transform_indices = @transform_0, window_bounds = array<i64: 1, 2, 512>}, {transform_indices = @transform_1, window_bounds = array<i64: 1, 2, 1>}, {pipeline_mode = #tpu.pipeline_mode<synchronous>, transform_indices = @transform_2, window_bounds = array<i64: 2, 128>}, {pipeline_mode = #tpu.pipeline_mode<synchronous>, transform_indices = @transform_3, window_bounds = array<i64: 2, 128>}, {pipeline_mode = #tpu.pipeline_mode<synchronous>, transform_indices = @transform_4, window_bounds = array<i64: 128, 512>}, {pipeline_mode = #tpu.pipeline_mode<synchronous>, transform_indices = @transform_5, window_bounds = array<i64: 1, 512>}, {pipeline_mode = #tpu.pipeline_mode<synchronous>, transform_indices = @transform_6, window_bounds = array<i64: 1, 512>}, {pipeline_mode = #tpu.pipeline_mode<synchronous>, transform_indices = @transform_7, window_bounds = array<i64: 1, 512>}, {pipeline_mode = #tpu.pipeline_mode<synchronous>, transform_indices = @transform_8, window_bounds = array<i64: 1, 128>}, {pipeline_mode = #tpu.pipeline_mode<synchronous>, transform_indices = @transform_9, window_bounds = array<i64: 1, 128>}, {transform_indices = @transform_10, window_bounds = array<i64: 1, 2, 128>}, {pipeline_mode = #tpu.pipeline_mode<synchronous>, transform_indices = @transform_11, window_bounds = array<i64: 2, 128>}, {pipeline_mode = #tpu.pipeline_mode<synchronous>, transform_indices = @transform_12, window_bounds = array<i64: 2, 128>}]} {
    %c0_i32 = arith.constant 0 : i32
    %0 = arith.cmpi eq, %arg0, %c0_i32 : i32
    %1 = arith.extui %0 : i1 to i32
    %c0_i32_0 = arith.constant 0 : i32
    %2 = arith.cmpi ne, %1, %c0_i32_0 : i32
    scf.if %2 {
      %c0_46 = arith.constant 0 : index
      %c0_47 = arith.constant 0 : index
      %100 = vector.load %arg3[%c0_46, %c0_47] : memref<2x128xf32, #tpu.memory_space<vmem>>, vector<2x128xf32>
      %c0_48 = arith.constant 0 : index
      %c0_49 = arith.constant 0 : index
      %101 = vector.load %arg14[%c0_48, %c0_49] : memref<2x128xf32, #tpu.memory_space<vmem>>, vector<2x128xf32>
      tpu.vector_store %arg14[%c0_48, %c0_49], %100 {strides = array<i32>} : memref<2x128xf32, #tpu.memory_space<vmem>>, vector<2x128xf32>,
      %c0_50 = arith.constant 0 : index
      %c0_51 = arith.constant 0 : index
      %102 = vector.load %arg4[%c0_50, %c0_51] : memref<2x128xf32, #tpu.memory_space<vmem>>, vector<2x128xf32>
      %c0_52 = arith.constant 0 : index
      %c0_53 = arith.constant 0 : index
      %103 = vector.load %arg15[%c0_52, %c0_53] : memref<2x128xf32, #tpu.memory_space<vmem>>, vector<2x128xf32>
      tpu.vector_store %arg15[%c0_52, %c0_53], %102 {strides = array<i32>} : memref<2x128xf32, #tpu.memory_space<vmem>>, vector<2x128xf32>,
    } else {
    }
    %c0 = arith.constant 0 : index
    %c0_1 = arith.constant 0 : index
    %c0_2 = arith.constant 0 : index
    %3 = vector.load %arg2[%c0, %c0_1, %c0_2] : memref<1x2x1xf32, #tpu.memory_space<vmem>>, vector<1x2x1xf32>
    %4 = vector.shape_cast %3 : vector<1x2x1xf32> to vector<2x1xf32>
    %c0_3 = arith.constant 0 : index
    %c0_4 = arith.constant 0 : index
    %5 = vector.load %arg14[%c0_3, %c0_4] : memref<2x128xf32, #tpu.memory_space<vmem>>, vector<2x128xf32>
    %6 = vector.broadcast %4 : vector<2x1xf32> to vector<2x128xf32>
    %7 = arith.mulf %5, %6 : vector<2x128xf32>
    %c0_5 = arith.constant 0 : index
    %c0_6 = arith.constant 0 : index
    %8 = vector.load %arg15[%c0_5, %c0_6] : memref<2x128xf32, #tpu.memory_space<vmem>>, vector<2x128xf32>
    %9 = vector.broadcast %4 : vector<2x1xf32> to vector<2x128xf32>
    %10 = arith.mulf %8, %9 : vector<2x128xf32>
    %11 = arith.truncf %7 : vector<2x128xf32> to vector<2x128xbf16>
    %c0_7 = arith.constant 0 : index
    %c0_8 = arith.constant 0 : index
    %12 = vector.load %arg5[%c0_7, %c0_8] : memref<128x512xbf16, #tpu.memory_space<vmem>>, vector<128x512xbf16>
    %cst = arith.constant dense<0.000000e+00> : vector<2x512xf32>
    %13 = tpu.matmul %11, %12, %cst {dimension_numbers = #tpu.dot_dimension_numbers<[1], [0], [0], [1], [0, 0, 1, 1], [], []>} : vector<2x128xbf16>, vector<128x512xbf16>, vector<2x512xf32> -> vector<2x512xf32>
    %c0_9 = arith.constant 0 : index
    %c0_10 = arith.constant 0 : index
    %c0_11 = arith.constant 0 : index
    %14 = vector.load %arg1[%c0_9, %c0_10, %c0_11] : memref<1x2x512xf32, #tpu.memory_space<vmem>>, vector<1x2x512xf32>
    %15 = vector.shape_cast %14 : vector<1x2x512xf32> to vector<2x512xf32>
    %c0_12 = arith.constant 0 : index
    %c0_13 = arith.constant 0 : index
    %16 = vector.load %arg7[%c0_12, %c0_13] : memref<1x512xf32, #tpu.memory_space<vmem>>, vector<1x512xf32>
    %c0_14 = arith.constant 0 : index
    %c0_15 = arith.constant 0 : index
    %17 = vector.load %arg8[%c0_14, %c0_15] : memref<1x512xf32, #tpu.memory_space<vmem>>, vector<1x512xf32>
    %cst_16 = arith.constant dense<0.000000e+00> : vector<2xf32>
    %18 = vector.multi_reduction <add>, %13, %cst_16 [1] : vector<2x512xf32> to vector<2xf32>
    %19 = vector.shape_cast %18 : vector<2xf32> to vector<2x1xf32>
    %cst_17 = arith.constant 5.120000e+02 : f32
    %20 = vector.broadcast %cst_17 : f32 to vector<2x1xf32>
    %21 = arith.divf %19, %20 : vector<2x1xf32>
    %22 = vector.broadcast %21 : vector<2x1xf32> to vector<2x512xf32>
    %23 = arith.subf %13, %22 : vector<2x512xf32>
    %24 = arith.mulf %23, %23 : vector<2x512xf32>
    %cst_18 = arith.constant dense<0.000000e+00> : vector<2xf32>
    %25 = vector.multi_reduction <add>, %24, %cst_18 [1] : vector<2x512xf32> to vector<2xf32>
    %26 = vector.shape_cast %25 : vector<2xf32> to vector<2x1xf32>
    %cst_19 = arith.constant 5.120000e+02 : f32
    %27 = vector.broadcast %cst_19 : f32 to vector<2x1xf32>
    %28 = arith.divf %26, %27 : vector<2x1xf32>
    %29 = vector.broadcast %21 : vector<2x1xf32> to vector<2x512xf32>
    %30 = arith.subf %13, %29 : vector<2x512xf32>
    %cst_20 = arith.constant 9.99999974E-6 : f32
    %31 = vector.broadcast %cst_20 : f32 to vector<2x1xf32>
    %32 = arith.addf %28, %31 : vector<2x1xf32>
    %33 = math.rsqrt %32 : vector<2x1xf32>
    %34 = vector.broadcast %33 : vector<2x1xf32> to vector<2x512xf32>
    %35 = arith.mulf %30, %34 : vector<2x512xf32>
    %36 = vector.broadcast %16 : vector<1x512xf32> to vector<2x512xf32>
    %37 = arith.mulf %35, %36 : vector<2x512xf32>
    %38 = vector.broadcast %17 : vector<1x512xf32> to vector<2x512xf32>
    %39 = arith.addf %37, %38 : vector<2x512xf32>
    %40 = arith.addf %15, %39 : vector<2x512xf32>
    %c0_21 = arith.constant 0 : index
    %c0_22 = arith.constant 0 : index
    %41 = vector.load %arg6[%c0_21, %c0_22] : memref<1x512xf32, #tpu.memory_space<vmem>>, vector<1x512xf32>
    %42 = vector.broadcast %41 : vector<1x512xf32> to vector<2x512xf32>
    %43 = arith.addf %40, %42 : vector<2x512xf32>
    %44 = vector.extract_strided_slice %43 {offsets = [0, 0], sizes = [2, 128], strides = [1, 1]} : vector<2x512xf32> to vector<2x128xf32>
    %45 = arith.negf %44 : vector<2x128xf32>
    %46 = math.exp %45 : vector<2x128xf32>
    %cst_23 = arith.constant 1.000000e+00 : f32
    %47 = vector.broadcast %cst_23 : f32 to vector<2x128xf32>
    %48 = arith.addf %47, %46 : vector<2x128xf32>
    %49 = arith.divf %47, %48 : vector<2x128xf32>
    %50 = vector.extract_strided_slice %43 {offsets = [0, 128], sizes = [2, 128], strides = [1, 1]} : vector<2x512xf32> to vector<2x128xf32>
    %51 = arith.negf %50 : vector<2x128xf32>
    %52 = math.exp %51 : vector<2x128xf32>
    %cst_24 = arith.constant 1.000000e+00 : f32
    %53 = vector.broadcast %cst_24 : f32 to vector<2x128xf32>
    %54 = arith.addf %53, %52 : vector<2x128xf32>
    %55 = arith.divf %53, %54 : vector<2x128xf32>
    %56 = vector.extract_strided_slice %43 {offsets = [0, 256], sizes = [2, 128], strides = [1, 1]} : vector<2x512xf32> to vector<2x128xf32>
    %57 = math.tanh %56 : vector<2x128xf32>
    %58 = vector.extract_strided_slice %43 {offsets = [0, 384], sizes = [2, 128], strides = [1, 1]} : vector<2x512xf32> to vector<2x128xf32>
    %59 = arith.negf %58 : vector<2x128xf32>
    %60 = math.exp %59 : vector<2x128xf32>
    %cst_25 = arith.constant 1.000000e+00 : f32
    %61 = vector.broadcast %cst_25 : f32 to vector<2x128xf32>
    %62 = arith.addf %61, %60 : vector<2x128xf32>
    %63 = arith.divf %61, %62 : vector<2x128xf32>
    %64 = arith.mulf %55, %10 : vector<2x128xf32>
    %65 = arith.mulf %49, %57 : vector<2x128xf32>
    %66 = arith.addf %64, %65 : vector<2x128xf32>
    %c0_26 = arith.constant 0 : index
    %c0_27 = arith.constant 0 : index
    %67 = vector.load %arg9[%c0_26, %c0_27] : memref<1x128xf32, #tpu.memory_space<vmem>>, vector<1x128xf32>
    %c0_28 = arith.constant 0 : index
    %c0_29 = arith.constant 0 : index
    %68 = vector.load %arg10[%c0_28, %c0_29] : memref<1x128xf32, #tpu.memory_space<vmem>>, vector<1x128xf32>
    %cst_30 = arith.constant dense<0.000000e+00> : vector<2xf32>
    %69 = vector.multi_reduction <add>, %66, %cst_30 [1] : vector<2x128xf32> to vector<2xf32>
    %70 = vector.shape_cast %69 : vector<2xf32> to vector<2x1xf32>
    %cst_31 = arith.constant 1.280000e+02 : f32
    %71 = vector.broadcast %cst_31 : f32 to vector<2x1xf32>
    %72 = arith.divf %70, %71 : vector<2x1xf32>
    %73 = vector.broadcast %72 : vector<2x1xf32> to vector<2x128xf32>
    %74 = arith.subf %66, %73 : vector<2x128xf32>
    %75 = arith.mulf %74, %74 : vector<2x128xf32>
    %cst_32 = arith.constant dense<0.000000e+00> : vector<2xf32>
    %76 = vector.multi_reduction <add>, %75, %cst_32 [1] : vector<2x128xf32> to vector<2xf32>
    %77 = vector.shape_cast %76 : vector<2xf32> to vector<2x1xf32>
    %cst_33 = arith.constant 1.280000e+02 : f32
    %78 = vector.broadcast %cst_33 : f32 to vector<2x1xf32>
    %79 = arith.divf %77, %78 : vector<2x1xf32>
    %80 = vector.broadcast %72 : vector<2x1xf32> to vector<2x128xf32>
    %81 = arith.subf %66, %80 : vector<2x128xf32>
    %cst_34 = arith.constant 9.99999974E-6 : f32
    %82 = vector.broadcast %cst_34 : f32 to vector<2x1xf32>
    %83 = arith.addf %79, %82 : vector<2x1xf32>
    %84 = math.rsqrt %83 : vector<2x1xf32>
    %85 = vector.broadcast %84 : vector<2x1xf32> to vector<2x128xf32>
    %86 = arith.mulf %81, %85 : vector<2x128xf32>
    %87 = vector.broadcast %67 : vector<1x128xf32> to vector<2x128xf32>
    %88 = arith.mulf %86, %87 : vector<2x128xf32>
    %89 = vector.broadcast %68 : vector<1x128xf32> to vector<2x128xf32>
    %90 = arith.addf %88, %89 : vector<2x128xf32>
    %91 = math.tanh %90 : vector<2x128xf32>
    %92 = arith.mulf %63, %91 : vector<2x128xf32>
    %c0_35 = arith.constant 0 : index
    %c0_36 = arith.constant 0 : index
    %93 = vector.load %arg14[%c0_35, %c0_36] : memref<2x128xf32, #tpu.memory_space<vmem>>, vector<2x128xf32>
    tpu.vector_store %arg14[%c0_35, %c0_36], %92 {strides = array<i32>} : memref<2x128xf32, #tpu.memory_space<vmem>>, vector<2x128xf32>,
    %c0_37 = arith.constant 0 : index
    %c0_38 = arith.constant 0 : index
    %94 = vector.load %arg15[%c0_37, %c0_38] : memref<2x128xf32, #tpu.memory_space<vmem>>, vector<2x128xf32>
    tpu.vector_store %arg15[%c0_37, %c0_38], %66 {strides = array<i32>} : memref<2x128xf32, #tpu.memory_space<vmem>>, vector<2x128xf32>,
    %c0_39 = arith.constant 0 : index
    %c0_40 = arith.constant 0 : index
    %c0_41 = arith.constant 0 : index
    %95 = vector.load %arg11[%c0_39, %c0_40, %c0_41] : memref<1x2x128xf32, #tpu.memory_space<vmem>>, vector<1x2x128xf32>
    %96 = vector.shape_cast %95 : vector<1x2x128xf32> to vector<2x128xf32>
    %97 = vector.shape_cast %92 : vector<2x128xf32> to vector<1x2x128xf32>
    tpu.vector_store %arg11[%c0_39, %c0_40, %c0_41], %97 {strides = array<i32>} : memref<1x2x128xf32, #tpu.memory_space<vmem>>, vector<1x2x128xf32>,
    %c0_42 = arith.constant 0 : index
    %c0_43 = arith.constant 0 : index
    %98 = vector.load %arg12[%c0_42, %c0_43] : memref<2x128xf32, #tpu.memory_space<vmem>>, vector<2x128xf32>
    tpu.vector_store %arg12[%c0_42, %c0_43], %92 {strides = array<i32>} : memref<2x128xf32, #tpu.memory_space<vmem>>, vector<2x128xf32>,
    %c0_44 = arith.constant 0 : index
    %c0_45 = arith.constant 0 : index
    %99 = vector.load %arg13[%c0_44, %c0_45] : memref<2x128xf32, #tpu.memory_space<vmem>>, vector<2x128xf32>
    tpu.vector_store %arg13[%c0_44, %c0_45], %66 {strides = array<i32>} : memref<2x128xf32, #tpu.memory_space<vmem>>, vector<2x128xf32>,
    return
  }
  func.func @transform_0(%arg0: i32) -> (i32, i32, i32) {
    %c0_i32 = arith.constant 0 : i32
    %c0_i32_0 = arith.constant 0 : i32
    %c0_i32_1 = arith.constant 0 : i32
    return %arg0, %c0_i32, %c0_i32_0 : i32, i32, i32
  }
  func.func @transform_1(%arg0: i32) -> (i32, i32, i32) {
    %c0_i32 = arith.constant 0 : i32
    %c0_i32_0 = arith.constant 0 : i32
    %c0_i32_1 = arith.constant 0 : i32
    return %arg0, %c0_i32, %c0_i32_0 : i32, i32, i32
  }
  func.func @transform_2(%arg0: i32) -> (i32, i32) {
    %c0_i32 = arith.constant 0 : i32
    %c0_i32_0 = arith.constant 0 : i32
    %c0_i32_1 = arith.constant 0 : i32
    return %c0_i32, %c0_i32_0 : i32, i32
  }
  func.func @transform_3(%arg0: i32) -> (i32, i32) {
    %c0_i32 = arith.constant 0 : i32
    %c0_i32_0 = arith.constant 0 : i32
    %c0_i32_1 = arith.constant 0 : i32
    return %c0_i32, %c0_i32_0 : i32, i32
  }
  func.func @transform_4(%arg0: i32) -> (i32, i32) {
    %c0_i32 = arith.constant 0 : i32
    %c0_i32_0 = arith.constant 0 : i32
    %c0_i32_1 = arith.constant 0 : i32
    return %c0_i32, %c0_i32_0 : i32, i32
  }
  func.func @transform_5(%arg0: i32) -> (i32, i32) {
    %c0_i32 = arith.constant 0 : i32
    %c0_i32_0 = arith.constant 0 : i32
    %c0_i32_1 = arith.constant 0 : i32
    return %c0_i32, %c0_i32_0 : i32, i32
  }
  func.func @transform_6(%arg0: i32) -> (i32, i32) {
    %c0_i32 = arith.constant 0 : i32
    %c0_i32_0 = arith.constant 0 : i32
    %c0_i32_1 = arith.constant 0 : i32
    return %c0_i32, %c0_i32_0 : i32, i32
  }
  func.func @transform_7(%arg0: i32) -> (i32, i32) {
    %c0_i32 = arith.constant 0 : i32
    %c0_i32_0 = arith.constant 0 : i32
    %c0_i32_1 = arith.constant 0 : i32
    return %c0_i32, %c0_i32_0 : i32, i32
  }
  func.func @transform_8(%arg0: i32) -> (i32, i32) {
    %c0_i32 = arith.constant 0 : i32
    %c0_i32_0 = arith.constant 0 : i32
    %c0_i32_1 = arith.constant 0 : i32
    return %c0_i32, %c0_i32_0 : i32, i32
  }
  func.func @transform_9(%arg0: i32) -> (i32, i32) {
    %c0_i32 = arith.constant 0 : i32
    %c0_i32_0 = arith.constant 0 : i32
    %c0_i32_1 = arith.constant 0 : i32
    return %c0_i32, %c0_i32_0 : i32, i32
  }
  func.func @transform_10(%arg0: i32) -> (i32, i32, i32) {
    %c0_i32 = arith.constant 0 : i32
    %c0_i32_0 = arith.constant 0 : i32
    %c0_i32_1 = arith.constant 0 : i32
    return %arg0, %c0_i32, %c0_i32_0 : i32, i32, i32
  }
  func.func @transform_11(%arg0: i32) -> (i32, i32) {
    %c0_i32 = arith.constant 0 : i32
    %c0_i32_0 = arith.constant 0 : i32
    %c0_i32_1 = arith.constant 0 : i32
    return %c0_i32, %c0_i32_0 : i32, i32
  }
  func.func @transform_12(%arg0: i32) -> (i32, i32) {
    %c0_i32 = arith.constant 0 : i32
    %c0_i32_0 = arith.constant 0 : i32
    %c0_i32_1 = arith.constant 0 : i32
    return %c0_i32, %c0_i32_0 : i32, i32
  }
}

</mosaic_0001>

<bundles_post_ra>
// kernel: _lambda_.16
= control target key start
LH: loop header
LB: loop body
LE: loop exit
PB: predicated region body
PF: predicated region fallthrough
CT: control target
= control target key end

     0   :  { %s1282_s12 = smov 0   ;;  %s1284_s13 = smov 0   ;;  %s1751_s0 = inlined_call_operand.vmem [shape: f32[1800,128], index: 0, kind: input, shape index: {}]   ;;  %s1752_s1 = inlined_call_operand.vmem [shape: bf16[128,32], index: 1, kind: input, shape index: {}]   ;;  %s1753_s2 = inlined_call_operand.vmem [shape: f32[1,32], index: 2, kind: input, shape index: {}]   ;;  %s1754_s3 = inlined_call_operand.vmem [shape: f32[1800,32], index: 3, kind: output, shape index: {}]  }
   0x1   :  { %s1286_s14 = smov 0  }
   0x2 LB: > { %s1295_s15 = sadd.s32 4294967295, %s1228_s14   ;;  %s1297_s16 = sadd.s32 1, %s1228_s14   ;;  %s1228_s14 = sphi %s1286_s14, %s1763_s14   ;;  %s1224_s13 = sphi %s1284_s13, %s1762_s13   ;;  %s1220_s12 = sphi %s1282_s12, %s1761_s12  }
   0x3   : > { %s85_s17 = ssub.s32 %s1228_s14, %s1297_s16  ;;  %s88_s18 = sadd.s32 1, %s1224_s13 }
   0x4   : > { %p86_p0 = scmp.eq.s32.totalorder %s85_s17, 0  ;;  %p98_p1 = scmp.ne.s32.totalorder %s1224_s13, %s1220_s12 }
   0x5   : > { %p99_p2 = scmp.eq.s32.totalorder %s1295_s15, 3  ;;  %p997_p3 = scmp.ge.s32.totalorder %s1228_s14, 1 }
   0x6   : > { %s1305_s19 = scalar_select %p86_p0, %s1224_s13, %s88_s18  }
   0x7   : > { %p1307_p4 = por %p99_p2, %p98_p1  ;;  %p146_p5 = scmp.lt.s32.totalorder %s1228_s14, 5 }
   0x9   : > { %p147_p6 = pnand %p997_p3, %p146_p5 }
   0xa   : > { %s1321_s27 = sshll.u32 (!%p147_p6), %s1295_s15, 6  ;;  %s170_s22 = sand.u32 (!%p147_p6), 1, %s1220_s12  }
   0xb   : > { %150 = sbr.rel (%p147_p6) target bundleno = 371 (0x173), region = 32  ;;  %p178_p7 = scmp.lt.s32.totalorder (!%p147_p6), %s1321_s27, 224 }
   0xc   : > { %s998_s25 = sshll.u32 (!%p147_p6), %s170_s22, 9 }
   0xd   : > { %s1417_s26 = scalar_lea.vmem (!%p147_p6), [#allocation2], %s998_s25  }
  0x10   : > { %v1057_v0 = vld [vmem:[%s1752_s1 + $0x38] sm:$0xff]  ;;  %v1056_v1 = vld [vmem:[%s1752_s1 + $0x30] sm:$0xff]  ;;  %v1055_v2 = vld [vmem:[%s1752_s1 + $0x28] sm:$0xff]  ;;  %s179_s5 = scalar_select %p178_p7, %s1321_s27, 224  ;;  %vm589_vm0 = vcmask 261120  }
  0x11   : > { %356 = vmatpush.bf16.msra.mxu0 %v1057_v0  ;;  %1061 = vmatpush.bf16.msra.mxu1 %v1057_v0  ;;  %v1054_v3 = vld [vmem:[%s1752_s1 + $0x20] sm:$0xff]  ;;  %v1053_v4 = vld [vmem:[%s1752_s1 + $0x18] sm:$0xff]  ;;  %v1052_v5 = vld [vmem:[%s1752_s1 + $0x10] sm:$0xff]  ;;  %s662_s12 = ssub.s32 (%p1307_p4), 225, %s1321_s27  ;;  %s1058_s28 = sshll.u32 (%p1307_p4), %s1295_s15, 9 }
  0x12   : > { %1062 = vmatpush.bf16.msra.mxu2 %v1057_v0  ;;  %1063 = vmatpush.bf16.msra.mxu3 %v1057_v0  ;;  %s1000_s8 = sshll.u32 %s179_s5, 3  ;;  %v1051_v6 = vld [vmem:[%s1752_s1 + $0x8] sm:$0xff]  ;;  %v1050_v7 = vld [vmem:[%s1752_s1] sm:$0xff]  ;;  %p663_p8 = scmp.lt.s32.totalorder (%p1307_p4), %s662_s12, 64 }
  0x13   : > { %s1340_s17 = scalar_lea.vmem %s1751_s0, %s1000_s8  ;;  %s1616_s4 = scalar_lea.vmem (%p1307_p4), %s1754_s3, %s1058_s28  }
  0x14   : > { %v192_v8 = vld [vmem:[%s1340_s17] sm:$0xff]  ;;  %v193_v9 = vld [vmem:[%s1340_s17 + $0x8] sm:$0xff]  ;;  %v194_v20 = vld [vmem:[%s1340_s17 + $0x10] sm:$0xff] }
  0x15   : > { %357 = vmatpush.bf16.msra.mxu0 %v1056_v1  ;;  %1064 = vmatpush.bf16.msra.mxu1 %v1056_v1  ;;  %v208_v10 = vld [vmem:[%s1340_s17 + $0x80] sm:$0xff]  ;;  %v209_v11 = vld [vmem:[%s1340_s17 + $0x88] sm:$0xff]  ;;  %v256_v16 = vpack.c.bf16 %v193_v9, %v192_v8  ;;  %v195_v21 = vld [vmem:[%s1340_s17 + $0x18] sm:$0xff] }
  0x16   : > { %1065 = vmatpush.bf16.msra.mxu2 %v1056_v1  ;;  %1066 = vmatpush.bf16.msra.mxu3 %v1056_v1  ;;  %v224_v12 = vld [vmem:[%s1340_s17 + $0x100] sm:$0xff]  ;;  %v225_v13 = vld [vmem:[%s1340_s17 + $0x108] sm:$0xff]  ;;  %v264_v17 = vpack.c.bf16 %v209_v11, %v208_v10  ;;  %v210_v22 = vld [vmem:[%s1340_s17 + $0x90] sm:$0xff]  ;;  %v257_v28 = vpack.c.bf16 %v195_v21, %v194_v20 }
  0x17   : > { %v240_v14 = vld [vmem:[%s1340_s17 + $0x180] sm:$0xff]  ;;  %v241_v15 = vld [vmem:[%s1340_s17 + $0x188] sm:$0xff]  ;;  %v272_v18 = vpack.c.bf16 %v225_v13, %v224_v12  ;;  %v211_v23 = vld [vmem:[%s1340_s17 + $0x98] sm:$0xff] }
  0x18   : > { %v280_v19 = vpack.c.bf16 %v241_v15, %v240_v14  ;;  %v226_v24 = vld [vmem:[%s1340_s17 + $0x110] sm:$0xff]  ;;  %v227_v25 = vld [vmem:[%s1340_s17 + $0x118] sm:$0xff]  ;;  %v265_v29 = vpack.c.bf16 %v211_v23, %v210_v22  ;;  %v196_v32 = vld [vmem:[%s1340_s17 + $0x20] sm:$0xff] }
  0x19   : > { %358 = vmatpush.bf16.msra.mxu0 %v1055_v2  ;;  %1067 = vmatpush.bf16.msra.mxu1 %v1055_v2  ;;  %v242_v26 = vld [vmem:[%s1340_s17 + $0x190] sm:$0xff]  ;;  %v243_v27 = vld [vmem:[%s1340_s17 + $0x198] sm:$0xff]  ;;  %v273_v30 = vpack.c.bf16 %v227_v25, %v226_v24  ;;  %v197_v33 = vld [vmem:[%s1340_s17 + $0x28] sm:$0xff] }
  0x1a   : > { %1068 = vmatpush.bf16.msra.mxu2 %v1055_v2  ;;  %1069 = vmatpush.bf16.msra.mxu3 %v1055_v2  ;;  %v281_v31 = vpack.c.bf16 %v243_v27, %v242_v26  ;;  %v212_v34 = vld [vmem:[%s1340_s17 + $0xa0] sm:$0xff]  ;;  %v213_v35 = vld [vmem:[%s1340_s17 + $0xa8] sm:$0xff]  ;;  %v258_v40 = vpack.c.bf16 %v197_v33, %v196_v32  ;;  %v198_v44 = vld [vmem:[%s1340_s17 + $0x30] sm:$0xff] }
  0x1b   : > { %v228_v36 = vld [vmem:[%s1340_s17 + $0x120] sm:$0xff]  ;;  %v229_v37 = vld [vmem:[%s1340_s17 + $0x128] sm:$0xff]  ;;  %v266_v41 = vpack.c.bf16 %v213_v35, %v212_v34  ;;  %v199_v45 = vld [vmem:[%s1340_s17 + $0x38] sm:$0xff] }
  0x1c   : > { %v244_v38 = vld [vmem:[%s1340_s17 + $0x1a0] sm:$0xff]  ;;  %v245_v39 = vld [vmem:[%s1340_s17 + $0x1a8] sm:$0xff]  ;;  %v274_v42 = vpack.c.bf16 %v229_v37, %v228_v36  ;;  %v214_v46 = vld [vmem:[%s1340_s17 + $0xb0] sm:$0xff]  ;;  %v259_v52 = vpack.c.bf16 %v199_v45, %v198_v44 }
  0x1d   : > { %359 = vmatpush.bf16.msra.mxu0 %v1054_v3  ;;  %1070 = vmatpush.bf16.msra.mxu1 %v1054_v3  ;;  %v282_v43 = vpack.c.bf16 %v245_v39, %v244_v38  ;;  %v215_v47 = vld [vmem:[%s1340_s17 + $0xb8] sm:$0xff]  ;;  %v230_v48 = vld [vmem:[%s1340_s17 + $0x130] sm:$0xff]  ;;  %v200_v56 = vld [vmem:[%s1340_s17 + $0x40] sm:$0xff] }
  0x1e   : > { %1071 = vmatpush.bf16.msra.mxu2 %v1054_v3  ;;  %1072 = vmatpush.bf16.msra.mxu3 %v1054_v3  ;;  %v231_v49 = vld [vmem:[%s1340_s17 + $0x138] sm:$0xff]  ;;  %v246_v50 = vld [vmem:[%s1340_s17 + $0x1b0] sm:$0xff]  ;;  %v267_v53 = vpack.c.bf16 %v215_v47, %v214_v46  ;;  %v201_v57 = vld [vmem:[%s1340_s17 + $0x48] sm:$0xff] }
  0x1f   : > { %v247_v51 = vld [vmem:[%s1340_s17 + $0x1b8] sm:$0xff]  ;;  %v275_v54 = vpack.c.bf16 %v231_v49, %v230_v48  ;;  %v216_v58 = vld [vmem:[%s1340_s17 + $0xc0] sm:$0xff]  ;;  %v217_v59 = vld [vmem:[%s1340_s17 + $0xc8] sm:$0xff]  ;;  %v260_v0 = vpack.c.bf16 %v201_v57, %v200_v56 }
  0x20   : > { %v283_v55 = vpack.c.bf16 %v247_v51, %v246_v50  ;;  %v232_v60 = vld [vmem:[%s1340_s17 + $0x140] sm:$0xff]  ;;  %v233_v61 = vld [vmem:[%s1340_s17 + $0x148] sm:$0xff]  ;;  %v268_v1 = vpack.c.bf16 %v217_v59, %v216_v58  ;;  %v234_v8 = vld [vmem:[%s1340_s17 + $0x150] sm:$0xff] }
  0x21   : > { %360 = vmatpush.bf16.msra.mxu0 %v1053_v4  ;;  %1073 = vmatpush.bf16.msra.mxu1 %v1053_v4  ;;  %v248_v62 = vld [vmem:[%s1340_s17 + $0x1c0] sm:$0xff]  ;;  %v249_v63 = vld [vmem:[%s1340_s17 + $0x1c8] sm:$0xff]  ;;  %v276_v2 = vpack.c.bf16 %v233_v61, %v232_v60  ;;  %v235_v9 = vld [vmem:[%s1340_s17 + $0x158] sm:$0xff] }
  0x22   : > { %1074 = vmatpush.bf16.msra.mxu2 %v1053_v4  ;;  %1075 = vmatpush.bf16.msra.mxu3 %v1053_v4  ;;  %v284_v3 = vpack.c.bf16 %v249_v63, %v248_v62  ;;  %v202_v4 = vld [vmem:[%s1340_s17 + $0x50] sm:$0xff]  ;;  %v251_v11 = vld [vmem:[%s1340_s17 + $0x1d8] sm:$0xff]  ;;  %v277_v14 = vpack.c.bf16 %v235_v9, %v234_v8  ;;  %v236_v20 = vld [vmem:[%s1340_s17 + $0x160] sm:$0xff] }
  0x23   : > { %v250_v10 = vld [vmem:[%s1340_s17 + $0x1d0] sm:$0xff]  ;;  %v237_v21 = vld [vmem:[%s1340_s17 + $0x168] sm:$0xff]  ;;  %v252_v22 = vld [vmem:[%s1340_s17 + $0x1e0] sm:$0xff] }
  0x24   : > { %v285_v15 = vpack.c.bf16 %v251_v11, %v250_v10  ;;  %v253_v23 = vld [vmem:[%s1340_s17 + $0x1e8] sm:$0xff]  ;;  %v278_v26 = vpack.c.bf16 %v237_v21, %v236_v20  ;;  %v238_v32 = vld [vmem:[%s1340_s17 + $0x170] sm:$0xff]  ;;  %v239_v33 = vld [vmem:[%s1340_s17 + $0x178] sm:$0xff] }
  0x25   : > { %361 = vmatpush.bf16.msra.mxu0 %v1052_v5  ;;  %1076 = vmatpush.bf16.msra.mxu1 %v1052_v5  ;;  %v286_v27 = vpack.c.bf16 %v253_v23, %v252_v22  ;;  %v254_v34 = vld [vmem:[%s1340_s17 + $0x1f0] sm:$0xff]  ;;  %v255_v35 = vld [vmem:[%s1340_s17 + $0x1f8] sm:$0xff]  ;;  %v279_v38 = vpack.c.bf16 %v239_v33, %v238_v32 }
  0x26   : > { %1077 = vmatpush.bf16.msra.mxu2 %v1052_v5  ;;  %1078 = vmatpush.bf16.msra.mxu3 %v1052_v5  ;;  %v203_v5 = vld [vmem:[%s1340_s17 + $0x58] sm:$0xff]  ;;  %v287_v39 = vpack.c.bf16 %v255_v35, %v254_v34 }
  0x27   : > { %v261_v12 = vpack.c.bf16 %v203_v5, %v202_v4 }
  0x29   : > { %362 = vmatpush.bf16.msra.mxu0 %v1051_v6  ;;  %1079 = vmatpush.bf16.msra.mxu1 %v1051_v6 }
  0x2a   : > { %1080 = vmatpush.bf16.msra.mxu2 %v1051_v6  ;;  %1081 = vmatpush.bf16.msra.mxu3 %v1051_v6  ;;  %v218_v6 = vld [vmem:[%s1340_s17 + $0xd0] sm:$0xff] }
  0x2d   : > { %363 = vmatpush.bf16.msra.mxu0 %v1050_v7  ;;  %1082 = vmatpush.bf16.msra.mxu1 %v1050_v7 }
  0x2e   : > { %1083 = vmatpush.bf16.msra.mxu2 %v1050_v7  ;;  %1084 = vmatpush.bf16.msra.mxu3 %v1050_v7  ;;  %v219_v7 = vld [vmem:[%s1340_s17 + $0xd8] sm:$0xff] }
  0x2f   : > { %v269_v13 = vpack.c.bf16 %v219_v7, %v218_v6 }
  0x30   : > { %364 = vmatmul.bf16.vlgmr.msra.gmra.mxu0 %v256_v16  ;;  %404 = vmatmul.bf16.vlgmr.msra.gmra.mxu1 %v264_v17  ;;  %v204_v16 = vld [vmem:[%s1340_s17 + $0x60] sm:$0xff]  ;;  %v205_v17 = vld [vmem:[%s1340_s17 + $0x68] sm:$0xff] }
  0x31   : > { %444 = vmatmul.bf16.vlgmr.msra.gmra.mxu2 %v272_v18  ;;  %484 = vmatmul.bf16.vlgmr.msra.gmra.mxu3 %v280_v19  ;;  %v220_v18 = vld [vmem:[%s1340_s17 + $0xe0] sm:$0xff]  ;;  %v221_v19 = vld [vmem:[%s1340_s17 + $0xe8] sm:$0xff]  ;;  %v262_v24 = vpack.c.bf16 %v205_v17, %v204_v16 }
  0x32   : > { %v270_v25 = vpack.c.bf16 %v221_v19, %v220_v18 }
  0x40   : > { %369 = vmatmul.bf16.gmra.mxu0 %v257_v28  ;;  %409 = vmatmul.bf16.gmra.mxu1 %v265_v29  ;;  %v206_v28 = vld [vmem:[%s1340_s17 + $0x70] sm:$0xff]  ;;  %v207_v29 = vld [vmem:[%s1340_s17 + $0x78] sm:$0xff] }
  0x41   : > { %449 = vmatmul.bf16.gmra.mxu2 %v273_v30  ;;  %489 = vmatmul.bf16.gmra.mxu3 %v281_v31  ;;  %v222_v30 = vld [vmem:[%s1340_s17 + $0xf0] sm:$0xff]  ;;  %v223_v31 = vld [vmem:[%s1340_s17 + $0xf8] sm:$0xff]  ;;  %v263_v36 = vpack.c.bf16 %v207_v29, %v206_v28 }
  0x42   : > { %v271_v37 = vpack.c.bf16 %v223_v31, %v222_v30 }
  0x50   : > { %374 = vmatmul.bf16.gmra.mxu0 %v258_v40  ;;  %414 = vmatmul.bf16.gmra.mxu1 %v266_v41  ;;  %v1413_v40 = vld [vmem:[%s1753_s2] ss:$0 sm:$0xff] }
  0x51   : > { %454 = vmatmul.bf16.gmra.mxu2 %v274_v42  ;;  %494 = vmatmul.bf16.gmra.mxu3 %v282_v43 }
  0x60   : > { %379 = vmatmul.bf16.gmra.mxu0 %v259_v52  ;;  %419 = vmatmul.bf16.gmra.mxu1 %v267_v53 }
  0x61   : > { %459 = vmatmul.bf16.gmra.mxu2 %v275_v54  ;;  %499 = vmatmul.bf16.gmra.mxu3 %v283_v55 }
  0x70   : > { %384 = vmatmul.bf16.gmra.mxu0 %v260_v0  ;;  %424 = vmatmul.bf16.gmra.mxu1 %v268_v1 }
  0x71   : > { %464 = vmatmul.bf16.gmra.mxu2 %v276_v2  ;;  %504 = vmatmul.bf16.gmra.mxu3 %v284_v3 }
  0x80   : > { %389 = vmatmul.bf16.gmra.mxu0 %v261_v12  ;;  %429 = vmatmul.bf16.gmra.mxu1 %v269_v13 }
  0x81   : > { %469 = vmatmul.bf16.gmra.mxu2 %v277_v14  ;;  %509 = vmatmul.bf16.gmra.mxu3 %v285_v15 }
  0x90   : > { %394 = vmatmul.bf16.gmra.mxu0 %v262_v24  ;;  %434 = vmatmul.bf16.gmra.mxu1 %v270_v25 }
  0x91   : > { %474 = vmatmul.bf16.gmra.mxu2 %v278_v26  ;;  %514 = vmatmul.bf16.gmra.mxu3 %v286_v27 }
  0xa0   : > { %399 = vmatmul.bf16.gmra.mxu0 %v263_v36  ;;  %439 = vmatmul.bf16.gmra.mxu1 %v271_v37 }
  0xa1   : > { %479 = vmatmul.bf16.gmra.mxu2 %v279_v38  ;;  %519 = vmatmul.bf16.gmra.mxu3 %v287_v39 }
  0xad   : > { %v365_v41 = vpop.f32.mrf.mxu0  ;;  %v405_v42 = vpop.f32.mrf.mxu1 }
  0xae   : > { %v366_v43 = vadd.f32 %v1413_v40, %v365_v41  ;;  %v406_v44 = vadd.f32 %v1413_v40, %v405_v42 }
  0xb0   : > { %v525_v45 = vmax.f32 %v366_v43, 0.0  ;;  %v541_v46 = vmax.f32 %v406_v44, 0.0 }
  0xb2   : > { %590 = vst.msk [vmem:[%s1417_s26] sm:$0xff] %vm589_vm0, %v525_v45 }
  0xb3   : > { %606 = vst.msk [vmem:[%s1417_s26 + $0x80] sm:$0xff] %vm589_vm0, %v541_v46 }
  0xb4   : > { %v445_v47 = vpop.f32.mrf.mxu2  ;;  %v485_v48 = vpop.f32.mrf.mxu3 }
  0xb5   : > { %v446_v49 = vadd.f32 %v1413_v40, %v445_v47  ;;  %v486_v50 = vadd.f32 %v1413_v40, %v485_v48  ;;  %v367_v51 = vpop.f32.mrf.mxu0  ;;  %v407_v52 = vpop.f32.mrf.mxu1 }
  0xb6   : > { %v368_v53 = vadd.f32 %v1413_v40, %v367_v51  ;;  %v408_v54 = vadd.f32 %v1413_v40, %v407_v52 }
  0xb7   : > { %v557_v55 = vmax.f32 %v446_v49, 0.0  ;;  %v573_v56 = vmax.f32 %v486_v50, 0.0 }
  0xb8   : > { %v526_v57 = vmax.f32 %v368_v53, 0.0  ;;  %v542_v58 = vmax.f32 %v408_v54, 0.0 }
  0xb9   : > { %622 = vst.msk [vmem:[%s1417_s26 + $0x100] sm:$0xff] %vm589_vm0, %v557_v55 }
  0xba   : > { %638 = vst.msk [vmem:[%s1417_s26 + $0x180] sm:$0xff] %vm589_vm0, %v573_v56 }
  0xbb   : > { %591 = vst.msk [vmem:[%s1417_s26 + $0x8] sm:$0xff] %vm589_vm0, %v526_v57 }
  0xbc   : > { %607 = vst.msk [vmem:[%s1417_s26 + $0x88] sm:$0xff] %vm589_vm0, %v542_v58  ;;  %v447_v59 = vpop.f32.mrf.mxu2  ;;  %v487_v60 = vpop.f32.mrf.mxu3 }
  0xbd   : > { %v448_v61 = vadd.f32 %v1413_v40, %v447_v59  ;;  %v488_v62 = vadd.f32 %v1413_v40, %v487_v60  ;;  %v370_v63 = vpop.f32.mrf.mxu0  ;;  %v410_v0 = vpop.f32.mrf.mxu1 }
  0xbe   : > { %v371_v1 = vadd.f32 %v1413_v40, %v370_v63  ;;  %v411_v2 = vadd.f32 %v1413_v40, %v410_v0 }
  0xbf   : > { %v558_v3 = vmax.f32 %v448_v61, 0.0  ;;  %v574_v4 = vmax.f32 %v488_v62, 0.0 }
  0xc0   : > { %v527_v5 = vmax.f32 %v371_v1, 0.0  ;;  %v543_v6 = vmax.f32 %v411_v2, 0.0 }
  0xc1   : > { %623 = vst.msk [vmem:[%s1417_s26 + $0x108] sm:$0xff] %vm589_vm0, %v558_v3 }
  0xc2   : > { %639 = vst.msk [vmem:[%s1417_s26 + $0x188] sm:$0xff] %vm589_vm0, %v574_v4 }
  0xc3   : > { %592 = vst.msk [vmem:[%s1417_s26 + $0x10] sm:$0xff] %vm589_vm0, %v527_v5 }
  0xc4   : > { %608 = vst.msk [vmem:[%s1417_s26 + $0x90] sm:$0xff] %vm589_vm0, %v543_v6  ;;  %v450_v7 = vpop.f32.mrf.mxu2  ;;  %v490_v8 = vpop.f32.mrf.mxu3 }
  0xc5   : > { %v451_v9 = vadd.f32 %v1413_v40, %v450_v7  ;;  %v491_v10 = vadd.f32 %v1413_v40, %v490_v8  ;;  %v372_v11 = vpop.f32.mrf.mxu0  ;;  %v412_v12 = vpop.f32.mrf.mxu1 }
  0xc6   : > { %v373_v13 = vadd.f32 %v1413_v40, %v372_v11  ;;  %v413_v14 = vadd.f32 %v1413_v40, %v412_v12 }
  0xc7   : > { %v559_v15 = vmax.f32 %v451_v9, 0.0  ;;  %v575_v16 = vmax.f32 %v491_v10, 0.0 }
  0xc8   : > { %v528_v17 = vmax.f32 %v373_v13, 0.0  ;;  %v544_v18 = vmax.f32 %v413_v14, 0.0 }
  0xc9   : > { %624 = vst.msk [vmem:[%s1417_s26 + $0x110] sm:$0xff] %vm589_vm0, %v559_v15 }
  0xca   : > { %640 = vst.msk [vmem:[%s1417_s26 + $0x190] sm:$0xff] %vm589_vm0, %v575_v16 }
  0xcb   : > { %593 = vst.msk [vmem:[%s1417_s26 + $0x18] sm:$0xff] %vm589_vm0, %v528_v17 }
  0xcc   : > { %609 = vst.msk [vmem:[%s1417_s26 + $0x98] sm:$0xff] %vm589_vm0, %v544_v18  ;;  %v452_v19 = vpop.f32.mrf.mxu2  ;;  %v492_v20 = vpop.f32.mrf.mxu3 }
  0xcd   : > { %v453_v21 = vadd.f32 %v1413_v40, %v452_v19  ;;  %v493_v22 = vadd.f32 %v1413_v40, %v492_v20  ;;  %v375_v23 = vpop.f32.mrf.mxu0  ;;  %v415_v24 = vpop.f32.mrf.mxu1 }
  0xce   : > { %v376_v25 = vadd.f32 %v1413_v40, %v375_v23  ;;  %v416_v26 = vadd.f32 %v1413_v40, %v415_v24 }
  0xcf   : > { %v560_v27 = vmax.f32 %v453_v21, 0.0  ;;  %v576_v28 = vmax.f32 %v493_v22, 0.0 }
  0xd0   : > { %v529_v29 = vmax.f32 %v376_v25, 0.0  ;;  %v545_v30 = vmax.f32 %v416_v26, 0.0 }
  0xd1   : > { %625 = vst.msk [vmem:[%s1417_s26 + $0x118] sm:$0xff] %vm589_vm0, %v560_v27 }
  0xd2   : > { %641 = vst.msk [vmem:[%s1417_s26 + $0x198] sm:$0xff] %vm589_vm0, %v576_v28 }
  0xd3   : > { %594 = vst.msk [vmem:[%s1417_s26 + $0x20] sm:$0xff] %vm589_vm0, %v529_v29 }
  0xd4   : > { %610 = vst.msk [vmem:[%s1417_s26 + $0xa0] sm:$0xff] %vm589_vm0, %v545_v30  ;;  %v455_v31 = vpop.f32.mrf.mxu2  ;;  %v495_v32 = vpop.f32.mrf.mxu3 }
  0xd5   : > { %v456_v33 = vadd.f32 %v1413_v40, %v455_v31  ;;  %v496_v34 = vadd.f32 %v1413_v40, %v495_v32  ;;  %v377_v35 = vpop.f32.mrf.mxu0  ;;  %v417_v36 = vpop.f32.mrf.mxu1 }
  0xd6   : > { %v378_v37 = vadd.f32 %v1413_v40, %v377_v35  ;;  %v418_v38 = vadd.f32 %v1413_v40, %v417_v36 }
  0xd7   : > { %v561_v39 = vmax.f32 %v456_v33, 0.0  ;;  %v577_v41 = vmax.f32 %v496_v34, 0.0 }
  0xd8   : > { %v530_v42 = vmax.f32 %v378_v37, 0.0  ;;  %v546_v43 = vmax.f32 %v418_v38, 0.0 }
  0xd9   : > { %626 = vst.msk [vmem:[%s1417_s26 + $0x120] sm:$0xff] %vm589_vm0, %v561_v39 }
  0xda   : > { %642 = vst.msk [vmem:[%s1417_s26 + $0x1a0] sm:$0xff] %vm589_vm0, %v577_v41 }
  0xdb   : > { %595 = vst.msk [vmem:[%s1417_s26 + $0x28] sm:$0xff] %vm589_vm0, %v530_v42 }
  0xdc   : > { %611 = vst.msk [vmem:[%s1417_s26 + $0xa8] sm:$0xff] %vm589_vm0, %v546_v43  ;;  %v457_v44 = vpop.f32.mrf.mxu2  ;;  %v497_v45 = vpop.f32.mrf.mxu3 }
  0xdd   : > { %v458_v46 = vadd.f32 %v1413_v40, %v457_v44  ;;  %v498_v47 = vadd.f32 %v1413_v40, %v497_v45  ;;  %v380_v48 = vpop.f32.mrf.mxu0  ;;  %v420_v49 = vpop.f32.mrf.mxu1 }
  0xde   : > { %v381_v50 = vadd.f32 %v1413_v40, %v380_v48  ;;  %v421_v51 = vadd.f32 %v1413_v40, %v420_v49 }
  0xdf   : > { %v562_v52 = vmax.f32 %v458_v46, 0.0  ;;  %v578_v53 = vmax.f32 %v498_v47, 0.0 }
  0xe0   : > { %v531_v54 = vmax.f32 %v381_v50, 0.0  ;;  %v547_v55 = vmax.f32 %v421_v51, 0.0 }
  0xe1   : > { %627 = vst.msk [vmem:[%s1417_s26 + $0x128] sm:$0xff] %vm589_vm0, %v562_v52 }
  0xe2   : > { %643 = vst.msk [vmem:[%s1417_s26 + $0x1a8] sm:$0xff] %vm589_vm0, %v578_v53 }
  0xe3   : > { %596 = vst.msk [vmem:[%s1417_s26 + $0x30] sm:$0xff] %vm589_vm0, %v531_v54 }
  0xe4   : > { %612 = vst.msk [vmem:[%s1417_s26 + $0xb0] sm:$0xff] %vm589_vm0, %v547_v55  ;;  %v460_v56 = vpop.f32.mrf.mxu2  ;;  %v500_v57 = vpop.f32.mrf.mxu3 }
  0xe5   : > { %v461_v58 = vadd.f32 %v1413_v40, %v460_v56  ;;  %v501_v59 = vadd.f32 %v1413_v40, %v500_v57  ;;  %v382_v60 = vpop.f32.mrf.mxu0  ;;  %v422_v61 = vpop.f32.mrf.mxu1 }
  0xe6   : > { %v383_v62 = vadd.f32 %v1413_v40, %v382_v60  ;;  %v423_v63 = vadd.f32 %v1413_v40, %v422_v61 }
  0xe7   : > { %v563_v0 = vmax.f32 %v461_v58, 0.0  ;;  %v579_v1 = vmax.f32 %v501_v59, 0.0 }
  0xe8   : > { %v532_v2 = vmax.f32 %v383_v62, 0.0  ;;  %v548_v3 = vmax.f32 %v423_v63, 0.0 }
  0xe9   : > { %628 = vst.msk [vmem:[%s1417_s26 + $0x130] sm:$0xff] %vm589_vm0, %v563_v0 }
  0xea   : > { %644 = vst.msk [vmem:[%s1417_s26 + $0x1b0] sm:$0xff] %vm589_vm0, %v579_v1 }
  0xeb   : > { %597 = vst.msk [vmem:[%s1417_s26 + $0x38] sm:$0xff] %vm589_vm0, %v532_v2 }
  0xec   : > { %613 = vst.msk [vmem:[%s1417_s26 + $0xb8] sm:$0xff] %vm589_vm0, %v548_v3  ;;  %v462_v4 = vpop.f32.mrf.mxu2  ;;  %v502_v5 = vpop.f32.mrf.mxu3 }
  0xed   : > { %v463_v6 = vadd.f32 %v1413_v40, %v462_v4  ;;  %v503_v7 = vadd.f32 %v1413_v40, %v502_v5  ;;  %v385_v8 = vpop.f32.mrf.mxu0  ;;  %v425_v9 = vpop.f32.mrf.mxu1 }
  0xee   : > { %v386_v10 = vadd.f32 %v1413_v40, %v385_v8  ;;  %v426_v11 = vadd.f32 %v1413_v40, %v425_v9 }
  0xef   : > { %v564_v12 = vmax.f32 %v463_v6, 0.0  ;;  %v580_v13 = vmax.f32 %v503_v7, 0.0 }
  0xf0   : > { %v533_v14 = vmax.f32 %v386_v10, 0.0  ;;  %v549_v15 = vmax.f32 %v426_v11, 0.0 }
  0xf1   : > { %629 = vst.msk [vmem:[%s1417_s26 + $0x138] sm:$0xff] %vm589_vm0, %v564_v12 }
  0xf2   : > { %645 = vst.msk [vmem:[%s1417_s26 + $0x1b8] sm:$0xff] %vm589_vm0, %v580_v13 }
  0xf3   : > { %598 = vst.msk [vmem:[%s1417_s26 + $0x40] sm:$0xff] %vm589_vm0, %v533_v14 }
  0xf4   : > { %614 = vst.msk [vmem:[%s1417_s26 + $0xc0] sm:$0xff] %vm589_vm0, %v549_v15  ;;  %v465_v16 = vpop.f32.mrf.mxu2  ;;  %v505_v17 = vpop.f32.mrf.mxu3 }
  0xf5   : > { %v466_v18 = vadd.f32 %v1413_v40, %v465_v16  ;;  %v506_v19 = vadd.f32 %v1413_v40, %v505_v17  ;;  %v387_v20 = vpop.f32.mrf.mxu0  ;;  %v427_v21 = vpop.f32.mrf.mxu1 }
  0xf6   : > { %v388_v22 = vadd.f32 %v1413_v40, %v387_v20  ;;  %v428_v23 = vadd.f32 %v1413_v40, %v427_v21 }
  0xf7   : > { %v565_v24 = vmax.f32 %v466_v18, 0.0  ;;  %v581_v25 = vmax.f32 %v506_v19, 0.0 }
  0xf8   : > { %v534_v26 = vmax.f32 %v388_v22, 0.0  ;;  %v550_v27 = vmax.f32 %v428_v23, 0.0 }
  0xf9   : > { %630 = vst.msk [vmem:[%s1417_s26 + $0x140] sm:$0xff] %vm589_vm0, %v565_v24 }
  0xfa   : > { %646 = vst.msk [vmem:[%s1417_s26 + $0x1c0] sm:$0xff] %vm589_vm0, %v581_v25 }
  0xfb   : > { %599 = vst.msk [vmem:[%s1417_s26 + $0x48] sm:$0xff] %vm589_vm0, %v534_v26 }
  0xfc   : > { %615 = vst.msk [vmem:[%s1417_s26 + $0xc8] sm:$0xff] %vm589_vm0, %v550_v27  ;;  %v467_v28 = vpop.f32.mrf.mxu2  ;;  %v507_v29 = vpop.f32.mrf.mxu3 }
  0xfd   : > { %v468_v30 = vadd.f32 %v1413_v40, %v467_v28  ;;  %v508_v31 = vadd.f32 %v1413_v40, %v507_v29  ;;  %v390_v32 = vpop.f32.mrf.mxu0  ;;  %v430_v33 = vpop.f32.mrf.mxu1 }
  0xfe   : > { %v391_v34 = vadd.f32 %v1413_v40, %v390_v32  ;;  %v431_v35 = vadd.f32 %v1413_v40, %v430_v33 }
  0xff   : > { %v566_v36 = vmax.f32 %v468_v30, 0.0  ;;  %v582_v37 = vmax.f32 %v508_v31, 0.0 }
 0x100   : > { %v535_v38 = vmax.f32 %v391_v34, 0.0  ;;  %v551_v39 = vmax.f32 %v431_v35, 0.0 }
 0x101   : > { %631 = vst.msk [vmem:[%s1417_s26 + $0x148] sm:$0xff] %vm589_vm0, %v566_v36 }
 0x102   : > { %647 = vst.msk [vmem:[%s1417_s26 + $0x1c8] sm:$0xff] %vm589_vm0, %v582_v37 }
 0x103   : > { %600 = vst.msk [vmem:[%s1417_s26 + $0x50] sm:$0xff] %vm589_vm0, %v535_v38 }
 0x104   : > { %616 = vst.msk [vmem:[%s1417_s26 + $0xd0] sm:$0xff] %vm589_vm0, %v551_v39  ;;  %v470_v41 = vpop.f32.mrf.mxu2  ;;  %v510_v42 = vpop.f32.mrf.mxu3 }
 0x105   : > { %v471_v43 = vadd.f32 %v1413_v40, %v470_v41  ;;  %v511_v44 = vadd.f32 %v1413_v40, %v510_v42  ;;  %v392_v45 = vpop.f32.mrf.mxu0  ;;  %v432_v46 = vpop.f32.mrf.mxu1 }
 0x106   : > { %v393_v47 = vadd.f32 %v1413_v40, %v392_v45  ;;  %v433_v48 = vadd.f32 %v1413_v40, %v432_v46 }
 0x107   : > { %v567_v49 = vmax.f32 %v471_v43, 0.0  ;;  %v583_v50 = vmax.f32 %v511_v44, 0.0 }
 0x108   : > { %v536_v51 = vmax.f32 %v393_v47, 0.0  ;;  %v552_v52 = vmax.f32 %v433_v48, 0.0 }
 0x109   : > { %632 = vst.msk [vmem:[%s1417_s26 + $0x150] sm:$0xff] %vm589_vm0, %v567_v49 }
 0x10a   : > { %648 = vst.msk [vmem:[%s1417_s26 + $0x1d0] sm:$0xff] %vm589_vm0, %v583_v50 }
 0x10b   : > { %601 = vst.msk [vmem:[%s1417_s26 + $0x58] sm:$0xff] %vm589_vm0, %v536_v51 }
 0x10c   : > { %617 = vst.msk [vmem:[%s1417_s26 + $0xd8] sm:$0xff] %vm589_vm0, %v552_v52  ;;  %v472_v53 = vpop.f32.mrf.mxu2  ;;  %v512_v54 = vpop.f32.mrf.mxu3 }
 0x10d   : > { %v473_v55 = vadd.f32 %v1413_v40, %v472_v53  ;;  %v513_v56 = vadd.f32 %v1413_v40, %v512_v54  ;;  %v395_v57 = vpop.f32.mrf.mxu0  ;;  %v435_v58 = vpop.f32.mrf.mxu1 }
 0x10e   : > { %v396_v59 = vadd.f32 %v1413_v40, %v395_v57  ;;  %v436_v60 = vadd.f32 %v1413_v40, %v435_v58 }
 0x10f   : > { %v568_v61 = vmax.f32 %v473_v55, 0.0  ;;  %v584_v62 = vmax.f32 %v513_v56, 0.0 }
 0x110   : > { %v537_v63 = vmax.f32 %v396_v59, 0.0  ;;  %v553_v0 = vmax.f32 %v436_v60, 0.0 }
 0x111   : > { %633 = vst.msk [vmem:[%s1417_s26 + $0x158] sm:$0xff] %vm589_vm0, %v568_v61 }
 0x112   : > { %649 = vst.msk [vmem:[%s1417_s26 + $0x1d8] sm:$0xff] %vm589_vm0, %v584_v62 }
 0x113   : > { %602 = vst.msk [vmem:[%s1417_s26 + $0x60] sm:$0xff] %vm589_vm0, %v537_v63 }
 0x114   : > { %618 = vst.msk [vmem:[%s1417_s26 + $0xe0] sm:$0xff] %vm589_vm0, %v553_v0  ;;  %v475_v1 = vpop.f32.mrf.mxu2  ;;  %v515_v2 = vpop.f32.mrf.mxu3 }
 0x115   : > { %v476_v3 = vadd.f32 %v1413_v40, %v475_v1  ;;  %v516_v4 = vadd.f32 %v1413_v40, %v515_v2  ;;  %v397_v5 = vpop.f32.mrf.mxu0  ;;  %v437_v6 = vpop.f32.mrf.mxu1 }
 0x116   : > { %v398_v7 = vadd.f32 %v1413_v40, %v397_v5  ;;  %v438_v8 = vadd.f32 %v1413_v40, %v437_v6 }
 0x117   : > { %v569_v9 = vmax.f32 %v476_v3, 0.0  ;;  %v585_v10 = vmax.f32 %v516_v4, 0.0 }
 0x118   : > { %v538_v11 = vmax.f32 %v398_v7, 0.0  ;;  %v554_v12 = vmax.f32 %v438_v8, 0.0 }
 0x119   : > { %634 = vst.msk [vmem:[%s1417_s26 + $0x160] sm:$0xff] %vm589_vm0, %v569_v9 }
 0x11a   : > { %650 = vst.msk [vmem:[%s1417_s26 + $0x1e0] sm:$0xff] %vm589_vm0, %v585_v10 }
 0x11b   : > { %603 = vst.msk [vmem:[%s1417_s26 + $0x68] sm:$0xff] %vm589_vm0, %v538_v11 }
 0x11c   : > { %619 = vst.msk [vmem:[%s1417_s26 + $0xe8] sm:$0xff] %vm589_vm0, %v554_v12  ;;  %v477_v13 = vpop.f32.mrf.mxu2  ;;  %v517_v14 = vpop.f32.mrf.mxu3 }
 0x11d   : > { %v478_v15 = vadd.f32 %v1413_v40, %v477_v13  ;;  %v518_v16 = vadd.f32 %v1413_v40, %v517_v14  ;;  %v400_v17 = vpop.f32.mrf.mxu0  ;;  %v440_v18 = vpop.f32.mrf.mxu1 }
 0x11e   : > { %v401_v19 = vadd.f32 %v1413_v40, %v400_v17  ;;  %v441_v20 = vadd.f32 %v1413_v40, %v440_v18 }
 0x11f   : > { %v570_v21 = vmax.f32 %v478_v15, 0.0  ;;  %v586_v22 = vmax.f32 %v518_v16, 0.0 }
 0x120   : > { %v539_v23 = vmax.f32 %v401_v19, 0.0  ;;  %v555_v24 = vmax.f32 %v441_v20, 0.0 }
 0x121   : > { %635 = vst.msk [vmem:[%s1417_s26 + $0x168] sm:$0xff] %vm589_vm0, %v570_v21 }
 0x122   : > { %651 = vst.msk [vmem:[%s1417_s26 + $0x1e8] sm:$0xff] %vm589_vm0, %v586_v22 }
 0x123   : > { %604 = vst.msk [vmem:[%s1417_s26 + $0x70] sm:$0xff] %vm589_vm0, %v539_v23 }
 0x124   : > { %620 = vst.msk [vmem:[%s1417_s26 + $0xf0] sm:$0xff] %vm589_vm0, %v555_v24  ;;  %v480_v25 = vpop.f32.mrf.mxu2  ;;  %v520_v26 = vpop.f32.mrf.mxu3 }
 0x125   : > { %v481_v27 = vadd.f32 %v1413_v40, %v480_v25  ;;  %v521_v28 = vadd.f32 %v1413_v40, %v520_v26  ;;  %v402_v29 = vpop.f32.mrf.mxu0  ;;  %v442_v30 = vpop.f32.mrf.mxu1 }
 0x126   : > { %v403_v31 = vadd.f32 %v1413_v40, %v402_v29  ;;  %v443_v32 = vadd.f32 %v1413_v40, %v442_v30 }
 0x127   : > { %v571_v33 = vmax.f32 %v481_v27, 0.0  ;;  %v587_v34 = vmax.f32 %v521_v28, 0.0 }
 0x128   : > { %v540_v35 = vmax.f32 %v403_v31, 0.0  ;;  %v556_v36 = vmax.f32 %v443_v32, 0.0 }
 0x129   : > { %636 = vst.msk [vmem:[%s1417_s26 + $0x170] sm:$0xff] %vm589_vm0, %v571_v33 }
 0x12a   : > { %652 = vst.msk [vmem:[%s1417_s26 + $0x1f0] sm:$0xff] %vm589_vm0, %v587_v34 }
 0x12b   : > { %605 = vst.msk [vmem:[%s1417_s26 + $0x78] sm:$0xff] %vm589_vm0, %v540_v35 }
 0x12c   : > { %621 = vst.msk [vmem:[%s1417_s26 + $0xf8] sm:$0xff] %vm589_vm0, %v556_v36  ;;  %v482_v37 = vpop.f32.mrf.mxu2  ;;  %v522_v38 = vpop.f32.mrf.mxu3 }
 0x12d   : > { %v483_v39 = vadd.f32 %v1413_v40, %v482_v37  ;;  %v523_v41 = vadd.f32 %v1413_v40, %v522_v38 }
 0x12e   : > { %660 = sbr.rel (!%p1307_p4) target bundleno = 371 (0x173), region = 36 }
 0x12f   : > { %v572_v42 = vmax.f32 %v483_v39, 0.0  ;;  %v588_v43 = vmax.f32 %v523_v41, 0.0 }
 0x131   : > { %637 = vst.msk [vmem:[%s1417_s26 + $0x178] sm:$0xff] %vm589_vm0, %v572_v42 }
 0x132   : > { %653 = vst.msk [vmem:[%s1417_s26 + $0x1f8] sm:$0xff] %vm589_vm0, %v588_v43 }
 0x133   : > { %s1765_s12 = smov (!%p663_p8, %s662_s12), 64 }
 0x134   : > { %s1035_s5 = sshll.u32 %s1765_s12, 3 }
 0x135   : > { %p1038_p9 = scmp.eq.s32.totalorder %s1035_s5, 0 }
 0x136   : > { %s1622_s6 = sshrl.u32 (!%p1038_p9), %s1765_s12, 5 }
 0x137   : > { %671 = sbr.rel (%p1038_p9) target bundleno = 371 (0x173), region = 40  ;;  %p1039_p10 = scmp.le.s32.totalorder (!%p1038_p9), %s1622_s6, 0 }
 0x13c   : > { %950 = sbr.rel (%p1039_p10) target bundleno = 354 (0x162), region = 116  ;;  %s1756_s15 = smov (!%p1039_p10), %s1616_s4 }
 0x13d   : > { %s1757_s20 = smov (!%p1039_p10), %s1417_s26  ;;  %s1631_s27 = smov (!%p1039_p10), 0  }
 0x13e   : > { %s1633_s7 = smov (!%p1039_p10), 0  }
 0x141 LB: >> { %v796_v40 = vld [vmem:[%s1236_s20] sm:$0xff]  ;;  %v798_v44 = vld [vmem:[%s1236_s20 + $0x8] sm:$0xff]  ;;  %v800_v45 = vld [vmem:[%s1236_s20 + $0x10] sm:$0xff]  ;;  %s860_s8 = sadd.s32 1, %s1240_s27  ;;  %s790_s7 = sadd.s32 1, %s1244_s7   ;;  %s1244_s7 = sphi %s1633_s7, %s790_s7   ;;  %s1240_s27 = sphi %s1631_s27, %s1760_s27   ;;  %s1236_s20 = sphi %s1757_s20, %s1759_s20   ;;  %s1232_s15 = sphi %s1756_s15, %s1758_s15  }
 0x142   : >> { %797 = vst [vmem:[%s1232_s15] sm:$0xff] %v796_v40  ;;  %v802_v46 = vld [vmem:[%s1236_s20 + $0x18] sm:$0xff]  ;;  %p861_p11 = scmp.ge.s32.totalorder %s860_s8, %s1622_s6  ;;  %v804_v47 = vld [vmem:[%s1236_s20 + $0x20] sm:$0xff]  ;;  %v806_v48 = vld [vmem:[%s1236_s20 + $0x28] sm:$0xff]  ;;  %p789_p12 = scmp.ge.s32.totalorder %s790_s7, %s1622_s6 }
 0x143   : >> { %799 = vst [vmem:[%s1232_s15 + $0x8] sm:$0xff] %v798_v44  ;;  %v808_v49 = vld [vmem:[%s1236_s20 + $0x30] sm:$0xff]  ;;  %v810_v50 = vld [vmem:[%s1236_s20 + $0x38] sm:$0xff]  ;;  %v812_v51 = vld [vmem:[%s1236_s20 + $0x40] sm:$0xff] }
 0x144   : >> { %801 = vst [vmem:[%s1232_s15 + $0x10] sm:$0xff] %v800_v45  ;;  %s1767_s8 = smov (%p861_p11, %s860_s8), 0  ;;  %v814_v52 = vld [vmem:[%s1236_s20 + $0x48] sm:$0xff]  ;;  %v816_v53 = vld [vmem:[%s1236_s20 + $0x50] sm:$0xff]  ;;  %v818_v54 = vld [vmem:[%s1236_s20 + $0x58] sm:$0xff] }
 0x145   : >> { %803 = vst [vmem:[%s1232_s15 + $0x18] sm:$0xff] %v802_v46  ;;  %s1040_s9 = sshll.u32 %s1767_s8, 8  ;;  %v820_v55 = vld [vmem:[%s1236_s20 + $0x60] sm:$0xff]  ;;  %v822_v56 = vld [vmem:[%s1236_s20 + $0x68] sm:$0xff]  ;;  %v824_v57 = vld [vmem:[%s1236_s20 + $0x70] sm:$0xff]  ;;  %s1760_s27 = smov %s1767_s8 }
 0x146   : >> { %805 = vst [vmem:[%s1232_s15 + $0x20] sm:$0xff] %v804_v47  ;;  %s1665_s10 = scalar_lea.vmem %s1417_s26, %s1040_s9 [#allocation2]   ;;  %s1668_s11 = scalar_lea.vmem %s1616_s4, %s1040_s9   ;;  %v826_v58 = vld [vmem:[%s1236_s20 + $0x78] sm:$0xff]  ;;  %v828_v59 = vld [vmem:[%s1236_s20 + $0x80] sm:$0xff]  ;;  %v830_v60 = vld [vmem:[%s1236_s20 + $0x88] sm:$0xff] }
 0x147   : >> { %807 = vst [vmem:[%s1232_s15 + $0x28] sm:$0xff] %v806_v48  ;;  %v832_v61 = vld [vmem:[%s1236_s20 + $0x90] sm:$0xff]  ;;  %v834_v62 = vld [vmem:[%s1236_s20 + $0x98] sm:$0xff]  ;;  %v836_v63 = vld [vmem:[%s1236_s20 + $0xa0] sm:$0xff] }
 0x148   : >> { %809 = vst [vmem:[%s1232_s15 + $0x30] sm:$0xff] %v808_v49  ;;  %v838_v0 = vld [vmem:[%s1236_s20 + $0xa8] sm:$0xff]  ;;  %v840_v1 = vld [vmem:[%s1236_s20 + $0xb0] sm:$0xff]  ;;  %v842_v2 = vld [vmem:[%s1236_s20 + $0xb8] sm:$0xff] }
 0x149   : >> { %811 = vst [vmem:[%s1232_s15 + $0x38] sm:$0xff] %v810_v50  ;;  %v844_v3 = vld [vmem:[%s1236_s20 + $0xc0] sm:$0xff]  ;;  %v846_v4 = vld [vmem:[%s1236_s20 + $0xc8] sm:$0xff]  ;;  %v848_v5 = vld [vmem:[%s1236_s20 + $0xd0] sm:$0xff] }
 0x14a   : >> { %813 = vst [vmem:[%s1232_s15 + $0x40] sm:$0xff] %v812_v51  ;;  %v850_v6 = vld [vmem:[%s1236_s20 + $0xd8] sm:$0xff]  ;;  %v852_v7 = vld [vmem:[%s1236_s20 + $0xe0] sm:$0xff]  ;;  %v854_v8 = vld [vmem:[%s1236_s20 + $0xe8] sm:$0xff] }
 0x14b   : >> { %815 = vst [vmem:[%s1232_s15 + $0x48] sm:$0xff] %v814_v52  ;;  %v856_v9 = vld [vmem:[%s1236_s20 + $0xf0] sm:$0xff]  ;;  %v858_v10 = vld [vmem:[%s1236_s20 + $0xf8] sm:$0xff]  ;;  %s1759_s20 = smov %s1665_s10 }
 0x14c   : >> { %817 = vst [vmem:[%s1232_s15 + $0x50] sm:$0xff] %v816_v53 }
 0x14d   : >> { %819 = vst [vmem:[%s1232_s15 + $0x58] sm:$0xff] %v818_v54 }
 0x14e   : >> { %821 = vst [vmem:[%s1232_s15 + $0x60] sm:$0xff] %v820_v55 }
 0x14f   : >> { %823 = vst [vmem:[%s1232_s15 + $0x68] sm:$0xff] %v822_v56 }
 0x150   : >> { %825 = vst [vmem:[%s1232_s15 + $0x70] sm:$0xff] %v824_v57 }
 0x151   : >> { %827 = vst [vmem:[%s1232_s15 + $0x78] sm:$0xff] %v826_v58 }
 0x152   : >> { %829 = vst [vmem:[%s1232_s15 + $0x80] sm:$0xff] %v828_v59 }
 0x153   : >> { %831 = vst [vmem:[%s1232_s15 + $0x88] sm:$0xff] %v830_v60 }
 0x154   : >> { %833 = vst [vmem:[%s1232_s15 + $0x90] sm:$0xff] %v832_v61 }
 0x155   : >> { %835 = vst [vmem:[%s1232_s15 + $0x98] sm:$0xff] %v834_v62 }
 0x156   : >> { %837 = vst [vmem:[%s1232_s15 + $0xa0] sm:$0xff] %v836_v63 }
 0x157   : >> { %839 = vst [vmem:[%s1232_s15 + $0xa8] sm:$0xff] %v838_v0 }
 0x158   : >> { %841 = vst [vmem:[%s1232_s15 + $0xb0] sm:$0xff] %v840_v1 }
 0x159   : >> { %843 = vst [vmem:[%s1232_s15 + $0xb8] sm:$0xff] %v842_v2 }
 0x15a   : >> { %845 = vst [vmem:[%s1232_s15 + $0xc0] sm:$0xff] %v844_v3 }
 0x15b   : >> { %847 = vst [vmem:[%s1232_s15 + $0xc8] sm:$0xff] %v846_v4 }
 0x15c   : >> { %849 = vst [vmem:[%s1232_s15 + $0xd0] sm:$0xff] %v848_v5 }
 0x15d   : >> { %851 = vst [vmem:[%s1232_s15 + $0xd8] sm:$0xff] %v850_v6  ;;  %792 = sbr.rel (!%p789_p12) target bundleno = 321 (0x141), region = 122 }
 0x15e   : >> { %853 = vst [vmem:[%s1232_s15 + $0xe0] sm:$0xff] %v852_v7 }
 0x15f   : >> { %855 = vst [vmem:[%s1232_s15 + $0xe8] sm:$0xff] %v854_v8 }
 0x160   : >> { %857 = vst [vmem:[%s1232_s15 + $0xf0] sm:$0xff] %v856_v9 }
 0x161   : >> { %859 = vst [vmem:[%s1232_s15 + $0xf8] sm:$0xff] %v858_v10  ;;  %s1758_s15 = smov %s1668_s11 }
 0x162 PF: > { %s1733_s14 = sand.u32 31, %s1765_s12   ;;  %s1059_s17 = sshll.u32 %s1622_s6, 8 }
 0x163   : > { %s871_s18 = scalar_lea.vmem %s1417_s26, %s1059_s17 [#allocation2]   ;;  %s873_s21 = scalar_lea.vmem %s1616_s4, %s1059_s17  }
 0x164   : > { %p1045_p13 = scmp.le.s32.totalorder %s1733_s14, 0 }
 0x165   : > { %s1246_s22 = smov (!%p1045_p13), %s873_s21   ;;  %s1250_s23 = smov (!%p1045_p13), %s871_s18  }
 0x166   : > { %964 = sbr.rel (%p1045_p13) target bundleno = 371 (0x173), region = 127  ;;  %s1254_s24 = smov (!%p1045_p13), 0  }
 0x167   : > { %s1258_s25 = smov (!%p1045_p13), 0  }
 0x16b LB: >> { %v883_v11 = vld [vmem:[%s1252_s23] sm:$0xff]  ;;  %s885_s12 = sadd.s32 1, %s1256_s24  ;;  %s877_s25 = sadd.s32 1, %s1260_s25   ;;  %s1260_s25 = sphi %s1258_s25, %s877_s25   ;;  %s1256_s24 = sphi %s1254_s24, %s1255_s24   ;;  %s1252_s23 = sphi %s1250_s23, %s890_s23   ;;  %s1248_s22 = sphi %s1246_s22, %s891_s22  }
 0x16c   : >> { %884 = vst [vmem:[%s1248_s22] sm:$0xff] %v883_v11  ;;  %p886_p0 = scmp.ge.s32.totalorder %s885_s12, %s1733_s14  ;;  %p876_p1 = scmp.ge.s32.totalorder %s877_s25, %s1733_s14 }
 0x16e   : >> { %s1769_s12 = smov (%p886_p0, %s885_s12), 0  ;;  %879 = sbr.rel (!%p876_p1) target bundleno = 363 (0x16b), region = 133 }
 0x16f   : >> { %s1046_s26 = sshll.u32 %s1769_s12, 3  ;;  %s1255_s24 = smov %s1769_s12  }
 0x170   : >> { %s890_s23 = scalar_lea.vmem %s871_s18, %s1046_s26 [#allocation2]   ;;  %s891_s22 = scalar_lea.vmem %s873_s21, %s1046_s26  }
 0x173 PF: > { %p10_p2 = scmp.ge.s32.totalorder %s1297_s16, 6   ;;  %s1761_s12 = smov %s1224_s13 }
 0x174   : > { %s1762_s13 = smov %s1305_s19  ;;  %s1763_s14 = smov %s1297_s16 }
 0x175   :  { %12 = sbr.rel (!%p10_p2) target bundleno = 2 (0x2), region = 144 }

// kernel: _lambda_.17
= control target key start
LH: loop header
LB: loop body
LE: loop exit
PB: predicated region body
PF: predicated region fallthrough
CT: control target
= control target key end

     0   :  { %vm922_vm0 = vcmask 523264   ;;  %s1860_s1 = inlined_call_operand.vmem [shape: bf16[512,64], index: 1, kind: input, shape index: {}]   ;;  %s1861_s2 = inlined_call_operand.vmem [shape: f32[1,64], index: 2, kind: input, shape index: {}]   ;;  %s1862_s0 = inlined_call_operand.vmem [shape: f32[288,512], index: 0, kind: input, shape index: {}]   ;;  %s1863_s3 = inlined_call_operand.vmem [shape: f32[288,64], index: 3, kind: output, shape index: {}]  }
   0x1   :  { %v1098_v0 = vld [vmem:[%s1860_s1 + $0x38] sm:$0xff]  ;;  %v1097_v4 = vld [vmem:[%s1860_s1 + $0x30] sm:$0xff]  ;;  %v1096_v8 = vld [vmem:[%s1860_s1 + $0x28] sm:$0xff] }
   0x2   :  { %v1106_v1 = vld [vmem:[%s1860_s1 + $0x78] sm:$0xff]  ;;  %490 = vmatpush.bf16.msra.mxu0 %v1098_v0  ;;  %v1105_v5 = vld [vmem:[%s1860_s1 + $0x70] sm:$0xff]  ;;  %v1104_v9 = vld [vmem:[%s1860_s1 + $0x68] sm:$0xff] }
   0x3   :  { %v1114_v2 = vld [vmem:[%s1860_s1 + $0xb8] sm:$0xff]  ;;  %589 = vmatpush.bf16.msra.mxu1 %v1106_v1  ;;  %v1113_v6 = vld [vmem:[%s1860_s1 + $0xb0] sm:$0xff]  ;;  %v1112_v10 = vld [vmem:[%s1860_s1 + $0xa8] sm:$0xff] }
   0x4   :  { %v1122_v3 = vld [vmem:[%s1860_s1 + $0xf8] sm:$0xff]  ;;  %688 = vmatpush.bf16.msra.mxu2 %v1114_v2  ;;  %v1121_v7 = vld [vmem:[%s1860_s1 + $0xf0] sm:$0xff]  ;;  %v1120_v11 = vld [vmem:[%s1860_s1 + $0xe8] sm:$0xff] }
   0x5   :  { %787 = vmatpush.bf16.msra.mxu3 %v1122_v3  ;;  %v1095_v12 = vld [vmem:[%s1860_s1 + $0x20] sm:$0xff]  ;;  %v1094_v16 = vld [vmem:[%s1860_s1 + $0x18] sm:$0xff]  ;;  %v1093_v20 = vld [vmem:[%s1860_s1 + $0x10] sm:$0xff] }
   0x6   :  { %491 = vmatpush.bf16.msra.mxu0 %v1097_v4  ;;  %v1103_v13 = vld [vmem:[%s1860_s1 + $0x60] sm:$0xff]  ;;  %v1102_v17 = vld [vmem:[%s1860_s1 + $0x58] sm:$0xff]  ;;  %v1101_v21 = vld [vmem:[%s1860_s1 + $0x50] sm:$0xff] }
   0x7   :  { %590 = vmatpush.bf16.msra.mxu1 %v1105_v5  ;;  %v1111_v14 = vld [vmem:[%s1860_s1 + $0xa0] sm:$0xff]  ;;  %v1110_v18 = vld [vmem:[%s1860_s1 + $0x98] sm:$0xff]  ;;  %v1109_v22 = vld [vmem:[%s1860_s1 + $0x90] sm:$0xff] }
   0x8   :  { %689 = vmatpush.bf16.msra.mxu2 %v1113_v6  ;;  %v1119_v15 = vld [vmem:[%s1860_s1 + $0xe0] sm:$0xff]  ;;  %v1118_v19 = vld [vmem:[%s1860_s1 + $0xd8] sm:$0xff]  ;;  %v1117_v23 = vld [vmem:[%s1860_s1 + $0xd0] sm:$0xff] }
   0x9   :  { %788 = vmatpush.bf16.msra.mxu3 %v1121_v7  ;;  %v1092_v24 = vld [vmem:[%s1860_s1 + $0x8] sm:$0xff]  ;;  %v1091_v28 = vld [vmem:[%s1860_s1] sm:$0xff]  ;;  %v16_v36 = vld [vmem:[%s1862_s0 + $0x10] sm:$0xff] }
   0xa   :  { %492 = vmatpush.bf16.msra.mxu0 %v1096_v8  ;;  %v1100_v25 = vld [vmem:[%s1860_s1 + $0x48] sm:$0xff]  ;;  %v1099_v29 = vld [vmem:[%s1860_s1 + $0x40] sm:$0xff]  ;;  %v20_v37 = vld [vmem:[%s1862_s0 + $0x30] sm:$0xff] }
   0xb   :  { %591 = vmatpush.bf16.msra.mxu1 %v1104_v9  ;;  %v1108_v26 = vld [vmem:[%s1860_s1 + $0x88] sm:$0xff]  ;;  %v1107_v30 = vld [vmem:[%s1860_s1 + $0x80] sm:$0xff]  ;;  %v17_v38 = vld [vmem:[%s1862_s0 + $0x18] sm:$0xff]  ;;  %v160_v42 = vpack.c.bf16 %v20_v37, %v16_v36 }
   0xc   :  { %690 = vmatpush.bf16.msra.mxu2 %v1112_v10  ;;  %v1116_v27 = vld [vmem:[%s1860_s1 + $0xc8] sm:$0xff]  ;;  %v1115_v31 = vld [vmem:[%s1860_s1 + $0xc0] sm:$0xff]  ;;  %v21_v39 = vld [vmem:[%s1862_s0 + $0x38] sm:$0xff] }
   0xd   :  { %789 = vmatpush.bf16.msra.mxu3 %v1120_v11  ;;  %v14_v32 = vld [vmem:[%s1862_s0] sm:$0xff]  ;;  %v15_v34 = vld [vmem:[%s1862_s0 + $0x8] sm:$0xff]  ;;  %v161_v43 = vpack.c.bf16 %v21_v39, %v17_v38  ;;  %v24_v48 = vld [vmem:[%s1862_s0 + $0x50] sm:$0xff] }
   0xe   :  { %493 = vmatpush.bf16.msra.mxu0 %v1095_v12  ;;  %v18_v33 = vld [vmem:[%s1862_s0 + $0x20] sm:$0xff]  ;;  %v19_v35 = vld [vmem:[%s1862_s0 + $0x28] sm:$0xff]  ;;  %v28_v49 = vld [vmem:[%s1862_s0 + $0x70] sm:$0xff] }
   0xf   :  { %592 = vmatpush.bf16.msra.mxu1 %v1103_v13  ;;  %v158_v40 = vpack.c.bf16 %v18_v33, %v14_v32  ;;  %v159_v41 = vpack.c.bf16 %v19_v35, %v15_v34  ;;  %v22_v44 = vld [vmem:[%s1862_s0 + $0x40] sm:$0xff]  ;;  %v23_v46 = vld [vmem:[%s1862_s0 + $0x48] sm:$0xff]  ;;  %v25_v50 = vld [vmem:[%s1862_s0 + $0x58] sm:$0xff]  ;;  %v164_v54 = vpack.c.bf16 %v28_v49, %v24_v48 }
  0x10   :  { %691 = vmatpush.bf16.msra.mxu2 %v1111_v14  ;;  %v26_v45 = vld [vmem:[%s1862_s0 + $0x60] sm:$0xff]  ;;  %v27_v47 = vld [vmem:[%s1862_s0 + $0x68] sm:$0xff]  ;;  %v29_v51 = vld [vmem:[%s1862_s0 + $0x78] sm:$0xff] }
  0x11   :  { %790 = vmatpush.bf16.msra.mxu3 %v1119_v15  ;;  %v162_v52 = vpack.c.bf16 %v26_v45, %v22_v44  ;;  %v163_v53 = vpack.c.bf16 %v27_v47, %v23_v46  ;;  %v165_v55 = vpack.c.bf16 %v29_v51, %v25_v50  ;;  %v30_v56 = vld [vmem:[%s1862_s0 + $0x80] sm:$0xff]  ;;  %v31_v58 = vld [vmem:[%s1862_s0 + $0x88] sm:$0xff]  ;;  %v32_v60 = vld [vmem:[%s1862_s0 + $0x90] sm:$0xff] }
  0x12   :  { %494 = vmatpush.bf16.msra.mxu0 %v1094_v16  ;;  %v34_v57 = vld [vmem:[%s1862_s0 + $0xa0] sm:$0xff]  ;;  %v35_v59 = vld [vmem:[%s1862_s0 + $0xa8] sm:$0xff]  ;;  %v36_v61 = vld [vmem:[%s1862_s0 + $0xb0] sm:$0xff] }
  0x13   :  { %593 = vmatpush.bf16.msra.mxu1 %v1102_v17  ;;  %v33_v62 = vld [vmem:[%s1862_s0 + $0x98] sm:$0xff]  ;;  %v166_v0 = vpack.c.bf16 %v34_v57, %v30_v56  ;;  %v167_v1 = vpack.c.bf16 %v35_v59, %v31_v58  ;;  %v168_v2 = vpack.c.bf16 %v36_v61, %v32_v60  ;;  %v38_v4 = vld [vmem:[%s1862_s0 + $0xc0] sm:$0xff]  ;;  %v39_v6 = vld [vmem:[%s1862_s0 + $0xc8] sm:$0xff] }
  0x14   :  { %692 = vmatpush.bf16.msra.mxu2 %v1110_v18  ;;  %v37_v63 = vld [vmem:[%s1862_s0 + $0xb8] sm:$0xff]  ;;  %v42_v5 = vld [vmem:[%s1862_s0 + $0xe0] sm:$0xff]  ;;  %v43_v7 = vld [vmem:[%s1862_s0 + $0xe8] sm:$0xff] }
  0x15   :  { %791 = vmatpush.bf16.msra.mxu3 %v1118_v19  ;;  %v169_v3 = vpack.c.bf16 %v37_v63, %v33_v62  ;;  %v40_v8 = vld [vmem:[%s1862_s0 + $0xd0] sm:$0xff]  ;;  %v41_v10 = vld [vmem:[%s1862_s0 + $0xd8] sm:$0xff]  ;;  %v170_v12 = vpack.c.bf16 %v42_v5, %v38_v4  ;;  %v171_v13 = vpack.c.bf16 %v43_v7, %v39_v6  ;;  %v46_v16 = vld [vmem:[%s1862_s0 + $0x100] sm:$0xff] }
  0x16   :  { %495 = vmatpush.bf16.msra.mxu0 %v1093_v20  ;;  %v44_v9 = vld [vmem:[%s1862_s0 + $0xf0] sm:$0xff]  ;;  %v45_v11 = vld [vmem:[%s1862_s0 + $0xf8] sm:$0xff]  ;;  %v50_v17 = vld [vmem:[%s1862_s0 + $0x120] sm:$0xff] }
  0x17   :  { %594 = vmatpush.bf16.msra.mxu1 %v1101_v21  ;;  %v172_v14 = vpack.c.bf16 %v44_v9, %v40_v8  ;;  %v173_v15 = vpack.c.bf16 %v45_v11, %v41_v10  ;;  %v47_v18 = vld [vmem:[%s1862_s0 + $0x108] sm:$0xff]  ;;  %v48_v20 = vld [vmem:[%s1862_s0 + $0x110] sm:$0xff]  ;;  %v57_v34 = vld [vmem:[%s1862_s0 + $0x158] sm:$0xff] }
  0x18   :  { %693 = vmatpush.bf16.msra.mxu2 %v1109_v22  ;;  %v51_v19 = vld [vmem:[%s1862_s0 + $0x128] sm:$0xff]  ;;  %v52_v21 = vld [vmem:[%s1862_s0 + $0x130] sm:$0xff]  ;;  %v49_v22 = vld [vmem:[%s1862_s0 + $0x118] sm:$0xff] }
  0x19   :  { %792 = vmatpush.bf16.msra.mxu3 %v1117_v23  ;;  %v53_v23 = vld [vmem:[%s1862_s0 + $0x138] sm:$0xff]  ;;  %v56_v32 = vld [vmem:[%s1862_s0 + $0x150] sm:$0xff]  ;;  %v83_v4 = vld [vmem:[%s1862_s0 + $0x228] sm:$0xff] }
  0x1a   :  { %496 = vmatpush.bf16.msra.mxu0 %v1092_v24  ;;  %v174_v24 = vpack.c.bf16 %v50_v17, %v46_v16  ;;  %v60_v33 = vld [vmem:[%s1862_s0 + $0x170] sm:$0xff]  ;;  %v61_v35 = vld [vmem:[%s1862_s0 + $0x178] sm:$0xff] }
  0x1b   :  { %595 = vmatpush.bf16.msra.mxu1 %v1100_v25  ;;  %v175_v25 = vpack.c.bf16 %v51_v19, %v47_v18  ;;  %v180_v38 = vpack.c.bf16 %v60_v33, %v56_v32  ;;  %v181_v39 = vpack.c.bf16 %v61_v35, %v57_v34  ;;  %v64_v44 = vld [vmem:[%s1862_s0 + $0x190] sm:$0xff]  ;;  %v65_v46 = vld [vmem:[%s1862_s0 + $0x198] sm:$0xff] }
  0x1c   :  { %694 = vmatpush.bf16.msra.mxu2 %v1108_v26  ;;  %v176_v26 = vpack.c.bf16 %v52_v21, %v48_v20  ;;  %v68_v45 = vld [vmem:[%s1862_s0 + $0x1b0] sm:$0xff]  ;;  %v69_v47 = vld [vmem:[%s1862_s0 + $0x1b8] sm:$0xff] }
  0x1d   :  { %793 = vmatpush.bf16.msra.mxu3 %v1116_v27  ;;  %v177_v27 = vpack.c.bf16 %v53_v23, %v49_v22  ;;  %v184_v50 = vpack.c.bf16 %v68_v45, %v64_v44  ;;  %v185_v51 = vpack.c.bf16 %v69_v47, %v65_v46  ;;  %v72_v56 = vld [vmem:[%s1862_s0 + $0x1d0] sm:$0xff]  ;;  %v73_v58 = vld [vmem:[%s1862_s0 + $0x1d8] sm:$0xff] }
  0x1e   :  { %497 = vmatpush.bf16.msra.mxu0 %v1091_v28  ;;  %v54_v28 = vld [vmem:[%s1862_s0 + $0x140] sm:$0xff]  ;;  %v76_v57 = vld [vmem:[%s1862_s0 + $0x1f0] sm:$0xff]  ;;  %v77_v59 = vld [vmem:[%s1862_s0 + $0x1f8] sm:$0xff] }
  0x1f   :  { %596 = vmatpush.bf16.msra.mxu1 %v1099_v29  ;;  %v58_v29 = vld [vmem:[%s1862_s0 + $0x160] sm:$0xff]  ;;  %v188_v62 = vpack.c.bf16 %v76_v57, %v72_v56  ;;  %v189_v63 = vpack.c.bf16 %v77_v59, %v73_v58  ;;  %v80_v5 = vld [vmem:[%s1862_s0 + $0x210] sm:$0xff]  ;;  %v81_v7 = vld [vmem:[%s1862_s0 + $0x218] sm:$0xff] }
  0x20   :  { %695 = vmatpush.bf16.msra.mxu2 %v1107_v30  ;;  %v55_v30 = vld [vmem:[%s1862_s0 + $0x148] sm:$0xff]  ;;  %v178_v36 = vpack.c.bf16 %v58_v29, %v54_v28  ;;  %v84_v6 = vld [vmem:[%s1862_s0 + $0x230] sm:$0xff]  ;;  %v85_v8 = vld [vmem:[%s1862_s0 + $0x238] sm:$0xff] }
  0x21   :  { %794 = vmatpush.bf16.msra.mxu3 %v1115_v31  ;;  %498 = vmatmul.bf16.vlgmr.msra.gmra.mxu0 %v158_v40  ;;  %v59_v31 = vld [vmem:[%s1862_s0 + $0x168] sm:$0xff]  ;;  %v62_v40 = vld [vmem:[%s1862_s0 + $0x180] sm:$0xff]  ;;  %v88_v29 = vld [vmem:[%s1862_s0 + $0x250] sm:$0xff] }
  0x22   :  { %597 = vmatmul.bf16.vlgmr.msra.gmra.mxu1 %v159_v41  ;;  %v179_v37 = vpack.c.bf16 %v59_v31, %v55_v30  ;;  %v66_v41 = vld [vmem:[%s1862_s0 + $0x1a0] sm:$0xff]  ;;  %v91_v28 = vld [vmem:[%s1862_s0 + $0x268] sm:$0xff]  ;;  %v92_v30 = vld [vmem:[%s1862_s0 + $0x270] sm:$0xff] }
  0x23   :  { %696 = vmatmul.bf16.vlgmr.msra.gmra.mxu2 %v160_v42  ;;  %v63_v42 = vld [vmem:[%s1862_s0 + $0x188] sm:$0xff]  ;;  %v182_v48 = vpack.c.bf16 %v66_v41, %v62_v40  ;;  %v89_v31 = vld [vmem:[%s1862_s0 + $0x258] sm:$0xff]  ;;  %v196_v41 = vpack.c.bf16 %v92_v30, %v88_v29  ;;  %v96_v59 = vld [vmem:[%s1862_s0 + $0x290] sm:$0xff] }
  0x24   :  { %795 = vmatmul.bf16.vlgmr.msra.gmra.mxu3 %v161_v43  ;;  %v67_v43 = vld [vmem:[%s1862_s0 + $0x1a8] sm:$0xff]  ;;  %v93_v32 = vld [vmem:[%s1862_s0 + $0x278] sm:$0xff] }
  0x25   :  { %v183_v49 = vpack.c.bf16 %v67_v43, %v63_v42  ;;  %v197_v42 = vpack.c.bf16 %v93_v32, %v89_v31  ;;  %v95_v57 = vld [vmem:[%s1862_s0 + $0x288] sm:$0xff]  ;;  %v109_v29 = vld [vmem:[%s1862_s0 + $0x2f8] sm:$0xff] }
  0x26   :  { %v99_v58 = vld [vmem:[%s1862_s0 + $0x2a8] sm:$0xff] }
  0x31   :  { %503 = vmatmul.bf16.gmra.mxu0 %v162_v52  ;;  %v70_v52 = vld [vmem:[%s1862_s0 + $0x1c0] sm:$0xff] }
  0x32   :  { %602 = vmatmul.bf16.gmra.mxu1 %v163_v53  ;;  %v74_v53 = vld [vmem:[%s1862_s0 + $0x1e0] sm:$0xff] }
  0x33   :  { %701 = vmatmul.bf16.gmra.mxu2 %v164_v54  ;;  %v71_v54 = vld [vmem:[%s1862_s0 + $0x1c8] sm:$0xff]  ;;  %v186_v60 = vpack.c.bf16 %v74_v53, %v70_v52 }
  0x34   :  { %800 = vmatmul.bf16.gmra.mxu3 %v165_v55  ;;  %v75_v55 = vld [vmem:[%s1862_s0 + $0x1e8] sm:$0xff] }
  0x35   :  { %v187_v61 = vpack.c.bf16 %v75_v55, %v71_v54  ;;  %v94_v54 = vld [vmem:[%s1862_s0 + $0x280] sm:$0xff] }
  0x36   :  { %v98_v55 = vld [vmem:[%s1862_s0 + $0x2a0] sm:$0xff] }
  0x41   :  { %508 = vmatmul.bf16.gmra.mxu0 %v166_v0  ;;  %v1436_v0 = vld [vmem:[%s1861_s2] ss:$0 sm:$0xff] }
  0x42   :  { %607 = vmatmul.bf16.gmra.mxu1 %v167_v1  ;;  %v78_v1 = vld [vmem:[%s1862_s0 + $0x200] sm:$0xff] }
  0x43   :  { %706 = vmatmul.bf16.gmra.mxu2 %v168_v2  ;;  %v82_v2 = vld [vmem:[%s1862_s0 + $0x220] sm:$0xff] }
  0x44   :  { %805 = vmatmul.bf16.gmra.mxu3 %v169_v3  ;;  %v79_v3 = vld [vmem:[%s1862_s0 + $0x208] sm:$0xff]  ;;  %v190_v9 = vpack.c.bf16 %v82_v2, %v78_v1 }
  0x45   :  { %v191_v10 = vpack.c.bf16 %v83_v4, %v79_v3  ;;  %v198_v3 = vpack.c.bf16 %v98_v55, %v94_v54  ;;  %v199_v4 = vpack.c.bf16 %v99_v58, %v95_v57  ;;  %v111_v54 = vld [vmem:[%s1862_s0 + $0x308] sm:$0xff]  ;;  %v116_v57 = vld [vmem:[%s1862_s0 + $0x330] sm:$0xff]  ;;  %v113_v58 = vld [vmem:[%s1862_s0 + $0x318] sm:$0xff] }
  0x46   :  { %v115_v55 = vld [vmem:[%s1862_s0 + $0x328] sm:$0xff] }
  0x51   :  { %513 = vmatmul.bf16.gmra.mxu0 %v170_v12 }
  0x52   :  { %612 = vmatmul.bf16.gmra.mxu1 %v171_v13  ;;  %v192_v13 = vpack.c.bf16 %v84_v6, %v80_v5 }
  0x53   :  { %711 = vmatmul.bf16.gmra.mxu2 %v172_v14  ;;  %v193_v14 = vpack.c.bf16 %v85_v8, %v81_v7 }
  0x54   :  { %810 = vmatmul.bf16.gmra.mxu3 %v173_v15 }
  0x61   :  { %518 = vmatmul.bf16.gmra.mxu0 %v174_v24  ;;  %v86_v24 = vld [vmem:[%s1862_s0 + $0x240] sm:$0xff] }
  0x62   :  { %617 = vmatmul.bf16.gmra.mxu1 %v175_v25  ;;  %v90_v25 = vld [vmem:[%s1862_s0 + $0x260] sm:$0xff] }
  0x63   :  { %716 = vmatmul.bf16.gmra.mxu2 %v176_v26 }
  0x64   :  { %815 = vmatmul.bf16.gmra.mxu3 %v177_v27  ;;  %v87_v27 = vld [vmem:[%s1862_s0 + $0x248] sm:$0xff] }
  0x71   :  { %523 = vmatmul.bf16.gmra.mxu0 %v178_v36  ;;  %v194_v36 = vpack.c.bf16 %v90_v25, %v86_v24  ;;  %v103_v24 = vld [vmem:[%s1862_s0 + $0x2c8] sm:$0xff] }
  0x72   :  { %622 = vmatmul.bf16.gmra.mxu1 %v179_v37  ;;  %v195_v37 = vpack.c.bf16 %v91_v28, %v87_v27  ;;  %v107_v25 = vld [vmem:[%s1862_s0 + $0x2e8] sm:$0xff]  ;;  %v108_v27 = vld [vmem:[%s1862_s0 + $0x2f0] sm:$0xff]  ;;  %v105_v28 = vld [vmem:[%s1862_s0 + $0x2d8] sm:$0xff] }
  0x73   :  { %721 = vmatmul.bf16.gmra.mxu2 %v180_v38 }
  0x74   :  { %820 = vmatmul.bf16.gmra.mxu3 %v181_v39 }
  0x81   :  { %528 = vmatmul.bf16.gmra.mxu0 %v182_v48 }
  0x82   :  { %627 = vmatmul.bf16.gmra.mxu1 %v183_v49 }
  0x83   :  { %726 = vmatmul.bf16.gmra.mxu2 %v184_v50 }
  0x84   :  { %825 = vmatmul.bf16.gmra.mxu3 %v185_v51 }
  0x91   :  { %533 = vmatmul.bf16.gmra.mxu0 %v186_v60  ;;  %v100_v60 = vld [vmem:[%s1862_s0 + $0x2b0] sm:$0xff] }
  0x92   :  { %632 = vmatmul.bf16.gmra.mxu1 %v187_v61  ;;  %v97_v61 = vld [vmem:[%s1862_s0 + $0x298] sm:$0xff]  ;;  %v200_v8 = vpack.c.bf16 %v100_v60, %v96_v59 }
  0x93   :  { %731 = vmatmul.bf16.gmra.mxu2 %v188_v62  ;;  %v101_v62 = vld [vmem:[%s1862_s0 + $0x2b8] sm:$0xff] }
  0x94   :  { %830 = vmatmul.bf16.gmra.mxu3 %v189_v63  ;;  %v117_v59 = vld [vmem:[%s1862_s0 + $0x338] sm:$0xff] }
  0x9e   :  { %v499_v11 = vpop.f32.mrf.mxu0 }
  0x9f   :  { %v598_v12 = vpop.f32.mrf.mxu1  ;;  %v500_v15 = vadd.f32 %v1436_v0, %v499_v11 }
  0xa1   :  { %538 = vmatmul.bf16.gmra.mxu0 %v190_v9  ;;  %v599_v16 = vadd.f32 %v598_v12, %v500_v15  ;;  %v201_v9 = vpack.c.bf16 %v101_v62, %v97_v61 }
  0xa2   :  { %637 = vmatmul.bf16.gmra.mxu1 %v191_v10 }
  0xa3   :  { %736 = vmatmul.bf16.gmra.mxu2 %v192_v13 }
  0xa4   :  { %835 = vmatmul.bf16.gmra.mxu3 %v193_v14 }
  0xa6   :  { %v697_v17 = vpop.f32.mrf.mxu2  ;;  %v501_v20 = vpop.f32.mrf.mxu0 }
  0xa7   :  { %v796_v18 = vpop.f32.mrf.mxu3  ;;  %v698_v19 = vadd.f32 %v697_v17, %v599_v16  ;;  %v600_v21 = vpop.f32.mrf.mxu1  ;;  %v502_v23 = vadd.f32 %v1436_v0, %v501_v20 }
  0xa9   :  { %v797_v22 = vadd.f32 %v796_v18, %v698_v19  ;;  %v601_v33 = vadd.f32 %v600_v21, %v502_v23  ;;  %v102_v21 = vld [vmem:[%s1862_s0 + $0x2c0] sm:$0xff] }
  0xab   :  { %v886_v26 = vmax.f32 %v797_v22, 0.0  ;;  %v106_v22 = vld [vmem:[%s1862_s0 + $0x2e0] sm:$0xff] }
  0xad   :  { %923 = vst.msk [vmem:[%s1863_s3] sm:$0xff] %vm922_vm0, %v886_v26  ;;  %v104_v26 = vld [vmem:[%s1862_s0 + $0x2d0] sm:$0xff] }
  0xae   :  { %v699_v34 = vpop.f32.mrf.mxu2  ;;  %v504_v39 = vpop.f32.mrf.mxu0 }
  0xaf   :  { %v798_v35 = vpop.f32.mrf.mxu3  ;;  %v700_v38 = vadd.f32 %v699_v34, %v601_v33  ;;  %v603_v40 = vpop.f32.mrf.mxu1  ;;  %v505_v43 = vadd.f32 %v1436_v0, %v504_v39  ;;  %v202_v33 = vpack.c.bf16 %v106_v22, %v102_v21  ;;  %v203_v34 = vpack.c.bf16 %v107_v25, %v103_v24  ;;  %v119_v21 = vld [vmem:[%s1862_s0 + $0x348] sm:$0xff]  ;;  %v124_v24 = vld [vmem:[%s1862_s0 + $0x370] sm:$0xff]  ;;  %v121_v25 = vld [vmem:[%s1862_s0 + $0x358] sm:$0xff] }
  0xb0   :  { %v205_v39 = vpack.c.bf16 %v109_v29, %v105_v28  ;;  %v123_v22 = vld [vmem:[%s1862_s0 + $0x368] sm:$0xff] }
  0xb1   :  { %v799_v44 = vadd.f32 %v798_v35, %v700_v38  ;;  %543 = vmatmul.bf16.gmra.mxu0 %v194_v36  ;;  %v604_v46 = vadd.f32 %v603_v40, %v505_v43  ;;  %v204_v38 = vpack.c.bf16 %v108_v27, %v104_v26  ;;  %v125_v26 = vld [vmem:[%s1862_s0 + $0x378] sm:$0xff] }
  0xb2   :  { %642 = vmatmul.bf16.gmra.mxu1 %v195_v37 }
  0xb3   :  { %v887_v45 = vmax.f32 %v799_v44, 0.0  ;;  %741 = vmatmul.bf16.gmra.mxu2 %v196_v41 }
  0xb4   :  { %840 = vmatmul.bf16.gmra.mxu3 %v197_v42 }
  0xb5   :  { %924 = vst.msk [vmem:[%s1863_s3 + $0x8] sm:$0xff] %vm922_vm0, %v887_v45 }
  0xb6   :  { %v702_v47 = vpop.f32.mrf.mxu2  ;;  %v506_v50 = vpop.f32.mrf.mxu0 }
  0xb7   :  { %v801_v48 = vpop.f32.mrf.mxu3  ;;  %v703_v49 = vadd.f32 %v702_v47, %v604_v46  ;;  %v605_v51 = vpop.f32.mrf.mxu1  ;;  %v507_v53 = vadd.f32 %v1436_v0, %v506_v50 }
  0xb9   :  { %v802_v52 = vadd.f32 %v801_v48, %v703_v49  ;;  %v606_v63 = vadd.f32 %v605_v51, %v507_v53  ;;  %v110_v51 = vld [vmem:[%s1862_s0 + $0x300] sm:$0xff] }
  0xbb   :  { %v888_v56 = vmax.f32 %v802_v52, 0.0  ;;  %v114_v52 = vld [vmem:[%s1862_s0 + $0x320] sm:$0xff] }
  0xbd   :  { %925 = vst.msk [vmem:[%s1863_s3 + $0x10] sm:$0xff] %vm922_vm0, %v888_v56  ;;  %v112_v56 = vld [vmem:[%s1862_s0 + $0x310] sm:$0xff] }
  0xbe   :  { %v704_v1 = vpop.f32.mrf.mxu2  ;;  %v509_v6 = vpop.f32.mrf.mxu0 }
  0xbf   :  { %v803_v2 = vpop.f32.mrf.mxu3  ;;  %v705_v5 = vadd.f32 %v704_v1, %v606_v63  ;;  %v608_v7 = vpop.f32.mrf.mxu1  ;;  %v510_v10 = vadd.f32 %v1436_v0, %v509_v6  ;;  %v206_v63 = vpack.c.bf16 %v114_v52, %v110_v51  ;;  %v207_v1 = vpack.c.bf16 %v115_v55, %v111_v54  ;;  %v127_v51 = vld [vmem:[%s1862_s0 + $0x388] sm:$0xff]  ;;  %v132_v54 = vld [vmem:[%s1862_s0 + $0x3b0] sm:$0xff]  ;;  %v129_v55 = vld [vmem:[%s1862_s0 + $0x398] sm:$0xff] }
  0xc0   :  { %v209_v6 = vpack.c.bf16 %v117_v59, %v113_v58  ;;  %v131_v52 = vld [vmem:[%s1862_s0 + $0x3a8] sm:$0xff] }
  0xc1   :  { %v804_v11 = vadd.f32 %v803_v2, %v705_v5  ;;  %548 = vmatmul.bf16.gmra.mxu0 %v198_v3  ;;  %v609_v13 = vadd.f32 %v608_v7, %v510_v10  ;;  %v208_v5 = vpack.c.bf16 %v116_v57, %v112_v56  ;;  %v133_v56 = vld [vmem:[%s1862_s0 + $0x3b8] sm:$0xff] }
  0xc2   :  { %647 = vmatmul.bf16.gmra.mxu1 %v199_v4 }
  0xc3   :  { %v889_v12 = vmax.f32 %v804_v11, 0.0  ;;  %746 = vmatmul.bf16.gmra.mxu2 %v200_v8 }
  0xc4   :  { %845 = vmatmul.bf16.gmra.mxu3 %v201_v9 }
  0xc5   :  { %926 = vst.msk [vmem:[%s1863_s3 + $0x18] sm:$0xff] %vm922_vm0, %v889_v12 }
  0xc6   :  { %v707_v14 = vpop.f32.mrf.mxu2  ;;  %v511_v17 = vpop.f32.mrf.mxu0 }
  0xc7   :  { %v806_v15 = vpop.f32.mrf.mxu3  ;;  %v708_v16 = vadd.f32 %v707_v14, %v609_v13  ;;  %v610_v18 = vpop.f32.mrf.mxu1  ;;  %v512_v20 = vadd.f32 %v1436_v0, %v511_v17 }
  0xc9   :  { %v807_v19 = vadd.f32 %v806_v15, %v708_v16  ;;  %v611_v30 = vadd.f32 %v610_v18, %v512_v20  ;;  %v118_v18 = vld [vmem:[%s1862_s0 + $0x340] sm:$0xff] }
  0xcb   :  { %v890_v23 = vmax.f32 %v807_v19, 0.0  ;;  %v122_v19 = vld [vmem:[%s1862_s0 + $0x360] sm:$0xff] }
  0xcd   :  { %927 = vst.msk [vmem:[%s1863_s3 + $0x20] sm:$0xff] %vm922_vm0, %v890_v23  ;;  %v120_v23 = vld [vmem:[%s1862_s0 + $0x350] sm:$0xff] }
  0xce   :  { %v709_v31 = vpop.f32.mrf.mxu2  ;;  %v514_v36 = vpop.f32.mrf.mxu0 }
  0xcf   :  { %v808_v32 = vpop.f32.mrf.mxu3  ;;  %v710_v35 = vadd.f32 %v709_v31, %v611_v30  ;;  %v613_v37 = vpop.f32.mrf.mxu1  ;;  %v515_v40 = vadd.f32 %v1436_v0, %v514_v36  ;;  %v210_v30 = vpack.c.bf16 %v122_v19, %v118_v18  ;;  %v211_v31 = vpack.c.bf16 %v123_v22, %v119_v21  ;;  %v135_v18 = vld [vmem:[%s1862_s0 + $0x3c8] sm:$0xff]  ;;  %v140_v21 = vld [vmem:[%s1862_s0 + $0x3f0] sm:$0xff]  ;;  %v137_v22 = vld [vmem:[%s1862_s0 + $0x3d8] sm:$0xff] }
  0xd0   :  { %v213_v36 = vpack.c.bf16 %v125_v26, %v121_v25  ;;  %v139_v19 = vld [vmem:[%s1862_s0 + $0x3e8] sm:$0xff] }
  0xd1   :  { %v809_v41 = vadd.f32 %v808_v32, %v710_v35  ;;  %553 = vmatmul.bf16.gmra.mxu0 %v202_v33  ;;  %v614_v43 = vadd.f32 %v613_v37, %v515_v40  ;;  %v212_v35 = vpack.c.bf16 %v124_v24, %v120_v23  ;;  %v141_v23 = vld [vmem:[%s1862_s0 + $0x3f8] sm:$0xff] }
  0xd2   :  { %652 = vmatmul.bf16.gmra.mxu1 %v203_v34 }
  0xd3   :  { %v891_v42 = vmax.f32 %v809_v41, 0.0  ;;  %751 = vmatmul.bf16.gmra.mxu2 %v204_v38 }
  0xd4   :  { %850 = vmatmul.bf16.gmra.mxu3 %v205_v39 }
  0xd5   :  { %928 = vst.msk [vmem:[%s1863_s3 + $0x28] sm:$0xff] %vm922_vm0, %v891_v42 }
  0xd6   :  { %v712_v44 = vpop.f32.mrf.mxu2  ;;  %v516_v47 = vpop.f32.mrf.mxu0 }
  0xd7   :  { %v811_v45 = vpop.f32.mrf.mxu3  ;;  %v713_v46 = vadd.f32 %v712_v44, %v614_v43  ;;  %v615_v48 = vpop.f32.mrf.mxu1  ;;  %v517_v50 = vadd.f32 %v1436_v0, %v516_v47 }
  0xd9   :  { %v812_v49 = vadd.f32 %v811_v45, %v713_v46  ;;  %v616_v60 = vadd.f32 %v615_v48, %v517_v50  ;;  %v126_v48 = vld [vmem:[%s1862_s0 + $0x380] sm:$0xff] }
  0xdb   :  { %v892_v53 = vmax.f32 %v812_v49, 0.0  ;;  %v130_v49 = vld [vmem:[%s1862_s0 + $0x3a0] sm:$0xff] }
  0xdd   :  { %929 = vst.msk [vmem:[%s1863_s3 + $0x30] sm:$0xff] %vm922_vm0, %v892_v53  ;;  %v128_v53 = vld [vmem:[%s1862_s0 + $0x390] sm:$0xff] }
  0xde   :  { %v714_v61 = vpop.f32.mrf.mxu2  ;;  %v519_v3 = vpop.f32.mrf.mxu0 }
  0xdf   :  { %v813_v62 = vpop.f32.mrf.mxu3  ;;  %v715_v2 = vadd.f32 %v714_v61, %v616_v60  ;;  %v618_v4 = vpop.f32.mrf.mxu1  ;;  %v520_v7 = vadd.f32 %v1436_v0, %v519_v3  ;;  %v214_v60 = vpack.c.bf16 %v130_v49, %v126_v48  ;;  %v215_v61 = vpack.c.bf16 %v131_v52, %v127_v51  ;;  %v143_v48 = vld [vmem:[%s1862_s0 + $0x408] sm:$0xff]  ;;  %v148_v51 = vld [vmem:[%s1862_s0 + $0x430] sm:$0xff]  ;;  %v145_v52 = vld [vmem:[%s1862_s0 + $0x418] sm:$0xff] }
  0xe0   :  { %v217_v3 = vpack.c.bf16 %v133_v56, %v129_v55  ;;  %v147_v49 = vld [vmem:[%s1862_s0 + $0x428] sm:$0xff] }
  0xe1   :  { %v814_v8 = vadd.f32 %v813_v62, %v715_v2  ;;  %558 = vmatmul.bf16.gmra.mxu0 %v206_v63  ;;  %v619_v10 = vadd.f32 %v618_v4, %v520_v7  ;;  %v216_v2 = vpack.c.bf16 %v132_v54, %v128_v53  ;;  %v149_v53 = vld [vmem:[%s1862_s0 + $0x438] sm:$0xff] }
  0xe2   :  { %657 = vmatmul.bf16.gmra.mxu1 %v207_v1 }
  0xe3   :  { %v893_v9 = vmax.f32 %v814_v8, 0.0  ;;  %756 = vmatmul.bf16.gmra.mxu2 %v208_v5 }
  0xe4   :  { %855 = vmatmul.bf16.gmra.mxu3 %v209_v6 }
  0xe5   :  { %930 = vst.msk [vmem:[%s1863_s3 + $0x38] sm:$0xff] %vm922_vm0, %v893_v9 }
  0xe6   :  { %v717_v11 = vpop.f32.mrf.mxu2  ;;  %v521_v14 = vpop.f32.mrf.mxu0 }
  0xe7   :  { %v816_v12 = vpop.f32.mrf.mxu3  ;;  %v718_v13 = vadd.f32 %v717_v11, %v619_v10  ;;  %v620_v15 = vpop.f32.mrf.mxu1  ;;  %v522_v17 = vadd.f32 %v1436_v0, %v521_v14 }
  0xe9   :  { %v817_v16 = vadd.f32 %v816_v12, %v718_v13  ;;  %v621_v27 = vadd.f32 %v620_v15, %v522_v17  ;;  %v134_v15 = vld [vmem:[%s1862_s0 + $0x3c0] sm:$0xff] }
  0xeb   :  { %v894_v20 = vmax.f32 %v817_v16, 0.0  ;;  %v138_v16 = vld [vmem:[%s1862_s0 + $0x3e0] sm:$0xff] }
  0xed   :  { %931 = vst.msk [vmem:[%s1863_s3 + $0x40] sm:$0xff] %vm922_vm0, %v894_v20  ;;  %v136_v20 = vld [vmem:[%s1862_s0 + $0x3d0] sm:$0xff] }
  0xee   :  { %v719_v28 = vpop.f32.mrf.mxu2  ;;  %v524_v33 = vpop.f32.mrf.mxu0 }
  0xef   :  { %v818_v29 = vpop.f32.mrf.mxu3  ;;  %v720_v32 = vadd.f32 %v719_v28, %v621_v27  ;;  %v623_v34 = vpop.f32.mrf.mxu1  ;;  %v525_v37 = vadd.f32 %v1436_v0, %v524_v33  ;;  %v218_v27 = vpack.c.bf16 %v138_v16, %v134_v15  ;;  %v219_v28 = vpack.c.bf16 %v139_v19, %v135_v18  ;;  %v151_v15 = vld [vmem:[%s1862_s0 + $0x448] sm:$0xff]  ;;  %v156_v18 = vld [vmem:[%s1862_s0 + $0x470] sm:$0xff]  ;;  %v153_v19 = vld [vmem:[%s1862_s0 + $0x458] sm:$0xff] }
  0xf0   :  { %v221_v33 = vpack.c.bf16 %v141_v23, %v137_v22  ;;  %v155_v16 = vld [vmem:[%s1862_s0 + $0x468] sm:$0xff] }
  0xf1   :  { %v819_v38 = vadd.f32 %v818_v29, %v720_v32  ;;  %563 = vmatmul.bf16.gmra.mxu0 %v210_v30  ;;  %v624_v40 = vadd.f32 %v623_v34, %v525_v37  ;;  %v220_v32 = vpack.c.bf16 %v140_v21, %v136_v20  ;;  %v157_v20 = vld [vmem:[%s1862_s0 + $0x478] sm:$0xff] }
  0xf2   :  { %662 = vmatmul.bf16.gmra.mxu1 %v211_v31 }
  0xf3   :  { %v895_v39 = vmax.f32 %v819_v38, 0.0  ;;  %761 = vmatmul.bf16.gmra.mxu2 %v212_v35 }
  0xf4   :  { %860 = vmatmul.bf16.gmra.mxu3 %v213_v36 }
  0xf5   :  { %932 = vst.msk [vmem:[%s1863_s3 + $0x48] sm:$0xff] %vm922_vm0, %v895_v39 }
  0xf6   :  { %v722_v41 = vpop.f32.mrf.mxu2  ;;  %v526_v44 = vpop.f32.mrf.mxu0 }
  0xf7   :  { %v821_v42 = vpop.f32.mrf.mxu3  ;;  %v723_v43 = vadd.f32 %v722_v41, %v624_v40  ;;  %v625_v45 = vpop.f32.mrf.mxu1  ;;  %v527_v47 = vadd.f32 %v1436_v0, %v526_v44 }
  0xf9   :  { %v822_v46 = vadd.f32 %v821_v42, %v723_v43  ;;  %v626_v57 = vadd.f32 %v625_v45, %v527_v47  ;;  %v142_v45 = vld [vmem:[%s1862_s0 + $0x400] sm:$0xff] }
  0xfb   :  { %v896_v50 = vmax.f32 %v822_v46, 0.0  ;;  %v146_v46 = vld [vmem:[%s1862_s0 + $0x420] sm:$0xff] }
  0xfd   :  { %933 = vst.msk [vmem:[%s1863_s3 + $0x50] sm:$0xff] %vm922_vm0, %v896_v50  ;;  %v144_v50 = vld [vmem:[%s1862_s0 + $0x410] sm:$0xff] }
  0xfe   :  { %v724_v58 = vpop.f32.mrf.mxu2  ;;  %v529_v63 = vpop.f32.mrf.mxu0 }
  0xff   :  { %v823_v59 = vpop.f32.mrf.mxu3  ;;  %v725_v62 = vadd.f32 %v724_v58, %v626_v57  ;;  %v628_v1 = vpop.f32.mrf.mxu1  ;;  %v530_v4 = vadd.f32 %v1436_v0, %v529_v63  ;;  %v222_v57 = vpack.c.bf16 %v146_v46, %v142_v45  ;;  %v223_v58 = vpack.c.bf16 %v147_v49, %v143_v48 }
 0x100   :  { %v225_v63 = vpack.c.bf16 %v149_v53, %v145_v52 }
 0x101   :  { %v824_v5 = vadd.f32 %v823_v59, %v725_v62  ;;  %568 = vmatmul.bf16.gmra.mxu0 %v214_v60  ;;  %v629_v7 = vadd.f32 %v628_v1, %v530_v4  ;;  %v224_v62 = vpack.c.bf16 %v148_v51, %v144_v50 }
 0x102   :  { %667 = vmatmul.bf16.gmra.mxu1 %v215_v61 }
 0x103   :  { %v897_v6 = vmax.f32 %v824_v5, 0.0  ;;  %766 = vmatmul.bf16.gmra.mxu2 %v216_v2 }
 0x104   :  { %865 = vmatmul.bf16.gmra.mxu3 %v217_v3 }
 0x105   :  { %934 = vst.msk [vmem:[%s1863_s3 + $0x58] sm:$0xff] %vm922_vm0, %v897_v6 }
 0x106   :  { %v727_v8 = vpop.f32.mrf.mxu2  ;;  %v531_v11 = vpop.f32.mrf.mxu0 }
 0x107   :  { %v826_v9 = vpop.f32.mrf.mxu3  ;;  %v728_v10 = vadd.f32 %v727_v8, %v629_v7  ;;  %v630_v12 = vpop.f32.mrf.mxu1  ;;  %v532_v14 = vadd.f32 %v1436_v0, %v531_v11 }
 0x109   :  { %v827_v13 = vadd.f32 %v826_v9, %v728_v10  ;;  %v631_v24 = vadd.f32 %v630_v12, %v532_v14  ;;  %v150_v12 = vld [vmem:[%s1862_s0 + $0x440] sm:$0xff] }
 0x10b   :  { %v898_v17 = vmax.f32 %v827_v13, 0.0  ;;  %v154_v13 = vld [vmem:[%s1862_s0 + $0x460] sm:$0xff] }
 0x10d   :  { %935 = vst.msk [vmem:[%s1863_s3 + $0x60] sm:$0xff] %vm922_vm0, %v898_v17  ;;  %v152_v17 = vld [vmem:[%s1862_s0 + $0x450] sm:$0xff] }
 0x10e   :  { %v729_v25 = vpop.f32.mrf.mxu2  ;;  %v534_v30 = vpop.f32.mrf.mxu0 }
 0x10f   :  { %v828_v26 = vpop.f32.mrf.mxu3  ;;  %v730_v29 = vadd.f32 %v729_v25, %v631_v24  ;;  %v633_v31 = vpop.f32.mrf.mxu1  ;;  %v535_v34 = vadd.f32 %v1436_v0, %v534_v30  ;;  %v226_v24 = vpack.c.bf16 %v154_v13, %v150_v12  ;;  %v227_v25 = vpack.c.bf16 %v155_v16, %v151_v15 }
 0x110   :  { %v229_v30 = vpack.c.bf16 %v157_v20, %v153_v19 }
 0x111   :  { %v829_v35 = vadd.f32 %v828_v26, %v730_v29  ;;  %573 = vmatmul.bf16.gmra.mxu0 %v218_v27  ;;  %v634_v37 = vadd.f32 %v633_v31, %v535_v34  ;;  %v228_v29 = vpack.c.bf16 %v156_v18, %v152_v17 }
 0x112   :  { %672 = vmatmul.bf16.gmra.mxu1 %v219_v28 }
 0x113   :  { %v899_v36 = vmax.f32 %v829_v35, 0.0  ;;  %771 = vmatmul.bf16.gmra.mxu2 %v220_v32 }
 0x114   :  { %870 = vmatmul.bf16.gmra.mxu3 %v221_v33 }
 0x115   :  { %936 = vst.msk [vmem:[%s1863_s3 + $0x68] sm:$0xff] %vm922_vm0, %v899_v36 }
 0x116   :  { %v732_v38 = vpop.f32.mrf.mxu2  ;;  %v536_v41 = vpop.f32.mrf.mxu0 }
 0x117   :  { %v831_v39 = vpop.f32.mrf.mxu3  ;;  %v733_v40 = vadd.f32 %v732_v38, %v634_v37  ;;  %v635_v42 = vpop.f32.mrf.mxu1  ;;  %v537_v44 = vadd.f32 %v1436_v0, %v536_v41 }
 0x119   :  { %v832_v43 = vadd.f32 %v831_v39, %v733_v40  ;;  %v636_v54 = vadd.f32 %v635_v42, %v537_v44 }
 0x11b   :  { %v900_v47 = vmax.f32 %v832_v43, 0.0 }
 0x11d   :  { %937 = vst.msk [vmem:[%s1863_s3 + $0x70] sm:$0xff] %vm922_vm0, %v900_v47 }
 0x11e   :  { %v734_v55 = vpop.f32.mrf.mxu2  ;;  %v539_v60 = vpop.f32.mrf.mxu0 }
 0x11f   :  { %v833_v56 = vpop.f32.mrf.mxu3  ;;  %v735_v59 = vadd.f32 %v734_v55, %v636_v54  ;;  %v638_v61 = vpop.f32.mrf.mxu1  ;;  %v540_v1 = vadd.f32 %v1436_v0, %v539_v60 }
 0x121   :  { %v834_v2 = vadd.f32 %v833_v56, %v735_v59  ;;  %578 = vmatmul.bf16.gmra.mxu0 %v222_v57  ;;  %v639_v4 = vadd.f32 %v638_v61, %v540_v1 }
 0x122   :  { %677 = vmatmul.bf16.gmra.mxu1 %v223_v58 }
 0x123   :  { %v901_v3 = vmax.f32 %v834_v2, 0.0  ;;  %776 = vmatmul.bf16.gmra.mxu2 %v224_v62 }
 0x124   :  { %875 = vmatmul.bf16.gmra.mxu3 %v225_v63 }
 0x125   :  { %938 = vst.msk [vmem:[%s1863_s3 + $0x78] sm:$0xff] %vm922_vm0, %v901_v3 }
 0x126   :  { %v737_v5 = vpop.f32.mrf.mxu2  ;;  %v541_v8 = vpop.f32.mrf.mxu0 }
 0x127   :  { %v836_v6 = vpop.f32.mrf.mxu3  ;;  %v738_v7 = vadd.f32 %v737_v5, %v639_v4  ;;  %v640_v9 = vpop.f32.mrf.mxu1  ;;  %v542_v11 = vadd.f32 %v1436_v0, %v541_v8 }
 0x129   :  { %v837_v10 = vadd.f32 %v836_v6, %v738_v7  ;;  %v641_v21 = vadd.f32 %v640_v9, %v542_v11 }
 0x12b   :  { %v902_v14 = vmax.f32 %v837_v10, 0.0 }
 0x12d   :  { %939 = vst.msk [vmem:[%s1863_s3 + $0x80] sm:$0xff] %vm922_vm0, %v902_v14 }
 0x12e   :  { %v739_v22 = vpop.f32.mrf.mxu2  ;;  %v544_v27 = vpop.f32.mrf.mxu0 }
 0x12f   :  { %v838_v23 = vpop.f32.mrf.mxu3  ;;  %v740_v26 = vadd.f32 %v739_v22, %v641_v21  ;;  %v643_v28 = vpop.f32.mrf.mxu1  ;;  %v545_v31 = vadd.f32 %v1436_v0, %v544_v27 }
 0x131   :  { %v839_v32 = vadd.f32 %v838_v23, %v740_v26  ;;  %583 = vmatmul.bf16.gmra.mxu0 %v226_v24  ;;  %v644_v34 = vadd.f32 %v643_v28, %v545_v31 }
 0x132   :  { %682 = vmatmul.bf16.gmra.mxu1 %v227_v25 }
 0x133   :  { %v903_v33 = vmax.f32 %v839_v32, 0.0  ;;  %781 = vmatmul.bf16.gmra.mxu2 %v228_v29 }
 0x134   :  { %880 = vmatmul.bf16.gmra.mxu3 %v229_v30 }
 0x135   :  { %940 = vst.msk [vmem:[%s1863_s3 + $0x88] sm:$0xff] %vm922_vm0, %v903_v33 }
 0x136   :  { %v742_v35 = vpop.f32.mrf.mxu2  ;;  %v546_v38 = vpop.f32.mrf.mxu0 }
 0x137   :  { %v841_v36 = vpop.f32.mrf.mxu3  ;;  %v743_v37 = vadd.f32 %v742_v35, %v644_v34  ;;  %v645_v39 = vpop.f32.mrf.mxu1  ;;  %v547_v41 = vadd.f32 %v1436_v0, %v546_v38 }
 0x139   :  { %v842_v40 = vadd.f32 %v841_v36, %v743_v37  ;;  %v646_v43 = vadd.f32 %v645_v39, %v547_v41 }
 0x13b   :  { %v904_v42 = vmax.f32 %v842_v40, 0.0 }
 0x13d   :  { %941 = vst.msk [vmem:[%s1863_s3 + $0x90] sm:$0xff] %vm922_vm0, %v904_v42 }
 0x13e   :  { %v744_v44 = vpop.f32.mrf.mxu2  ;;  %v549_v47 = vpop.f32.mrf.mxu0 }
 0x13f   :  { %v843_v45 = vpop.f32.mrf.mxu3  ;;  %v745_v46 = vadd.f32 %v744_v44, %v646_v43  ;;  %v648_v48 = vpop.f32.mrf.mxu1  ;;  %v550_v49 = vadd.f32 %v1436_v0, %v549_v47 }
 0x141   :  { %v844_v50 = vadd.f32 %v843_v45, %v745_v46  ;;  %v649_v52 = vadd.f32 %v648_v48, %v550_v49 }
 0x143   :  { %v905_v51 = vmax.f32 %v844_v50, 0.0 }
 0x145   :  { %942 = vst.msk [vmem:[%s1863_s3 + $0x98] sm:$0xff] %vm922_vm0, %v905_v51 }
 0x146   :  { %v747_v53 = vpop.f32.mrf.mxu2  ;;  %v551_v56 = vpop.f32.mrf.mxu0 }
 0x147   :  { %v846_v54 = vpop.f32.mrf.mxu3  ;;  %v748_v55 = vadd.f32 %v747_v53, %v649_v52  ;;  %v650_v57 = vpop.f32.mrf.mxu1  ;;  %v552_v59 = vadd.f32 %v1436_v0, %v551_v56 }
 0x149   :  { %v847_v58 = vadd.f32 %v846_v54, %v748_v55  ;;  %v651_v61 = vadd.f32 %v650_v57, %v552_v59 }
 0x14b   :  { %v906_v60 = vmax.f32 %v847_v58, 0.0 }
 0x14d   :  { %943 = vst.msk [vmem:[%s1863_s3 + $0xa0] sm:$0xff] %vm922_vm0, %v906_v60 }
 0x14e   :  { %v749_v62 = vpop.f32.mrf.mxu2  ;;  %v554_v2 = vpop.f32.mrf.mxu0 }
 0x14f   :  { %v848_v63 = vpop.f32.mrf.mxu3  ;;  %v750_v1 = vadd.f32 %v749_v62, %v651_v61  ;;  %v653_v3 = vpop.f32.mrf.mxu1  ;;  %v555_v4 = vadd.f32 %v1436_v0, %v554_v2 }
 0x151   :  { %v849_v5 = vadd.f32 %v848_v63, %v750_v1  ;;  %v654_v7 = vadd.f32 %v653_v3, %v555_v4 }
 0x153   :  { %v907_v6 = vmax.f32 %v849_v5, 0.0 }
 0x155   :  { %944 = vst.msk [vmem:[%s1863_s3 + $0xa8] sm:$0xff] %vm922_vm0, %v907_v6 }
 0x156   :  { %v752_v8 = vpop.f32.mrf.mxu2  ;;  %v556_v11 = vpop.f32.mrf.mxu0 }
 0x157   :  { %v851_v9 = vpop.f32.mrf.mxu3  ;;  %v753_v10 = vadd.f32 %v752_v8, %v654_v7  ;;  %v655_v12 = vpop.f32.mrf.mxu1  ;;  %v557_v14 = vadd.f32 %v1436_v0, %v556_v11 }
 0x159   :  { %v852_v13 = vadd.f32 %v851_v9, %v753_v10  ;;  %v656_v16 = vadd.f32 %v655_v12, %v557_v14 }
 0x15b   :  { %v908_v15 = vmax.f32 %v852_v13, 0.0 }
 0x15d   :  { %945 = vst.msk [vmem:[%s1863_s3 + $0xb0] sm:$0xff] %vm922_vm0, %v908_v15 }
 0x15e   :  { %v754_v17 = vpop.f32.mrf.mxu2  ;;  %v559_v20 = vpop.f32.mrf.mxu0 }
 0x15f   :  { %v853_v18 = vpop.f32.mrf.mxu3  ;;  %v755_v19 = vadd.f32 %v754_v17, %v656_v16  ;;  %v658_v21 = vpop.f32.mrf.mxu1  ;;  %v560_v22 = vadd.f32 %v1436_v0, %v559_v20 }
 0x161   :  { %v854_v23 = vadd.f32 %v853_v18, %v755_v19  ;;  %v659_v25 = vadd.f32 %v658_v21, %v560_v22 }
 0x163   :  { %v909_v24 = vmax.f32 %v854_v23, 0.0 }
 0x165   :  { %946 = vst.msk [vmem:[%s1863_s3 + $0xb8] sm:$0xff] %vm922_vm0, %v909_v24 }
 0x166   :  { %v757_v26 = vpop.f32.mrf.mxu2  ;;  %v561_v29 = vpop.f32.mrf.mxu0 }
 0x167   :  { %v856_v27 = vpop.f32.mrf.mxu3  ;;  %v758_v28 = vadd.f32 %v757_v26, %v659_v25  ;;  %v660_v30 = vpop.f32.mrf.mxu1  ;;  %v562_v32 = vadd.f32 %v1436_v0, %v561_v29 }
 0x169   :  { %v857_v31 = vadd.f32 %v856_v27, %v758_v28  ;;  %v661_v34 = vadd.f32 %v660_v30, %v562_v32 }
 0x16b   :  { %v910_v33 = vmax.f32 %v857_v31, 0.0 }
 0x16d   :  { %947 = vst.msk [vmem:[%s1863_s3 + $0xc0] sm:$0xff] %vm922_vm0, %v910_v33 }
 0x16e   :  { %v759_v35 = vpop.f32.mrf.mxu2  ;;  %v564_v38 = vpop.f32.mrf.mxu0 }
 0x16f   :  { %v858_v36 = vpop.f32.mrf.mxu3  ;;  %v760_v37 = vadd.f32 %v759_v35, %v661_v34  ;;  %v663_v39 = vpop.f32.mrf.mxu1  ;;  %v565_v40 = vadd.f32 %v1436_v0, %v564_v38 }
 0x171   :  { %v859_v41 = vadd.f32 %v858_v36, %v760_v37  ;;  %v664_v43 = vadd.f32 %v663_v39, %v565_v40 }
 0x173   :  { %v911_v42 = vmax.f32 %v859_v41, 0.0 }
 0x175   :  { %948 = vst.msk [vmem:[%s1863_s3 + $0xc8] sm:$0xff] %vm922_vm0, %v911_v42 }
 0x176   :  { %v762_v44 = vpop.f32.mrf.mxu2  ;;  %v566_v47 = vpop.f32.mrf.mxu0 }
 0x177   :  { %v861_v45 = vpop.f32.mrf.mxu3  ;;  %v763_v46 = vadd.f32 %v762_v44, %v664_v43  ;;  %v665_v48 = vpop.f32.mrf.mxu1  ;;  %v567_v50 = vadd.f32 %v1436_v0, %v566_v47 }
 0x179   :  { %v862_v49 = vadd.f32 %v861_v45, %v763_v46  ;;  %v666_v52 = vadd.f32 %v665_v48, %v567_v50 }
 0x17b   :  { %v912_v51 = vmax.f32 %v862_v49, 0.0 }
 0x17d   :  { %949 = vst.msk [vmem:[%s1863_s3 + $0xd0] sm:$0xff] %vm922_vm0, %v912_v51 }
 0x17e   :  { %v764_v53 = vpop.f32.mrf.mxu2  ;;  %v569_v56 = vpop.f32.mrf.mxu0 }
 0x17f   :  { %v863_v54 = vpop.f32.mrf.mxu3  ;;  %v765_v55 = vadd.f32 %v764_v53, %v666_v52  ;;  %v668_v57 = vpop.f32.mrf.mxu1  ;;  %v570_v58 = vadd.f32 %v1436_v0, %v569_v56 }
 0x181   :  { %v864_v59 = vadd.f32 %v863_v54, %v765_v55  ;;  %v669_v61 = vadd.f32 %v668_v57, %v570_v58  ;;  %v1124_v58 = vld [vmem:[%s1861_s2] ss:$0 sm:$0xff] }
 0x183   :  { %v913_v60 = vmax.f32 %v864_v59, 0.0 }
 0x185   :  { %950 = vst.msk [vmem:[%s1863_s3 + $0xd8] sm:$0xff] %vm922_vm0, %v913_v60 }
 0x186   :  { %v767_v62 = vpop.f32.mrf.mxu2  ;;  %v571_v2 = vpop.f32.mrf.mxu0 }
 0x187   :  { %v866_v63 = vpop.f32.mrf.mxu3  ;;  %v768_v1 = vadd.f32 %v767_v62, %v669_v61  ;;  %v670_v3 = vpop.f32.mrf.mxu1  ;;  %v572_v5 = vadd.f32 %v1436_v0, %v571_v2 }
 0x189   :  { %v867_v4 = vadd.f32 %v866_v63, %v768_v1  ;;  %v671_v7 = vadd.f32 %v670_v3, %v572_v5 }
 0x18b   :  { %v914_v6 = vmax.f32 %v867_v4, 0.0 }
 0x18d   :  { %951 = vst.msk [vmem:[%s1863_s3 + $0xe0] sm:$0xff] %vm922_vm0, %v914_v6 }
 0x18e   :  { %v769_v8 = vpop.f32.mrf.mxu2  ;;  %v574_v11 = vpop.f32.mrf.mxu0 }
 0x18f   :  { %v868_v9 = vpop.f32.mrf.mxu3  ;;  %v770_v10 = vadd.f32 %v769_v8, %v671_v7  ;;  %v673_v12 = vpop.f32.mrf.mxu1  ;;  %v575_v13 = vadd.f32 %v1436_v0, %v574_v11 }
 0x191   :  { %v869_v14 = vadd.f32 %v868_v9, %v770_v10  ;;  %v674_v16 = vadd.f32 %v673_v12, %v575_v13 }
 0x193   :  { %v915_v15 = vmax.f32 %v869_v14, 0.0 }
 0x195   :  { %952 = vst.msk [vmem:[%s1863_s3 + $0xe8] sm:$0xff] %vm922_vm0, %v915_v15 }
 0x196   :  { %v772_v17 = vpop.f32.mrf.mxu2  ;;  %v576_v20 = vpop.f32.mrf.mxu0 }
 0x197   :  { %v871_v18 = vpop.f32.mrf.mxu3  ;;  %v773_v19 = vadd.f32 %v772_v17, %v674_v16  ;;  %v675_v21 = vpop.f32.mrf.mxu1  ;;  %v577_v23 = vadd.f32 %v1436_v0, %v576_v20 }
 0x199   :  { %v872_v22 = vadd.f32 %v871_v18, %v773_v19  ;;  %v676_v25 = vadd.f32 %v675_v21, %v577_v23 }
 0x19b   :  { %v916_v24 = vmax.f32 %v872_v22, 0.0 }
 0x19d   :  { %953 = vst.msk [vmem:[%s1863_s3 + $0xf0] sm:$0xff] %vm922_vm0, %v916_v24 }
 0x19e   :  { %v774_v26 = vpop.f32.mrf.mxu2  ;;  %v579_v29 = vpop.f32.mrf.mxu0 }
 0x19f   :  { %v873_v27 = vpop.f32.mrf.mxu3  ;;  %v775_v28 = vadd.f32 %v774_v26, %v676_v25  ;;  %v678_v30 = vpop.f32.mrf.mxu1  ;;  %v580_v31 = vadd.f32 %v1436_v0, %v579_v29 }
 0x1a1   :  { %v874_v32 = vadd.f32 %v873_v27, %v775_v28  ;;  %v679_v34 = vadd.f32 %v678_v30, %v580_v31 }
 0x1a3   :  { %v917_v33 = vmax.f32 %v874_v32, 0.0 }
 0x1a5   :  { %954 = vst.msk [vmem:[%s1863_s3 + $0xf8] sm:$0xff] %vm922_vm0, %v917_v33 }
 0x1a6   :  { %v777_v35 = vpop.f32.mrf.mxu2  ;;  %v581_v38 = vpop.f32.mrf.mxu0 }
 0x1a7   :  { %v876_v36 = vpop.f32.mrf.mxu3  ;;  %v778_v37 = vadd.f32 %v777_v35, %v679_v34  ;;  %v680_v39 = vpop.f32.mrf.mxu1  ;;  %v582_v41 = vadd.f32 %v1436_v0, %v581_v38 }
 0x1a9   :  { %v877_v40 = vadd.f32 %v876_v36, %v778_v37  ;;  %v681_v43 = vadd.f32 %v680_v39, %v582_v41 }
 0x1ab   :  { %v918_v42 = vmax.f32 %v877_v40, 0.0 }
 0x1ad   :  { %955 = vst.msk [vmem:[%s1863_s3 + $0x100] sm:$0xff] %vm922_vm0, %v918_v42 }
 0x1ae   :  { %v779_v44 = vpop.f32.mrf.mxu2  ;;  %v584_v47 = vpop.f32.mrf.mxu0 }
 0x1af   :  { %v878_v45 = vpop.f32.mrf.mxu3  ;;  %v780_v46 = vadd.f32 %v779_v44, %v681_v43  ;;  %v585_v48 = vadd.f32 %v1436_v0, %v584_v47  ;;  %v683_v50 = vpop.f32.mrf.mxu1 }
 0x1b1   :  { %v879_v49 = vadd.f32 %v878_v45, %v780_v46  ;;  %v684_v52 = vadd.f32 %v683_v50, %v585_v48 }
 0x1b3   :  { %v919_v51 = vmax.f32 %v879_v49, 0.0 }
 0x1b5   :  { %956 = vst.msk [vmem:[%s1863_s3 + $0x108] sm:$0xff] %vm922_vm0, %v919_v51 }
 0x1b6   :  { %v782_v53 = vpop.f32.mrf.mxu2  ;;  %v586_v56 = vpop.f32.mrf.mxu0 }
 0x1b7   :  { %v881_v54 = vpop.f32.mrf.mxu3  ;;  %v783_v55 = vadd.f32 %v782_v53, %v684_v52  ;;  %v587_v59 = vadd.f32 %v1124_v58, %v586_v56  ;;  %v685_v60 = vpop.f32.mrf.mxu1 }
 0x1b9   :  { %v882_v57 = vadd.f32 %v881_v54, %v783_v55  ;;  %v686_v61 = vadd.f32 %v685_v60, %v587_v59 }
 0x1bb   :  { %v920_v0 = vmax.f32 %v882_v57, 0.0 }
 0x1bd   :  { %957 = vst.msk [vmem:[%s1863_s3 + $0x110] sm:$0xff] %vm922_vm0, %v920_v0 }
 0x1be   :  { %v784_v62 = vpop.f32.mrf.mxu2 }
 0x1bf   :  { %v785_v63 = vadd.f32 %v784_v62, %v686_v61  ;;  %v883_v1 = vpop.f32.mrf.mxu3 }
 0x1c1   :  { %v884_v2 = vadd.f32 %v883_v1, %v785_v63 }
 0x1c3   :  { %v921_v3 = vmax.f32 %v884_v2, 0.0 }
 0x1c5   :  { %958 = vst.msk [vmem:[%s1863_s3 + $0x118] sm:$0xff] %vm922_vm0, %v921_v3 }

// kernel: _lambda_.18
= control target key start
LH: loop header
LB: loop body
LE: loop exit
PB: predicated region body
PF: predicated region fallthrough
CT: control target
= control target key end

     0   :  { %vm427_vm0 = vcmask 523264   ;;  %s1443_s1 = inlined_call_operand.vmem [shape: bf16[576,64], index: 1, kind: input, shape index: {}]   ;;  %s1444_s2 = inlined_call_operand.vmem [shape: f32[1,64], index: 2, kind: input, shape index: {}]   ;;  %s1445_s0 = inlined_call_operand.vmem [shape: f32[128,576], index: 0, kind: input, shape index: {}]   ;;  %s1446_s3 = inlined_call_operand.vmem [shape: f32[128,64], index: 3, kind: output, shape index: {}]  }
   0x1   :  { %v892_v0 = vld [vmem:[%s1443_s1 + $0x38] sm:$0xff]  ;;  %v891_v1 = vld [vmem:[%s1443_s1 + $0x30] sm:$0xff]  ;;  %v890_v2 = vld [vmem:[%s1443_s1 + $0x28] sm:$0xff] }
   0x2   :  { %921 = vmatpush.bf16.msra.mxu1 %v892_v0  ;;  %922 = vmatpush.bf16.msra.mxu2 %v892_v0  ;;  %v889_v3 = vld [vmem:[%s1443_s1 + $0x20] sm:$0xff]  ;;  %v888_v4 = vld [vmem:[%s1443_s1 + $0x18] sm:$0xff]  ;;  %v887_v5 = vld [vmem:[%s1443_s1 + $0x10] sm:$0xff] }
   0x3   :  { %923 = vmatpush.bf16.msra.mxu3 %v892_v0  ;;  %452 = vmatpush.bf16.msra.mxu0 %v892_v0  ;;  %v886_v6 = vld [vmem:[%s1443_s1 + $0x8] sm:$0xff]  ;;  %v885_v7 = vld [vmem:[%s1443_s1] sm:$0xff]  ;;  %v908_v16 = vld [vmem:[%s1443_s1 + $0xb8] sm:$0xff] }
   0x4   :  { %v35_v8 = vld [vmem:[%s1445_s0 + $0xa0] sm:$0xff]  ;;  %v40_v9 = vld [vmem:[%s1445_s0 + $0xc8] sm:$0xff]  ;;  %v900_v17 = vld [vmem:[%s1443_s1 + $0x78] sm:$0xff] }
   0x5   :  { %v55_v10 = vld [vmem:[%s1445_s0 + $0x140] sm:$0xff]  ;;  %v60_v11 = vld [vmem:[%s1445_s0 + $0x168] sm:$0xff]  ;;  %v105_v18 = vpack.c.bf16 %v40_v9, %v35_v8  ;;  %v916_v22 = vld [vmem:[%s1443_s1 + $0xf8] sm:$0xff] }
   0x6   :  { %924 = vmatpush.bf16.msra.mxu1 %v891_v1  ;;  %925 = vmatpush.bf16.msra.mxu2 %v891_v1  ;;  %v75_v12 = vld [vmem:[%s1445_s0 + $0x1e0] sm:$0xff]  ;;  %v80_v13 = vld [vmem:[%s1445_s0 + $0x208] sm:$0xff]  ;;  %v115_v19 = vpack.c.bf16 %v60_v11, %v55_v10  ;;  %v920_v23 = vld [vmem:[%s1443_s1 + $0x118] sm:$0xff] }
   0x7   :  { %926 = vmatpush.bf16.msra.mxu3 %v891_v1  ;;  %453 = vmatpush.bf16.msra.mxu0 %v891_v1  ;;  %v15_v14 = vld [vmem:[%s1445_s0] sm:$0xff]  ;;  %v20_v15 = vld [vmem:[%s1445_s0 + $0x28] sm:$0xff]  ;;  %v125_v20 = vpack.c.bf16 %v80_v13, %v75_v12  ;;  %v907_v24 = vld [vmem:[%s1443_s1 + $0xb0] sm:$0xff] }
   0x8   :  { %v95_v21 = vpack.c.bf16 %v20_v15, %v15_v14  ;;  %v899_v25 = vld [vmem:[%s1443_s1 + $0x70] sm:$0xff]  ;;  %v906_v28 = vld [vmem:[%s1443_s1 + $0xa8] sm:$0xff]  ;;  %v905_v32 = vld [vmem:[%s1443_s1 + $0xa0] sm:$0xff] }
   0x9   :  { %v915_v26 = vld [vmem:[%s1443_s1 + $0xf0] sm:$0xff]  ;;  %v898_v29 = vld [vmem:[%s1443_s1 + $0x68] sm:$0xff]  ;;  %v897_v33 = vld [vmem:[%s1443_s1 + $0x60] sm:$0xff] }
   0xa   :  { %927 = vmatpush.bf16.msra.mxu1 %v890_v2  ;;  %928 = vmatpush.bf16.msra.mxu2 %v890_v2  ;;  %v919_v27 = vld [vmem:[%s1443_s1 + $0x110] sm:$0xff]  ;;  %v914_v30 = vld [vmem:[%s1443_s1 + $0xe8] sm:$0xff]  ;;  %v913_v34 = vld [vmem:[%s1443_s1 + $0xe0] sm:$0xff] }
   0xb   :  { %929 = vmatpush.bf16.msra.mxu3 %v890_v2  ;;  %454 = vmatpush.bf16.msra.mxu0 %v890_v2  ;;  %v918_v31 = vld [vmem:[%s1443_s1 + $0x108] sm:$0xff]  ;;  %v45_v35 = vld [vmem:[%s1445_s0 + $0xf0] sm:$0xff]  ;;  %v50_v36 = vld [vmem:[%s1445_s0 + $0x118] sm:$0xff] }
   0xc   :  { %v65_v37 = vld [vmem:[%s1445_s0 + $0x190] sm:$0xff]  ;;  %v70_v38 = vld [vmem:[%s1445_s0 + $0x1b8] sm:$0xff]  ;;  %v917_v43 = vld [vmem:[%s1443_s1 + $0x100] sm:$0xff]  ;;  %v110_v46 = vpack.c.bf16 %v50_v36, %v45_v35 }
   0xd   :  { %v85_v39 = vld [vmem:[%s1445_s0 + $0x230] sm:$0xff]  ;;  %v90_v40 = vld [vmem:[%s1445_s0 + $0x258] sm:$0xff]  ;;  %v120_v47 = vpack.c.bf16 %v70_v38, %v65_v37  ;;  %v902_v54 = vld [vmem:[%s1443_s1 + $0x88] sm:$0xff] }
   0xe   :  { %930 = vmatpush.bf16.msra.mxu1 %v889_v3  ;;  %931 = vmatpush.bf16.msra.mxu2 %v889_v3  ;;  %v25_v41 = vld [vmem:[%s1445_s0 + $0x50] sm:$0xff]  ;;  %v30_v42 = vld [vmem:[%s1445_s0 + $0x78] sm:$0xff]  ;;  %v130_v48 = vpack.c.bf16 %v90_v40, %v85_v39  ;;  %v894_v55 = vld [vmem:[%s1443_s1 + $0x48] sm:$0xff] }
   0xf   :  { %932 = vmatpush.bf16.msra.mxu3 %v889_v3  ;;  %455 = vmatpush.bf16.msra.mxu0 %v889_v3  ;;  %v904_v44 = vld [vmem:[%s1443_s1 + $0x98] sm:$0xff]  ;;  %v100_v49 = vpack.c.bf16 %v30_v42, %v25_v41  ;;  %v903_v51 = vld [vmem:[%s1443_s1 + $0x90] sm:$0xff]  ;;  %v910_v56 = vld [vmem:[%s1443_s1 + $0xc8] sm:$0xff] }
  0x10   :  { %v896_v45 = vld [vmem:[%s1443_s1 + $0x58] sm:$0xff]  ;;  %v895_v52 = vld [vmem:[%s1443_s1 + $0x50] sm:$0xff]  ;;  %v901_v57 = vld [vmem:[%s1443_s1 + $0x80] sm:$0xff] }
  0x11   :  { %v912_v50 = vld [vmem:[%s1443_s1 + $0xd8] sm:$0xff]  ;;  %v911_v53 = vld [vmem:[%s1443_s1 + $0xd0] sm:$0xff]  ;;  %v893_v58 = vld [vmem:[%s1443_s1 + $0x40] sm:$0xff] }
  0x12   :  { %933 = vmatpush.bf16.msra.mxu1 %v888_v4  ;;  %934 = vmatpush.bf16.msra.mxu2 %v888_v4  ;;  %v909_v59 = vld [vmem:[%s1443_s1 + $0xc0] sm:$0xff]  ;;  %v16_v60 = vld [vmem:[%s1445_s0 + $0x8] sm:$0xff]  ;;  %v21_v61 = vld [vmem:[%s1445_s0 + $0x30] sm:$0xff] }
  0x13   :  { %935 = vmatpush.bf16.msra.mxu3 %v888_v4  ;;  %456 = vmatpush.bf16.msra.mxu0 %v888_v4  ;;  %v17_v62 = vld [vmem:[%s1445_s0 + $0x10] sm:$0xff]  ;;  %v22_v63 = vld [vmem:[%s1445_s0 + $0x38] sm:$0xff]  ;;  %v23_v1 = vld [vmem:[%s1445_s0 + $0x40] sm:$0xff]  ;;  %v96_v4 = vpack.c.bf16 %v21_v61, %v16_v60 }
  0x14   :  { %v18_v0 = vld [vmem:[%s1445_s0 + $0x18] sm:$0xff]  ;;  %v19_v2 = vld [vmem:[%s1445_s0 + $0x20] sm:$0xff]  ;;  %v24_v3 = vld [vmem:[%s1445_s0 + $0x48] sm:$0xff] }
  0x15   :  { %v26_v8 = vld [vmem:[%s1445_s0 + $0x58] sm:$0xff]  ;;  %v31_v9 = vld [vmem:[%s1445_s0 + $0x80] sm:$0xff]  ;;  %v32_v11 = vld [vmem:[%s1445_s0 + $0x88] sm:$0xff] }
  0x16   :  { %936 = vmatpush.bf16.msra.mxu1 %v887_v5  ;;  %937 = vmatpush.bf16.msra.mxu2 %v887_v5  ;;  %v27_v10 = vld [vmem:[%s1445_s0 + $0x60] sm:$0xff]  ;;  %v28_v12 = vld [vmem:[%s1445_s0 + $0x68] sm:$0xff]  ;;  %v33_v13 = vld [vmem:[%s1445_s0 + $0x90] sm:$0xff] }
  0x17   :  { %938 = vmatpush.bf16.msra.mxu3 %v887_v5  ;;  %457 = vmatpush.bf16.msra.mxu0 %v887_v5  ;;  %v97_v5 = vpack.c.bf16 %v22_v63, %v17_v62  ;;  %v29_v14 = vld [vmem:[%s1445_s0 + $0x70] sm:$0xff]  ;;  %v34_v15 = vld [vmem:[%s1445_s0 + $0x98] sm:$0xff]  ;;  %v52_v35 = vld [vmem:[%s1445_s0 + $0x128] sm:$0xff] }
  0x18   :  { %v48_v36 = vld [vmem:[%s1445_s0 + $0x108] sm:$0xff]  ;;  %v53_v37 = vld [vmem:[%s1445_s0 + $0x130] sm:$0xff]  ;;  %v54_v39 = vld [vmem:[%s1445_s0 + $0x138] sm:$0xff] }
  0x19   :  { %v49_v38 = vld [vmem:[%s1445_s0 + $0x110] sm:$0xff]  ;;  %v113_v42 = vpack.c.bf16 %v53_v37, %v48_v36  ;;  %v68_v60 = vld [vmem:[%s1445_s0 + $0x1a8] sm:$0xff]  ;;  %v74_v63 = vld [vmem:[%s1445_s0 + $0x1d8] sm:$0xff] }
  0x1a   :  { %939 = vmatpush.bf16.msra.mxu1 %v886_v6  ;;  %940 = vmatpush.bf16.msra.mxu2 %v886_v6  ;;  %v73_v61 = vld [vmem:[%s1445_s0 + $0x1d0] sm:$0xff] }
  0x1b   :  { %941 = vmatpush.bf16.msra.mxu3 %v886_v6  ;;  %458 = vmatpush.bf16.msra.mxu0 %v886_v6  ;;  %v98_v6 = vpack.c.bf16 %v23_v1, %v18_v0  ;;  %v69_v62 = vld [vmem:[%s1445_s0 + $0x1b0] sm:$0xff] }
  0x1e   :  { %942 = vmatpush.bf16.msra.mxu1 %v885_v7  ;;  %943 = vmatpush.bf16.msra.mxu2 %v885_v7 }
  0x1f   :  { %944 = vmatpush.bf16.msra.mxu3 %v885_v7  ;;  %459 = vmatpush.bf16.msra.mxu0 %v885_v7  ;;  %v99_v7 = vpack.c.bf16 %v24_v3, %v19_v2  ;;  %v123_v2 = vpack.c.bf16 %v73_v61, %v68_v60  ;;  %v124_v3 = vpack.c.bf16 %v74_v63, %v69_v62 }
  0x21   :  { %470 = vmatmul.bf16.vlgmr.msra.gmra.mxu1 %v105_v18  ;;  %480 = vmatmul.bf16.vlgmr.msra.gmra.mxu2 %v115_v19  ;;  %v103_v18 = vpack.c.bf16 %v33_v13, %v28_v12  ;;  %v104_v19 = vpack.c.bf16 %v34_v15, %v29_v14 }
  0x22   :  { %550 = vmatpush.bf16.msrb.mxu2 %v908_v16  ;;  %501 = vmatpush.bf16.msrb.mxu1 %v900_v17  ;;  %v101_v16 = vpack.c.bf16 %v31_v9, %v26_v8  ;;  %v102_v17 = vpack.c.bf16 %v32_v11, %v27_v10  ;;  %v78_v8 = vld [vmem:[%s1445_s0 + $0x1f8] sm:$0xff]  ;;  %v83_v9 = vld [vmem:[%s1445_s0 + $0x220] sm:$0xff]  ;;  %v84_v11 = vld [vmem:[%s1445_s0 + $0x228] sm:$0xff] }
  0x23   :  { %490 = vmatmul.bf16.vlgmr.msra.gmra.mxu3 %v125_v20  ;;  %460 = vmatmul.bf16.vlgmr.msra.gmra.mxu0 %v95_v21  ;;  %v36_v20 = vld [vmem:[%s1445_s0 + $0xa8] sm:$0xff]  ;;  %v41_v21 = vld [vmem:[%s1445_s0 + $0xd0] sm:$0xff]  ;;  %v79_v10 = vld [vmem:[%s1445_s0 + $0x200] sm:$0xff]  ;;  %v128_v15 = vpack.c.bf16 %v83_v9, %v78_v8 }
  0x24   :  { %599 = vmatpush.bf16.msrb.mxu3 %v916_v22  ;;  %652 = vmatpush.bf16.msrb.mxu0 %v920_v23  ;;  %v37_v22 = vld [vmem:[%s1445_s0 + $0xb0] sm:$0xff]  ;;  %v42_v23 = vld [vmem:[%s1445_s0 + $0xd8] sm:$0xff] }
  0x26   :  { %551 = vmatpush.bf16.msrb.mxu2 %v907_v24  ;;  %502 = vmatpush.bf16.msrb.mxu1 %v899_v25  ;;  %v38_v24 = vld [vmem:[%s1445_s0 + $0xb8] sm:$0xff]  ;;  %v43_v25 = vld [vmem:[%s1445_s0 + $0xe0] sm:$0xff] }
  0x28   :  { %600 = vmatpush.bf16.msrb.mxu3 %v915_v26  ;;  %653 = vmatpush.bf16.msrb.mxu0 %v919_v27  ;;  %v39_v26 = vld [vmem:[%s1445_s0 + $0xc0] sm:$0xff]  ;;  %v44_v27 = vld [vmem:[%s1445_s0 + $0xe8] sm:$0xff] }
  0x2a   :  { %552 = vmatpush.bf16.msrb.mxu2 %v906_v28  ;;  %503 = vmatpush.bf16.msrb.mxu1 %v898_v29  ;;  %v106_v28 = vpack.c.bf16 %v41_v21, %v36_v20  ;;  %v107_v29 = vpack.c.bf16 %v42_v23, %v37_v22 }
  0x2c   :  { %601 = vmatpush.bf16.msrb.mxu3 %v914_v30  ;;  %654 = vmatpush.bf16.msrb.mxu0 %v918_v31  ;;  %v108_v30 = vpack.c.bf16 %v43_v25, %v38_v24  ;;  %v109_v31 = vpack.c.bf16 %v44_v27, %v39_v26  ;;  %v86_v25 = vld [vmem:[%s1445_s0 + $0x238] sm:$0xff]  ;;  %v91_v26 = vld [vmem:[%s1445_s0 + $0x260] sm:$0xff] }
  0x2d   :  { %v87_v27 = vld [vmem:[%s1445_s0 + $0x240] sm:$0xff]  ;;  %v131_v36 = vpack.c.bf16 %v91_v26, %v86_v25 }
  0x2e   :  { %553 = vmatpush.bf16.msrb.mxu2 %v905_v32  ;;  %504 = vmatpush.bf16.msrb.mxu1 %v897_v33  ;;  %v46_v32 = vld [vmem:[%s1445_s0 + $0xf8] sm:$0xff]  ;;  %v51_v33 = vld [vmem:[%s1445_s0 + $0x120] sm:$0xff] }
  0x2f   :  { %v111_v40 = vpack.c.bf16 %v51_v33, %v46_v32  ;;  %v94_v32 = vld [vmem:[%s1445_s0 + $0x278] sm:$0xff] }
  0x30   :  { %602 = vmatpush.bf16.msrb.mxu3 %v913_v34  ;;  %655 = vmatpush.bf16.msrb.mxu0 %v917_v43  ;;  %v47_v34 = vld [vmem:[%s1445_s0 + $0x100] sm:$0xff]  ;;  %v114_v43 = vpack.c.bf16 %v54_v39, %v49_v38 }
  0x31   :  { %475 = vmatmul.bf16.gmra.mxu1 %v110_v46  ;;  %485 = vmatmul.bf16.gmra.mxu2 %v120_v47  ;;  %v112_v41 = vpack.c.bf16 %v52_v35, %v47_v34  ;;  %v57_v46 = vld [vmem:[%s1445_s0 + $0x150] sm:$0xff]  ;;  %v62_v47 = vld [vmem:[%s1445_s0 + $0x178] sm:$0xff] }
  0x32   :  { %554 = vmatpush.bf16.msrb.mxu2 %v904_v44  ;;  %505 = vmatpush.bf16.msrb.mxu1 %v896_v45  ;;  %v56_v44 = vld [vmem:[%s1445_s0 + $0x148] sm:$0xff]  ;;  %v61_v45 = vld [vmem:[%s1445_s0 + $0x170] sm:$0xff] }
  0x33   :  { %495 = vmatmul.bf16.gmra.mxu3 %v130_v48  ;;  %465 = vmatmul.bf16.gmra.mxu0 %v100_v49  ;;  %v58_v48 = vld [vmem:[%s1445_s0 + $0x158] sm:$0xff]  ;;  %v63_v49 = vld [vmem:[%s1445_s0 + $0x180] sm:$0xff] }
  0x34   :  { %603 = vmatpush.bf16.msrb.mxu3 %v912_v50  ;;  %v59_v50 = vld [vmem:[%s1445_s0 + $0x160] sm:$0xff] }
  0x36   :  { %555 = vmatpush.bf16.msrb.mxu2 %v903_v51  ;;  %506 = vmatpush.bf16.msrb.mxu1 %v895_v52  ;;  %v64_v51 = vld [vmem:[%s1445_s0 + $0x188] sm:$0xff]  ;;  %v116_v52 = vpack.c.bf16 %v61_v45, %v56_v44 }
  0x38   :  { %604 = vmatpush.bf16.msrb.mxu3 %v911_v53  ;;  %v117_v53 = vpack.c.bf16 %v62_v47, %v57_v46 }
  0x3a   :  { %556 = vmatpush.bf16.msrb.mxu2 %v902_v54  ;;  %507 = vmatpush.bf16.msrb.mxu1 %v894_v55  ;;  %v118_v54 = vpack.c.bf16 %v63_v49, %v58_v48  ;;  %v119_v55 = vpack.c.bf16 %v64_v51, %v59_v50 }
  0x3c   :  { %605 = vmatpush.bf16.msrb.mxu3 %v910_v56  ;;  %v66_v56 = vld [vmem:[%s1445_s0 + $0x198] sm:$0xff] }
  0x3e   :  { %557 = vmatpush.bf16.msrb.mxu2 %v901_v57  ;;  %508 = vmatpush.bf16.msrb.mxu1 %v893_v58  ;;  %v71_v57 = vld [vmem:[%s1445_s0 + $0x1c0] sm:$0xff] }
  0x3f   :  { %v67_v58 = vld [vmem:[%s1445_s0 + $0x1a0] sm:$0xff]  ;;  %v121_v0 = vpack.c.bf16 %v71_v57, %v66_v56 }
  0x40   :  { %606 = vmatpush.bf16.msrb.mxu3 %v909_v59  ;;  %v72_v59 = vld [vmem:[%s1445_s0 + $0x1c8] sm:$0xff] }
  0x41   :  { %509 = vmatmul.bf16.vlgmr.msrb.gmra.mxu1 %v96_v4  ;;  %558 = vmatmul.bf16.vlgmr.msrb.gmra.mxu2 %v97_v5  ;;  %v122_v1 = vpack.c.bf16 %v72_v59, %v67_v58  ;;  %v76_v4 = vld [vmem:[%s1445_s0 + $0x1e8] sm:$0xff]  ;;  %v81_v5 = vld [vmem:[%s1445_s0 + $0x210] sm:$0xff] }
  0x42   :  { %v126_v12 = vpack.c.bf16 %v81_v5, %v76_v4 }
  0x43   :  { %607 = vmatmul.bf16.vlgmr.msrb.gmra.mxu3 %v98_v6  ;;  %877 = vmatmul.msk.bf16.vlgmr.msrb.gmra.mxu0 %vm427_vm0, %v99_v7  ;;  %v77_v6 = vld [vmem:[%s1445_s0 + $0x1f0] sm:$0xff]  ;;  %v82_v7 = vld [vmem:[%s1445_s0 + $0x218] sm:$0xff] }
  0x44   :  { %v127_v13 = vpack.c.bf16 %v82_v7, %v77_v6 }
  0x51   :  { %514 = vmatmul.bf16.gmra.mxu1 %v101_v16  ;;  %563 = vmatmul.bf16.gmra.mxu2 %v102_v17  ;;  %v129_v16 = vpack.c.bf16 %v84_v11, %v79_v10 }
  0x53   :  { %612 = vmatmul.bf16.gmra.mxu3 %v103_v18  ;;  %878 = vmatmul.msk.bf16.gmra.mxu0 %vm427_vm0, %v104_v19  ;;  %v1302_v18 = vld [vmem:[%s1444_s2] ss:$0 sm:$0xff] }
  0x61   :  { %519 = vmatmul.bf16.gmra.mxu1 %v106_v28  ;;  %568 = vmatmul.bf16.gmra.mxu2 %v107_v29  ;;  %v92_v28 = vld [vmem:[%s1445_s0 + $0x268] sm:$0xff] }
  0x62   :  { %v88_v29 = vld [vmem:[%s1445_s0 + $0x248] sm:$0xff]  ;;  %v132_v37 = vpack.c.bf16 %v92_v28, %v87_v27 }
  0x63   :  { %617 = vmatmul.bf16.gmra.mxu3 %v108_v30  ;;  %879 = vmatmul.msk.bf16.gmra.mxu0 %vm427_vm0, %v109_v31  ;;  %v93_v30 = vld [vmem:[%s1445_s0 + $0x270] sm:$0xff] }
  0x64   :  { %v89_v31 = vld [vmem:[%s1445_s0 + $0x250] sm:$0xff] }
  0x71   :  { %524 = vmatmul.bf16.gmra.mxu1 %v111_v40  ;;  %573 = vmatmul.bf16.gmra.mxu2 %v112_v41  ;;  %v133_v40 = vpack.c.bf16 %v93_v30, %v88_v29  ;;  %v134_v41 = vpack.c.bf16 %v94_v32, %v89_v31 }
  0x73   :  { %622 = vmatmul.bf16.gmra.mxu3 %v113_v42  ;;  %880 = vmatmul.msk.bf16.gmra.mxu0 %vm427_vm0, %v114_v43 }
  0x81   :  { %529 = vmatmul.bf16.gmra.mxu1 %v116_v52  ;;  %578 = vmatmul.bf16.gmra.mxu2 %v117_v53 }
  0x83   :  { %627 = vmatmul.bf16.gmra.mxu3 %v118_v54  ;;  %881 = vmatmul.msk.bf16.gmra.mxu0 %vm427_vm0, %v119_v55 }
  0x91   :  { %534 = vmatmul.bf16.gmra.mxu1 %v121_v0  ;;  %583 = vmatmul.bf16.gmra.mxu2 %v122_v1 }
  0x93   :  { %632 = vmatmul.bf16.gmra.mxu3 %v123_v2  ;;  %882 = vmatmul.msk.bf16.gmra.mxu0 %vm427_vm0, %v124_v3 }
  0x9e   :  { %v1296_v14 = vpop.f32.mrf.mxu1 }
  0xa0   :  { %v461_v17 = vpop.f32.mrf.mxu0 }
  0xa1   :  { %539 = vmatmul.bf16.gmra.mxu1 %v126_v12  ;;  %588 = vmatmul.bf16.gmra.mxu2 %v127_v13  ;;  %v462_v55 = vadd.f32 %v1302_v18, %v461_v17 }
  0xa3   :  { %637 = vmatmul.bf16.gmra.mxu3 %v128_v15  ;;  %883 = vmatmul.msk.bf16.gmra.mxu0 %vm427_vm0, %v129_v16 }
  0xa4   :  { %v481_v19 = vpop.f32.mrf.mxu2 }
  0xa5   :  { %v1305_v20 = vadd.f32 %v1302_v18, %v481_v19 }
  0xa6   :  { %v491_v21 = vpop.f32.mrf.mxu3  ;;  %v1310_v23 = vpop.f32.mrf.mxu1 }
  0xa7   :  { %v1308_v22 = vadd.f32 %v1302_v18, %v491_v21 }
  0xa8   :  { %v463_v24 = vpop.f32.mrf.mxu0 }
  0xa9   :  { %v464_v63 = vadd.f32 %v1302_v18, %v463_v24 }
  0xac   :  { %v483_v33 = vpop.f32.mrf.mxu2 }
  0xad   :  { %v1337_v34 = vadd.f32 %v1302_v18, %v483_v33 }
  0xae   :  { %v493_v35 = vpop.f32.mrf.mxu3  ;;  %v1342_v39 = vpop.f32.mrf.mxu1 }
  0xaf   :  { %v1340_v38 = vadd.f32 %v1302_v18, %v493_v35  ;;  %v472_v35 = vadd.f32 %v1302_v18, %v1296_v14 }
  0xb0   :  { %v466_v42 = vpop.f32.mrf.mxu0 }
  0xb1   :  { %544 = vmatmul.bf16.gmra.mxu1 %v131_v36  ;;  %593 = vmatmul.bf16.gmra.mxu2 %v132_v37  ;;  %v467_v9 = vadd.f32 %v1302_v18, %v466_v42 }
  0xb3   :  { %642 = vmatmul.bf16.gmra.mxu3 %v133_v40  ;;  %884 = vmatmul.msk.bf16.gmra.mxu0 %vm427_vm0, %v134_v41 }
  0xb4   :  { %v486_v43 = vpop.f32.mrf.mxu2 }
  0xb5   :  { %v1346_v44 = vadd.f32 %v1302_v18, %v486_v43 }
  0xb6   :  { %v496_v45 = vpop.f32.mrf.mxu3  ;;  %v1351_v47 = vpop.f32.mrf.mxu1 }
  0xb7   :  { %v1349_v46 = vadd.f32 %v1302_v18, %v496_v45 }
  0xb8   :  { %v468_v48 = vpop.f32.mrf.mxu0 }
  0xb9   :  { %v469_v24 = vadd.f32 %v1302_v18, %v468_v48 }
  0xbc   :  { %v488_v49 = vpop.f32.mrf.mxu2 }
  0xbd   :  { %v1354_v50 = vadd.f32 %v1302_v18, %v488_v49 }
  0xbe   :  { %v498_v51 = vpop.f32.mrf.mxu3  ;;  %v510_v53 = vpop.f32.mrf.mxu1 }
  0xbf   :  { %v1357_v52 = vadd.f32 %v1302_v18, %v498_v51  ;;  %v511_v56 = vadd.f32 %v510_v53, %v462_v55  ;;  %v474_v51 = vadd.f32 %v1302_v18, %v1310_v23 }
  0xc0   :  { %v657_v54 = vpop.f32.mrf.mxu0 }
  0xc4   :  { %v559_v57 = vpop.f32.mrf.mxu2 }
  0xc5   :  { %v560_v58 = vadd.f32 %v559_v57, %v511_v56 }
  0xc6   :  { %v608_v59 = vpop.f32.mrf.mxu3  ;;  %v512_v60 = vpop.f32.mrf.mxu1 }
  0xc7   :  { %v609_v61 = vadd.f32 %v608_v59, %v560_v58  ;;  %v513_v2 = vadd.f32 %v512_v60, %v464_v63 }
  0xc8   :  { %v659_v62 = vpop.f32.mrf.mxu0 }
  0xc9   :  { %v658_v0 = vadd.f32 %v657_v54, %v609_v61  ;;  %v477_v61 = vadd.f32 %v1302_v18, %v1342_v39 }
  0xcb   :  { %v697_v1 = vmax.f32 %v658_v0, 0.0 }
  0xcc   :  { %v561_v3 = vpop.f32.mrf.mxu2 }
  0xcd   :  { %713 = vst.msk [vmem:[%s1446_s3] sm:$0xff] %vm427_vm0, %v697_v1  ;;  %v562_v4 = vadd.f32 %v561_v3, %v513_v2 }
  0xce   :  { %v610_v5 = vpop.f32.mrf.mxu3  ;;  %v515_v6 = vpop.f32.mrf.mxu1 }
  0xcf   :  { %v611_v7 = vadd.f32 %v610_v5, %v562_v4  ;;  %v516_v12 = vadd.f32 %v515_v6, %v467_v9  ;;  %v479_v6 = vadd.f32 %v1302_v18, %v1351_v47 }
  0xd0   :  { %v662_v8 = vpop.f32.mrf.mxu0 }
  0xd1   :  { %v660_v10 = vadd.f32 %v659_v62, %v611_v7 }
  0xd3   :  { %v698_v11 = vmax.f32 %v660_v10, 0.0 }
  0xd4   :  { %v564_v13 = vpop.f32.mrf.mxu2 }
  0xd5   :  { %714 = vst.msk [vmem:[%s1446_s3 + $0x8] sm:$0xff] %vm427_vm0, %v698_v11  ;;  %v565_v15 = vadd.f32 %v564_v13, %v516_v12 }
  0xd6   :  { %v613_v16 = vpop.f32.mrf.mxu3  ;;  %v517_v17 = vpop.f32.mrf.mxu1 }
  0xd7   :  { %v614_v19 = vadd.f32 %v613_v16, %v565_v15  ;;  %v518_v27 = vadd.f32 %v517_v17, %v469_v24 }
  0xd8   :  { %v664_v21 = vpop.f32.mrf.mxu0 }
  0xd9   :  { %v663_v25 = vadd.f32 %v662_v8, %v614_v19 }
  0xdb   :  { %v699_v26 = vmax.f32 %v663_v25, 0.0 }
  0xdc   :  { %v566_v28 = vpop.f32.mrf.mxu2 }
  0xdd   :  { %715 = vst.msk [vmem:[%s1446_s3 + $0x10] sm:$0xff] %vm427_vm0, %v699_v26  ;;  %v567_v29 = vadd.f32 %v566_v28, %v518_v27 }
  0xde   :  { %v615_v30 = vpop.f32.mrf.mxu3  ;;  %v520_v31 = vpop.f32.mrf.mxu1 }
  0xdf   :  { %v616_v32 = vadd.f32 %v615_v30, %v567_v29  ;;  %v521_v40 = vadd.f32 %v520_v31, %v472_v35 }
  0xe0   :  { %v667_v33 = vpop.f32.mrf.mxu0 }
  0xe1   :  { %v665_v36 = vadd.f32 %v664_v21, %v616_v32 }
  0xe3   :  { %v700_v37 = vmax.f32 %v665_v36, 0.0 }
  0xe4   :  { %v569_v41 = vpop.f32.mrf.mxu2 }
  0xe5   :  { %716 = vst.msk [vmem:[%s1446_s3 + $0x18] sm:$0xff] %vm427_vm0, %v700_v37  ;;  %v570_v42 = vadd.f32 %v569_v41, %v521_v40 }
  0xe6   :  { %v618_v43 = vpop.f32.mrf.mxu3  ;;  %v522_v45 = vpop.f32.mrf.mxu1 }
  0xe7   :  { %v619_v48 = vadd.f32 %v618_v43, %v570_v42  ;;  %v523_v14 = vadd.f32 %v522_v45, %v474_v51 }
  0xe8   :  { %v669_v49 = vpop.f32.mrf.mxu0 }
  0xe9   :  { %v668_v53 = vadd.f32 %v667_v33, %v619_v48 }
  0xeb   :  { %v701_v54 = vmax.f32 %v668_v53, 0.0 }
  0xec   :  { %v571_v55 = vpop.f32.mrf.mxu2 }
  0xed   :  { %717 = vst.msk [vmem:[%s1446_s3 + $0x20] sm:$0xff] %vm427_vm0, %v701_v54  ;;  %v572_v56 = vadd.f32 %v571_v55, %v523_v14 }
  0xee   :  { %v620_v57 = vpop.f32.mrf.mxu3  ;;  %v525_v58 = vpop.f32.mrf.mxu1 }
  0xef   :  { %v621_v59 = vadd.f32 %v620_v57, %v572_v56  ;;  %v526_v23 = vadd.f32 %v525_v58, %v477_v61 }
  0xf0   :  { %v672_v60 = vpop.f32.mrf.mxu0 }
  0xf1   :  { %v670_v62 = vadd.f32 %v669_v49, %v621_v59 }
  0xf3   :  { %v702_v63 = vmax.f32 %v670_v62, 0.0 }
  0xf4   :  { %v574_v0 = vpop.f32.mrf.mxu2 }
  0xf5   :  { %718 = vst.msk [vmem:[%s1446_s3 + $0x28] sm:$0xff] %vm427_vm0, %v702_v63  ;;  %v575_v1 = vadd.f32 %v574_v0, %v526_v23 }
  0xf6   :  { %v623_v2 = vpop.f32.mrf.mxu3  ;;  %v527_v3 = vpop.f32.mrf.mxu1 }
  0xf7   :  { %v624_v4 = vadd.f32 %v623_v2, %v575_v1  ;;  %v528_v39 = vadd.f32 %v527_v3, %v479_v6 }
  0xf8   :  { %v674_v5 = vpop.f32.mrf.mxu0 }
  0xf9   :  { %v673_v7 = vadd.f32 %v672_v60, %v624_v4 }
  0xfb   :  { %v703_v8 = vmax.f32 %v673_v7, 0.0 }
  0xfc   :  { %v576_v9 = vpop.f32.mrf.mxu2 }
  0xfd   :  { %719 = vst.msk [vmem:[%s1446_s3 + $0x30] sm:$0xff] %vm427_vm0, %v703_v8  ;;  %v577_v10 = vadd.f32 %v576_v9, %v528_v39 }
  0xfe   :  { %v625_v11 = vpop.f32.mrf.mxu3  ;;  %v530_v12 = vpop.f32.mrf.mxu1 }
  0xff   :  { %v626_v13 = vadd.f32 %v625_v11, %v577_v10  ;;  %v531_v19 = vadd.f32 %v530_v12, %v1305_v20 }
 0x100   :  { %v677_v15 = vpop.f32.mrf.mxu0 }
 0x101   :  { %v675_v16 = vadd.f32 %v674_v5, %v626_v13 }
 0x103   :  { %v704_v17 = vmax.f32 %v675_v16, 0.0 }
 0x104   :  { %v579_v21 = vpop.f32.mrf.mxu2 }
 0x105   :  { %720 = vst.msk [vmem:[%s1446_s3 + $0x38] sm:$0xff] %vm427_vm0, %v704_v17  ;;  %v580_v18 = vadd.f32 %v579_v21, %v531_v19 }
 0x106   :  { %v628_v47 = vpop.f32.mrf.mxu3  ;;  %v532_v24 = vpop.f32.mrf.mxu1 }
 0x107   :  { %v629_v25 = vadd.f32 %v628_v47, %v580_v18  ;;  %v533_v29 = vadd.f32 %v532_v24, %v1337_v34 }
 0x108   :  { %v679_v26 = vpop.f32.mrf.mxu0 }
 0x109   :  { %v678_v27 = vadd.f32 %v677_v15, %v629_v25 }
 0x10b   :  { %v705_v28 = vmax.f32 %v678_v27, 0.0 }
 0x10c   :  { %v581_v30 = vpop.f32.mrf.mxu2 }
 0x10d   :  { %721 = vst.msk [vmem:[%s1446_s3 + $0x40] sm:$0xff] %vm427_vm0, %v705_v28  ;;  %v582_v20 = vadd.f32 %v581_v30, %v533_v29 }
 0x10e   :  { %v630_v31 = vpop.f32.mrf.mxu3  ;;  %v535_v32 = vpop.f32.mrf.mxu1 }
 0x10f   :  { %v631_v33 = vadd.f32 %v630_v31, %v582_v20  ;;  %v536_v40 = vadd.f32 %v535_v32, %v1346_v44 }
 0x110   :  { %v682_v35 = vpop.f32.mrf.mxu0 }
 0x111   :  { %v680_v36 = vadd.f32 %v679_v26, %v631_v33 }
 0x113   :  { %v706_v37 = vmax.f32 %v680_v36, 0.0 }
 0x114   :  { %v584_v41 = vpop.f32.mrf.mxu2 }
 0x115   :  { %722 = vst.msk [vmem:[%s1446_s3 + $0x48] sm:$0xff] %vm427_vm0, %v706_v37  ;;  %v585_v34 = vadd.f32 %v584_v41, %v536_v40 }
 0x116   :  { %v633_v42 = vpop.f32.mrf.mxu3  ;;  %v537_v43 = vpop.f32.mrf.mxu1 }
 0x117   :  { %v634_v45 = vadd.f32 %v633_v42, %v585_v34  ;;  %v538_v53 = vadd.f32 %v537_v43, %v1354_v50 }
 0x118   :  { %v684_v48 = vpop.f32.mrf.mxu0 }
 0x119   :  { %v683_v49 = vadd.f32 %v682_v35, %v634_v45 }
 0x11b   :  { %v707_v51 = vmax.f32 %v683_v49, 0.0 }
 0x11c   :  { %v586_v54 = vpop.f32.mrf.mxu2 }
 0x11d   :  { %723 = vst.msk [vmem:[%s1446_s3 + $0x50] sm:$0xff] %vm427_vm0, %v707_v51  ;;  %v587_v44 = vadd.f32 %v586_v54, %v538_v53 }
 0x11e   :  { %v635_v14 = vpop.f32.mrf.mxu3  ;;  %v540_v55 = vpop.f32.mrf.mxu1 }
 0x11f   :  { %v636_v56 = vadd.f32 %v635_v14, %v587_v44  ;;  %v541_v60 = vadd.f32 %v540_v55, %v1308_v22 }
 0x120   :  { %v687_v58 = vpop.f32.mrf.mxu0 }
 0x121   :  { %v685_v57 = vadd.f32 %v684_v48, %v636_v56 }
 0x123   :  { %v708_v59 = vmax.f32 %v685_v57, 0.0 }
 0x124   :  { %v589_v61 = vpop.f32.mrf.mxu2 }
 0x125   :  { %724 = vst.msk [vmem:[%s1446_s3 + $0x58] sm:$0xff] %vm427_vm0, %v708_v59  ;;  %v590_v50 = vadd.f32 %v589_v61, %v541_v60 }
 0x126   :  { %v638_v62 = vpop.f32.mrf.mxu3  ;;  %v542_v63 = vpop.f32.mrf.mxu1 }
 0x127   :  { %v639_v23 = vadd.f32 %v638_v62, %v590_v50  ;;  %v543_v2 = vadd.f32 %v542_v63, %v1340_v38 }
 0x128   :  { %v689_v3 = vpop.f32.mrf.mxu0 }
 0x129   :  { %v688_v0 = vadd.f32 %v687_v58, %v639_v23 }
 0x12b   :  { %v709_v1 = vmax.f32 %v688_v0, 0.0 }
 0x12c   :  { %v591_v4 = vpop.f32.mrf.mxu2 }
 0x12d   :  { %725 = vst.msk [vmem:[%s1446_s3 + $0x60] sm:$0xff] %vm427_vm0, %v709_v1  ;;  %v592_v22 = vadd.f32 %v591_v4, %v543_v2 }
 0x12e   :  { %v640_v5 = vpop.f32.mrf.mxu3  ;;  %v545_v6 = vpop.f32.mrf.mxu1 }
 0x12f   :  { %v641_v7 = vadd.f32 %v640_v5, %v592_v22  ;;  %v546_v9 = vadd.f32 %v545_v6, %v1349_v46 }
 0x130   :  { %v692_v12 = vpop.f32.mrf.mxu0 }
 0x131   :  { %v690_v8 = vadd.f32 %v689_v3, %v641_v7 }
 0x133   :  { %v710_v39 = vmax.f32 %v690_v8, 0.0 }
 0x134   :  { %v594_v10 = vpop.f32.mrf.mxu2 }
 0x135   :  { %726 = vst.msk [vmem:[%s1446_s3 + $0x68] sm:$0xff] %vm427_vm0, %v710_v39  ;;  %v595_v38 = vadd.f32 %v594_v10, %v546_v9 }
 0x136   :  { %v643_v11 = vpop.f32.mrf.mxu3  ;;  %v547_v15 = vpop.f32.mrf.mxu1 }
 0x137   :  { %v644_v13 = vadd.f32 %v643_v11, %v595_v38  ;;  %v548_v19 = vadd.f32 %v547_v15, %v1357_v52 }
 0x138   :  { %v694_v24 = vpop.f32.mrf.mxu0 }
 0x139   :  { %v693_v16 = vadd.f32 %v692_v12, %v644_v13 }
 0x13b   :  { %v711_v17 = vmax.f32 %v693_v16, 0.0 }
 0x13c   :  { %v596_v21 = vpop.f32.mrf.mxu2 }
 0x13d   :  { %727 = vst.msk [vmem:[%s1446_s3 + $0x70] sm:$0xff] %vm427_vm0, %v711_v17  ;;  %v597_v46 = vadd.f32 %v596_v21, %v548_v19 }
 0x13e   :  { %v645_v18 = vpop.f32.mrf.mxu3 }
 0x13f   :  { %v646_v47 = vadd.f32 %v645_v18, %v597_v46 }
 0x141   :  { %v695_v25 = vadd.f32 %v694_v24, %v646_v47 }
 0x143   :  { %v712_v26 = vmax.f32 %v695_v25, 0.0 }
 0x145   :  { %728 = vst.msk [vmem:[%s1446_s3 + $0x78] sm:$0xff] %vm427_vm0, %v712_v26 }

// kernel: _lambda_.21
= control target key start
LH: loop header
LB: loop body
LE: loop exit
PB: predicated region body
PF: predicated region fallthrough
CT: control target
= control target key end

     0   :  { %s1570_s21 = smov 0   ;;  %s1770_s0 = inlined_call_operand.vmem [shape: f32[2,4,128], index: 0, kind: input, shape index: {}]   ;;  %s1771_s1 = inlined_call_operand.vmem [shape: f32[2,4,128], index: 1, kind: input, shape index: {}]   ;;  %s1772_s2 = inlined_call_operand.vmem [shape: bf16[128,128], index: 2, kind: input, shape index: {}]   ;;  %s1773_s3 = inlined_call_operand.vmem [shape: f32[1,128], index: 3, kind: input, shape index: {}]   ;;  %s1774_s4 = inlined_call_operand.vmem [shape: bf16[128,128], index: 4, kind: input, shape index: {}]   ;;  %s1775_s5 = inlined_call_operand.vmem [shape: f32[1,128], index: 5, kind: input, shape index: {}]   ;;  %s1776_s6 = inlined_call_operand.vmem [shape: bf16[128,128], index: 6, kind: input, shape index: {}]   ;;  %s1777_s7 = inlined_call_operand.vmem [shape: f32[1,128], index: 7, kind: input, shape index: {}]   ;;  %s1778_s8 = inlined_call_operand.vmem [shape: bf16[128,128], index: 8, kind: input, shape index: {}]   ;;  %s1779_s9 = inlined_call_operand.vmem [shape: f32[1,128], index: 9, kind: input, shape index: {}]   ;;  %s1780_s10 = inlined_call_operand.vmem [shape: f32[1,128], index: 10, kind: input, shape index: {}]   ;;  %s1781_s11 = inlined_call_operand.vmem [shape: f32[1,128], index: 11, kind: input, shape index: {}]   ;;  %s1782_s12 = inlined_call_operand.vmem [shape: bf16[128,128], index: 12, kind: input, shape index: {}]   ;;  %s1783_s13 = inlined_call_operand.vmem [shape: f32[1,128], index: 13, kind: input, shape index: {}]   ;;  %s1784_s14 = inlined_call_operand.vmem [shape: bf16[128,128], index: 14, kind: input, shape index: {}]   ;;  %s1785_s15 = inlined_call_operand.vmem [shape: f32[1,128], index: 15, kind: input, shape index: {}]   ;;  %s1786_s16 = inlined_call_operand.vmem [shape: f32[2,4,128], index: 16, kind: output, shape index: {}]  }
   0x1   :  { %1787 = sst [smem:[#allocation2_spill]] %s1770_s0 }
   0x2 LB: > { %s1200_s22 = sadd.s32 4294967295, %s1482_s21   ;;  %p1204_p0 = scmp.ge.s32.totalorder %s1482_s21, 1  ;;  %s1482_s21 = sphi %s1570_s21, %s26_s21  }
   0x3   : > { %p470_p1 = scmp.lt.s32.totalorder %s1482_s21, 3 }
   0x5   : > { %p471_p2 = pnand %p1204_p0, %p470_p1 }
   0x6   : > { %p522_p3 = scmp.lt.s32.totalorder (!%p471_p2), %s1200_s22, 1  ;;  %s1788_s28 = sld [smem:[#allocation2_spill]] (!%p471_p2) }
   0x7   : > { %474 = sbr.rel (%p471_p2) target bundleno = 1388 (0x56c), region = 84 }
   0xc   : > { %v1410_v0 = vld [vmem:[%s1772_s2 + $0x38] sm:$0xff]  ;;  %v1409_v2 = vld [vmem:[%s1772_s2 + $0x30] sm:$0xff]  ;;  %v1408_v4 = vld [vmem:[%s1772_s2 + $0x28] sm:$0xff]  ;;  %s1790_s22 = smov (!%p522_p3, %s1200_s22), 1  ;;  %vm798_vm0 = vcmask 27648   ;;  %vm829_vm1 = vcmask 1041408  }
   0xd   : > { %v1418_v1 = vld [vmem:[%s1774_s4 + $0x38] sm:$0xff]  ;;  %606 = vmatpush.bf16.msra.mxu0 %v1410_v0  ;;  %v1417_v3 = vld [vmem:[%s1774_s4 + $0x30] sm:$0xff]  ;;  %v1416_v5 = vld [vmem:[%s1774_s4 + $0x28] sm:$0xff]  ;;  %s1614_s19 = sshll.u32 %s1790_s22, 2  ;;  %vm825_vm6 = vcmask 31744   ;;  %vm931_vm7 = vcmask 1043456  }
   0xe   : > { %688 = vmatpush.bf16.msra.mxu1 %v1418_v1  ;;  %v1407_v6 = vld [vmem:[%s1772_s2 + $0x20] sm:$0xff]  ;;  %v1406_v8 = vld [vmem:[%s1772_s2 + $0x18] sm:$0xff]  ;;  %v1405_v10 = vld [vmem:[%s1772_s2 + $0x10] sm:$0xff]  ;;  %s525_s29 = scalar_lea.vmem %s1788_s28, %s1614_s19  ;;  %s529_s22 = scalar_lea.vmem %s1771_s1, %s1614_s19 }
   0xf   : > { %v1415_v7 = vld [vmem:[%s1774_s4 + $0x20] sm:$0xff]  ;;  %v1414_v9 = vld [vmem:[%s1774_s4 + $0x18] sm:$0xff]  ;;  %v1413_v11 = vld [vmem:[%s1774_s4 + $0x10] sm:$0xff]  ;;  %s533_s28 = scalar_lea.vmem %s1786_s16, %s1614_s19 }
  0x10   : > { %v1404_v12 = vld [vmem:[%s1772_s2 + $0x8] sm:$0xff]  ;;  %v1403_v14 = vld [vmem:[%s1772_s2] sm:$0xff]  ;;  %v1426_v30 = vld [vmem:[%s1776_s6 + $0x38] sm:$0xff] }
  0x11   : > { %607 = vmatpush.bf16.msra.mxu0 %v1409_v2  ;;  %v1412_v13 = vld [vmem:[%s1774_s4 + $0x8] sm:$0xff]  ;;  %v1411_v15 = vld [vmem:[%s1774_s4] sm:$0xff]  ;;  %769 = vmatpush.bf16.msra.mxu2 %v1426_v30  ;;  %v1425_v31 = vld [vmem:[%s1776_s6 + $0x30] sm:$0xff] }
  0x12   : > { %689 = vmatpush.bf16.msra.mxu1 %v1417_v3  ;;  %v1636_v16 = vld [vmem:[%s525_s29] sm:$0xf]  ;;  %v1424_v32 = vld [vmem:[%s1776_s6 + $0x28] sm:$0xff]  ;;  %v1422_v34 = vld [vmem:[%s1776_s6 + $0x18] sm:$0xff] }
  0x13   : > { %v536_v17 = vld [vmem:[%s529_s22] sm:$0xf]  ;;  %v537_v18 = vpack.c.bf16 %v1636_v16, %v1636_v16  ;;  %v1421_v35 = vld [vmem:[%s1776_s6 + $0x10] sm:$0xff]  ;;  %v1420_v36 = vld [vmem:[%s1776_s6 + $0x8] sm:$0xff] }
  0x14   : > { %v619_v19 = vpack.c.bf16 %v536_v17, %v536_v17  ;;  %v1461_v20 = vld [vmem:[%s1775_s5] ss:$0 sm:$0xff]  ;;  %v1434_v53 = vld [vmem:[%s1778_s8 + $0x38] sm:$0xff]  ;;  %v1433_v54 = vld [vmem:[%s1778_s8 + $0x30] sm:$0xff] }
  0x15   : > { %608 = vmatpush.bf16.msra.mxu0 %v1408_v4  ;;  %v1460_v21 = vld [vmem:[%s1773_s3] ss:$0 sm:$0xff]  ;;  %770 = vmatpush.bf16.msra.mxu2 %v1425_v31  ;;  %v1432_v55 = vld [vmem:[%s1778_s8 + $0x28] sm:$0xff]  ;;  %v1430_v58 = vld [vmem:[%s1778_s8 + $0x18] sm:$0xff] }
  0x16   : > { %690 = vmatpush.bf16.msra.mxu1 %v1416_v5  ;;  %v1423_v33 = vld [vmem:[%s1776_s6 + $0x20] sm:$0xff]  ;;  %v1429_v61 = vld [vmem:[%s1778_s8 + $0x10] sm:$0xff]  ;;  %v1428_v2 = vld [vmem:[%s1778_s8 + $0x8] sm:$0xff] }
  0x17   : > { %v1419_v39 = vld [vmem:[%s1776_s6] sm:$0xff] }
  0x18   : > { %v1462_v49 = vld [vmem:[%s1777_s7] ss:$0 sm:$0xff] }
  0x19   : > { %609 = vmatpush.bf16.msra.mxu0 %v1407_v6  ;;  %771 = vmatpush.bf16.msra.mxu2 %v1424_v32  ;;  %v1431_v57 = vld [vmem:[%s1778_s8 + $0x20] sm:$0xff]  ;;  %v1441_v32 = vld [vmem:[%s1782_s12 + $0x30] sm:$0xff] }
  0x1a   : > { %691 = vmatpush.bf16.msra.mxu1 %v1415_v7 }
  0x1d   : > { %610 = vmatpush.bf16.msra.mxu0 %v1406_v8  ;;  %772 = vmatpush.bf16.msra.mxu2 %v1423_v33  ;;  %v1440_v33 = vld [vmem:[%s1782_s12 + $0x28] sm:$0xff] }
  0x1e   : > { %692 = vmatpush.bf16.msra.mxu1 %v1414_v9  ;;  %v1427_v9 = vld [vmem:[%s1778_s8] sm:$0xff] }
  0x21   : > { %611 = vmatpush.bf16.msra.mxu0 %v1405_v10  ;;  %773 = vmatpush.bf16.msra.mxu2 %v1422_v34  ;;  %v1439_v34 = vld [vmem:[%s1782_s12 + $0x20] sm:$0xff] }
  0x22   : > { %693 = vmatpush.bf16.msra.mxu1 %v1413_v11 }
  0x25   : > { %612 = vmatpush.bf16.msra.mxu0 %v1404_v12  ;;  %774 = vmatpush.bf16.msra.mxu2 %v1421_v35  ;;  %v1438_v35 = vld [vmem:[%s1782_s12 + $0x18] sm:$0xff] }
  0x26   : > { %694 = vmatpush.bf16.msra.mxu1 %v1412_v13  ;;  %v1463_v13 = vld [vmem:[%s1779_s9] ss:$0 sm:$0xff] }
  0x29   : > { %613 = vmatpush.bf16.msra.mxu0 %v1403_v14  ;;  %775 = vmatpush.bf16.msra.mxu2 %v1420_v36  ;;  %v1437_v36 = vld [vmem:[%s1782_s12 + $0x10] sm:$0xff] }
  0x2a   : > { %695 = vmatpush.bf16.msra.mxu1 %v1411_v15 }
  0x2c   : > { %614 = vmatmul.bf16.vlgmr.msra.gmra.mxu0 %v537_v18 }
  0x2d   : > { %696 = vmatmul.bf16.vlgmr.msra.gmra.mxu1 %v619_v19  ;;  %776 = vmatpush.bf16.msra.mxu2 %v1419_v39  ;;  %v1450_v39 = vld [vmem:[%s1784_s14 + $0x38] sm:$0xff] }
  0x2e   : > { %1121 = vmatpush.bf16.msrb.mxu1 %v1450_v39 }
  0x30   : > { %777 = vmatmul.bf16.vlgmr.msra.gmra.mxu2 %v619_v19 }
  0xa9   : > { %v615_v22 = vpop.f32.mrf.mxu0 }
  0xaa   : > { %v697_v23 = vpop.f32.mrf.mxu1  ;;  %v616_v26 = vadd.f32 %v1460_v21, %v615_v22  ;;  %v1442_v21 = vld [vmem:[%s1782_s12 + $0x38] sm:$0xff] }
  0xab   : > { %v698_v24 = vadd.f32 %v1461_v20, %v697_v23  ;;  %v1484_v20 = vmov 128.0   ;;  %1038 = vmatpush.bf16.msrb.mxu0 %v1442_v21 }
  0xac   : > { %v782_v27 = vpack.c.bf16 %v616_v26, %v616_v26 }
  0xad   : > { %v783_v25 = vpack.c.bf16 %v698_v24, %v698_v24 }
  0xaf   : > { %791 = vmatpush.bf16.xpose.msra.mxu3 %v783_v25  ;;  %1039 = vmatpush.bf16.msrb.mxu0 %v1441_v32 }
  0xb1   : > { %v617_v28 = vpop.f32.mrf.mxu0 }
  0xb2   : > { %v699_v29 = vpop.f32.mrf.mxu1 }
  0xb3   : > { %v778_v47 = vpop.f32.mrf.mxu2  ;;  %1040 = vmatpush.bf16.msrb.mxu0 %v1440_v33 }
  0xb4   : > { %v779_v50 = vadd.f32 %v1462_v49, %v778_v47 }
  0xb6   : > { %792 = vmatmul.bf16.vlgmr.msra.gmra.mxu3 %v782_v27  ;;  %v824_v51 = vpack.c.bf16 %v779_v50, %v779_v50 }
  0xb7   : > { %1041 = vmatpush.bf16.msrb.mxu0 %v1439_v34 }
  0xb8   : > { %v831_v52 = vsel %vm829_vm1, %v824_v51, 0  ;;  %v1445_v51 = vld [vmem:[%s1784_s14 + $0x10] sm:$0xff] }
  0xb9   : > { %840 = vmatpush.bf16.msrb.mxu3 %v831_v52 }
  0xbb   : > { %v780_v48 = vpop.f32.mrf.mxu2  ;;  %1042 = vmatpush.bf16.msrb.mxu0 %v1438_v35 }
  0xbc   : > { %v1446_v48 = vld [vmem:[%s1784_s14 + $0x18] sm:$0xff] }
  0xbd   : > { %915 = vmatpush.bf16.msra.mxu3 %v1434_v53 }
  0xbf   : > { %1043 = vmatpush.bf16.msrb.mxu0 %v1437_v36 }
  0xc1   : > { %916 = vmatpush.bf16.msra.mxu3 %v1433_v54  ;;  %v1464_v54 = vld [vmem:[%s1780_s10] ss:$0 sm:$0xff] }
  0xc5   : > { %917 = vmatpush.bf16.msra.mxu3 %v1432_v55 }
  0xc9   : > { %918 = vmatpush.bf16.msra.mxu3 %v1431_v57  ;;  %v1465_v57 = vld [vmem:[%s1781_s11] ss:$0 sm:$0xff] }
  0xcd   : > { %919 = vmatpush.bf16.msra.mxu3 %v1430_v58 }
  0xd1   : > { %920 = vmatpush.bf16.msra.mxu3 %v1429_v61  ;;  %v1444_v61 = vld [vmem:[%s1784_s14 + $0x8] sm:$0xff] }
  0xd5   : > { %921 = vmatpush.bf16.msra.mxu3 %v1428_v2 }
  0xd9   : > { %922 = vmatpush.bf16.msra.mxu3 %v1427_v9 }
 0x139   : > { %v793_v37 = vpop.f32.mrf.mxu3 }
 0x13a   : > { %v797_v38 = vmul.f32 0.088388346, %v793_v37  ;;  %v1436_v37 = vld [vmem:[%s1782_s12 + $0x8] sm:$0xff] }
 0x13b   : > { %1044 = vmatpush.bf16.msrb.mxu0 %v1436_v37 }
 0x13c   : > { %v799_v40 = vsel %vm798_vm0, %v797_v38, -inf }
 0x13d   : > { %800 = vmax.xlane.f32.xlu0 %v799_v40 }
 0x141   : > { %v795_v41 = vpop.f32.mrf.mxu3 }
 0x1b0   : > { %v801_v42 = vpop.xlane.xlu0 %800 }
 0x1b1   : > { %v802_v43 = vsub.f32 %v797_v38, %v801_v42  ;;  %v1435_v38 = vld [vmem:[%s1782_s12] sm:$0xff]  ;;  %v1449_v42 = vld [vmem:[%s1784_s14 + $0x30] sm:$0xff] }
 0x1b2   : > { %1045 = vmatpush.bf16.msrb.mxu0 %v1435_v38  ;;  %1122 = vmatpush.bf16.msrb.mxu1 %v1449_v42 }
 0x1b3   : > { %v803_v44 = vmul.f32 1.442695, %v802_v43 }
 0x1b5   : > { %1468 = vpow2.f32 %v803_v44  ;;  %v1448_v44 = vld [vmem:[%s1784_s14 + $0x28] sm:$0xff] }
 0x1b6   : > { %1123 = vmatpush.bf16.msrb.mxu1 %v1448_v44 }
 0x1bb   : > { %v1469_v45 = vpop.eup %1468 }
 0x1bc   : > { %v805_v46 = vsel %vm798_vm0, %v1469_v45, 0.0 }
 0x1bd   : > { %806 = vadd.xlane.f32.xlu0 %v805_v46 }
 0x230   : > { %v807_v56 = vpop.xlane.xlu0 %806 }
 0x231   : > { %1470 = vrcp.f32 %v807_v56  ;;  %v819_v63 = vand.u32 2147483648, %v807_v56  ;;  %v817_v1 = vand.u32 2147483647, %v807_v56  ;;  %vm813_vm3 = vweird.f32 %v807_v56 }
 0x232   : > { %1472 = vrcp.f32 %v1484_v20 }
 0x233   : > { %v820_v4 = vor.u32 1.1754944e-38, %v819_v63  ;;  %vm818_vm5 = vcmp.eq.f32.partialorder %v817_v1, 8.507059e+37  ;;  %v1466_v63 = vld [vmem:[%s1783_s13] ss:$0 sm:$0xff] }
 0x237   : > { %v1471_v59 = vpop.eup %1470 }
 0x238   : > { %v809_v60 = vmul.f32 %v1471_v59, %v807_v56  ;;  %vm814_vm2 = vweird.f32 %v1471_v59  ;;  %v1473_v22 = vpop.eup %1472 }
 0x239   : > { %vm815_vm4 = vmor %vm813_vm3, %vm814_vm2  ;;  %v936_v23 = vmul.f32 128.0, %v1473_v22  ;;  %vm940_vm8 = vweird.f32 %v1473_v22 }
 0x23a   : > { %v810_v62 = vsub.f32 1.0, %v809_v60 }
 0x23b   : > { %v937_v24 = vsub.f32 1.0, %v936_v23 }
 0x23c   : > { %v811_v0 = vmul.f32 %v1471_v59, %v810_v62  ;;  %v1443_v62 = vld [vmem:[%s1784_s14] sm:$0xff] }
 0x23d   : > { %v938_v25 = vmul.f32 %v1473_v22, %v937_v24 }
 0x23e   : > { %v812_v3 = vadd.f32 %v1471_v59, %v811_v0 }
 0x23f   : > { %v939_v26 = vadd.f32 %v1473_v22, %v938_v25 }
 0x240   : > { %v816_v5 = vsel %vm815_vm4, %v1471_v59, %v812_v3 }
 0x241   : > { %v821_v6 = vsel %vm818_vm5, %v820_v4, %v816_v5  ;;  %v941_v27 = vsel %vm940_vm8, %v1473_v22, %v939_v26  ;;  %v1467_v5 = vld [vmem:[%s1785_s15] ss:$0 sm:$0xff] }
 0x242   : > { %v822_v7 = vmul.f32 %v1469_v45, %v821_v6  ;;  %v1447_v45 = vld [vmem:[%s1784_s14 + $0x20] sm:$0xff] }
 0x243   : > { %1124 = vmatpush.bf16.msrb.mxu1 %v1447_v45 }
 0x244   : > { %v823_v8 = vpack.c.bf16 %v822_v7, %v822_v7 }
 0x246   : > { %1304 = vmatmul.msk.bf16.vlgmr.msrb.gmra.mxu3 %vm825_vm6, %v823_v8 }
 0x247   : > { %1125 = vmatpush.bf16.msrb.mxu1 %v1446_v48 }
 0x24b   : > { %1126 = vmatpush.bf16.msrb.mxu1 %v1445_v51 }
 0x24f   : > { %1127 = vmatpush.bf16.msrb.mxu1 %v1444_v61 }
 0x253   : > { %1128 = vmatpush.bf16.msrb.mxu1 %v1443_v62 }
 0x2c9   : > { %v842_v10 = vpop.f32.mrf.mxu3 }
 0x2ca   : > { %v846_v11 = vpack.c.bf16 %v842_v10, %v842_v10 }
 0x2cc   : > { %923 = vmatmul.bf16.vlgmr.msra.gmra.mxu3 %v846_v11 }
 0x2d1   : > { %v844_v12 = vpop.f32.mrf.mxu3 }
 0x34f   : > { %v924_v14 = vpop.f32.mrf.mxu3 }
 0x350   : > { %v925_v15 = vadd.f32 %v1463_v13, %v924_v14 }
 0x352   : > { %v928_v17 = vadd.f32 %v925_v15, %v1636_v16 }
 0x354   : > { %v932_v18 = vsel %vm931_vm7, %v928_v17, 0.0 }
 0x355   : > { %933 = vadd.xlane.f32.xlu1 %v932_v18 }
 0x357   : > { %v926_v19 = vpop.f32.mrf.mxu3 }
 0x3c8   : > { %v934_v28 = vpop.xlane.xlu1 %933 }
 0x3c9   : > { %v942_v16 = vmul.f32 %v941_v27, %v934_v28 }
 0x3cb   : > { %v943_v29 = vsub.f32 %v928_v17, %v942_v16 }
 0x3cd   : > { %v944_v30 = vmul.f32 %v943_v29, %v943_v29 }
 0x3cf   : > { %v945_v31 = vsel %vm931_vm7, %v944_v30, 0.0 }
 0x3d0   : > { %946 = vadd.xlane.f32.xlu1 %v945_v31 }
 0x443   : > { %v947_v40 = vpop.xlane.xlu1 %946 }
 0x444   : > { %v948_v41 = vmul.f32 %v947_v40, %v941_v27 }
 0x446   : > { %v949_v43 = vadd.f32 1e-05, %v948_v41 }
 0x448   : > { %1474 = vrsqrt.f32 %v949_v43  ;;  %vm956_vm10 = vweird.f32 %v949_v43 }
 0x44e   : > { %v1475_v46 = vpop.eup %1474 }
 0x44f   : > { %v951_v47 = vmul.f32 %v1475_v46, %v949_v43  ;;  %vm957_vm9 = vweird.f32 %v1475_v46 }
 0x450   : > { %vm958_vm11 = vmor %vm956_vm10, %vm957_vm9 }
 0x451   : > { %v952_v49 = vmul.f32 %v1475_v46, %v951_v47 }
 0x453   : > { %v953_v50 = vmul.f32 0.5, %v952_v49 }
 0x455   : > { %v954_v52 = vsub.f32 1.5, %v953_v50 }
 0x457   : > { %v955_v53 = vmul.f32 %v1475_v46, %v954_v52 }
 0x459   : > { %v959_v55 = vsel %vm958_vm11, %v1475_v46, %v955_v53 }
 0x45a   : > { %v960_v56 = vmul.f32 %v959_v55, %v943_v29 }
 0x45c   : > { %v964_v58 = vmul.f32 %v1464_v54, %v960_v56 }
 0x45e   : > { %v968_v59 = vadd.f32 %v1465_v57, %v964_v58 }
 0x460   : > { %v969_v60 = vpack.c.bf16 %v968_v59, %v968_v59 }
 0x462   : > { %1046 = vmatmul.bf16.vlgmr.msrb.gmra.mxu0 %v969_v60 }
 0x4df   : > { %v1047_v0 = vpop.f32.mrf.mxu0 }
 0x4e0   : > { %v1048_v1 = vadd.f32 %v1466_v63, %v1047_v0 }
 0x4e2   : > { %v1051_v2 = vmax.f32 %v1048_v1, 0.0 }
 0x4e4   : > { %v1052_v3 = vpack.c.bf16 %v1051_v2, %v1051_v2 }
 0x4e6   : > { %1129 = vmatmul.bf16.vlgmr.msrb.gmra.mxu1 %v1052_v3 }
 0x4e7   : > { %v1049_v4 = vpop.f32.mrf.mxu0 }
 0x563   : > { %v1130_v6 = vpop.f32.mrf.mxu1 }
 0x564   : > { %v1131_v7 = vadd.f32 %v1467_v5, %v1130_v6 }
 0x566   : > { %1134 = vst [vmem:[%s533_s28] sm:$0xf] %v1131_v7 }
 0x56b   : > { %v1132_v8 = vpop.f32.mrf.mxu1 }
 0x56c PF: > { %s26_s21 = sadd.s32 1, %s1482_s21  }
 0x56d   : > { %p23_p4 = scmp.ge.s32.totalorder %s26_s21, 4  }
 0x56f   :  { %25 = sbr.rel (!%p23_p4) target bundleno = 2 (0x2), region = 117 }

// kernel: _lambda_.20
= control target key start
LH: loop header
LB: loop body
LE: loop exit
PB: predicated region body
PF: predicated region fallthrough
CT: control target
= control target key end

     0   :  { %s1219_s1 = inlined_call_operand.vmem [shape: bf16[1024,128], index: 1, kind: input, shape index: {}]   ;;  %s1220_s2 = inlined_call_operand.vmem [shape: f32[1,128], index: 2, kind: input, shape index: {}]   ;;  %s1221_s0 = inlined_call_operand.vmem [shape: f32[8,1024], index: 0, kind: input, shape index: {}]   ;;  %s1222_s3 = inlined_call_operand.vmem [shape: f32[8,128], index: 3, kind: output, shape index: {}]  }
   0x1   :  { %v919_v0 = vld [vmem:[%s1219_s1 + $0x38] sm:$0xff]  ;;  %v918_v4 = vld [vmem:[%s1219_s1 + $0x30] sm:$0xff]  ;;  %v917_v8 = vld [vmem:[%s1219_s1 + $0x28] sm:$0xff] }
   0x2   :  { %v927_v1 = vld [vmem:[%s1219_s1 + $0x78] sm:$0xff]  ;;  %546 = vmatpush.bf16.msra.mxu0 %v919_v0  ;;  %v926_v5 = vld [vmem:[%s1219_s1 + $0x70] sm:$0xff]  ;;  %v925_v9 = vld [vmem:[%s1219_s1 + $0x68] sm:$0xff] }
   0x3   :  { %v935_v2 = vld [vmem:[%s1219_s1 + $0xb8] sm:$0xff]  ;;  %559 = vmatpush.bf16.msra.mxu1 %v927_v1  ;;  %v934_v6 = vld [vmem:[%s1219_s1 + $0xb0] sm:$0xff]  ;;  %v933_v10 = vld [vmem:[%s1219_s1 + $0xa8] sm:$0xff] }
   0x4   :  { %v943_v3 = vld [vmem:[%s1219_s1 + $0xf8] sm:$0xff]  ;;  %572 = vmatpush.bf16.msra.mxu2 %v935_v2  ;;  %v942_v7 = vld [vmem:[%s1219_s1 + $0xf0] sm:$0xff]  ;;  %v941_v11 = vld [vmem:[%s1219_s1 + $0xe8] sm:$0xff] }
   0x5   :  { %585 = vmatpush.bf16.msra.mxu3 %v943_v3  ;;  %v916_v12 = vld [vmem:[%s1219_s1 + $0x20] sm:$0xff]  ;;  %v915_v16 = vld [vmem:[%s1219_s1 + $0x18] sm:$0xff]  ;;  %v914_v20 = vld [vmem:[%s1219_s1 + $0x10] sm:$0xff] }
   0x6   :  { %547 = vmatpush.bf16.msra.mxu0 %v918_v4  ;;  %v924_v13 = vld [vmem:[%s1219_s1 + $0x60] sm:$0xff]  ;;  %v923_v17 = vld [vmem:[%s1219_s1 + $0x58] sm:$0xff]  ;;  %v922_v21 = vld [vmem:[%s1219_s1 + $0x50] sm:$0xff] }
   0x7   :  { %560 = vmatpush.bf16.msra.mxu1 %v926_v5  ;;  %v932_v14 = vld [vmem:[%s1219_s1 + $0xa0] sm:$0xff]  ;;  %v931_v18 = vld [vmem:[%s1219_s1 + $0x98] sm:$0xff]  ;;  %v930_v22 = vld [vmem:[%s1219_s1 + $0x90] sm:$0xff] }
   0x8   :  { %573 = vmatpush.bf16.msra.mxu2 %v934_v6  ;;  %v940_v15 = vld [vmem:[%s1219_s1 + $0xe0] sm:$0xff]  ;;  %v939_v19 = vld [vmem:[%s1219_s1 + $0xd8] sm:$0xff]  ;;  %v938_v23 = vld [vmem:[%s1219_s1 + $0xd0] sm:$0xff] }
   0x9   :  { %586 = vmatpush.bf16.msra.mxu3 %v942_v7  ;;  %v913_v24 = vld [vmem:[%s1219_s1 + $0x8] sm:$0xff]  ;;  %v912_v28 = vld [vmem:[%s1219_s1] sm:$0xff]  ;;  %v951_v32 = vld [vmem:[%s1219_s1 + $0x138] sm:$0xff] }
   0xa   :  { %548 = vmatpush.bf16.msra.mxu0 %v917_v8  ;;  %v921_v25 = vld [vmem:[%s1219_s1 + $0x48] sm:$0xff]  ;;  %v920_v29 = vld [vmem:[%s1219_s1 + $0x40] sm:$0xff]  ;;  %v16_v33 = vld [vmem:[%s1221_s0 + $0x10] sm:$0xff] }
   0xb   :  { %561 = vmatpush.bf16.msra.mxu1 %v925_v9  ;;  %v929_v26 = vld [vmem:[%s1219_s1 + $0x88] sm:$0xff]  ;;  %v928_v30 = vld [vmem:[%s1219_s1 + $0x80] sm:$0xff]  ;;  %v17_v34 = vld [vmem:[%s1221_s0 + $0x18] sm:$0xff]  ;;  %v24_v40 = vpack.c.bf16 %v16_v33, %v16_v33 }
   0xc   :  { %574 = vmatpush.bf16.msra.mxu2 %v933_v10  ;;  %v937_v27 = vld [vmem:[%s1219_s1 + $0xc8] sm:$0xff]  ;;  %v936_v31 = vld [vmem:[%s1219_s1 + $0xc0] sm:$0xff]  ;;  %v959_v35 = vld [vmem:[%s1219_s1 + $0x178] sm:$0xff]  ;;  %v25_v41 = vpack.c.bf16 %v17_v34, %v17_v34 }
   0xd   :  { %587 = vmatpush.bf16.msra.mxu3 %v941_v11  ;;  %v14_v36 = vld [vmem:[%s1221_s0] sm:$0xff]  ;;  %v15_v37 = vld [vmem:[%s1221_s0 + $0x8] sm:$0xff]  ;;  %v967_v38 = vld [vmem:[%s1219_s1 + $0x1b8] sm:$0xff] }
   0xe   :  { %549 = vmatpush.bf16.msra.mxu0 %v916_v12  ;;  %v975_v39 = vld [vmem:[%s1219_s1 + $0x1f8] sm:$0xff]  ;;  %v22_v42 = vpack.c.bf16 %v14_v36, %v14_v36  ;;  %v23_v43 = vpack.c.bf16 %v15_v37, %v15_v37  ;;  %v950_v44 = vld [vmem:[%s1219_s1 + $0x130] sm:$0xff]  ;;  %v949_v48 = vld [vmem:[%s1219_s1 + $0x128] sm:$0xff] }
   0xf   :  { %562 = vmatpush.bf16.msra.mxu1 %v924_v13  ;;  %v958_v45 = vld [vmem:[%s1219_s1 + $0x170] sm:$0xff]  ;;  %v957_v49 = vld [vmem:[%s1219_s1 + $0x168] sm:$0xff]  ;;  %v948_v52 = vld [vmem:[%s1219_s1 + $0x120] sm:$0xff] }
  0x10   :  { %575 = vmatpush.bf16.msra.mxu2 %v932_v14  ;;  %v966_v46 = vld [vmem:[%s1219_s1 + $0x1b0] sm:$0xff]  ;;  %v965_v50 = vld [vmem:[%s1219_s1 + $0x1a8] sm:$0xff]  ;;  %v956_v53 = vld [vmem:[%s1219_s1 + $0x160] sm:$0xff] }
  0x11   :  { %588 = vmatpush.bf16.msra.mxu3 %v940_v15  ;;  %v974_v47 = vld [vmem:[%s1219_s1 + $0x1f0] sm:$0xff]  ;;  %v973_v51 = vld [vmem:[%s1219_s1 + $0x1e8] sm:$0xff]  ;;  %v964_v54 = vld [vmem:[%s1219_s1 + $0x1a0] sm:$0xff] }
  0x12   :  { %550 = vmatpush.bf16.msra.mxu0 %v915_v16  ;;  %v972_v55 = vld [vmem:[%s1219_s1 + $0x1e0] sm:$0xff]  ;;  %v947_v56 = vld [vmem:[%s1219_s1 + $0x118] sm:$0xff]  ;;  %v946_v60 = vld [vmem:[%s1219_s1 + $0x110] sm:$0xff] }
  0x13   :  { %563 = vmatpush.bf16.msra.mxu1 %v923_v17  ;;  %v955_v57 = vld [vmem:[%s1219_s1 + $0x158] sm:$0xff]  ;;  %v954_v61 = vld [vmem:[%s1219_s1 + $0x150] sm:$0xff]  ;;  %v945_v0 = vld [vmem:[%s1219_s1 + $0x108] sm:$0xff] }
  0x14   :  { %576 = vmatpush.bf16.msra.mxu2 %v931_v18  ;;  %v963_v58 = vld [vmem:[%s1219_s1 + $0x198] sm:$0xff]  ;;  %v962_v62 = vld [vmem:[%s1219_s1 + $0x190] sm:$0xff]  ;;  %v953_v1 = vld [vmem:[%s1219_s1 + $0x148] sm:$0xff] }
  0x15   :  { %589 = vmatpush.bf16.msra.mxu3 %v939_v19  ;;  %v971_v59 = vld [vmem:[%s1219_s1 + $0x1d8] sm:$0xff]  ;;  %v970_v63 = vld [vmem:[%s1219_s1 + $0x1d0] sm:$0xff]  ;;  %v961_v2 = vld [vmem:[%s1219_s1 + $0x188] sm:$0xff] }
  0x16   :  { %551 = vmatpush.bf16.msra.mxu0 %v914_v20  ;;  %v969_v3 = vld [vmem:[%s1219_s1 + $0x1c8] sm:$0xff]  ;;  %v944_v4 = vld [vmem:[%s1219_s1 + $0x100] sm:$0xff]  ;;  %v20_v10 = vld [vmem:[%s1221_s0 + $0x30] sm:$0xff] }
  0x17   :  { %564 = vmatpush.bf16.msra.mxu1 %v922_v21  ;;  %v952_v5 = vld [vmem:[%s1219_s1 + $0x140] sm:$0xff]  ;;  %v19_v8 = vld [vmem:[%s1221_s0 + $0x28] sm:$0xff]  ;;  %v21_v11 = vld [vmem:[%s1221_s0 + $0x38] sm:$0xff]  ;;  %v28_v14 = vpack.c.bf16 %v20_v10, %v20_v10 }
  0x18   :  { %577 = vmatpush.bf16.msra.mxu2 %v930_v22  ;;  %v960_v6 = vld [vmem:[%s1219_s1 + $0x180] sm:$0xff]  ;;  %v27_v13 = vpack.c.bf16 %v19_v8, %v19_v8  ;;  %v29_v15 = vpack.c.bf16 %v21_v11, %v21_v11 }
  0x19   :  { %590 = vmatpush.bf16.msra.mxu3 %v938_v23  ;;  %v18_v7 = vld [vmem:[%s1221_s0 + $0x20] sm:$0xff] }
  0x1a   :  { %552 = vmatpush.bf16.msra.mxu0 %v913_v24  ;;  %v968_v9 = vld [vmem:[%s1219_s1 + $0x1c0] sm:$0xff]  ;;  %v26_v12 = vpack.c.bf16 %v18_v7, %v18_v7 }
  0x1b   :  { %565 = vmatpush.bf16.msra.mxu1 %v921_v25  ;;  %v976_v22 = vld [vmem:[%s1220_s2] ss:$0 sm:$0xff] }
  0x1c   :  { %578 = vmatpush.bf16.msra.mxu2 %v929_v26 }
  0x1d   :  { %591 = vmatpush.bf16.msra.mxu3 %v937_v27 }
  0x1e   :  { %553 = vmatpush.bf16.msra.mxu0 %v912_v28 }
  0x1f   :  { %566 = vmatpush.bf16.msra.mxu1 %v920_v29 }
  0x20   :  { %579 = vmatpush.bf16.msra.mxu2 %v928_v30 }
  0x21   :  { %592 = vmatpush.bf16.msra.mxu3 %v936_v31  ;;  %554 = vmatmul.bf16.vlgmr.msra.gmra.mxu0 %v22_v42 }
  0x22   :  { %598 = vmatpush.bf16.msrb.mxu0 %v951_v32  ;;  %567 = vmatmul.bf16.vlgmr.msra.gmra.mxu1 %v23_v43 }
  0x23   :  { %611 = vmatpush.bf16.msrb.mxu1 %v959_v35  ;;  %580 = vmatmul.bf16.vlgmr.msra.gmra.mxu2 %v24_v40 }
  0x24   :  { %624 = vmatpush.bf16.msrb.mxu2 %v967_v38  ;;  %593 = vmatmul.bf16.vlgmr.msra.gmra.mxu3 %v25_v41 }
  0x25   :  { %637 = vmatpush.bf16.msrb.mxu3 %v975_v39 }
  0x26   :  { %599 = vmatpush.bf16.msrb.mxu0 %v950_v44 }
  0x27   :  { %612 = vmatpush.bf16.msrb.mxu1 %v958_v45 }
  0x28   :  { %625 = vmatpush.bf16.msrb.mxu2 %v966_v46 }
  0x29   :  { %638 = vmatpush.bf16.msrb.mxu3 %v974_v47 }
  0x2a   :  { %600 = vmatpush.bf16.msrb.mxu0 %v949_v48 }
  0x2b   :  { %613 = vmatpush.bf16.msrb.mxu1 %v957_v49 }
  0x2c   :  { %626 = vmatpush.bf16.msrb.mxu2 %v965_v50 }
  0x2d   :  { %639 = vmatpush.bf16.msrb.mxu3 %v973_v51 }
  0x2e   :  { %601 = vmatpush.bf16.msrb.mxu0 %v948_v52 }
  0x2f   :  { %614 = vmatpush.bf16.msrb.mxu1 %v956_v53 }
  0x30   :  { %627 = vmatpush.bf16.msrb.mxu2 %v964_v54 }
  0x31   :  { %640 = vmatpush.bf16.msrb.mxu3 %v972_v55 }
  0x32   :  { %602 = vmatpush.bf16.msrb.mxu0 %v947_v56 }
  0x33   :  { %615 = vmatpush.bf16.msrb.mxu1 %v955_v57 }
  0x34   :  { %628 = vmatpush.bf16.msrb.mxu2 %v963_v58 }
  0x35   :  { %641 = vmatpush.bf16.msrb.mxu3 %v971_v59 }
  0x36   :  { %603 = vmatpush.bf16.msrb.mxu0 %v946_v60 }
  0x37   :  { %616 = vmatpush.bf16.msrb.mxu1 %v954_v61 }
  0x38   :  { %629 = vmatpush.bf16.msrb.mxu2 %v962_v62 }
  0x39   :  { %642 = vmatpush.bf16.msrb.mxu3 %v970_v63 }
  0x3a   :  { %604 = vmatpush.bf16.msrb.mxu0 %v945_v0 }
  0x3b   :  { %617 = vmatpush.bf16.msrb.mxu1 %v953_v1 }
  0x3c   :  { %630 = vmatpush.bf16.msrb.mxu2 %v961_v2 }
  0x3d   :  { %643 = vmatpush.bf16.msrb.mxu3 %v969_v3 }
  0x3e   :  { %605 = vmatpush.bf16.msrb.mxu0 %v944_v4 }
  0x3f   :  { %618 = vmatpush.bf16.msrb.mxu1 %v952_v5 }
  0x40   :  { %631 = vmatpush.bf16.msrb.mxu2 %v960_v6 }
  0x41   :  { %644 = vmatpush.bf16.msrb.mxu3 %v968_v9  ;;  %606 = vmatmul.bf16.vlgmr.msrb.gmra.mxu0 %v26_v12 }
  0x42   :  { %619 = vmatmul.bf16.vlgmr.msrb.gmra.mxu1 %v27_v13 }
  0x43   :  { %632 = vmatmul.bf16.vlgmr.msrb.gmra.mxu2 %v28_v14 }
  0x44   :  { %645 = vmatmul.bf16.vlgmr.msrb.gmra.mxu3 %v29_v15 }
  0x9e   :  { %v555_v16 = vpop.f32.mrf.mxu0 }
  0x9f   :  { %v568_v17 = vpop.f32.mrf.mxu1  ;;  %v556_v25 = vadd.f32 %v976_v22, %v555_v16 }
  0xa1   :  { %v569_v26 = vadd.f32 %v568_v17, %v556_v25 }
  0xa6   :  { %v581_v18 = vpop.f32.mrf.mxu2  ;;  %v557_v20 = vpop.f32.mrf.mxu0 }
  0xa7   :  { %v594_v19 = vpop.f32.mrf.mxu3  ;;  %v570_v21 = vpop.f32.mrf.mxu1  ;;  %v582_v27 = vadd.f32 %v581_v18, %v569_v26 }
  0xa9   :  { %v595_v28 = vadd.f32 %v594_v19, %v582_v27 }
  0xae   :  { %v583_v23 = vpop.f32.mrf.mxu2 }
  0xaf   :  { %v596_v24 = vpop.f32.mrf.mxu3 }
  0xbe   :  { %v607_v29 = vpop.f32.mrf.mxu0 }
  0xbf   :  { %v620_v30 = vpop.f32.mrf.mxu1  ;;  %v608_v31 = vadd.f32 %v607_v29, %v595_v28 }
  0xc1   :  { %v621_v32 = vadd.f32 %v620_v30, %v608_v31 }
  0xc6   :  { %v633_v33 = vpop.f32.mrf.mxu2  ;;  %v609_v36 = vpop.f32.mrf.mxu0 }
  0xc7   :  { %v646_v34 = vpop.f32.mrf.mxu3  ;;  %v634_v35 = vadd.f32 %v633_v33, %v621_v32  ;;  %v622_v37 = vpop.f32.mrf.mxu1 }
  0xc9   :  { %v647_v38 = vadd.f32 %v646_v34, %v634_v35 }
  0xcb   :  { %v650_v39 = vmax.f32 %v647_v38, 0.0 }
  0xcd   :  { %651 = vst [vmem:[%s1222_s3] sm:$0xff] %v650_v39 }
  0xce   :  { %v635_v40 = vpop.f32.mrf.mxu2 }
  0xcf   :  { %v648_v41 = vpop.f32.mrf.mxu3 }

// kernel: _lambda_.23
= control target key start
LH: loop header
LB: loop body
LE: loop exit
PB: predicated region body
PF: predicated region fallthrough
CT: control target
= control target key end

     0   :  { %10 = vsyncpa [#allocation3], 0  ;;  %s355_s0 = inlined_call_operand.vmem [shape: f32[8,24], index: 0, kind: input, shape index: {}]   ;;  %s356_s1 = inlined_call_operand.vmem [shape: bf16[24,128], index: 1, kind: input, shape index: {}]   ;;  %s357_s2 = inlined_call_operand.hbm [shape: f32[1,128], index: 2, kind: input, shape index: {}]   ;;  %s358_s3 = inlined_call_operand.vmem [shape: bf16[128,128], index: 3, kind: input, shape index: {}]   ;;  %s359_s4 = inlined_call_operand.hbm [shape: f32[1,128], index: 4, kind: input, shape index: {}]   ;;  %s360_s5 = inlined_call_operand.vmem [shape: f32[8,128], index: 5, kind: output, shape index: {}]  }
   0x1   :  { %s21_s20 = sshll.u32 %s357_s2, 4  ;;  %s22_s20 = int_to_ptr.hbm [resolvable:$true] %s21_s20 }
   0x2   :  { %11 = vsyncpa [#allocation5], 0  ;;  %s281_s21 = smov [#allocation2]   ;;  %s34_s25 = sshll.u32 %s359_s4, 4  ;;  %s35_s25 = int_to_ptr.hbm [resolvable:$true] %s34_s25 }
   0x3   :  { %s23_s22 = sshll.u32 %s281_s21, 4  ;;  %s282_s26 = smov [#allocation4]   ;;  %s24_s22 = int_to_ptr.vmem [resolvable:$true] %s23_s22 }
   0x4   :  { %26 = dma.hbm_to_vmem [thread:$0]  %s22_s20, 16, %s24_s22, [#allocation3]  }
   0x5   :  { %s36_s27 = sshll.u32 %s282_s26, 4  ;;  %s37_s27 = int_to_ptr.vmem [resolvable:$true] %s36_s27 }
   0x6   :  { %39 = dma.hbm_to_vmem [thread:$0]  %s35_s25, 16, %s37_s27, [#allocation5]  }
   0x7   :  { %277 = dma.done.wait [#allocation3], 16  }
   0x8   :  { %278 = vsyncadd [#allocation3], 4294967280 }
   0x9   :  { %279 = dma.done.wait [#allocation5], 16  }
   0xa   :  { %280 = vsyncadd [#allocation5], 4294967280  ;;  %v52_v0 = vld [vmem:[%s356_s1 + $0x8] sm:$0xf]  ;;  %v224_v2 = vld [vmem:[%s358_s3 + $0x38] sm:$0xff]  ;;  %vm71_vm0 = vcmask 1043456  }
   0xb   :  { %v63_v1 = vunpack.c.l.b16 %v52_v0  ;;  %158 = vmatpush.bf16.msra.mxu1 %v224_v2  ;;  %v223_v4 = vld [vmem:[%s358_s3 + $0x30] sm:$0xff]  ;;  %v216_v6 = vld [vmem:[%s356_s1] sm:$0xff]  ;;  %v222_v8 = vld [vmem:[%s358_s3 + $0x28] sm:$0xff]  ;;  %vm67_vm1 = vcmask 195584  }
   0xc   :  { %v49_v7 = vld [vmem:[%s355_s0] sm:$0xff]  ;;  %v220_v11 = vld [vmem:[%s358_s3 + $0x18] sm:$0xff]  ;;  %v219_v12 = vld [vmem:[%s358_s3 + $0x10] sm:$0xff] }
   0xd   :  { %v65_v3 = vpack.c.b16 %v63_v1, %v63_v1  ;;  %v54_v9 = vpack.c.bf16 %v49_v7, %v49_v7  ;;  %v221_v10 = vld [vmem:[%s358_s3 + $0x20] sm:$0xff]  ;;  %v218_v13 = vld [vmem:[%s358_s3 + $0x8] sm:$0xff] }
   0xe   :  { %v217_v14 = vld [vmem:[%s358_s3] sm:$0xff] }
   0xf   :  { %v73_v5 = vsel %vm71_vm0, %v65_v3, 0  ;;  %159 = vmatpush.bf16.msra.mxu1 %v223_v4  ;;  %v227_v15 = vld [vmem:[#allocation2] ss:$0 sm:$0xff]  ;;  %v228_v21 = vld [vmem:[#allocation4] ss:$0 sm:$0xff] }
  0x10   :  { %81 = vmatpush.bf16.msra.mxu0 %v73_v5 }
  0x13   :  { %160 = vmatpush.bf16.msra.mxu1 %v222_v8 }
  0x14   :  { %82 = vmatpush.bf16.msra.mxu0 %v216_v6 }
  0x17   :  { %183 = vmatmul.msk.bf16.vlgmr.msra.gmra.mxu0 %vm67_vm1, %v54_v9  ;;  %161 = vmatpush.bf16.msra.mxu1 %v221_v10 }
  0x1b   :  { %162 = vmatpush.bf16.msra.mxu1 %v220_v11 }
  0x1f   :  { %163 = vmatpush.bf16.msra.mxu1 %v219_v12 }
  0x23   :  { %164 = vmatpush.bf16.msra.mxu1 %v218_v13 }
  0x27   :  { %165 = vmatpush.bf16.msra.mxu1 %v217_v14 }
  0x94   :  { %v84_v16 = vpop.f32.mrf.mxu0 }
  0x95   :  { %v85_v17 = vadd.f32 %v227_v15, %v84_v16 }
  0x97   :  { %v88_v18 = vmax.f32 %v85_v17, 0.0 }
  0x99   :  { %v106_v19 = vpack.c.bf16 %v88_v18, %v88_v18 }
  0x9b   :  { %166 = vmatmul.bf16.vlgmr.msra.gmra.mxu1 %v106_v19 }
  0x9c   :  { %v86_v20 = vpop.f32.mrf.mxu0 }
 0x118   :  { %v167_v22 = vpop.f32.mrf.mxu1 }
 0x119   :  { %v168_v23 = vadd.f32 %v228_v21, %v167_v22 }
 0x11b   :  { %v171_v24 = vmax.f32 %v168_v23, 0.0 }
 0x11d   :  { %172 = vst [vmem:[%s360_s5] sm:$0xff] %v171_v24 }
 0x120   :  { %v169_v25 = vpop.f32.mrf.mxu1 }
 0x121   :  { %177 = vsyncpa [#allocation3], 1 }
 0x122   :  { %178 = vsyncpa [#allocation5], 1 }

// kernel: _lambda_.22
= control target key start
LH: loop header
LB: loop body
LE: loop exit
PB: predicated region body
PF: predicated region fallthrough
CT: control target
= control target key end

     0   :  { %s2094_s0 = inlined_call_operand.vmem [shape: f32[2,4,128], index: 0, kind: input, shape index: {}]   ;;  %s2095_s1 = inlined_call_operand.vmem [shape: f32[2,4,128], index: 1, kind: input, shape index: {}]   ;;  %s2096_s2 = inlined_call_operand.vmem [shape: bf16[128,128], index: 2, kind: input, shape index: {}]   ;;  %s2097_s3 = inlined_call_operand.vmem [shape: f32[1,128], index: 3, kind: input, shape index: {}]   ;;  %s2098_s4 = inlined_call_operand.vmem [shape: bf16[128,128], index: 4, kind: input, shape index: {}]   ;;  %s2099_s5 = inlined_call_operand.vmem [shape: f32[1,128], index: 5, kind: input, shape index: {}]   ;;  %s2100_s6 = inlined_call_operand.vmem [shape: bf16[128,128], index: 6, kind: input, shape index: {}]   ;;  %s2101_s7 = inlined_call_operand.vmem [shape: f32[1,128], index: 7, kind: input, shape index: {}]   ;;  %s2102_s8 = inlined_call_operand.vmem [shape: bf16[128,128], index: 8, kind: input, shape index: {}]   ;;  %s2103_s9 = inlined_call_operand.vmem [shape: f32[1,128], index: 9, kind: input, shape index: {}]   ;;  %s2104_s10 = inlined_call_operand.hbm [shape: f32[1,128], index: 10, kind: input, shape index: {}]   ;;  %s2105_s11 = inlined_call_operand.hbm [shape: f32[1,128], index: 11, kind: input, shape index: {}]   ;;  %s2106_s12 = inlined_call_operand.vmem [shape: bf16[128,128], index: 12, kind: input, shape index: {}]   ;;  %s2107_s13 = inlined_call_operand.hbm [shape: f32[1,128], index: 13, kind: input, shape index: {}]   ;;  %s2108_s14 = inlined_call_operand.vmem [shape: bf16[128,128], index: 14, kind: input, shape index: {}]   ;;  %s2109_s15 = inlined_call_operand.hbm [shape: f32[1,128], index: 15, kind: input, shape index: {}]   ;;  %s2110_s16 = inlined_call_operand.vmem [shape: f32[2,4,128], index: 16, kind: output, shape index: {}]  }
   0x1   :  { %2111 = sst [smem:[#allocation12_spill]] %s2094_s0 }
   0x2   :  { %2112 = sst [smem:[#allocation13_spill]] %s2104_s10 }
   0x3   :  { %2113 = sst [smem:[#allocation14_spill]] %s2105_s11 }
   0x4   :  { %21 = vsyncpa [#allocation3], 0 }
   0x5   :  { %22 = vsyncpa [#allocation5], 0 }
   0x6   :  { %23 = vsyncpa [#allocation8], 0  ;;  %s1855_s21 = smov 0  }
   0x7 LB: > { %s2114_s11 = sld [smem:[#allocation14_spill]]  ;;  %s1864_s25 = sadd.s32 4294967295, %s1763_s21   ;;  %s1763_s21 = sphi %s1855_s21, %s29_s21  }
   0x8   : > { %p1302_p0 = scmp.ge.s32.totalorder %s1763_s21, 1  ;;  %p406_p1 = scmp.lt.s32.totalorder %s1763_s21, 3 }
   0x9   : > { %p1588_p2 = scmp.eq.s32.totalorder %s1864_s25, 0  ;;  %s1765_s27 = smov [#allocation4]  }
   0xa   : > { %p1869_p3 = pnand %p1302_p0, %p406_p1  ;;  %s456_s28 = sshll.u32 %s1765_s27, 4  ;;  %s457_s28 = int_to_ptr.vmem [resolvable:$true] %s456_s28 }
   0xb   : > { %s2116_s10 = sld [smem:[#allocation13_spill]]  ;;  %s469_s19 = sshll.u32 %s2107_s13, 4  ;;  %s470_s19 = int_to_ptr.hbm [resolvable:$true] %s469_s19 }
   0xc   : > { %p1575_p4 = pneg %p1869_p3  ;;  %s1766_s22 = smov [#allocation2]  }
   0xd   : > { %s454_s24 = sshll.u32 %s2114_s11, 4  ;;  %s444_s23 = sshll.u32 %s1766_s22, 4  ;;  %s455_s24 = int_to_ptr.hbm [resolvable:$true] %s454_s24  ;;  %s445_s23 = int_to_ptr.vmem [resolvable:$true] %s444_s23 }
   0xe   : > { %p1883_p5 = pnand %p1588_p2, %p1575_p4  ;;  %s1767_s27 = smov [#allocation6]  }
   0xf   : > { %s471_s29 = sshll.u32 %s1767_s27, 4  ;;  %s484_s18 = sshll.u32 %s2109_s15, 4  ;;  %s472_s29 = int_to_ptr.vmem [resolvable:$true] %s471_s29  ;;  %s485_s18 = int_to_ptr.hbm [resolvable:$true] %s484_s18 }
  0x10   : > { %1581 = dma.hbm_to_vmem [thread:$0]  (!%p1883_p5), %s455_s24, 16, %s457_s28, [#allocation5]  }
  0x11   : > { %s442_s0 = sshll.u32 %s2116_s10, 4  ;;  %s1768_s10 = smov [#allocation7]   ;;  %s443_s0 = int_to_ptr.hbm [resolvable:$true] %s442_s0 }
  0x12   : > { %1578 = dma.hbm_to_vmem [thread:$0]  (!%p1883_p5), %s443_s0, 16, %s445_s23, [#allocation3]  }
  0x13   : > { %1584 = dma.hbm_to_vmem [thread:$0]  (!%p1883_p5), %s470_s19, 16, %s472_s29, [#allocation5]  }
  0x14   : > { %s486_s11 = sshll.u32 %s1768_s10, 4  ;;  %513 = sbr.rel (%p1869_p3) target bundleno = 1406 (0x57e), region = 84  ;;  %s487_s11 = int_to_ptr.vmem [resolvable:$true] %s486_s11 }
  0x15   : > { %1587 = dma.hbm_to_vmem [thread:$0]  (!%p1883_p5), %s485_s18, 16, %s487_s11, [#allocation8]  }
  0x19   : > { %1750 = dma.done.wait (%p1588_p2), [#allocation3], 16  }
  0x1a   : > { %1752 = vsyncadd (%p1588_p2), [#allocation3], 4294967280 }
  0x1b   : > { %1754 = dma.done.wait (%p1588_p2), [#allocation5], 32  }
  0x1c   : > { %1756 = vsyncadd (%p1588_p2), [#allocation5], 4294967264 }
  0x1d   : > { %1758 = dma.done.wait (%p1588_p2), [#allocation8], 16  }
  0x1e   : > { %1760 = vsyncadd (%p1588_p2), [#allocation8], 4294967280  ;;  %v1518_v0 = vld [vmem:[%s2096_s2 + $0x38] sm:$0xff]  ;;  %v1517_v2 = vld [vmem:[%s2096_s2 + $0x30] sm:$0xff]  ;;  %p581_p6 = scmp.lt.s32.totalorder %s1864_s25, 1  ;;  %s2118_s11 = sld [smem:[#allocation12_spill]] }
  0x1f   : > { %v1526_v1 = vld [vmem:[%s2098_s4 + $0x38] sm:$0xff]  ;;  %665 = vmatpush.bf16.msra.mxu0 %v1518_v0  ;;  %v1525_v3 = vld [vmem:[%s2098_s4 + $0x30] sm:$0xff]  ;;  %v1516_v4 = vld [vmem:[%s2096_s2 + $0x28] sm:$0xff]  ;;  %vm857_vm0 = vcmask 27648   ;;  %vm888_vm1 = vcmask 1041408   ;;  %vm884_vm6 = vcmask 31744  }
  0x20   : > { %747 = vmatpush.bf16.msra.mxu1 %v1526_v1  ;;  %v1524_v5 = vld [vmem:[%s2098_s4 + $0x28] sm:$0xff]  ;;  %v1515_v6 = vld [vmem:[%s2096_s2 + $0x20] sm:$0xff]  ;;  %v1514_v8 = vld [vmem:[%s2096_s2 + $0x18] sm:$0xff]  ;;  %s2120_s25 = smov (!%p581_p6, %s1864_s25), 1  ;;  %vm990_vm7 = vcmask 1043456  }
  0x21   : > { %v1523_v7 = vld [vmem:[%s2098_s4 + $0x20] sm:$0xff]  ;;  %v1522_v9 = vld [vmem:[%s2098_s4 + $0x18] sm:$0xff]  ;;  %v1513_v10 = vld [vmem:[%s2096_s2 + $0x10] sm:$0xff]  ;;  %s1950_s23 = sshll.u32 %s2120_s25, 2 }
  0x22   : > { %v1521_v11 = vld [vmem:[%s2098_s4 + $0x10] sm:$0xff]  ;;  %v1512_v12 = vld [vmem:[%s2096_s2 + $0x8] sm:$0xff]  ;;  %s588_s25 = scalar_lea.vmem %s2095_s1, %s1950_s23  ;;  %v1511_v14 = vld [vmem:[%s2096_s2] sm:$0xff]  ;;  %s592_s22 = scalar_lea.vmem %s2110_s16, %s1950_s23 }
  0x23   : > { %666 = vmatpush.bf16.msra.mxu0 %v1517_v2  ;;  %v1520_v13 = vld [vmem:[%s2098_s4 + $0x8] sm:$0xff]  ;;  %v1519_v15 = vld [vmem:[%s2098_s4] sm:$0xff]  ;;  %v1534_v30 = vld [vmem:[%s2100_s6 + $0x38] sm:$0xff] }
  0x24   : > { %748 = vmatpush.bf16.msra.mxu1 %v1525_v3  ;;  %s584_s24 = scalar_lea.vmem %s2118_s11, %s1950_s23  ;;  %v595_v17 = vld [vmem:[%s588_s25] sm:$0xf]  ;;  %828 = vmatpush.bf16.msra.mxu2 %v1534_v30  ;;  %v1533_v31 = vld [vmem:[%s2100_s6 + $0x30] sm:$0xff]  ;;  %v1532_v32 = vld [vmem:[%s2100_s6 + $0x28] sm:$0xff] }
  0x25   : > { %v1972_v16 = vld [vmem:[%s584_s24] sm:$0xf]  ;;  %v678_v19 = vpack.c.bf16 %v595_v17, %v595_v17  ;;  %v1530_v34 = vld [vmem:[%s2100_s6 + $0x18] sm:$0xff]  ;;  %v1529_v35 = vld [vmem:[%s2100_s6 + $0x10] sm:$0xff] }
  0x26   : > { %v596_v18 = vpack.c.bf16 %v1972_v16, %v1972_v16  ;;  %v1610_v20 = vld [vmem:[%s2099_s5] ss:$0 sm:$0xff]  ;;  %v1528_v36 = vld [vmem:[%s2100_s6 + $0x8] sm:$0xff]  ;;  %v1542_v53 = vld [vmem:[%s2102_s8 + $0x38] sm:$0xff] }
  0x27   : > { %667 = vmatpush.bf16.msra.mxu0 %v1516_v4  ;;  %v1609_v21 = vld [vmem:[%s2097_s3] ss:$0 sm:$0xff]  ;;  %v1541_v54 = vld [vmem:[%s2102_s8 + $0x30] sm:$0xff]  ;;  %v1540_v55 = vld [vmem:[%s2102_s8 + $0x28] sm:$0xff] }
  0x28   : > { %749 = vmatpush.bf16.msra.mxu1 %v1524_v5  ;;  %829 = vmatpush.bf16.msra.mxu2 %v1533_v31  ;;  %v1531_v33 = vld [vmem:[%s2100_s6 + $0x20] sm:$0xff]  ;;  %v1538_v58 = vld [vmem:[%s2102_s8 + $0x18] sm:$0xff]  ;;  %v1537_v61 = vld [vmem:[%s2102_s8 + $0x10] sm:$0xff] }
  0x29   : > { %v1527_v39 = vld [vmem:[%s2100_s6] sm:$0xff]  ;;  %v1536_v2 = vld [vmem:[%s2102_s8 + $0x8] sm:$0xff] }
  0x2a   : > { %v1611_v49 = vld [vmem:[%s2101_s7] ss:$0 sm:$0xff] }
  0x2b   : > { %668 = vmatpush.bf16.msra.mxu0 %v1515_v6  ;;  %v1539_v57 = vld [vmem:[%s2102_s8 + $0x20] sm:$0xff] }
  0x2c   : > { %750 = vmatpush.bf16.msra.mxu1 %v1523_v7  ;;  %830 = vmatpush.bf16.msra.mxu2 %v1532_v32  ;;  %v1549_v32 = vld [vmem:[%s2106_s12 + $0x30] sm:$0xff] }
  0x2f   : > { %669 = vmatpush.bf16.msra.mxu0 %v1514_v8 }
  0x30   : > { %751 = vmatpush.bf16.msra.mxu1 %v1522_v9  ;;  %831 = vmatpush.bf16.msra.mxu2 %v1531_v33  ;;  %v1535_v9 = vld [vmem:[%s2102_s8] sm:$0xff]  ;;  %v1548_v33 = vld [vmem:[%s2106_s12 + $0x28] sm:$0xff] }
  0x33   : > { %670 = vmatpush.bf16.msra.mxu0 %v1513_v10 }
  0x34   : > { %752 = vmatpush.bf16.msra.mxu1 %v1521_v11  ;;  %832 = vmatpush.bf16.msra.mxu2 %v1530_v34  ;;  %v1547_v34 = vld [vmem:[%s2106_s12 + $0x20] sm:$0xff] }
  0x37   : > { %671 = vmatpush.bf16.msra.mxu0 %v1512_v12 }
  0x38   : > { %753 = vmatpush.bf16.msra.mxu1 %v1520_v13  ;;  %833 = vmatpush.bf16.msra.mxu2 %v1529_v35  ;;  %v1612_v13 = vld [vmem:[%s2103_s9] ss:$0 sm:$0xff]  ;;  %v1546_v35 = vld [vmem:[%s2106_s12 + $0x18] sm:$0xff] }
  0x3b   : > { %672 = vmatpush.bf16.msra.mxu0 %v1511_v14 }
  0x3c   : > { %754 = vmatpush.bf16.msra.mxu1 %v1519_v15  ;;  %834 = vmatpush.bf16.msra.mxu2 %v1528_v36  ;;  %v1545_v36 = vld [vmem:[%s2106_s12 + $0x10] sm:$0xff] }
  0x3e   : > { %673 = vmatmul.bf16.vlgmr.msra.gmra.mxu0 %v596_v18 }
  0x3f   : > { %755 = vmatmul.bf16.vlgmr.msra.gmra.mxu1 %v678_v19 }
  0x40   : > { %835 = vmatpush.bf16.msra.mxu2 %v1527_v39  ;;  %v1558_v39 = vld [vmem:[%s2108_s14 + $0x38] sm:$0xff] }
  0x41   : > { %1180 = vmatpush.bf16.msrb.mxu1 %v1558_v39 }
  0x43   : > { %836 = vmatmul.bf16.vlgmr.msra.gmra.mxu2 %v678_v19 }
  0xbb   : > { %v674_v22 = vpop.f32.mrf.mxu0 }
  0xbc   : > { %v756_v23 = vpop.f32.mrf.mxu1  ;;  %v675_v26 = vadd.f32 %v1609_v21, %v674_v22  ;;  %v1550_v21 = vld [vmem:[%s2106_s12 + $0x38] sm:$0xff] }
  0xbd   : > { %v757_v24 = vadd.f32 %v1610_v20, %v756_v23  ;;  %v1769_v20 = vmov 128.0   ;;  %1097 = vmatpush.bf16.msrb.mxu0 %v1550_v21 }
  0xbe   : > { %v841_v27 = vpack.c.bf16 %v675_v26, %v675_v26 }
  0xbf   : > { %v842_v25 = vpack.c.bf16 %v757_v24, %v757_v24 }
  0xc1   : > { %850 = vmatpush.bf16.xpose.msra.mxu3 %v842_v25  ;;  %1098 = vmatpush.bf16.msrb.mxu0 %v1549_v32 }
  0xc3   : > { %v676_v28 = vpop.f32.mrf.mxu0 }
  0xc4   : > { %v758_v29 = vpop.f32.mrf.mxu1 }
  0xc5   : > { %1099 = vmatpush.bf16.msrb.mxu0 %v1548_v33 }
  0xc6   : > { %v837_v47 = vpop.f32.mrf.mxu2 }
  0xc7   : > { %v838_v50 = vadd.f32 %v1611_v49, %v837_v47 }
  0xc8   : > { %851 = vmatmul.bf16.vlgmr.msra.gmra.mxu3 %v841_v27 }
  0xc9   : > { %v883_v51 = vpack.c.bf16 %v838_v50, %v838_v50  ;;  %1100 = vmatpush.bf16.msrb.mxu0 %v1547_v34 }
  0xcb   : > { %v890_v52 = vsel %vm888_vm1, %v883_v51, 0  ;;  %v1553_v51 = vld [vmem:[%s2108_s14 + $0x10] sm:$0xff] }
  0xcc   : > { %899 = vmatpush.bf16.msrb.mxu3 %v890_v52 }
  0xcd   : > { %1101 = vmatpush.bf16.msrb.mxu0 %v1546_v35 }
  0xce   : > { %v839_v48 = vpop.f32.mrf.mxu2 }
  0xcf   : > { %v1554_v48 = vld [vmem:[%s2108_s14 + $0x18] sm:$0xff] }
  0xd0   : > { %974 = vmatpush.bf16.msra.mxu3 %v1542_v53 }
  0xd1   : > { %1102 = vmatpush.bf16.msrb.mxu0 %v1545_v36 }
  0xd4   : > { %975 = vmatpush.bf16.msra.mxu3 %v1541_v54  ;;  %v1613_v54 = vld [vmem:[#allocation2] ss:$0 sm:$0xff] }
  0xd8   : > { %976 = vmatpush.bf16.msra.mxu3 %v1540_v55 }
  0xdc   : > { %977 = vmatpush.bf16.msra.mxu3 %v1539_v57  ;;  %v1614_v57 = vld [vmem:[#allocation4] ss:$0 sm:$0xff] }
  0xe0   : > { %978 = vmatpush.bf16.msra.mxu3 %v1538_v58 }
  0xe4   : > { %979 = vmatpush.bf16.msra.mxu3 %v1537_v61  ;;  %v1552_v61 = vld [vmem:[%s2108_s14 + $0x8] sm:$0xff] }
  0xe8   : > { %980 = vmatpush.bf16.msra.mxu3 %v1536_v2 }
  0xec   : > { %981 = vmatpush.bf16.msra.mxu3 %v1535_v9 }
 0x14b   : > { %v852_v37 = vpop.f32.mrf.mxu3 }
 0x14c   : > { %v856_v38 = vmul.f32 0.088388346, %v852_v37  ;;  %v1544_v37 = vld [vmem:[%s2106_s12 + $0x8] sm:$0xff] }
 0x14d   : > { %1103 = vmatpush.bf16.msrb.mxu0 %v1544_v37 }
 0x14e   : > { %v858_v40 = vsel %vm857_vm0, %v856_v38, -inf }
 0x14f   : > { %859 = vmax.xlane.f32.xlu0 %v858_v40 }
 0x153   : > { %v854_v41 = vpop.f32.mrf.mxu3 }
 0x1c2   : > { %v860_v42 = vpop.xlane.xlu0 %859 }
 0x1c3   : > { %v861_v43 = vsub.f32 %v856_v38, %v860_v42  ;;  %v1543_v38 = vld [vmem:[%s2106_s12] sm:$0xff]  ;;  %v1557_v42 = vld [vmem:[%s2108_s14 + $0x30] sm:$0xff] }
 0x1c4   : > { %1104 = vmatpush.bf16.msrb.mxu0 %v1543_v38  ;;  %1181 = vmatpush.bf16.msrb.mxu1 %v1557_v42 }
 0x1c5   : > { %v862_v44 = vmul.f32 1.442695, %v861_v43 }
 0x1c7   : > { %1617 = vpow2.f32 %v862_v44  ;;  %v1556_v44 = vld [vmem:[%s2108_s14 + $0x28] sm:$0xff] }
 0x1c8   : > { %1182 = vmatpush.bf16.msrb.mxu1 %v1556_v44 }
 0x1cd   : > { %v1618_v45 = vpop.eup %1617 }
 0x1ce   : > { %v864_v46 = vsel %vm857_vm0, %v1618_v45, 0.0 }
 0x1cf   : > { %865 = vadd.xlane.f32.xlu0 %v864_v46 }
 0x242   : > { %v866_v56 = vpop.xlane.xlu0 %865 }
 0x243   : > { %1619 = vrcp.f32 %v866_v56  ;;  %v878_v63 = vand.u32 2147483648, %v866_v56  ;;  %v876_v1 = vand.u32 2147483647, %v866_v56  ;;  %vm872_vm3 = vweird.f32 %v866_v56 }
 0x244   : > { %1621 = vrcp.f32 %v1769_v20 }
 0x245   : > { %v879_v4 = vor.u32 1.1754944e-38, %v878_v63  ;;  %vm877_vm5 = vcmp.eq.f32.partialorder %v876_v1, 8.507059e+37  ;;  %v1615_v63 = vld [vmem:[#allocation6] ss:$0 sm:$0xff] }
 0x249   : > { %v1620_v59 = vpop.eup %1619 }
 0x24a   : > { %v868_v60 = vmul.f32 %v1620_v59, %v866_v56  ;;  %vm873_vm2 = vweird.f32 %v1620_v59  ;;  %v1622_v22 = vpop.eup %1621 }
 0x24b   : > { %vm874_vm4 = vmor %vm872_vm3, %vm873_vm2  ;;  %v995_v23 = vmul.f32 128.0, %v1622_v22  ;;  %vm999_vm8 = vweird.f32 %v1622_v22 }
 0x24c   : > { %v869_v62 = vsub.f32 1.0, %v868_v60 }
 0x24d   : > { %v996_v24 = vsub.f32 1.0, %v995_v23 }
 0x24e   : > { %v870_v0 = vmul.f32 %v1620_v59, %v869_v62  ;;  %v1551_v62 = vld [vmem:[%s2108_s14] sm:$0xff] }
 0x24f   : > { %v997_v25 = vmul.f32 %v1622_v22, %v996_v24 }
 0x250   : > { %v871_v3 = vadd.f32 %v1620_v59, %v870_v0 }
 0x251   : > { %v998_v26 = vadd.f32 %v1622_v22, %v997_v25 }
 0x252   : > { %v875_v5 = vsel %vm874_vm4, %v1620_v59, %v871_v3 }
 0x253   : > { %v880_v6 = vsel %vm877_vm5, %v879_v4, %v875_v5  ;;  %v1000_v27 = vsel %vm999_vm8, %v1622_v22, %v998_v26  ;;  %v1616_v5 = vld [vmem:[#allocation7] ss:$0 sm:$0xff] }
 0x254   : > { %v881_v7 = vmul.f32 %v1618_v45, %v880_v6  ;;  %v1555_v45 = vld [vmem:[%s2108_s14 + $0x20] sm:$0xff] }
 0x255   : > { %1183 = vmatpush.bf16.msrb.mxu1 %v1555_v45 }
 0x256   : > { %v882_v8 = vpack.c.bf16 %v881_v7, %v881_v7 }
 0x258   : > { %1412 = vmatmul.msk.bf16.vlgmr.msrb.gmra.mxu3 %vm884_vm6, %v882_v8 }
 0x259   : > { %1184 = vmatpush.bf16.msrb.mxu1 %v1554_v48 }
 0x25d   : > { %1185 = vmatpush.bf16.msrb.mxu1 %v1553_v51 }
 0x261   : > { %1186 = vmatpush.bf16.msrb.mxu1 %v1552_v61 }
 0x265   : > { %1187 = vmatpush.bf16.msrb.mxu1 %v1551_v62 }
 0x2db   : > { %v901_v10 = vpop.f32.mrf.mxu3 }
 0x2dc   : > { %v905_v11 = vpack.c.bf16 %v901_v10, %v901_v10 }
 0x2de   : > { %982 = vmatmul.bf16.vlgmr.msra.gmra.mxu3 %v905_v11 }
 0x2e3   : > { %v903_v12 = vpop.f32.mrf.mxu3 }
 0x361   : > { %v983_v14 = vpop.f32.mrf.mxu3 }
 0x362   : > { %v984_v15 = vadd.f32 %v1612_v13, %v983_v14 }
 0x364   : > { %v987_v17 = vadd.f32 %v984_v15, %v1972_v16 }
 0x366   : > { %v991_v18 = vsel %vm990_vm7, %v987_v17, 0.0 }
 0x367   : > { %992 = vadd.xlane.f32.xlu1 %v991_v18 }
 0x369   : > { %v985_v19 = vpop.f32.mrf.mxu3 }
 0x3da   : > { %v993_v28 = vpop.xlane.xlu1 %992 }
 0x3db   : > { %v1001_v16 = vmul.f32 %v1000_v27, %v993_v28 }
 0x3dd   : > { %v1002_v29 = vsub.f32 %v987_v17, %v1001_v16 }
 0x3df   : > { %v1003_v30 = vmul.f32 %v1002_v29, %v1002_v29 }
 0x3e1   : > { %v1004_v31 = vsel %vm990_vm7, %v1003_v30, 0.0 }
 0x3e2   : > { %1005 = vadd.xlane.f32.xlu1 %v1004_v31 }
 0x455   : > { %v1006_v40 = vpop.xlane.xlu1 %1005 }
 0x456   : > { %v1007_v41 = vmul.f32 %v1006_v40, %v1000_v27 }
 0x458   : > { %v1008_v43 = vadd.f32 1e-05, %v1007_v41 }
 0x45a   : > { %1623 = vrsqrt.f32 %v1008_v43  ;;  %vm1015_vm10 = vweird.f32 %v1008_v43 }
 0x460   : > { %v1624_v46 = vpop.eup %1623 }
 0x461   : > { %v1010_v47 = vmul.f32 %v1624_v46, %v1008_v43  ;;  %vm1016_vm9 = vweird.f32 %v1624_v46 }
 0x462   : > { %vm1017_vm11 = vmor %vm1015_vm10, %vm1016_vm9 }
 0x463   : > { %v1011_v49 = vmul.f32 %v1624_v46, %v1010_v47 }
 0x465   : > { %v1012_v50 = vmul.f32 0.5, %v1011_v49 }
 0x467   : > { %v1013_v52 = vsub.f32 1.5, %v1012_v50 }
 0x469   : > { %v1014_v53 = vmul.f32 %v1624_v46, %v1013_v52 }
 0x46b   : > { %v1018_v55 = vsel %vm1017_vm11, %v1624_v46, %v1014_v53 }
 0x46c   : > { %v1019_v56 = vmul.f32 %v1018_v55, %v1002_v29 }
 0x46e   : > { %v1023_v58 = vmul.f32 %v1613_v54, %v1019_v56 }
 0x470   : > { %v1027_v59 = vadd.f32 %v1614_v57, %v1023_v58 }
 0x472   : > { %v1028_v60 = vpack.c.bf16 %v1027_v59, %v1027_v59 }
 0x474   : > { %1105 = vmatmul.bf16.vlgmr.msrb.gmra.mxu0 %v1028_v60 }
 0x4f1   : > { %v1106_v0 = vpop.f32.mrf.mxu0 }
 0x4f2   : > { %v1107_v1 = vadd.f32 %v1615_v63, %v1106_v0 }
 0x4f4   : > { %v1110_v2 = vmax.f32 %v1107_v1, 0.0 }
 0x4f6   : > { %v1111_v3 = vpack.c.bf16 %v1110_v2, %v1110_v2 }
 0x4f8   : > { %1188 = vmatmul.bf16.vlgmr.msrb.gmra.mxu1 %v1111_v3 }
 0x4f9   : > { %v1108_v4 = vpop.f32.mrf.mxu0 }
 0x575   : > { %v1189_v6 = vpop.f32.mrf.mxu1 }
 0x576   : > { %v1190_v7 = vadd.f32 %v1616_v5, %v1189_v6 }
 0x578   : > { %1193 = vst [vmem:[%s592_s22] sm:$0xf] %v1190_v7 }
 0x57d   : > { %v1191_v8 = vpop.f32.mrf.mxu1 }
 0x57e PF: > { %s29_s21 = sadd.s32 1, %s1763_s21  }
 0x57f   : > { %p26_p7 = scmp.ge.s32.totalorder %s29_s21, 4  }
 0x581   :  { %28 = sbr.rel (!%p26_p7) target bundleno = 7 (0x7), region = 134 }
 0x586   :  { %1213 = vsyncpa [#allocation3], 1 }
 0x587   :  { %1215 = vsyncpa [#allocation3 + $0x1], 1 }
 0x588   :  { %1216 = vsyncpa [#allocation5], 1 }
 0x589   :  { %1217 = vsyncpa [#allocation8], 1 }

// kernel: _lambda_.24
= control target key start
LH: loop header
LB: loop body
LE: loop exit
PB: predicated region body
PF: predicated region fallthrough
CT: control target
= control target key end

     0   :  { %s771_s3 = inlined_call_operand.vmem [shape: bf16[128,512], index: 3, kind: input, shape index: {}]   ;;  %s772_s0 = inlined_call_operand.vmem [shape: f32[8,128], index: 0, kind: input, shape index: {}]   ;;  %s773_s1 = inlined_call_operand.vmem [shape: f32[8,128], index: 1, kind: input, shape index: {}]   ;;  %s774_s2 = inlined_call_operand.vmem [shape: f32[8,128], index: 2, kind: input, shape index: {}]   ;;  %s775_s4 = inlined_call_operand.vmem [shape: f32[1,512], index: 4, kind: input, shape index: {}]   ;;  %s776_s5 = inlined_call_operand.vmem [shape: f32[1,512], index: 5, kind: input, shape index: {}]   ;;  %s777_s6 = inlined_call_operand.vmem [shape: f32[8,512], index: 6, kind: output, shape index: {}]  }
   0x1   :  { %v465_v0 = vld [vmem:[%s771_s3 + $0xe0] sm:$0xf]  ;;  %v509_v1 = vld [vmem:[%s771_s3 + $0xec] sm:$0xf0]  ;;  %v507_v2 = vld [vmem:[%s771_s3 + $0xe4] sm:$0xf] }
   0x2   :  { %v466_v3 = vor.u32 %v509_v1, %v465_v0  ;;  %v467_v4 = vld [vmem:[%s771_s3 + $0xf0] sm:$0xf0]  ;;  %v473_v5 = vld [vmem:[%s771_s3 + $0xe8] sm:$0xf]  ;;  %v510_v6 = vld [vmem:[%s771_s3 + $0xf4] sm:$0xf0] }
   0x3   :  { %v470_v7 = vor.u32 %v507_v2, %v467_v4  ;;  %v474_v8 = vor.u32 %v510_v6, %v473_v5  ;;  %v508_v9 = vld [vmem:[%s771_s3 + $0xec] sm:$0xf]  ;;  %v475_v10 = vld [vmem:[%s771_s3 + $0xf8] sm:$0xf0]  ;;  %v449_v11 = vld [vmem:[%s771_s3 + $0xc0] sm:$0xf] }
   0x4   :  { %221 = vmatpush.bf16.msra.mxu0 %v466_v3  ;;  %v478_v12 = vor.u32 %v508_v9, %v475_v10  ;;  %v505_v13 = vld [vmem:[%s771_s3 + $0xcc] sm:$0xf0]  ;;  %v503_v14 = vld [vmem:[%s771_s3 + $0xc4] sm:$0xf]  ;;  %v451_v15 = vld [vmem:[%s771_s3 + $0xd0] sm:$0xf0] }
   0x5   :  { %234 = vmatpush.bf16.msra.mxu1 %v470_v7  ;;  %247 = vmatpush.bf16.msra.mxu2 %v474_v8  ;;  %v450_v16 = vor.u32 %v505_v13, %v449_v11  ;;  %v454_v17 = vor.u32 %v503_v14, %v451_v15  ;;  %v457_v18 = vld [vmem:[%s771_s3 + $0xc8] sm:$0xf]  ;;  %v506_v19 = vld [vmem:[%s771_s3 + $0xd4] sm:$0xf0]  ;;  %v504_v20 = vld [vmem:[%s771_s3 + $0xcc] sm:$0xf] }
   0x6   :  { %260 = vmatpush.bf16.msra.mxu3 %v478_v12  ;;  %v458_v21 = vor.u32 %v506_v19, %v457_v18  ;;  %v459_v22 = vld [vmem:[%s771_s3 + $0xd8] sm:$0xf0]  ;;  %v433_v23 = vld [vmem:[%s771_s3 + $0xa0] sm:$0xf]  ;;  %v501_v24 = vld [vmem:[%s771_s3 + $0xac] sm:$0xf0] }
   0x7   :  { %v462_v25 = vor.u32 %v504_v20, %v459_v22  ;;  %v499_v26 = vld [vmem:[%s771_s3 + $0xa4] sm:$0xf]  ;;  %v435_v27 = vld [vmem:[%s771_s3 + $0xb0] sm:$0xf0]  ;;  %v441_v28 = vld [vmem:[%s771_s3 + $0xa8] sm:$0xf]  ;;  %v434_v29 = vor.u32 %v501_v24, %v433_v23 }
   0x8   :  { %222 = vmatpush.bf16.msra.mxu0 %v450_v16  ;;  %v502_v30 = vld [vmem:[%s771_s3 + $0xb4] sm:$0xf0]  ;;  %v500_v31 = vld [vmem:[%s771_s3 + $0xac] sm:$0xf]  ;;  %v443_v32 = vld [vmem:[%s771_s3 + $0xb8] sm:$0xf0]  ;;  %v438_v33 = vor.u32 %v499_v26, %v435_v27 }
   0x9   :  { %235 = vmatpush.bf16.msra.mxu1 %v454_v17  ;;  %248 = vmatpush.bf16.msra.mxu2 %v458_v21  ;;  %v442_v34 = vor.u32 %v502_v30, %v441_v28  ;;  %v417_v35 = vld [vmem:[%s771_s3 + $0x80] sm:$0xf]  ;;  %v497_v36 = vld [vmem:[%s771_s3 + $0x8c] sm:$0xf0]  ;;  %v495_v37 = vld [vmem:[%s771_s3 + $0x84] sm:$0xf]  ;;  %v446_v38 = vor.u32 %v500_v31, %v443_v32 }
   0xa   :  { %261 = vmatpush.bf16.msra.mxu3 %v462_v25  ;;  %v419_v39 = vld [vmem:[%s771_s3 + $0x90] sm:$0xf0]  ;;  %v425_v40 = vld [vmem:[%s771_s3 + $0x88] sm:$0xf]  ;;  %v498_v41 = vld [vmem:[%s771_s3 + $0x94] sm:$0xf0]  ;;  %v418_v44 = vor.u32 %v497_v36, %v417_v35 }
   0xb   :  { %v496_v42 = vld [vmem:[%s771_s3 + $0x8c] sm:$0xf]  ;;  %v427_v43 = vld [vmem:[%s771_s3 + $0x98] sm:$0xf0]  ;;  %v422_v45 = vor.u32 %v495_v37, %v419_v39  ;;  %v426_v46 = vor.u32 %v498_v41, %v425_v40  ;;  %v401_v47 = vld [vmem:[%s771_s3 + $0x60] sm:$0xf] }
   0xc   :  { %223 = vmatpush.bf16.msra.mxu0 %v434_v29  ;;  %v493_v48 = vld [vmem:[%s771_s3 + $0x6c] sm:$0xf0]  ;;  %v491_v49 = vld [vmem:[%s771_s3 + $0x64] sm:$0xf]  ;;  %v430_v50 = vor.u32 %v496_v42, %v427_v43  ;;  %v403_v51 = vld [vmem:[%s771_s3 + $0x70] sm:$0xf0] }
   0xd   :  { %236 = vmatpush.bf16.msra.mxu1 %v438_v33  ;;  %249 = vmatpush.bf16.msra.mxu2 %v442_v34  ;;  %v409_v52 = vld [vmem:[%s771_s3 + $0x68] sm:$0xf]  ;;  %v494_v53 = vld [vmem:[%s771_s3 + $0x74] sm:$0xf0]  ;;  %v492_v54 = vld [vmem:[%s771_s3 + $0x6c] sm:$0xf]  ;;  %v402_v56 = vor.u32 %v493_v48, %v401_v47  ;;  %v406_v57 = vor.u32 %v491_v49, %v403_v51 }
   0xe   :  { %262 = vmatpush.bf16.msra.mxu3 %v446_v38  ;;  %v411_v55 = vld [vmem:[%s771_s3 + $0x78] sm:$0xf0]  ;;  %v410_v58 = vor.u32 %v494_v53, %v409_v52  ;;  %v385_v59 = vld [vmem:[%s771_s3 + $0x40] sm:$0xf]  ;;  %v489_v60 = vld [vmem:[%s771_s3 + $0x4c] sm:$0xf0] }
   0xf   :  { %v487_v61 = vld [vmem:[%s771_s3 + $0x44] sm:$0xf]  ;;  %v414_v62 = vor.u32 %v492_v54, %v411_v55  ;;  %v387_v63 = vld [vmem:[%s771_s3 + $0x50] sm:$0xf0]  ;;  %v393_v0 = vld [vmem:[%s771_s3 + $0x48] sm:$0xf]  ;;  %v386_v4 = vor.u32 %v489_v60, %v385_v59 }
  0x10   :  { %224 = vmatpush.bf16.msra.mxu0 %v418_v44  ;;  %v490_v1 = vld [vmem:[%s771_s3 + $0x54] sm:$0xf0]  ;;  %v488_v2 = vld [vmem:[%s771_s3 + $0x4c] sm:$0xf]  ;;  %v395_v3 = vld [vmem:[%s771_s3 + $0x58] sm:$0xf0]  ;;  %v390_v7 = vor.u32 %v487_v61, %v387_v63 }
  0x11   :  { %237 = vmatpush.bf16.msra.mxu1 %v422_v45  ;;  %250 = vmatpush.bf16.msra.mxu2 %v426_v46  ;;  %v369_v5 = vld [vmem:[%s771_s3 + $0x20] sm:$0xf]  ;;  %v485_v6 = vld [vmem:[%s771_s3 + $0x2c] sm:$0xf0]  ;;  %v394_v8 = vor.u32 %v490_v1, %v393_v0  ;;  %v483_v9 = vld [vmem:[%s771_s3 + $0x24] sm:$0xf]  ;;  %v398_v12 = vor.u32 %v488_v2, %v395_v3 }
  0x12   :  { %263 = vmatpush.bf16.msra.mxu3 %v430_v50  ;;  %v371_v10 = vld [vmem:[%s771_s3 + $0x30] sm:$0xf0]  ;;  %v377_v11 = vld [vmem:[%s771_s3 + $0x28] sm:$0xf]  ;;  %v486_v13 = vld [vmem:[%s771_s3 + $0x34] sm:$0xf0]  ;;  %v370_v19 = vor.u32 %v485_v6, %v369_v5 }
  0x13   :  { %v23_v14 = vld [vmem:[%s772_s0] sm:$0xff]  ;;  %v484_v16 = vld [vmem:[%s771_s3 + $0x2c] sm:$0xf]  ;;  %v379_v17 = vld [vmem:[%s771_s3 + $0x38] sm:$0xf0]  ;;  %v374_v21 = vor.u32 %v483_v9, %v371_v10  ;;  %v378_v22 = vor.u32 %v486_v13, %v377_v11  ;;  %v516_v49 = vmov 512.0  }
  0x14   :  { %225 = vmatpush.bf16.msra.mxu0 %v402_v56  ;;  %v24_v15 = vld [vmem:[%s773_s1] sm:$0xff]  ;;  %v481_v24 = vld [vmem:[%s771_s3 + $0xc] sm:$0xf0]  ;;  %v382_v26 = vor.u32 %v484_v16, %v379_v17  ;;  %v355_v27 = vld [vmem:[%s771_s3 + $0x10] sm:$0xf0]  ;;  %512 = vrcp.f32 %v516_v49 }
  0x15   :  { %238 = vmatpush.bf16.msra.mxu1 %v406_v57  ;;  %251 = vmatpush.bf16.msra.mxu2 %v410_v58  ;;  %v25_v18 = vmul.f32 %v24_v15, %v23_v14  ;;  %v26_v20 = vld [vmem:[%s774_s2] sm:$0xff]  ;;  %v361_v28 = vld [vmem:[%s771_s3 + $0x8] sm:$0xf]  ;;  %v482_v29 = vld [vmem:[%s771_s3 + $0x14] sm:$0xf0] }
  0x16   :  { %264 = vmatpush.bf16.msra.mxu3 %v414_v62  ;;  %v353_v23 = vld [vmem:[%s771_s3] sm:$0xf]  ;;  %v479_v25 = vld [vmem:[%s771_s3 + $0x4] sm:$0xf]  ;;  %v480_v30 = vld [vmem:[%s771_s3 + $0xc] sm:$0xf]  ;;  %v362_v35 = vor.u32 %v482_v29, %v361_v28 }
  0x17   :  { %v363_v31 = vld [vmem:[%s771_s3 + $0x18] sm:$0xf0]  ;;  %v27_v32 = vmul.f32 %v26_v20, %v25_v18  ;;  %v354_v33 = vor.u32 %v481_v24, %v353_v23  ;;  %v358_v34 = vor.u32 %v479_v25, %v355_v27  ;;  %v274_v14 = vld [vmem:[%s776_s5] sm:$0xf] }
  0x18   :  { %226 = vmatpush.bf16.msra.mxu0 %v386_v4  ;;  %v366_v36 = vor.u32 %v480_v30, %v363_v31  ;;  %v331_v20 = vperm.slane %v274_v14, 0  ;;  %v334_v28 = vperm.slane %v274_v14, 3 }
  0x19   :  { %239 = vmatpush.bf16.msra.mxu1 %v390_v7  ;;  %252 = vmatpush.bf16.msra.mxu2 %v394_v8  ;;  %v28_v37 = vpack.c.bf16 %v27_v32, %v27_v32 }
  0x1a   :  { %265 = vmatpush.bf16.msra.mxu3 %v398_v12  ;;  %v513_v50 = vpop.eup %512  ;;  %v273_v12 = vld [vmem:[%s775_s4] sm:$0xf] }
  0x1b   :  { %v281_v51 = vmul.f32 512.0, %v513_v50  ;;  %vm285_vm0 = vweird.f32 %v513_v50  ;;  %v318_v16 = vperm.slane %v273_v12, 0  ;;  %v319_v17 = vperm.slane %v273_v12, 1 }
  0x1c   :  { %227 = vmatpush.bf16.msra.mxu0 %v370_v19  ;;  %v320_v18 = vperm.slane %v273_v12, 2  ;;  %v321_v19 = vperm.slane %v273_v12, 3 }
  0x1d   :  { %240 = vmatpush.bf16.msra.mxu1 %v374_v21  ;;  %253 = vmatpush.bf16.msra.mxu2 %v378_v22  ;;  %v282_v52 = vsub.f32 1.0, %v281_v51  ;;  %v332_v21 = vperm.slane %v274_v14, 1  ;;  %v333_v22 = vperm.slane %v274_v14, 2 }
  0x1e   :  { %266 = vmatpush.bf16.msra.mxu3 %v382_v26 }
  0x1f   :  { %v283_v53 = vmul.f32 %v513_v50, %v282_v52 }
  0x20   :  { %228 = vmatpush.bf16.msra.mxu0 %v354_v33 }
  0x21   :  { %241 = vmatpush.bf16.msra.mxu1 %v358_v34  ;;  %254 = vmatpush.bf16.msra.mxu2 %v362_v35  ;;  %v284_v54 = vadd.f32 %v513_v50, %v283_v53 }
  0x22   :  { %267 = vmatpush.bf16.msra.mxu3 %v366_v36 }
  0x23   :  { %229 = vmatmul.bf16.vlgmr.msra.gmra.mxu0 %v28_v37  ;;  %v286_v55 = vsel %vm285_vm0, %v513_v50, %v284_v54 }
  0x24   :  { %242 = vmatmul.bf16.vlgmr.msra.gmra.mxu1 %v28_v37  ;;  %255 = vmatmul.bf16.vlgmr.msra.gmra.mxu2 %v28_v37 }
  0x25   :  { %268 = vmatmul.bf16.vlgmr.msra.gmra.mxu3 %v28_v37 }
  0xa0   :  { %v230_v38 = vpop.f32.mrf.mxu0 }
  0xa1   :  { %v243_v39 = vpop.f32.mrf.mxu1 }
  0xa2   :  { %v275_v40 = vadd.f32 %v243_v39, %v230_v38 }
  0xa7   :  { %v256_v41 = vpop.f32.mrf.mxu2 }
  0xa8   :  { %v276_v42 = vadd.f32 %v275_v40, %v256_v41  ;;  %v269_v43 = vpop.f32.mrf.mxu3  ;;  %v232_v44 = vpop.f32.mrf.mxu0 }
  0xa9   :  { %v245_v45 = vpop.f32.mrf.mxu1 }
  0xaa   :  { %v277_v46 = vadd.f32 %v276_v42, %v269_v43 }
  0xac   :  { %278 = vadd.xlane.f32.xlu0 %v277_v46 }
  0xaf   :  { %v258_v47 = vpop.f32.mrf.mxu2 }
  0xb0   :  { %v271_v48 = vpop.f32.mrf.mxu3 }
 0x11f   :  { %v279_v56 = vpop.xlane.xlu0 %278 }
 0x120   :  { %v287_v57 = vmul.f32 %v286_v55, %v279_v56 }
 0x122   :  { %v288_v58 = vsub.f32 %v230_v38, %v287_v57  ;;  %v289_v59 = vsub.f32 %v243_v39, %v287_v57  ;;  %v290_v60 = vsub.f32 %v256_v41, %v287_v57  ;;  %v291_v61 = vsub.f32 %v269_v43, %v287_v57 }
 0x124   :  { %v292_v62 = vmul.f32 %v288_v58, %v288_v58  ;;  %v293_v63 = vmul.f32 %v289_v59, %v289_v59  ;;  %v294_v0 = vmul.f32 %v290_v60, %v290_v60  ;;  %v295_v2 = vmul.f32 %v291_v61, %v291_v61 }
 0x126   :  { %v296_v1 = vadd.f32 %v293_v63, %v292_v62 }
 0x128   :  { %v297_v3 = vadd.f32 %v296_v1, %v294_v0 }
 0x12a   :  { %v298_v4 = vadd.f32 %v297_v3, %v295_v2 }
 0x12c   :  { %299 = vadd.xlane.f32.xlu0 %v298_v4 }
 0x19f   :  { %v300_v5 = vpop.xlane.xlu0 %299 }
 0x1a0   :  { %v301_v6 = vmul.f32 %v300_v5, %v286_v55 }
 0x1a2   :  { %v302_v7 = vadd.f32 1e-05, %v301_v6 }
 0x1a4   :  { %514 = vrsqrt.f32 %v302_v7  ;;  %vm309_vm2 = vweird.f32 %v302_v7 }
 0x1aa   :  { %v515_v8 = vpop.eup %514 }
 0x1ab   :  { %v304_v9 = vmul.f32 %v515_v8, %v302_v7  ;;  %vm310_vm1 = vweird.f32 %v515_v8 }
 0x1ac   :  { %vm311_vm3 = vmor %vm309_vm2, %vm310_vm1 }
 0x1ad   :  { %v305_v10 = vmul.f32 %v515_v8, %v304_v9 }
 0x1af   :  { %v306_v11 = vmul.f32 0.5, %v305_v10 }
 0x1b1   :  { %v307_v13 = vsub.f32 1.5, %v306_v11 }
 0x1b3   :  { %v308_v15 = vmul.f32 %v515_v8, %v307_v13 }
 0x1b5   :  { %v312_v23 = vsel %vm311_vm3, %v515_v8, %v308_v15 }
 0x1b6   :  { %v313_v24 = vmul.f32 %v312_v23, %v288_v58  ;;  %v314_v25 = vmul.f32 %v312_v23, %v289_v59  ;;  %v315_v26 = vmul.f32 %v312_v23, %v290_v60  ;;  %v316_v27 = vmul.f32 %v312_v23, %v291_v61 }
 0x1b8   :  { %v326_v29 = vmul.f32 %v318_v16, %v313_v24  ;;  %v327_v30 = vmul.f32 %v319_v17, %v314_v25  ;;  %v328_v31 = vmul.f32 %v320_v18, %v315_v26  ;;  %v329_v32 = vmul.f32 %v321_v19, %v316_v27 }
 0x1ba   :  { %v339_v33 = vadd.f32 %v331_v20, %v326_v29  ;;  %v340_v34 = vadd.f32 %v332_v21, %v327_v30  ;;  %v341_v35 = vadd.f32 %v333_v22, %v328_v31  ;;  %v342_v36 = vadd.f32 %v334_v28, %v329_v32 }
 0x1bc   :  { %343 = vst [vmem:[%s777_s6] sm:$0xff] %v339_v33 }
 0x1bd   :  { %344 = vst [vmem:[%s777_s6 + $0x8] sm:$0xff] %v340_v34 }
 0x1be   :  { %345 = vst [vmem:[%s777_s6 + $0x10] sm:$0xff] %v341_v35 }
 0x1bf   :  { %346 = vst [vmem:[%s777_s6 + $0x18] sm:$0xff] %v342_v36 }

// kernel: _lambda_.25
= control target key start
LH: loop header
LB: loop body
LE: loop exit
PB: predicated region body
PF: predicated region fallthrough
CT: control target
= control target key end

     0   :  { %s1898_s0 = inlined_call_operand.vmem [shape: f32[4,2,512], index: 0, kind: input, shape index: {}]   ;;  %s1899_s1 = inlined_call_operand.vmem [shape: f32[4,2,1], index: 1, kind: input, shape index: {}]   ;;  %s1900_s2 = inlined_call_operand.vmem [shape: f32[2,128], index: 2, kind: input, shape index: {}]   ;;  %s1901_s3 = inlined_call_operand.vmem [shape: f32[2,128], index: 3, kind: input, shape index: {}]   ;;  %s1902_s4 = inlined_call_operand.vmem [shape: bf16[128,512], index: 4, kind: input, shape index: {}]   ;;  %s1903_s5 = inlined_call_operand.vmem [shape: f32[1,512], index: 5, kind: input, shape index: {}]   ;;  %s1904_s6 = inlined_call_operand.vmem [shape: f32[1,512], index: 6, kind: input, shape index: {}]   ;;  %s1905_s7 = inlined_call_operand.vmem [shape: f32[1,512], index: 7, kind: input, shape index: {}]   ;;  %s1906_s8 = inlined_call_operand.hbm [shape: f32[1,128], index: 8, kind: input, shape index: {}]   ;;  %s1907_s9 = inlined_call_operand.hbm [shape: f32[1,128], index: 9, kind: input, shape index: {}]   ;;  %s1908_s10 = inlined_call_operand.hbm [shape: f32[4,2,128], index: 10, kind: output, shape index: {0}]   ;;  %s1909_s11 = inlined_call_operand.vmem [shape: f32[2,128], index: 11, kind: output, shape index: {1}]   ;;  %s1910_s12 = inlined_call_operand.vmem [shape: f32[2,128], index: 12, kind: output, shape index: {2}]  }
   0x1   :  { %1916 = sst [smem:[#allocation17_spill]] %s1906_s8 }
   0x2   :  { %1917 = sst [smem:[#allocation18_spill]] %s1907_s9 }
   0x3   :  { %18 = vsyncpa [#allocation5], 0 }
   0x4   :  { %19 = vsyncpa [#allocation8], 0 }
   0x5   :  { %20 = vsyncpa [#allocation6], 0 }
   0x6   :  { %22 = vsyncpa [#allocation6 + $0x1], 0  ;;  %s1533_s21 = smov 0   ;;  %s1535_s22 = smov 0  }
   0x7   :  { %s1537_s23 = smov 0   ;;  %s1539_s24 = smov 0  }
   0x8 LB: > { %1918 = sst [smem:[#allocation13_spill]] %s1457_s23  ;;  %s1554_s25 = sadd.s32 4294967295, %s1461_s24   ;;  %s1461_s24 = sphi %s1539_s24, %s1929_s24   ;;  %s1457_s23 = sphi %s1537_s23, %s1931_s23   ;;  %s1453_s22 = sphi %s1535_s22, %s1933_s22   ;;  %s1449_s21 = sphi %s1533_s21, %s1932_s21  }
   0x9   : > { %s1060_s26 = sadd.s32 4294967294, %s1461_s24   ;;  %s1558_s27 = sadd.s32 1, %s1461_s24  }
   0xa   : > { %1919 = sst [smem:[#allocation14_spill]] %s1558_s27  ;;  %s255_s28 = sadd.s32 1, %s1457_s23 }
   0xb   : > { %s252_s29 = ssub.s32 %s1461_s24, %s1558_s27  ;;  %p265_p0 = scmp.ne.s32.totalorder %s1457_s23, %s1453_s22 }
   0xc   : > { %p253_p1 = scmp.eq.s32.totalorder %s252_s29, 0  ;;  %p266_p2 = scmp.eq.s32.totalorder %s1554_s25, 3 }
   0xd   : > { %p271_p3 = scmp.ne.s32.totalorder %s1453_s22, %s1449_s21  ;;  %p272_p4 = scmp.eq.s32.totalorder %s1060_s26, 3 }
   0xe   : > { %s1569_s30 = scalar_select %p253_p1, %s1457_s23, %s255_s28  }
   0xf   : > { %p1571_p5 = por %p266_p2, %p265_p0  ;;  %p1575_p6 = por %p272_p4, %p271_p3 }
  0x10   : > { %1920 = sst [smem:[#allocation15_spill]] %s1569_s30  ;;  %p1061_p7 = scmp.ge.s32.totalorder %s1461_s24, 1 }
  0x11   : > { %s1922_s14 = scalar_select %p1575_p6, 1, 0 }
  0x12   : > { %p321_p8 = scmp.lt.s32.totalorder %s1461_s24, 5  ;;  %p1062_p9 = scmp.ne.s32.totalorder %s1554_s25, 0 }
  0x13   : > { %1923 = sst [smem:[#allocation16_spill]] %s1922_s14  ;;  %p1262_p10 = scmp.eq.s32.totalorder %s1554_s25, 0 }
  0x14   : > { %p1583_p11 = pnand %p1061_p7, %p321_p8  ;;  %s1925_s8 = sld [smem:[#allocation17_spill]] }
  0x15   : > { %s1463_s19 = smov [#allocation4]   ;;  %s1926_s9 = sld [smem:[#allocation18_spill]] }
  0x16   : > { %p1251_p12 = pneg %p1583_p11  ;;  %s353_s20 = sshll.u32 %s1463_s19, 4  ;;  %s354_s20 = int_to_ptr.vmem [resolvable:$true] %s353_s20 }
  0x17   : > { %s1464_s30 = smov [#allocation7]  }
  0x18   : > { %p1252_p13 = pnand %p1262_p10, %p1251_p12  ;;  %s365_s23 = sshll.u32 %s1464_s30, 4  ;;  %s366_s23 = int_to_ptr.vmem [resolvable:$true] %s365_s23 }
  0x19   : > { %393 = sbr.rel (%p1583_p11) target bundleno = 898 (0x382), region = 60 }
  0x1a   : > { %s351_s18 = sshll.u32 %s1925_s8, 4  ;;  %s352_s18 = int_to_ptr.hbm [resolvable:$true] %s351_s18 }
  0x1b   : > { %s363_s29 = sshll.u32 %s1926_s9, 4  ;;  %s364_s29 = int_to_ptr.hbm [resolvable:$true] %s363_s29 }
  0x1c   : > { %1254 = dma.hbm_to_vmem [thread:$0]  (!%p1252_p13), %s352_s18, 16, %s354_s20, [#allocation5]  }
  0x1d   : > { %1257 = dma.hbm_to_vmem [thread:$0]  (!%p1252_p13), %s364_s29, 16, %s366_s23, [#allocation8]  }
  0x1e   : > { %1436 = dma.done.wait (%p1262_p10), [#allocation5], 16  }
  0x1f   : > { %1438 = vsyncadd (%p1262_p10), [#allocation5], 4294967280 }
  0x20   : > { %1440 = dma.done.wait (%p1262_p10), [#allocation8], 16  }
  0x21   : > { %1442 = vsyncadd (%p1262_p10), [#allocation8], 4294967280  ;;  %s1912_s23 = sand.u32 1, %s1453_s22   ;;  %p445_p0 = scmp.lt.s32.totalorder %s1554_s25, 3 }
  0x22   : > { %s1611_s30 = sshll.u32 %s1912_s23, 1  ;;  %457 = sbr.rel (%p1062_p9) target bundleno = 42 (0x2a), region = 72 }
  0x23   : > { %s446_s15 = scalar_select %p445_p0, %s1554_s25, 3 }
  0x24   : > { %s440_s8 = scalar_lea.vmem [#allocation9], %s1611_s30 }
  0x25   : > { %s1208_s16 = sshll.u32 %s446_s15, 3  ;;  %s1071_s17 = sshll.u32 %s446_s15, 1 }
  0x26   : > { %s1617_s20 = scalar_lea.vmem %s1898_s0, %s1208_s16  ;;  %s453_s29 = scalar_lea.vmem %s1899_s1, %s1071_s17 }
  0x27   : > { %v458_v0 = vld [vmem:[%s1900_s2] sm:$0x3] }
  0x28   : > { %v460_v1 = vld [vmem:[%s1901_s3] sm:$0x3]  ;;  %459 = vst [vmem:[#allocation2] sm:$0x3] %v458_v0 }
  0x29   : > { %461 = vst [vmem:[#allocation3] sm:$0x3] %v460_v1 }
  0x2a PF: > { %v462_v2 = vld [vmem:[%s453_s29] sm:$0x3]  ;;  %v1465_v4 = vmov 0   ;;  %v1239_v5 = vld [vmem:[%s1902_s4 + $0xec] sm:$0xf0]  ;;  %vm720_vm0 = vcmask 1041408  }
  0x2b   : > { %v1187_v3 = vld [vmem:[%s1902_s4 + $0xe0] sm:$0xf]  ;;  %1304 = vset.pattern.permute.xlu0 %v1465_v4  ;;  %v1237_v6 = vld [vmem:[%s1902_s4 + $0xe4] sm:$0xf]  ;;  %v1189_v7 = vld [vmem:[%s1902_s4 + $0xf0] sm:$0xf0] }
  0x2c   : > { %466 = vperm.xlu0 %1304, %v462_v2   ;;  %v1188_v8 = vor.u32 %v1239_v5, %v1187_v3  ;;  %v1192_v9 = vor.u32 %v1237_v6, %v1189_v7  ;;  %v1195_v10 = vld [vmem:[%s1902_s4 + $0xe8] sm:$0xf]  ;;  %v1240_v11 = vld [vmem:[%s1902_s4 + $0xf4] sm:$0xf0]  ;;  %v1238_v12 = vld [vmem:[%s1902_s4 + $0xec] sm:$0xf] }
  0x2d   : > { %v1196_v13 = vor.u32 %v1240_v11, %v1195_v10  ;;  %v1197_v14 = vld [vmem:[%s1902_s4 + $0xf8] sm:$0xf0]  ;;  %v1171_v15 = vld [vmem:[%s1902_s4 + $0xc0] sm:$0xf]  ;;  %v1235_v16 = vld [vmem:[%s1902_s4 + $0xcc] sm:$0xf0] }
  0x2e   : > { %665 = vmatpush.bf16.msra.mxu0 %v1188_v8  ;;  %678 = vmatpush.bf16.msra.mxu1 %v1192_v9  ;;  %v1200_v17 = vor.u32 %v1238_v12, %v1197_v14  ;;  %v1172_v18 = vor.u32 %v1235_v16, %v1171_v15  ;;  %v1233_v19 = vld [vmem:[%s1902_s4 + $0xc4] sm:$0xf]  ;;  %v1173_v20 = vld [vmem:[%s1902_s4 + $0xd0] sm:$0xf0]  ;;  %v1179_v21 = vld [vmem:[%s1902_s4 + $0xc8] sm:$0xf] }
  0x2f   : > { %691 = vmatpush.bf16.msra.mxu2 %v1196_v13  ;;  %v1176_v22 = vor.u32 %v1233_v19, %v1173_v20  ;;  %v1236_v23 = vld [vmem:[%s1902_s4 + $0xd4] sm:$0xf0]  ;;  %v1234_v24 = vld [vmem:[%s1902_s4 + $0xcc] sm:$0xf]  ;;  %v1181_v25 = vld [vmem:[%s1902_s4 + $0xd8] sm:$0xf0] }
  0x30   : > { %704 = vmatpush.bf16.msra.mxu3 %v1200_v17  ;;  %v1180_v26 = vor.u32 %v1236_v23, %v1179_v21  ;;  %v1184_v27 = vor.u32 %v1234_v24, %v1181_v25  ;;  %v1155_v28 = vld [vmem:[%s1902_s4 + $0xa0] sm:$0xf]  ;;  %v1231_v29 = vld [vmem:[%s1902_s4 + $0xac] sm:$0xf0]  ;;  %v1229_v30 = vld [vmem:[%s1902_s4 + $0xa4] sm:$0xf] }
  0x31   : > { %v1157_v31 = vld [vmem:[%s1902_s4 + $0xb0] sm:$0xf0]  ;;  %v1163_v32 = vld [vmem:[%s1902_s4 + $0xa8] sm:$0xf]  ;;  %v1232_v33 = vld [vmem:[%s1902_s4 + $0xb4] sm:$0xf0]  ;;  %v1156_v34 = vor.u32 %v1231_v29, %v1155_v28 }
  0x32   : > { %666 = vmatpush.bf16.msra.mxu0 %v1172_v18  ;;  %679 = vmatpush.bf16.msra.mxu1 %v1176_v22  ;;  %v1160_v35 = vor.u32 %v1229_v30, %v1157_v31  ;;  %v1230_v36 = vld [vmem:[%s1902_s4 + $0xac] sm:$0xf]  ;;  %v1165_v37 = vld [vmem:[%s1902_s4 + $0xb8] sm:$0xf0]  ;;  %v1139_v38 = vld [vmem:[%s1902_s4 + $0x80] sm:$0xf]  ;;  %v1164_v39 = vor.u32 %v1232_v33, %v1163_v32 }
  0x33   : > { %692 = vmatpush.bf16.msra.mxu2 %v1180_v26  ;;  %v1227_v40 = vld [vmem:[%s1902_s4 + $0x8c] sm:$0xf0]  ;;  %v1225_v41 = vld [vmem:[%s1902_s4 + $0x84] sm:$0xf]  ;;  %v1141_v42 = vld [vmem:[%s1902_s4 + $0x90] sm:$0xf0]  ;;  %v1168_v43 = vor.u32 %v1230_v36, %v1165_v37 }
  0x34   : > { %705 = vmatpush.bf16.msra.mxu3 %v1184_v27  ;;  %v1147_v44 = vld [vmem:[%s1902_s4 + $0x88] sm:$0xf]  ;;  %v1228_v45 = vld [vmem:[%s1902_s4 + $0x94] sm:$0xf0]  ;;  %v1226_v46 = vld [vmem:[%s1902_s4 + $0x8c] sm:$0xf]  ;;  %v1140_v48 = vor.u32 %v1227_v40, %v1139_v38  ;;  %v1144_v49 = vor.u32 %v1225_v41, %v1141_v42 }
  0x35   : > { %v1149_v47 = vld [vmem:[%s1902_s4 + $0x98] sm:$0xf0]  ;;  %v1123_v50 = vld [vmem:[%s1902_s4 + $0x60] sm:$0xf]  ;;  %v1148_v51 = vor.u32 %v1228_v45, %v1147_v44  ;;  %v1223_v52 = vld [vmem:[%s1902_s4 + $0x6c] sm:$0xf0] }
  0x36   : > { %667 = vmatpush.bf16.msra.mxu0 %v1156_v34  ;;  %680 = vmatpush.bf16.msra.mxu1 %v1160_v35  ;;  %v1221_v53 = vld [vmem:[%s1902_s4 + $0x64] sm:$0xf]  ;;  %v1125_v54 = vld [vmem:[%s1902_s4 + $0x70] sm:$0xf0]  ;;  %v1152_v55 = vor.u32 %v1226_v46, %v1149_v47  ;;  %v1131_v56 = vld [vmem:[%s1902_s4 + $0x68] sm:$0xf]  ;;  %v1124_v60 = vor.u32 %v1223_v52, %v1123_v50 }
  0x37   : > { %693 = vmatpush.bf16.msra.mxu2 %v1164_v39  ;;  %v1224_v57 = vld [vmem:[%s1902_s4 + $0x74] sm:$0xf0]  ;;  %v1222_v58 = vld [vmem:[%s1902_s4 + $0x6c] sm:$0xf]  ;;  %v1133_v59 = vld [vmem:[%s1902_s4 + $0x78] sm:$0xf0]  ;;  %v1128_v61 = vor.u32 %v1221_v53, %v1125_v54 }
  0x38   : > { %706 = vmatpush.bf16.msra.mxu3 %v1168_v43  ;;  %v1107_v62 = vld [vmem:[%s1902_s4 + $0x40] sm:$0xf]  ;;  %v1132_v63 = vor.u32 %v1224_v57, %v1131_v56  ;;  %v1219_v0 = vld [vmem:[%s1902_s4 + $0x4c] sm:$0xf0]  ;;  %v1217_v1 = vld [vmem:[%s1902_s4 + $0x44] sm:$0xf]  ;;  %v1136_v3 = vor.u32 %v1222_v58, %v1133_v59 }
  0x39   : > { %v1109_v2 = vld [vmem:[%s1902_s4 + $0x50] sm:$0xf0]  ;;  %v1115_v4 = vld [vmem:[%s1902_s4 + $0x48] sm:$0xf]  ;;  %v1220_v5 = vld [vmem:[%s1902_s4 + $0x54] sm:$0xf0]  ;;  %v1108_v8 = vor.u32 %v1219_v0, %v1107_v62 }
  0x3a   : > { %668 = vmatpush.bf16.msra.mxu0 %v1140_v48  ;;  %681 = vmatpush.bf16.msra.mxu1 %v1144_v49  ;;  %v1218_v6 = vld [vmem:[%s1902_s4 + $0x4c] sm:$0xf]  ;;  %v1117_v7 = vld [vmem:[%s1902_s4 + $0x58] sm:$0xf0]  ;;  %v1112_v9 = vor.u32 %v1217_v1, %v1109_v2  ;;  %v1091_v10 = vld [vmem:[%s1902_s4 + $0x20] sm:$0xf]  ;;  %v1116_v11 = vor.u32 %v1220_v5, %v1115_v4 }
  0x3b   : > { %694 = vmatpush.bf16.msra.mxu2 %v1148_v51  ;;  %v1215_v12 = vld [vmem:[%s1902_s4 + $0x2c] sm:$0xf0]  ;;  %v1213_v13 = vld [vmem:[%s1902_s4 + $0x24] sm:$0xf]  ;;  %v1093_v14 = vld [vmem:[%s1902_s4 + $0x30] sm:$0xf0]  ;;  %v1120_v15 = vor.u32 %v1218_v6, %v1117_v7 }
  0x3c   : > { %707 = vmatpush.bf16.msra.mxu3 %v1152_v55  ;;  %v1099_v16 = vld [vmem:[%s1902_s4 + $0x28] sm:$0xf]  ;;  %v1216_v17 = vld [vmem:[%s1902_s4 + $0x34] sm:$0xf0]  ;;  %v1214_v18 = vld [vmem:[%s1902_s4 + $0x2c] sm:$0xf]  ;;  %v1092_v20 = vor.u32 %v1215_v12, %v1091_v10  ;;  %v1096_v21 = vor.u32 %v1213_v13, %v1093_v14 }
  0x3d   : > { %v1101_v19 = vld [vmem:[%s1902_s4 + $0x38] sm:$0xf0]  ;;  %v1100_v22 = vor.u32 %v1216_v17, %v1099_v16  ;;  %v1075_v24 = vld [vmem:[%s1902_s4] sm:$0xf]  ;;  %v1211_v25 = vld [vmem:[%s1902_s4 + $0xc] sm:$0xf0] }
  0x3e   : > { %669 = vmatpush.bf16.msra.mxu0 %v1124_v60  ;;  %682 = vmatpush.bf16.msra.mxu1 %v1128_v61  ;;  %v1104_v23 = vor.u32 %v1214_v18, %v1101_v19  ;;  %v1209_v26 = vld [vmem:[%s1902_s4 + $0x4] sm:$0xf]  ;;  %v1076_v27 = vor.u32 %v1211_v25, %v1075_v24  ;;  %v1077_v28 = vld [vmem:[%s1902_s4 + $0x10] sm:$0xf0]  ;;  %v1083_v29 = vld [vmem:[%s1902_s4 + $0x8] sm:$0xf] }
  0x3f   : > { %695 = vmatpush.bf16.msra.mxu2 %v1132_v63  ;;  %v1212_v30 = vld [vmem:[%s1902_s4 + $0x14] sm:$0xf0]  ;;  %v1080_v31 = vor.u32 %v1209_v26, %v1077_v28  ;;  %v1210_v33 = vld [vmem:[%s1902_s4 + $0xc] sm:$0xf]  ;;  %v1085_v34 = vld [vmem:[%s1902_s4 + $0x18] sm:$0xf0] }
  0x40   : > { %708 = vmatpush.bf16.msra.mxu3 %v1136_v3  ;;  %v1084_v32 = vor.u32 %v1212_v30, %v1083_v29  ;;  %v1088_v35 = vor.u32 %v1210_v33, %v1085_v34  ;;  %v463_v36 = vld [vmem:[#allocation2] sm:$0x3]  ;;  %v1466_v55 = vmov 512.0   ;;  %vm805_vm5 = vcmask 1045508   ;;  %s1205_s18 = sshll.u32 %s1554_s25, 1  ;;  %s952_s14 = sshll.u32 %s440_s8, 4  ;;  %s953_s14 = int_to_ptr.vmem [resolvable:$true] %s952_s14 }
  0x41   : > { %1307 = vrcp.f32 %v1466_v55  ;;  %v719_v24 = vld [vmem:[%s1905_s7] sm:$0xf]  ;;  %vm807_vm6 = vcmask 1043456   ;;  %s950_s27 = scalar_lea.hbm %s1908_s10, %s1205_s18  ;;  %s1927_s28 = sand.u32 1, %s1453_s22  }
  0x42   : > { %670 = vmatpush.bf16.msra.mxu0 %v1108_v8  ;;  %683 = vmatpush.bf16.msra.mxu1 %v1112_v9  ;;  %v785_v34 = vperm.slane %v719_v24, 0  ;;  %s954_s19 = sshll.u32 %s950_s27, 4  ;;  %s940_s29 = scalar_lea.sflag [#allocation6], %s1927_s28  ;;  %s955_s19 = int_to_ptr.hbm [resolvable:$true] %s954_s19 }
  0x43   : > { %696 = vmatpush.bf16.msra.mxu2 %v1116_v11  ;;  %s1405_s15 = sshra.s32 %s955_s19, 4  ;;  %s1411_s18 = scalar_lea.hbm %s1908_s10, 8  ;;  %s1406_s15 = int_to_ptr.hbm [resolvable:$true] %s1405_s15 }
  0x44   : > { %709 = vmatpush.bf16.msra.mxu3 %v1120_v15  ;;  %s1407_s16 = scalar_lea.hbm %s1406_s15, 2  ;;  %p1412_p4 = scmp.lt.s32.totalorder %s1406_s15, %s1908_s10 }
  0x45   : > { %p1408_p1 = scmp.ne.s32.totalorder %s1406_s15, %s1407_s16  ;;  %p1413_p7 = scmp.lt.s32.totalorder %s1411_s18, %s1407_s16 }
  0x46   : > { %671 = vmatpush.bf16.msra.mxu0 %v1092_v20  ;;  %684 = vmatpush.bf16.msra.mxu1 %v1096_v21  ;;  %v718_v21 = vld [vmem:[%s1904_s6] sm:$0xf] }
  0x47   : > { %697 = vmatpush.bf16.msra.mxu2 %v1100_v22  ;;  %v1308_v56 = vpop.eup %1307  ;;  %v811_v22 = vld [vmem:[%s1903_s5] sm:$0xf]  ;;  %v772_v26 = vperm.slane %v718_v21, 0  ;;  %v775_v33 = vperm.slane %v718_v21, 3  ;;  %p1409_p2 = pnand %p1408_p1, %p1571_p5  ;;  %p1414_p8 = por %p1413_p7, %p1412_p4 }
  0x48   : > { %710 = vmatpush.bf16.msra.mxu3 %v1104_v23  ;;  %v731_v57 = vmul.f32 512.0, %v1308_v56  ;;  %vm735_vm1 = vweird.f32 %v1308_v56  ;;  %v816_v28 = vperm.slane %v811_v22, 3  ;;  %v814_v30 = vperm.slane %v811_v22, 1 }
  0x49   : > { %p1410_p3 = pneg %p1409_p2 }
  0x4a   : > { %672 = vmatpush.bf16.msra.mxu0 %v1076_v27  ;;  %685 = vmatpush.bf16.msra.mxu1 %v1080_v31  ;;  %v732_v58 = vsub.f32 1.0, %v731_v57  ;;  %v815_v27 = vperm.slane %v811_v22, 2  ;;  %v773_v31 = vperm.slane %v718_v21, 1 }
  0x4b   : > { %698 = vmatpush.bf16.msra.mxu2 %v1084_v32  ;;  %v774_v32 = vperm.slane %v718_v21, 2  ;;  %p1415_p9 = pnand %p1414_p8, %p1410_p3 }
  0x4c   : > { %711 = vmatpush.bf16.msra.mxu3 %v1088_v35  ;;  %v733_v59 = vmul.f32 %v1308_v56, %v732_v58  ;;  %v786_v35 = vperm.slane %v719_v24, 1 }
  0x4e   : > { %v734_v60 = vadd.f32 %v1308_v56, %v733_v59 }
  0x50   : > { %v736_v61 = vsel %vm735_vm1, %v1308_v56, %v734_v60 }
  0x9e   : > { %v1823_v37 = vpop.permute.xlu0 %466 }
  0x9f   : > { %v469_v38 = vmul.f32 %v1823_v37, %v463_v36  ;;  %v787_v36 = vperm.slane %v719_v24, 2 }
  0xa1   : > { %v472_v39 = vpack.c.bf16 %v469_v38, %v469_v38  ;;  %v788_v38 = vperm.slane %v719_v24, 3 }
  0xa3   : > { %673 = vmatmul.bf16.vlgmr.msra.gmra.mxu0 %v472_v39  ;;  %686 = vmatmul.bf16.vlgmr.msra.gmra.mxu1 %v472_v39 }
  0xa4   : > { %699 = vmatmul.bf16.vlgmr.msra.gmra.mxu2 %v472_v39  ;;  %712 = vmatmul.bf16.vlgmr.msra.gmra.mxu3 %v472_v39 }
 0x120   : > { %v674_v40 = vpop.f32.mrf.mxu0  ;;  %v687_v41 = vpop.f32.mrf.mxu1 }
 0x121   : > { %v721_v42 = vsel %vm720_vm0, %v674_v40, 0.0  ;;  %v722_v43 = vsel %vm720_vm0, %v687_v41, 0.0 }
 0x122   : > { %v723_v44 = vadd.f32 %v722_v43, %v721_v42 }
 0x127   : > { %v700_v45 = vpop.f32.mrf.mxu2  ;;  %v713_v46 = vpop.f32.mrf.mxu3 }
 0x128   : > { %v724_v47 = vsel %vm720_vm0, %v700_v45, 0.0  ;;  %v676_v48 = vpop.f32.mrf.mxu0  ;;  %v689_v49 = vpop.f32.mrf.mxu1  ;;  %v726_v51 = vsel %vm720_vm0, %v713_v46, 0.0 }
 0x129   : > { %v725_v50 = vadd.f32 %v724_v47, %v723_v44  ;;  %v818_v44 = vrot.slane %v815_v27, 4  ;;  %v817_v47 = vrot.slane %v814_v30, 6 }
 0x12b   : > { %v727_v52 = vadd.f32 %v726_v51, %v725_v50 }
 0x12d   : > { %728 = vadd.xlane.f32.xlu0 %v727_v52 }
 0x12f   : > { %v702_v53 = vpop.f32.mrf.mxu2  ;;  %v715_v54 = vpop.f32.mrf.mxu3 }
 0x1a0   : > { %v729_v62 = vpop.xlane.xlu0 %728 }
 0x1a1   : > { %v737_v63 = vmul.f32 %v736_v61, %v729_v62 }
 0x1a3   : > { %v738_v0 = vsub.f32 %v674_v40, %v737_v63  ;;  %v739_v1 = vsub.f32 %v687_v41, %v737_v63  ;;  %v740_v2 = vsub.f32 %v700_v45, %v737_v63  ;;  %v741_v3 = vsub.f32 %v713_v46, %v737_v63 }
 0x1a4   : > { %v819_v45 = vrot.slane %v816_v28, 2  ;;  %v813_v46 = vperm.slane %v811_v22, 0 }
 0x1a5   : > { %v742_v4 = vmul.f32 %v738_v0, %v738_v0  ;;  %v743_v5 = vmul.f32 %v739_v1, %v739_v1  ;;  %v744_v6 = vmul.f32 %v740_v2, %v740_v2  ;;  %v745_v7 = vmul.f32 %v741_v3, %v741_v3 }
 0x1a6   : > { %v821_v55 = vsel %vm805_vm5, %v818_v44, %v819_v45  ;;  %v820_v56 = vsel %vm720_vm0, %v813_v46, %v817_v47 }
 0x1a7   : > { %v746_v8 = vsel %vm720_vm0, %v742_v4, 0.0  ;;  %v747_v9 = vsel %vm720_vm0, %v743_v5, 0.0  ;;  %v749_v11 = vsel %vm720_vm0, %v744_v6, 0.0  ;;  %v751_v13 = vsel %vm720_vm0, %v745_v7, 0.0 }
 0x1a8   : > { %v748_v10 = vadd.f32 %v747_v9, %v746_v8 }
 0x1aa   : > { %v750_v12 = vadd.f32 %v749_v11, %v748_v10 }
 0x1ac   : > { %v752_v14 = vadd.f32 %v751_v13, %v750_v12 }
 0x1ae   : > { %753 = vadd.xlane.f32.xlu1 %v752_v14 }
 0x221   : > { %v754_v15 = vpop.xlane.xlu1 %753 }
 0x222   : > { %v755_v16 = vmul.f32 %v754_v15, %v736_v61  ;;  %v717_v61 = vld [vmem:[%s1617_s20] sm:$0xff] }
 0x224   : > { %v756_v17 = vadd.f32 1e-05, %v755_v16 }
 0x226   : > { %1309 = vrsqrt.f32 %v756_v17  ;;  %vm763_vm3 = vweird.f32 %v756_v17 }
 0x22c   : > { %v1310_v18 = vpop.eup %1309 }
 0x22d   : > { %v758_v19 = vmul.f32 %v1310_v18, %v756_v17  ;;  %vm764_vm2 = vweird.f32 %v1310_v18 }
 0x22e   : > { %vm765_vm4 = vmor %vm763_vm3, %vm764_vm2 }
 0x22f   : > { %v759_v20 = vmul.f32 %v1310_v18, %v758_v19 }
 0x231   : > { %v760_v23 = vmul.f32 0.5, %v759_v20 }
 0x233   : > { %v761_v25 = vsub.f32 1.5, %v760_v23 }
 0x235   : > { %v762_v29 = vmul.f32 %v1310_v18, %v761_v25  ;;  %v470_v25 = vld [vmem:[#allocation3] sm:$0x3] }
 0x237   : > { %v766_v39 = vsel %vm765_vm4, %v1310_v18, %v762_v29 }
 0x238   : > { %v767_v40 = vmul.f32 %v766_v39, %v738_v0  ;;  %v768_v41 = vmul.f32 %v766_v39, %v739_v1  ;;  %v769_v42 = vmul.f32 %v766_v39, %v740_v2  ;;  %v770_v43 = vmul.f32 %v766_v39, %v741_v3 }
 0x239   : > { %v822_v1 = vsel %vm807_vm6, %v820_v56, %v821_v55 }
 0x23a   : > { %v780_v48 = vmul.f32 %v772_v26, %v767_v40  ;;  %v781_v49 = vmul.f32 %v773_v31, %v768_v41  ;;  %v782_v50 = vmul.f32 %v774_v32, %v769_v42  ;;  %v783_v51 = vmul.f32 %v775_v33, %v770_v43 }
 0x23b   : > { %v471_v31 = vmul.f32 %v470_v25, %v1823_v37  ;;  %v1467_v40 = vmov 128.0  }
 0x23c   : > { %v794_v52 = vadd.f32 %v786_v35, %v781_v49  ;;  %v795_v53 = vadd.f32 %v787_v36, %v782_v50  ;;  %v796_v54 = vadd.f32 %v788_v38, %v783_v51  ;;  %v793_v57 = vadd.f32 %v785_v34, %v780_v48 }
 0x23e   : > { %v801_v58 = vrot.slane %v794_v52, 6  ;;  %v802_v59 = vrot.slane %v795_v53, 4  ;;  %v803_v60 = vrot.slane %v796_v54, 2 }
 0x240   : > { %v804_v62 = vsel %vm720_vm0, %v793_v57, %v801_v58  ;;  %v806_v63 = vsel %vm805_vm5, %v802_v59, %v803_v60 }
 0x241   : > { %v808_v0 = vsel %vm807_vm6, %v804_v62, %v806_v63 }
 0x242   : > { %v810_v2 = vadd.f32 %v808_v0, %v717_v61 }
 0x244   : > { %v1846_v3 = vadd.f32 %v822_v1, %v810_v2 }
 0x246   : > { %v1201_v4 = vmul.f32 -1.442695, %v1846_v3  ;;  %v845_v5 = vrot.slane %v1846_v3, 2  ;;  %v866_v15 = vrot.slane %v1846_v3, 4  ;;  %v869_v51 = vrot.slane %v1846_v3, 6 }
 0x247   : > { %v1305_v3 = vld [vmem:[#allocation4] ss:$0 sm:$0xff] }
 0x248   : > { %1311 = vpow2.f32 %v1201_v4  ;;  %v1202_v6 = vmul.f32 -1.442695, %v845_v5  ;;  %v1203_v52 = vmul.f32 -1.442695, %v869_v51  ;;  %v1306_v5 = vld [vmem:[#allocation7] ss:$0 sm:$0xff] }
 0x24a   : > { %1313 = vpow2.f32 %v1202_v6 }
 0x24e   : > { %v1312_v7 = vpop.eup %1311 }
 0x24f   : > { %v828_v8 = vadd.f32 1.0, %v1312_v7 }
 0x250   : > { %v1314_v9 = vpop.eup %1313 }
 0x251   : > { %1315 = vrcp.f32 %v828_v8  ;;  %v850_v10 = vadd.f32 1.0, %v1314_v9  ;;  %v840_v18 = vand.u32 2147483648, %v828_v8  ;;  %v838_v19 = vand.u32 2147483647, %v828_v8 }
 0x252   : > { %vm834_vm8 = vweird.f32 %v828_v8 }
 0x253   : > { %1317 = vrcp.f32 %v850_v10  ;;  %v862_v22 = vand.u32 2147483648, %v850_v10  ;;  %v860_v24 = vand.u32 2147483647, %v850_v10  ;;  %v841_v27 = vor.u32 1.1754944e-38, %v840_v18 }
 0x254   : > { %1319 = vtanh.f32 %v866_v15  ;;  %vm839_vm11 = vcmp.eq.f32.partialorder %v838_v19, 8.507059e+37  ;;  %vm856_vm12 = vweird.f32 %v850_v10 }
 0x255   : > { %v863_v30 = vor.u32 1.1754944e-38, %v862_v22  ;;  %vm861_vm14 = vcmp.eq.f32.partialorder %v860_v24, 8.507059e+37  ;;  %1321 = vrcp.f32 %v1467_v40 }
 0x256   : > { %1323 = vpow2.f32 %v1203_v52 }
 0x257   : > { %v1316_v11 = vpop.eup %1315 }
 0x258   : > { %v830_v12 = vmul.f32 %v1316_v11, %v828_v8  ;;  %vm835_vm7 = vweird.f32 %v1316_v11 }
 0x259   : > { %v1318_v13 = vpop.eup %1317  ;;  %vm836_vm9 = vmor %vm834_vm8, %vm835_vm7 }
 0x25a   : > { %v831_v14 = vsub.f32 1.0, %v830_v12  ;;  %v852_v16 = vmul.f32 %v1318_v13, %v850_v10  ;;  %vm857_vm10 = vweird.f32 %v1318_v13  ;;  %v1320_v33 = vpop.eup %1319 }
 0x25b   : > { %vm858_vm13 = vmor %vm856_vm12, %vm857_vm10  ;;  %v1322_v41 = vpop.eup %1321 }
 0x25c   : > { %v832_v17 = vmul.f32 %v1316_v11, %v831_v14  ;;  %v853_v20 = vsub.f32 1.0, %v852_v16  ;;  %v899_v42 = vmul.f32 128.0, %v1322_v41  ;;  %vm903_vm15 = vweird.f32 %v1322_v41  ;;  %v1324_v53 = vpop.eup %1323 }
 0x25d   : > { %v874_v57 = vadd.f32 1.0, %v1324_v53 }
 0x25e   : > { %v833_v21 = vadd.f32 %v1316_v11, %v832_v17  ;;  %v854_v23 = vmul.f32 %v1318_v13, %v853_v20  ;;  %v900_v37 = vsub.f32 1.0, %v899_v42 }
 0x25f   : > { %vm880_vm4 = vweird.f32 %v874_v57  ;;  %v884_v12 = vand.u32 2147483647, %v874_v57 }
 0x260   : > { %v837_v26 = vsel %vm836_vm9, %v1316_v11, %v833_v21  ;;  %v855_v28 = vadd.f32 %v1318_v13, %v854_v23  ;;  %v901_v43 = vmul.f32 %v1322_v41, %v900_v37  ;;  %v886_v11 = vand.u32 2147483648, %v874_v57 }
 0x261   : > { %v842_v29 = vsel %vm839_vm11, %v841_v27, %v837_v26  ;;  %vm885_vm6 = vcmp.eq.f32.partialorder %v884_v12, 8.507059e+37 }
 0x262   : > { %v859_v32 = vsel %vm858_vm13, %v1318_v13, %v855_v28  ;;  %v891_v36 = vmul.f32 %v1320_v33, %v842_v29  ;;  %v902_v44 = vadd.f32 %v1322_v41, %v901_v43  ;;  %v887_v14 = vor.u32 1.1754944e-38, %v886_v11 }
 0x263   : > { %v864_v34 = vsel %vm861_vm14, %v863_v30, %v859_v32 }
 0x264   : > { %v890_v35 = vmul.f32 %v864_v34, %v471_v31  ;;  %v904_v45 = vsel %vm903_vm15, %v1322_v41, %v902_v44 }
 0x266   : > { %v892_v38 = vadd.f32 %v891_v36, %v890_v35 }
 0x268   : > { %v895_v39 = vsel %vm720_vm0, %v892_v38, 0.0  ;;  %935 = vst [vmem:[#allocation3] sm:$0x3] %v892_v38 }
 0x269   : > { %938 = vst [vmem:[%s1910_s12] sm:$0x3] %v892_v38  ;;  %896 = vadd.xlane.f32.xlu1 %v895_v39 }
 0x2dc   : > { %v897_v46 = vpop.xlane.xlu1 %896 }
 0x2dd   : > { %v905_v47 = vmul.f32 %v904_v45, %v897_v46 }
 0x2df   : > { %v906_v48 = vsub.f32 %v892_v38, %v905_v47 }
 0x2e1   : > { %v907_v49 = vmul.f32 %v906_v48, %v906_v48 }
 0x2e3   : > { %v908_v50 = vsel %vm720_vm0, %v907_v49, 0.0 }
 0x2e4   : > { %909 = vadd.xlane.f32.xlu2 %v908_v50 }
 0x357   : > { %v910_v54 = vpop.xlane.xlu2 %909 }
 0x358   : > { %v911_v55 = vmul.f32 %v910_v54, %v904_v45 }
 0x35a   : > { %v912_v56 = vadd.f32 1e-05, %v911_v55 }
 0x35c   : > { %1325 = vrsqrt.f32 %v912_v56  ;;  %vm919_vm1 = vweird.f32 %v912_v56 }
 0x35d   : > { %1327 = vrcp.f32 %v874_v57 }
 0x362   : > { %v1326_v58 = vpop.eup %1325 }
 0x363   : > { %v914_v59 = vmul.f32 %v1326_v58, %v912_v56  ;;  %v1328_v60 = vpop.eup %1327  ;;  %vm920_vm0 = vweird.f32 %v1326_v58 }
 0x364   : > { %v876_v63 = vmul.f32 %v1328_v60, %v874_v57  ;;  %vm921_vm2 = vmor %vm919_vm1, %vm920_vm0  ;;  %vm881_vm3 = vweird.f32 %v1328_v60 }
 0x365   : > { %v915_v61 = vmul.f32 %v1326_v58, %v914_v59  ;;  %vm882_vm5 = vmor %vm880_vm4, %vm881_vm3 }
 0x366   : > { %v877_v2 = vsub.f32 1.0, %v876_v63 }
 0x367   : > { %v916_v62 = vmul.f32 0.5, %v915_v61 }
 0x368   : > { %v878_v7 = vmul.f32 %v1328_v60, %v877_v2 }
 0x369   : > { %v917_v0 = vsub.f32 1.5, %v916_v62 }
 0x36a   : > { %v879_v10 = vadd.f32 %v1328_v60, %v878_v7 }
 0x36b   : > { %v918_v1 = vmul.f32 %v1326_v58, %v917_v0 }
 0x36c   : > { %v883_v13 = vsel %vm882_vm5, %v1328_v60, %v879_v10 }
 0x36d   : > { %v922_v4 = vsel %vm921_vm2, %v1326_v58, %v918_v1  ;;  %v888_v16 = vsel %vm885_vm6, %v887_v14, %v883_v13 }
 0x36e   : > { %v923_v6 = vmul.f32 %v922_v4, %v906_v48 }
 0x370   : > { %v927_v8 = vmul.f32 %v1305_v3, %v923_v6 }
 0x372   : > { %v931_v9 = vadd.f32 %v1306_v5, %v927_v8 }
 0x374   : > { %1329 = vtanh.f32 %v931_v9 }
 0x37a   : > { %v1330_v15 = vpop.eup %1329 }
 0x37b   : > { %v933_v17 = vmul.f32 %v1330_v15, %v888_v16 }
 0x37d   : > { %934 = vst [vmem:[#allocation2] sm:$0x3] %v933_v17 }
 0x37e   : > { %936 = vst [vmem:[%s440_s8] sm:$0x3] %v933_v17 }
 0x37f   : > { %937 = vst [vmem:[%s1909_s11] sm:$0x3] %v933_v17 }
 0x380   : > { %1418 = shalt.err (!%p1415_p9)
}
 0x381   : > { %1249 = dma.vmem_to_hbm [thread:$0]  (%p1571_p5), %s953_s14, 32, %s955_s19, %s940_s29  }
 0x382 PF: > { %p1266_p10 = scmp.ge.s32.totalorder %s1461_s24, 2  ;;  %s978_s23 = sand.u32 1, %s1449_s21  }
 0x383   : > { %s979_s27 = scalar_lea.sflag [#allocation6], %s978_s23 }
 0x384   : > { %p1259_p11 = pnand %p1266_p10, %p1575_p6 }
 0x386   : > { %p1260_p12 = pneg %p1259_p11 }
 0x388   : > { %1444 = dma.done.wait (%p1260_p12), %s979_s27, 32  }
 0x389   : > { %1446 = vsyncadd (%p1260_p12), %s979_s27, 4294967264  ;;  %s1929_s24 = sld [smem:[#allocation14_spill]]  ;;  %s1932_s21 = smov %s1453_s22 }
 0x38a   : > { %s1930_s25 = sld [smem:[#allocation13_spill]] }
 0x38b   : > { %s1931_s23 = sld [smem:[#allocation15_spill]] }
 0x38f   : > { %p25_p13 = scmp.ge.s32.totalorder %s1929_s24, 6  }
 0x390   : > { %s1933_s22 = smov %s1930_s25 }
 0x391   :  { %27 = sbr.rel (!%p25_p13) target bundleno = 8 (0x8), region = 127 }
 0x396   :  { %985 = vsyncpa [#allocation5], 1 }
 0x397   :  { %987 = vsyncpa [#allocation5 + $0x1], 1 }
 0x398   :  { %988 = vsyncpa [#allocation8], 1 }
 0x399   :  { %989 = vsyncpa [#allocation6], 1 }
 0x39a   :  { %991 = vsyncpa [#allocation6 + $0x1], 1 }

</bundles_post_ra>
